<compile_context>
chip_gen: v7x
topology: tpu7x:2x2x1
jax: 0.10.0
libtpu: 0.0.40
codegen_flags: <defaults>
</compile_context>

<pallas_src>
import functools

import jax
import jax.numpy as jnp
from jax.experimental import pallas as pl
from jax.experimental.pallas import tpu as pltpu


# ----------------------------- Pallas kernels -----------------------------

def _conv_mm_kernel(x_ref, w_ref, b_ref, o_ref, *, relu):
    """One conv layer as (tm, K) @ (K, Cout) with fused bias (+ optional ReLU)."""
    acc = jnp.dot(x_ref[...], w_ref[...], preferred_element_type=jnp.float32)
    acc = acc + b_ref[...]                      # (tm, Cout) + (1, Cout), f32
    if relu:
        acc = jnp.maximum(acc, 0.0)
    o_ref[...] = acc.astype(o_ref.dtype)


def _conv_head_kernel(x_ref, w1_ref, b1_ref, w2_ref, b2_ref, w3_ref, b3_ref, o_ref):
    """Branch tail fused in one kernel: spatial conv (ReLU) -> 1x1 (ReLU) -> 1x1 (no ReLU).

    All three matmuls stay VMEM/vreg-resident; only the final result hits HBM.
    """
    h = jnp.dot(x_ref[...], w1_ref[...], preferred_element_type=jnp.float32) + b1_ref[...]
    h = jnp.maximum(h, 0.0).astype(jnp.bfloat16)
    h = jnp.dot(h, w2_ref[...], preferred_element_type=jnp.float32) + b2_ref[...]
    h = jnp.maximum(h, 0.0).astype(jnp.bfloat16)
    o = jnp.dot(h, w3_ref[...], preferred_element_type=jnp.float32) + b3_ref[...]
    o_ref[...] = o.astype(o_ref.dtype)


_COMPILER_PARAMS = pltpu.CompilerParams(
    dimension_semantics=("parallel",),
    vmem_limit_bytes=32 * 1024 * 1024,
)


# ----------------------------- wrappers -----------------------------

def _choose_tm(M):
    # M tile: multiple of 16 (bf16 sublane pack), divides M; else full-M block.
    for tm in (256, 128, 64, 32, 16):
        if M % tm == 0:
            return tm
    return M


def _im2col(x_nhwc, k):
    """'same'-padded patch matrix: (N*H*W, k*k*C). Tap/channel order matches
    w.reshape(k*k*Cin, Cout) for w of shape (k, k, Cin, Cout)."""
    N, H, W, C = x_nhwc.shape
    if k == 1:
        return x_nhwc.reshape(N * H * W, C)
    p = k // 2
    xp = jnp.pad(x_nhwc, ((0, 0), (p, p), (p, p), (0, 0)))
    cols = [xp[:, i:i + H, j:j + W, :] for i in range(k) for j in range(k)]
    patches = jnp.concatenate(cols, axis=-1)          # (N, H, W, k*k*C)
    return patches.reshape(N * H * W, k * k * C)


def conv2d_same(x_nhwc, w, b, relu, out_dtype=jnp.bfloat16):
    """Conv2d ('same' padding, stride 1) as a single Pallas matmul, fused bias/ReLU."""
    N, H, W, Cin = x_nhwc.shape
    KH, KW, _, Cout = w.shape
    M = N * H * W
    K = KH * KW * Cin

    P = _im2col(x_nhwc, KH).astype(jnp.bfloat16)      # (M, K)
    Wm = w.reshape(K, Cout).astype(jnp.bfloat16)
    bm = b.reshape(1, Cout).astype(jnp.float32)
    tm = _choose_tm(M)

    out = pl.pallas_call(
        functools.partial(_conv_mm_kernel, relu=relu),
        out_shape=jax.ShapeDtypeStruct((M, Cout), out_dtype),
        grid_spec=pltpu.PrefetchScalarGridSpec(
            num_scalar_prefetch=0,
            grid=(M // tm,),
            in_specs=[pl.BlockSpec((tm, K), lambda i: (i, 0)),
                      pl.BlockSpec((K, Cout), lambda i: (0, 0)),   # weight resident
                      pl.BlockSpec((1, Cout), lambda i: (0, 0))],  # bias resident
            out_specs=pl.BlockSpec((tm, Cout), lambda i: (i, 0))),
        compiler_params=_COMPILER_PARAMS,
    )(P, Wm, bm)
    return out.reshape(N, H, W, Cout)


def conv_head(x_nhwc, w1, b1, w2, b2, w3, b3, out_dtype=jnp.bfloat16):
    """Fused branch tail: spatial conv (ReLU) + 1x1 conv (ReLU) + 1x1 conv (no ReLU)."""
    N, H, W, Cin = x_nhwc.shape
    K1 = w1.shape[0]
    C1, C2, C3 = w1.shape[-1], w2.shape[-1], w3.shape[-1]
    M = N * H * W
    K = K1 * K1 * Cin

    P = _im2col(x_nhwc, K1).astype(jnp.bfloat16)
    W1 = w1.reshape(K, C1).astype(jnp.bfloat16)
    W2 = w2.reshape(C1, C2).astype(jnp.bfloat16)
    W3 = w3.reshape(C2, C3).astype(jnp.bfloat16)
    b1m = b1.reshape(1, C1).astype(jnp.float32)
    b2m = b2.reshape(1, C2).astype(jnp.float32)
    b3m = b3.reshape(1, C3).astype(jnp.float32)
    tm = _choose_tm(M)

    out = pl.pallas_call(
        _conv_head_kernel,
        out_shape=jax.ShapeDtypeStruct((M, C3), out_dtype),
        grid_spec=pltpu.PrefetchScalarGridSpec(
            num_scalar_prefetch=0,
            grid=(M // tm,),
            in_specs=[pl.BlockSpec((tm, K), lambda i: (i, 0)),
                      pl.BlockSpec((K, C1), lambda i: (0, 0)),
                      pl.BlockSpec((1, C1), lambda i: (0, 0)),
                      pl.BlockSpec((C1, C2), lambda i: (0, 0)),
                      pl.BlockSpec((1, C2), lambda i: (0, 0)),
                      pl.BlockSpec((C2, C3), lambda i: (0, 0)),
                      pl.BlockSpec((1, C3), lambda i: (0, 0))],
            out_specs=pl.BlockSpec((tm, C3), lambda i: (i, 0))),
        compiler_params=_COMPILER_PARAMS,
    )(P, W1, b1m, W2, b2m, W3, b3m)
    return out.reshape(N, H, W, C3)


# ----------------------------- model definition -----------------------------

F0, A, B_ = 32, 8, 4          # feature / PAF-branch / heatmap-branch channels
_CAT = A + B_ + F0            # concat channels feeding stages 2..6

# Each entry: (kernel_size, cin, cout, relu_after) — per-branch, mirrors the nn.Sequentials.
BLOCK_SPECS = {
    'block0':   [(3, 3, 16, True), (3, 16, F0, True)],
    'block1_1': [(3, F0, 16, True), (3, 16, 16, True), (3, 16, 16, True),
                 (1, 16, 16, True), (1, 16, A, False)],
    'block1_2': [(3, F0, 16, True), (3, 16, 16, True), (3, 16, 16, True),
                 (1, 16, 16, True), (1, 16, B_, False)],
}
for _s in range(2, 7):
    BLOCK_SPECS[f'block{_s}_1'] = ([(7, _CAT, 16, True)] + [(7, 16, 16, True)] * 4
                                   + [(1, 16, 16, True), (1, 16, A, False)])
    BLOCK_SPECS[f'block{_s}_2'] = ([(7, _CAT, 16, True)] + [(7, 16, 16, True)] * 4
                                   + [(1, 16, 16, True), (1, 16, B_, False)])


def init_params(key):
    """init.normal_(w, std=0.01); init.constant_(bias, 0.0) for every conv (per branch)."""
    params = {}
    for name, spec in BLOCK_SPECS.items():
        layers = []
        for (k, cin, cout, _relu) in spec:
            key, wk = jax.random.split(key)
            w = jax.random.normal(wk, (k, k, cin, cout), jnp.float32) * 0.01
            b = jnp.zeros((cout,), jnp.float32)
            layers.append((w, b))
        params[name] = layers
    return params


def _fuse_pair(layers1, layers2):
    """Fuse two parallel branches of identical architecture into one conv stack.

    Layer 0 shares the same input -> concat weights along Cout.
    Later layers -> block-diagonal weights (each branch only reads its own features),
    so results are numerically identical to running the two branches separately.
    """
    fused = []
    for li, ((w1, b1), (w2, b2)) in enumerate(zip(layers1, layers2)):
        k = w1.shape[0]
        ci1, co1 = w1.shape[2], w1.shape[3]
        ci2, co2 = w2.shape[2], w2.shape[3]
        if li == 0:
            wf = jnp.concatenate([w1, w2], axis=3)
        else:
            wf = jnp.zeros((k, k, ci1 + ci2, co1 + co2), jnp.float32)
            wf = wf.at[:, :, :ci1, :co1].set(w1)
            wf = wf.at[:, :, ci1:, co1:].set(w2)
        bf = jnp.concatenate([b1, b2], axis=0)
        fused.append((wf.astype(jnp.bfloat16), bf.astype(jnp.float32)))
    return fused


def fuse_params(params):
    fp = {'block0': [(w.astype(jnp.bfloat16), b.astype(jnp.float32))
                     for (w, b) in params['block0']]}
    fp['stage1'] = _fuse_pair(params['block1_1'], params['block1_2'])
    for s in range(2, 7):
        fp[f'stage{s}'] = _fuse_pair(params[f'block{s}_1'], params[f'block{s}_2'])
    return fp


def run_fused_branch(layers, x):
    """Hidden spatial convs (ReLU) then the fused 3-layer tail kernel."""
    for (w, b) in layers[:-3]:
        x = conv2d_same(x, w, b, relu=True)
    (w1, b1), (w2, b2), (w3, b3) = layers[-3:]
    return conv_head(x, w1, b1, w2, b2, w3, b3)


def model_cnn_forward(fused_params, x_nchw):
    """Replicates Model_CNN.forward: returns ((out6_1, out6_2), saved_for_loss)."""
    x = jnp.transpose(x_nchw, (0, 2, 3, 1)).astype(jnp.bfloat16)   # NCHW -> NHWC
    saved = []

    out1 = x
    for (w, b) in fused_params['block0']:
        out1 = conv2d_same(out1, w, b, relu=True)

    o = run_fused_branch(fused_params['stage1'], out1)             # fused block1_1/1_2
    out_a, out_b = o[..., :A], o[..., A:]
    saved += [out_a, out_b]

    for s in range(2, 7):
        cat = jnp.concatenate([out_a, out_b, out1], axis=-1)       # torch.cat(..., dim=1)
        o = run_fused_branch(fused_params[f'stage{s}'], cat)
        out_a, out_b = o[..., :A], o[..., A:]
        saved += [out_a, out_b]

    to_nchw = lambda a: jnp.transpose(a.astype(jnp.float32), (0, 3, 1, 2))
    return ((to_nchw(out_a), to_nchw(out_b)), [to_nchw(a) for a in saved])


# ---------------------------------- main ----------------------------------

if __name__ == "__main__":
    key = jax.random.PRNGKey(0)
    pkey, xkey = jax.random.split(key)
    params = init_params(pkey)
    fused_params = fuse_params(params)

    # small NCHW input, as in the PyTorch convention
    x = jax.random.normal(xkey, (2, 3, 16, 16), jnp.float32)

    fwd = jax.jit(model_cnn_forward)
    (out6_1, out6_2), saved_for_loss = fwd(fused_params, x)
    jax.block_until_ready((out6_1, out6_2, saved_for_loss))

    assert out6_1.shape == (2, A, 16, 16)
    assert out6_2.shape == (2, B_, 16, 16)
    assert len(saved_for_loss) == 12
    print("KERNEL_OK")
</pallas_src>

<mosaic_0001>
module attributes {stable_mosaic.version = 11 : i64} {
  func.func @_conv_mm_kernel(%arg0: i32, %arg1: memref<256x27xbf16, #tpu.memory_space<vmem>>, %arg2: memref<27x16xbf16, #tpu.memory_space<vmem>>, %arg3: memref<1x16xf32, #tpu.memory_space<vmem>>, %arg4: memref<256x16xbf16, #tpu.memory_space<vmem>>) attributes {dimension_semantics = [#tpu.dimension_semantics<parallel>], iteration_bounds = array<i64: 2>, scalar_prefetch = 0 : i64, scratch_operands = 0 : i64, tpu.core_type = #tpu.core_type<tc>, window_params = [{transform_indices = @transform_0, window_bounds = array<i64: 256, 27>}, {pipeline_mode = #tpu.pipeline_mode<synchronous>, transform_indices = @transform_1, window_bounds = array<i64: 27, 16>}, {pipeline_mode = #tpu.pipeline_mode<synchronous>, transform_indices = @transform_2, window_bounds = array<i64: 1, 16>}, {transform_indices = @transform_3, window_bounds = array<i64: 256, 16>}]} {
    %c0 = arith.constant 0 : index
    %c0_0 = arith.constant 0 : index
    %0 = vector.load %arg1[%c0, %c0_0] : memref<256x27xbf16, #tpu.memory_space<vmem>>, vector<256x27xbf16>
    %c0_1 = arith.constant 0 : index
    %c0_2 = arith.constant 0 : index
    %1 = vector.load %arg2[%c0_1, %c0_2] : memref<27x16xbf16, #tpu.memory_space<vmem>>, vector<27x16xbf16>
    %cst = arith.constant dense<0.000000e+00> : vector<256x16xf32>
    %2 = tpu.matmul %0, %1, %cst {dimension_numbers = #tpu.dot_dimension_numbers<[1], [0], [0], [1], [0, 0, 1, 1], [], []>} : vector<256x27xbf16>, vector<27x16xbf16>, vector<256x16xf32> -> vector<256x16xf32>
    %c0_3 = arith.constant 0 : index
    %c0_4 = arith.constant 0 : index
    %3 = vector.load %arg3[%c0_3, %c0_4] : memref<1x16xf32, #tpu.memory_space<vmem>>, vector<1x16xf32>
    %4 = vector.broadcast %3 : vector<1x16xf32> to vector<256x16xf32>
    %5 = arith.addf %2, %4 : vector<256x16xf32>
    %cst_5 = arith.constant 0.000000e+00 : f32
    %6 = vector.broadcast %cst_5 : f32 to vector<256x16xf32>
    %7 = arith.maximumf %5, %6 : vector<256x16xf32>
    %8 = arith.truncf %7 : vector<256x16xf32> to vector<256x16xbf16>
    %c0_6 = arith.constant 0 : index
    %c0_7 = arith.constant 0 : index
    %9 = vector.load %arg4[%c0_6, %c0_7] : memref<256x16xbf16, #tpu.memory_space<vmem>>, vector<256x16xbf16>
    tpu.vector_store %arg4[%c0_6, %c0_7], %8 {strides = array<i32>} : memref<256x16xbf16, #tpu.memory_space<vmem>>, vector<256x16xbf16>,
    return
  }
  func.func @transform_0(%arg0: i32) -> (i32, i32) {
    %c0_i32 = arith.constant 0 : i32
    %c0_i32_0 = arith.constant 0 : i32
    return %arg0, %c0_i32 : i32, i32
  }
  func.func @transform_1(%arg0: i32) -> (i32, i32) {
    %c0_i32 = arith.constant 0 : i32
    %c0_i32_0 = arith.constant 0 : i32
    %c0_i32_1 = arith.constant 0 : i32
    return %c0_i32, %c0_i32_0 : i32, i32
  }
  func.func @transform_2(%arg0: i32) -> (i32, i32) {
    %c0_i32 = arith.constant 0 : i32
    %c0_i32_0 = arith.constant 0 : i32
    %c0_i32_1 = arith.constant 0 : i32
    return %c0_i32, %c0_i32_0 : i32, i32
  }
  func.func @transform_3(%arg0: i32) -> (i32, i32) {
    %c0_i32 = arith.constant 0 : i32
    %c0_i32_0 = arith.constant 0 : i32
    return %arg0, %c0_i32 : i32, i32
  }
}

module attributes {stable_mosaic.version = 11 : i64} {
  func.func @_conv_mm_kernel(%arg0: i32, %arg1: memref<256x144xbf16, #tpu.memory_space<vmem>>, %arg2: memref<144x32xbf16, #tpu.memory_space<vmem>>, %arg3: memref<1x32xf32, #tpu.memory_space<vmem>>, %arg4: memref<256x32xbf16, #tpu.memory_space<vmem>>) attributes {dimension_semantics = [#tpu.dimension_semantics<parallel>], iteration_bounds = array<i64: 2>, scalar_prefetch = 0 : i64, scratch_operands = 0 : i64, tpu.core_type = #tpu.core_type<tc>, window_params = [{transform_indices = @transform_0, window_bounds = array<i64: 256, 144>}, {pipeline_mode = #tpu.pipeline_mode<synchronous>, transform_indices = @transform_1, window_bounds = array<i64: 144, 32>}, {pipeline_mode = #tpu.pipeline_mode<synchronous>, transform_indices = @transform_2, window_bounds = array<i64: 1, 32>}, {transform_indices = @transform_3, window_bounds = array<i64: 256, 32>}]} {
    %c0 = arith.constant 0 : index
    %c0_0 = arith.constant 0 : index
    %0 = vector.load %arg1[%c0, %c0_0] : memref<256x144xbf16, #tpu.memory_space<vmem>>, vector<256x144xbf16>
    %c0_1 = arith.constant 0 : index
    %c0_2 = arith.constant 0 : index
    %1 = vector.load %arg2[%c0_1, %c0_2] : memref<144x32xbf16, #tpu.memory_space<vmem>>, vector<144x32xbf16>
    %cst = arith.constant dense<0.000000e+00> : vector<256x32xf32>
    %2 = tpu.matmul %0, %1, %cst {dimension_numbers = #tpu.dot_dimension_numbers<[1], [0], [0], [1], [0, 0, 1, 1], [], []>} : vector<256x144xbf16>, vector<144x32xbf16>, vector<256x32xf32> -> vector<256x32xf32>
    %c0_3 = arith.constant 0 : index
    %c0_4 = arith.constant 0 : index
    %3 = vector.load %arg3[%c0_3, %c0_4] : memref<1x32xf32, #tpu.memory_space<vmem>>, vector<1x32xf32>
    %4 = vector.broadcast %3 : vector<1x32xf32> to vector<256x32xf32>
    %5 = arith.addf %2, %4 : vector<256x32xf32>
    %cst_5 = arith.constant 0.000000e+00 : f32
    %6 = vector.broadcast %cst_5 : f32 to vector<256x32xf32>
    %7 = arith.maximumf %5, %6 : vector<256x32xf32>
    %8 = arith.truncf %7 : vector<256x32xf32> to vector<256x32xbf16>
    %c0_6 = arith.constant 0 : index
    %c0_7 = arith.constant 0 : index
    %9 = vector.load %arg4[%c0_6, %c0_7] : memref<256x32xbf16, #tpu.memory_space<vmem>>, vector<256x32xbf16>
    tpu.vector_store %arg4[%c0_6, %c0_7], %8 {strides = array<i32>} : memref<256x32xbf16, #tpu.memory_space<vmem>>, vector<256x32xbf16>,
    return
  }
  func.func @transform_0(%arg0: i32) -> (i32, i32) {
    %c0_i32 = arith.constant 0 : i32
    %c0_i32_0 = arith.constant 0 : i32
    return %arg0, %c0_i32 : i32, i32
  }
  func.func @transform_1(%arg0: i32) -> (i32, i32) {
    %c0_i32 = arith.constant 0 : i32
    %c0_i32_0 = arith.constant 0 : i32
    %c0_i32_1 = arith.constant 0 : i32
    return %c0_i32, %c0_i32_0 : i32, i32
  }
  func.func @transform_2(%arg0: i32) -> (i32, i32) {
    %c0_i32 = arith.constant 0 : i32
    %c0_i32_0 = arith.constant 0 : i32
    %c0_i32_1 = arith.constant 0 : i32
    return %c0_i32, %c0_i32_0 : i32, i32
  }
  func.func @transform_3(%arg0: i32) -> (i32, i32) {
    %c0_i32 = arith.constant 0 : i32
    %c0_i32_0 = arith.constant 0 : i32
    return %arg0, %c0_i32 : i32, i32
  }
}

module attributes {stable_mosaic.version = 11 : i64} {
  func.func @_conv_mm_kernel(%arg0: i32, %arg1: memref<256x288xbf16, #tpu.memory_space<vmem>>, %arg2: memref<288x32xbf16, #tpu.memory_space<vmem>>, %arg3: memref<1x32xf32, #tpu.memory_space<vmem>>, %arg4: memref<256x32xbf16, #tpu.memory_space<vmem>>) attributes {dimension_semantics = [#tpu.dimension_semantics<parallel>], iteration_bounds = array<i64: 2>, scalar_prefetch = 0 : i64, scratch_operands = 0 : i64, tpu.core_type = #tpu.core_type<tc>, window_params = [{transform_indices = @transform_0, window_bounds = array<i64: 256, 288>}, {pipeline_mode = #tpu.pipeline_mode<synchronous>, transform_indices = @transform_1, window_bounds = array<i64: 288, 32>}, {pipeline_mode = #tpu.pipeline_mode<synchronous>, transform_indices = @transform_2, window_bounds = array<i64: 1, 32>}, {transform_indices = @transform_3, window_bounds = array<i64: 256, 32>}]} {
    %c0 = arith.constant 0 : index
    %c0_0 = arith.constant 0 : index
    %0 = vector.load %arg1[%c0, %c0_0] : memref<256x288xbf16, #tpu.memory_space<vmem>>, vector<256x288xbf16>
    %c0_1 = arith.constant 0 : index
    %c0_2 = arith.constant 0 : index
    %1 = vector.load %arg2[%c0_1, %c0_2] : memref<288x32xbf16, #tpu.memory_space<vmem>>, vector<288x32xbf16>
    %cst = arith.constant dense<0.000000e+00> : vector<256x32xf32>
    %2 = tpu.matmul %0, %1, %cst {dimension_numbers = #tpu.dot_dimension_numbers<[1], [0], [0], [1], [0, 0, 1, 1], [], []>} : vector<256x288xbf16>, vector<288x32xbf16>, vector<256x32xf32> -> vector<256x32xf32>
    %c0_3 = arith.constant 0 : index
    %c0_4 = arith.constant 0 : index
    %3 = vector.load %arg3[%c0_3, %c0_4] : memref<1x32xf32, #tpu.memory_space<vmem>>, vector<1x32xf32>
    %4 = vector.broadcast %3 : vector<1x32xf32> to vector<256x32xf32>
    %5 = arith.addf %2, %4 : vector<256x32xf32>
    %cst_5 = arith.constant 0.000000e+00 : f32
    %6 = vector.broadcast %cst_5 : f32 to vector<256x32xf32>
    %7 = arith.maximumf %5, %6 : vector<256x32xf32>
    %8 = arith.truncf %7 : vector<256x32xf32> to vector<256x32xbf16>
    %c0_6 = arith.constant 0 : index
    %c0_7 = arith.constant 0 : index
    %9 = vector.load %arg4[%c0_6, %c0_7] : memref<256x32xbf16, #tpu.memory_space<vmem>>, vector<256x32xbf16>
    tpu.vector_store %arg4[%c0_6, %c0_7], %8 {strides = array<i32>} : memref<256x32xbf16, #tpu.memory_space<vmem>>, vector<256x32xbf16>,
    return
  }
  func.func @transform_0(%arg0: i32) -> (i32, i32) {
    %c0_i32 = arith.constant 0 : i32
    %c0_i32_0 = arith.constant 0 : i32
    return %arg0, %c0_i32 : i32, i32
  }
  func.func @transform_1(%arg0: i32) -> (i32, i32) {
    %c0_i32 = arith.constant 0 : i32
    %c0_i32_0 = arith.constant 0 : i32
    %c0_i32_1 = arith.constant 0 : i32
    return %c0_i32, %c0_i32_0 : i32, i32
  }
  func.func @transform_2(%arg0: i32) -> (i32, i32) {
    %c0_i32 = arith.constant 0 : i32
    %c0_i32_0 = arith.constant 0 : i32
    %c0_i32_1 = arith.constant 0 : i32
    return %c0_i32, %c0_i32_0 : i32, i32
  }
  func.func @transform_3(%arg0: i32) -> (i32, i32) {
    %c0_i32 = arith.constant 0 : i32
    %c0_i32_0 = arith.constant 0 : i32
    return %arg0, %c0_i32 : i32, i32
  }
}

module attributes {stable_mosaic.version = 11 : i64} {
  func.func @_conv_head_kernel(%arg0: i32, %arg1: memref<256x288xbf16, #tpu.memory_space<vmem>>, %arg2: memref<288x32xbf16, #tpu.memory_space<vmem>>, %arg3: memref<1x32xf32, #tpu.memory_space<vmem>>, %arg4: memref<32x32xbf16, #tpu.memory_space<vmem>>, %arg5: memref<1x32xf32, #tpu.memory_space<vmem>>, %arg6: memref<32x12xbf16, #tpu.memory_space<vmem>>, %arg7: memref<1x12xf32, #tpu.memory_space<vmem>>, %arg8: memref<256x12xbf16, #tpu.memory_space<vmem>>) attributes {dimension_semantics = [#tpu.dimension_semantics<parallel>], iteration_bounds = array<i64: 2>, scalar_prefetch = 0 : i64, scratch_operands = 0 : i64, tpu.core_type = #tpu.core_type<tc>, window_params = [{transform_indices = @transform_0, window_bounds = array<i64: 256, 288>}, {pipeline_mode = #tpu.pipeline_mode<synchronous>, transform_indices = @transform_1, window_bounds = array<i64: 288, 32>}, {pipeline_mode = #tpu.pipeline_mode<synchronous>, transform_indices = @transform_2, window_bounds = array<i64: 1, 32>}, {pipeline_mode = #tpu.pipeline_mode<synchronous>, transform_indices = @transform_3, window_bounds = array<i64: 32, 32>}, {pipeline_mode = #tpu.pipeline_mode<synchronous>, transform_indices = @transform_4, window_bounds = array<i64: 1, 32>}, {pipeline_mode = #tpu.pipeline_mode<synchronous>, transform_indices = @transform_5, window_bounds = array<i64: 32, 12>}, {pipeline_mode = #tpu.pipeline_mode<synchronous>, transform_indices = @transform_6, window_bounds = array<i64: 1, 12>}, {transform_indices = @transform_7, window_bounds = array<i64: 256, 12>}]} {
    %c0 = arith.constant 0 : index
    %c0_0 = arith.constant 0 : index
    %0 = vector.load %arg1[%c0, %c0_0] : memref<256x288xbf16, #tpu.memory_space<vmem>>, vector<256x288xbf16>
    %c0_1 = arith.constant 0 : index
    %c0_2 = arith.constant 0 : index
    %1 = vector.load %arg2[%c0_1, %c0_2] : memref<288x32xbf16, #tpu.memory_space<vmem>>, vector<288x32xbf16>
    %cst = arith.constant dense<0.000000e+00> : vector<256x32xf32>
    %2 = tpu.matmul %0, %1, %cst {dimension_numbers = #tpu.dot_dimension_numbers<[1], [0], [0], [1], [0, 0, 1, 1], [], []>} : vector<256x288xbf16>, vector<288x32xbf16>, vector<256x32xf32> -> vector<256x32xf32>
    %c0_3 = arith.constant 0 : index
    %c0_4 = arith.constant 0 : index
    %3 = vector.load %arg3[%c0_3, %c0_4] : memref<1x32xf32, #tpu.memory_space<vmem>>, vector<1x32xf32>
    %4 = vector.broadcast %3 : vector<1x32xf32> to vector<256x32xf32>
    %5 = arith.addf %2, %4 : vector<256x32xf32>
    %cst_5 = arith.constant 0.000000e+00 : f32
    %6 = vector.broadcast %cst_5 : f32 to vector<256x32xf32>
    %7 = arith.maximumf %5, %6 : vector<256x32xf32>
    %8 = arith.truncf %7 : vector<256x32xf32> to vector<256x32xbf16>
    %c0_6 = arith.constant 0 : index
    %c0_7 = arith.constant 0 : index
    %9 = vector.load %arg4[%c0_6, %c0_7] : memref<32x32xbf16, #tpu.memory_space<vmem>>, vector<32x32xbf16>
    %cst_8 = arith.constant dense<0.000000e+00> : vector<256x32xf32>
    %10 = tpu.matmul %8, %9, %cst_8 {dimension_numbers = #tpu.dot_dimension_numbers<[1], [0], [0], [1], [0, 0, 1, 1], [], []>} : vector<256x32xbf16>, vector<32x32xbf16>, vector<256x32xf32> -> vector<256x32xf32>
    %c0_9 = arith.constant 0 : index
    %c0_10 = arith.constant 0 : index
    %11 = vector.load %arg5[%c0_9, %c0_10] : memref<1x32xf32, #tpu.memory_space<vmem>>, vector<1x32xf32>
    %12 = vector.broadcast %11 : vector<1x32xf32> to vector<256x32xf32>
    %13 = arith.addf %10, %12 : vector<256x32xf32>
    %cst_11 = arith.constant 0.000000e+00 : f32
    %14 = vector.broadcast %cst_11 : f32 to vector<256x32xf32>
    %15 = arith.maximumf %13, %14 : vector<256x32xf32>
    %16 = arith.truncf %15 : vector<256x32xf32> to vector<256x32xbf16>
    %c0_12 = arith.constant 0 : index
    %c0_13 = arith.constant 0 : index
    %17 = vector.load %arg6[%c0_12, %c0_13] : memref<32x12xbf16, #tpu.memory_space<vmem>>, vector<32x12xbf16>
    %cst_14 = arith.constant dense<0.000000e+00> : vector<256x12xf32>
    %18 = tpu.matmul %16, %17, %cst_14 {dimension_numbers = #tpu.dot_dimension_numbers<[1], [0], [0], [1], [0, 0, 1, 1], [], []>} : vector<256x32xbf16>, vector<32x12xbf16>, vector<256x12xf32> -> vector<256x12xf32>
    %c0_15 = arith.constant 0 : index
    %c0_16 = arith.constant 0 : index
    %19 = vector.load %arg7[%c0_15, %c0_16] : memref<1x12xf32, #tpu.memory_space<vmem>>, vector<1x12xf32>
    %20 = vector.broadcast %19 : vector<1x12xf32> to vector<256x12xf32>
    %21 = arith.addf %18, %20 : vector<256x12xf32>
    %22 = arith.truncf %21 : vector<256x12xf32> to vector<256x12xbf16>
    %c0_17 = arith.constant 0 : index
    %c0_18 = arith.constant 0 : index
    %23 = vector.load %arg8[%c0_17, %c0_18] : memref<256x12xbf16, #tpu.memory_space<vmem>>, vector<256x12xbf16>
    tpu.vector_store %arg8[%c0_17, %c0_18], %22 {strides = array<i32>} : memref<256x12xbf16, #tpu.memory_space<vmem>>, vector<256x12xbf16>,
    return
  }
  func.func @transform_0(%arg0: i32) -> (i32, i32) {
    %c0_i32 = arith.constant 0 : i32
    %c0_i32_0 = arith.constant 0 : i32
    return %arg0, %c0_i32 : i32, i32
  }
  func.func @transform_1(%arg0: i32) -> (i32, i32) {
    %c0_i32 = arith.constant 0 : i32
    %c0_i32_0 = arith.constant 0 : i32
    %c0_i32_1 = arith.constant 0 : i32
    return %c0_i32, %c0_i32_0 : i32, i32
  }
  func.func @transform_2(%arg0: i32) -> (i32, i32) {
    %c0_i32 = arith.constant 0 : i32
    %c0_i32_0 = arith.constant 0 : i32
    %c0_i32_1 = arith.constant 0 : i32
    return %c0_i32, %c0_i32_0 : i32, i32
  }
  func.func @transform_3(%arg0: i32) -> (i32, i32) {
    %c0_i32 = arith.constant 0 : i32
    %c0_i32_0 = arith.constant 0 : i32
    %c0_i32_1 = arith.constant 0 : i32
    return %c0_i32, %c0_i32_0 : i32, i32
  }
  func.func @transform_4(%arg0: i32) -> (i32, i32) {
    %c0_i32 = arith.constant 0 : i32
    %c0_i32_0 = arith.constant 0 : i32
    %c0_i32_1 = arith.constant 0 : i32
    return %c0_i32, %c0_i32_0 : i32, i32
  }
  func.func @transform_5(%arg0: i32) -> (i32, i32) {
    %c0_i32 = arith.constant 0 : i32
    %c0_i32_0 = arith.constant 0 : i32
    %c0_i32_1 = arith.constant 0 : i32
    return %c0_i32, %c0_i32_0 : i32, i32
  }
  func.func @transform_6(%arg0: i32) -> (i32, i32) {
    %c0_i32 = arith.constant 0 : i32
    %c0_i32_0 = arith.constant 0 : i32
    %c0_i32_1 = arith.constant 0 : i32
    return %c0_i32, %c0_i32_0 : i32, i32
  }
  func.func @transform_7(%arg0: i32) -> (i32, i32) {
    %c0_i32 = arith.constant 0 : i32
    %c0_i32_0 = arith.constant 0 : i32
    return %arg0, %c0_i32 : i32, i32
  }
}

module attributes {stable_mosaic.version = 11 : i64} {
  func.func @_conv_mm_kernel(%arg0: i32, %arg1: memref<256x2156xbf16, #tpu.memory_space<vmem>>, %arg2: memref<2156x32xbf16, #tpu.memory_space<vmem>>, %arg3: memref<1x32xf32, #tpu.memory_space<vmem>>, %arg4: memref<256x32xbf16, #tpu.memory_space<vmem>>) attributes {dimension_semantics = [#tpu.dimension_semantics<parallel>], iteration_bounds = array<i64: 2>, scalar_prefetch = 0 : i64, scratch_operands = 0 : i64, tpu.core_type = #tpu.core_type<tc>, window_params = [{transform_indices = @transform_0, window_bounds = array<i64: 256, 2156>}, {pipeline_mode = #tpu.pipeline_mode<synchronous>, transform_indices = @transform_1, window_bounds = array<i64: 2156, 32>}, {pipeline_mode = #tpu.pipeline_mode<synchronous>, transform_indices = @transform_2, window_bounds = array<i64: 1, 32>}, {transform_indices = @transform_3, window_bounds = array<i64: 256, 32>}]} {
    %c0 = arith.constant 0 : index
    %c0_0 = arith.constant 0 : index
    %0 = vector.load %arg1[%c0, %c0_0] : memref<256x2156xbf16, #tpu.memory_space<vmem>>, vector<256x2156xbf16>
    %c0_1 = arith.constant 0 : index
    %c0_2 = arith.constant 0 : index
    %1 = vector.load %arg2[%c0_1, %c0_2] : memref<2156x32xbf16, #tpu.memory_space<vmem>>, vector<2156x32xbf16>
    %cst = arith.constant dense<0.000000e+00> : vector<256x32xf32>
    %2 = tpu.matmul %0, %1, %cst {dimension_numbers = #tpu.dot_dimension_numbers<[1], [0], [0], [1], [0, 0, 1, 1], [], []>} : vector<256x2156xbf16>, vector<2156x32xbf16>, vector<256x32xf32> -> vector<256x32xf32>
    %c0_3 = arith.constant 0 : index
    %c0_4 = arith.constant 0 : index
    %3 = vector.load %arg3[%c0_3, %c0_4] : memref<1x32xf32, #tpu.memory_space<vmem>>, vector<1x32xf32>
    %4 = vector.broadcast %3 : vector<1x32xf32> to vector<256x32xf32>
    %5 = arith.addf %2, %4 : vector<256x32xf32>
    %cst_5 = arith.constant 0.000000e+00 : f32
    %6 = vector.broadcast %cst_5 : f32 to vector<256x32xf32>
    %7 = arith.maximumf %5, %6 : vector<256x32xf32>
    %8 = arith.truncf %7 : vector<256x32xf32> to vector<256x32xbf16>
    %c0_6 = arith.constant 0 : index
    %c0_7 = arith.constant 0 : index
    %9 = vector.load %arg4[%c0_6, %c0_7] : memref<256x32xbf16, #tpu.memory_space<vmem>>, vector<256x32xbf16>
    tpu.vector_store %arg4[%c0_6, %c0_7], %8 {strides = array<i32>} : memref<256x32xbf16, #tpu.memory_space<vmem>>, vector<256x32xbf16>,
    return
  }
  func.func @transform_0(%arg0: i32) -> (i32, i32) {
    %c0_i32 = arith.constant 0 : i32
    %c0_i32_0 = arith.constant 0 : i32
    return %arg0, %c0_i32 : i32, i32
  }
  func.func @transform_1(%arg0: i32) -> (i32, i32) {
    %c0_i32 = arith.constant 0 : i32
    %c0_i32_0 = arith.constant 0 : i32
    %c0_i32_1 = arith.constant 0 : i32
    return %c0_i32, %c0_i32_0 : i32, i32
  }
  func.func @transform_2(%arg0: i32) -> (i32, i32) {
    %c0_i32 = arith.constant 0 : i32
    %c0_i32_0 = arith.constant 0 : i32
    %c0_i32_1 = arith.constant 0 : i32
    return %c0_i32, %c0_i32_0 : i32, i32
  }
  func.func @transform_3(%arg0: i32) -> (i32, i32) {
    %c0_i32 = arith.constant 0 : i32
    %c0_i32_0 = arith.constant 0 : i32
    return %arg0, %c0_i32 : i32, i32
  }
}

module attributes {stable_mosaic.version = 11 : i64} {
  func.func @_conv_mm_kernel(%arg0: i32, %arg1: memref<256x1568xbf16, #tpu.memory_space<vmem>>, %arg2: memref<1568x32xbf16, #tpu.memory_space<vmem>>, %arg3: memref<1x32xf32, #tpu.memory_space<vmem>>, %arg4: memref<256x32xbf16, #tpu.memory_space<vmem>>) attributes {dimension_semantics = [#tpu.dimension_semantics<parallel>], iteration_bounds = array<i64: 2>, scalar_prefetch = 0 : i64, scratch_operands = 0 : i64, tpu.core_type = #tpu.core_type<tc>, window_params = [{transform_indices = @transform_0, window_bounds = array<i64: 256, 1568>}, {pipeline_mode = #tpu.pipeline_mode<synchronous>, transform_indices = @transform_1, window_bounds = array<i64: 1568, 32>}, {pipeline_mode = #tpu.pipeline_mode<synchronous>, transform_indices = @transform_2, window_bounds = array<i64: 1, 32>}, {transform_indices = @transform_3, window_bounds = array<i64: 256, 32>}]} {
    %c0 = arith.constant 0 : index
    %c0_0 = arith.constant 0 : index
    %0 = vector.load %arg1[%c0, %c0_0] : memref<256x1568xbf16, #tpu.memory_space<vmem>>, vector<256x1568xbf16>
    %c0_1 = arith.constant 0 : index
    %c0_2 = arith.constant 0 : index
    %1 = vector.load %arg2[%c0_1, %c0_2] : memref<1568x32xbf16, #tpu.memory_space<vmem>>, vector<1568x32xbf16>
    %cst = arith.constant dense<0.000000e+00> : vector<256x32xf32>
    %2 = tpu.matmul %0, %1, %cst {dimension_numbers = #tpu.dot_dimension_numbers<[1], [0], [0], [1], [0, 0, 1, 1], [], []>} : vector<256x1568xbf16>, vector<1568x32xbf16>, vector<256x32xf32> -> vector<256x32xf32>
    %c0_3 = arith.constant 0 : index
    %c0_4 = arith.constant 0 : index
    %3 = vector.load %arg3[%c0_3, %c0_4] : memref<1x32xf32, #tpu.memory_space<vmem>>, vector<1x32xf32>
    %4 = vector.broadcast %3 : vector<1x32xf32> to vector<256x32xf32>
    %5 = arith.addf %2, %4 : vector<256x32xf32>
    %cst_5 = arith.constant 0.000000e+00 : f32
    %6 = vector.broadcast %cst_5 : f32 to vector<256x32xf32>
    %7 = arith.maximumf %5, %6 : vector<256x32xf32>
    %8 = arith.truncf %7 : vector<256x32xf32> to vector<256x32xbf16>
    %c0_6 = arith.constant 0 : index
    %c0_7 = arith.constant 0 : index
    %9 = vector.load %arg4[%c0_6, %c0_7] : memref<256x32xbf16, #tpu.memory_space<vmem>>, vector<256x32xbf16>
    tpu.vector_store %arg4[%c0_6, %c0_7], %8 {strides = array<i32>} : memref<256x32xbf16, #tpu.memory_space<vmem>>, vector<256x32xbf16>,
    return
  }
  func.func @transform_0(%arg0: i32) -> (i32, i32) {
    %c0_i32 = arith.constant 0 : i32
    %c0_i32_0 = arith.constant 0 : i32
    return %arg0, %c0_i32 : i32, i32
  }
  func.func @transform_1(%arg0: i32) -> (i32, i32) {
    %c0_i32 = arith.constant 0 : i32
    %c0_i32_0 = arith.constant 0 : i32
    %c0_i32_1 = arith.constant 0 : i32
    return %c0_i32, %c0_i32_0 : i32, i32
  }
  func.func @transform_2(%arg0: i32) -> (i32, i32) {
    %c0_i32 = arith.constant 0 : i32
    %c0_i32_0 = arith.constant 0 : i32
    %c0_i32_1 = arith.constant 0 : i32
    return %c0_i32, %c0_i32_0 : i32, i32
  }
  func.func @transform_3(%arg0: i32) -> (i32, i32) {
    %c0_i32 = arith.constant 0 : i32
    %c0_i32_0 = arith.constant 0 : i32
    return %arg0, %c0_i32 : i32, i32
  }
}

module attributes {stable_mosaic.version = 11 : i64} {
  func.func @_conv_head_kernel(%arg0: i32, %arg1: memref<256x1568xbf16, #tpu.memory_space<vmem>>, %arg2: memref<1568x32xbf16, #tpu.memory_space<vmem>>, %arg3: memref<1x32xf32, #tpu.memory_space<vmem>>, %arg4: memref<32x32xbf16, #tpu.memory_space<vmem>>, %arg5: memref<1x32xf32, #tpu.memory_space<vmem>>, %arg6: memref<32x12xbf16, #tpu.memory_space<vmem>>, %arg7: memref<1x12xf32, #tpu.memory_space<vmem>>, %arg8: memref<256x12xbf16, #tpu.memory_space<vmem>>) attributes {dimension_semantics = [#tpu.dimension_semantics<parallel>], iteration_bounds = array<i64: 2>, scalar_prefetch = 0 : i64, scratch_operands = 0 : i64, tpu.core_type = #tpu.core_type<tc>, window_params = [{transform_indices = @transform_0, window_bounds = array<i64: 256, 1568>}, {pipeline_mode = #tpu.pipeline_mode<synchronous>, transform_indices = @transform_1, window_bounds = array<i64: 1568, 32>}, {pipeline_mode = #tpu.pipeline_mode<synchronous>, transform_indices = @transform_2, window_bounds = array<i64: 1, 32>}, {pipeline_mode = #tpu.pipeline_mode<synchronous>, transform_indices = @transform_3, window_bounds = array<i64: 32, 32>}, {pipeline_mode = #tpu.pipeline_mode<synchronous>, transform_indices = @transform_4, window_bounds = array<i64: 1, 32>}, {pipeline_mode = #tpu.pipeline_mode<synchronous>, transform_indices = @transform_5, window_bounds = array<i64: 32, 12>}, {pipeline_mode = #tpu.pipeline_mode<synchronous>, transform_indices = @transform_6, window_bounds = array<i64: 1, 12>}, {transform_indices = @transform_7, window_bounds = array<i64: 256, 12>}]} {
    %c0 = arith.constant 0 : index
    %c0_0 = arith.constant 0 : index
    %0 = vector.load %arg1[%c0, %c0_0] : memref<256x1568xbf16, #tpu.memory_space<vmem>>, vector<256x1568xbf16>
    %c0_1 = arith.constant 0 : index
    %c0_2 = arith.constant 0 : index
    %1 = vector.load %arg2[%c0_1, %c0_2] : memref<1568x32xbf16, #tpu.memory_space<vmem>>, vector<1568x32xbf16>
    %cst = arith.constant dense<0.000000e+00> : vector<256x32xf32>
    %2 = tpu.matmul %0, %1, %cst {dimension_numbers = #tpu.dot_dimension_numbers<[1], [0], [0], [1], [0, 0, 1, 1], [], []>} : vector<256x1568xbf16>, vector<1568x32xbf16>, vector<256x32xf32> -> vector<256x32xf32>
    %c0_3 = arith.constant 0 : index
    %c0_4 = arith.constant 0 : index
    %3 = vector.load %arg3[%c0_3, %c0_4] : memref<1x32xf32, #tpu.memory_space<vmem>>, vector<1x32xf32>
    %4 = vector.broadcast %3 : vector<1x32xf32> to vector<256x32xf32>
    %5 = arith.addf %2, %4 : vector<256x32xf32>
    %cst_5 = arith.constant 0.000000e+00 : f32
    %6 = vector.broadcast %cst_5 : f32 to vector<256x32xf32>
    %7 = arith.maximumf %5, %6 : vector<256x32xf32>
    %8 = arith.truncf %7 : vector<256x32xf32> to vector<256x32xbf16>
    %c0_6 = arith.constant 0 : index
    %c0_7 = arith.constant 0 : index
    %9 = vector.load %arg4[%c0_6, %c0_7] : memref<32x32xbf16, #tpu.memory_space<vmem>>, vector<32x32xbf16>
    %cst_8 = arith.constant dense<0.000000e+00> : vector<256x32xf32>
    %10 = tpu.matmul %8, %9, %cst_8 {dimension_numbers = #tpu.dot_dimension_numbers<[1], [0], [0], [1], [0, 0, 1, 1], [], []>} : vector<256x32xbf16>, vector<32x32xbf16>, vector<256x32xf32> -> vector<256x32xf32>
    %c0_9 = arith.constant 0 : index
    %c0_10 = arith.constant 0 : index
    %11 = vector.load %arg5[%c0_9, %c0_10] : memref<1x32xf32, #tpu.memory_space<vmem>>, vector<1x32xf32>
    %12 = vector.broadcast %11 : vector<1x32xf32> to vector<256x32xf32>
    %13 = arith.addf %10, %12 : vector<256x32xf32>
    %cst_11 = arith.constant 0.000000e+00 : f32
    %14 = vector.broadcast %cst_11 : f32 to vector<256x32xf32>
    %15 = arith.maximumf %13, %14 : vector<256x32xf32>
    %16 = arith.truncf %15 : vector<256x32xf32> to vector<256x32xbf16>
    %c0_12 = arith.constant 0 : index
    %c0_13 = arith.constant 0 : index
    %17 = vector.load %arg6[%c0_12, %c0_13] : memref<32x12xbf16, #tpu.memory_space<vmem>>, vector<32x12xbf16>
    %cst_14 = arith.constant dense<0.000000e+00> : vector<256x12xf32>
    %18 = tpu.matmul %16, %17, %cst_14 {dimension_numbers = #tpu.dot_dimension_numbers<[1], [0], [0], [1], [0, 0, 1, 1], [], []>} : vector<256x32xbf16>, vector<32x12xbf16>, vector<256x12xf32> -> vector<256x12xf32>
    %c0_15 = arith.constant 0 : index
    %c0_16 = arith.constant 0 : index
    %19 = vector.load %arg7[%c0_15, %c0_16] : memref<1x12xf32, #tpu.memory_space<vmem>>, vector<1x12xf32>
    %20 = vector.broadcast %19 : vector<1x12xf32> to vector<256x12xf32>
    %21 = arith.addf %18, %20 : vector<256x12xf32>
    %22 = arith.truncf %21 : vector<256x12xf32> to vector<256x12xbf16>
    %c0_17 = arith.constant 0 : index
    %c0_18 = arith.constant 0 : index
    %23 = vector.load %arg8[%c0_17, %c0_18] : memref<256x12xbf16, #tpu.memory_space<vmem>>, vector<256x12xbf16>
    tpu.vector_store %arg8[%c0_17, %c0_18], %22 {strides = array<i32>} : memref<256x12xbf16, #tpu.memory_space<vmem>>, vector<256x12xbf16>,
    return
  }
  func.func @transform_0(%arg0: i32) -> (i32, i32) {
    %c0_i32 = arith.constant 0 : i32
    %c0_i32_0 = arith.constant 0 : i32
    return %arg0, %c0_i32 : i32, i32
  }
  func.func @transform_1(%arg0: i32) -> (i32, i32) {
    %c0_i32 = arith.constant 0 : i32
    %c0_i32_0 = arith.constant 0 : i32
    %c0_i32_1 = arith.constant 0 : i32
    return %c0_i32, %c0_i32_0 : i32, i32
  }
  func.func @transform_2(%arg0: i32) -> (i32, i32) {
    %c0_i32 = arith.constant 0 : i32
    %c0_i32_0 = arith.constant 0 : i32
    %c0_i32_1 = arith.constant 0 : i32
    return %c0_i32, %c0_i32_0 : i32, i32
  }
  func.func @transform_3(%arg0: i32) -> (i32, i32) {
    %c0_i32 = arith.constant 0 : i32
    %c0_i32_0 = arith.constant 0 : i32
    %c0_i32_1 = arith.constant 0 : i32
    return %c0_i32, %c0_i32_0 : i32, i32
  }
  func.func @transform_4(%arg0: i32) -> (i32, i32) {
    %c0_i32 = arith.constant 0 : i32
    %c0_i32_0 = arith.constant 0 : i32
    %c0_i32_1 = arith.constant 0 : i32
    return %c0_i32, %c0_i32_0 : i32, i32
  }
  func.func @transform_5(%arg0: i32) -> (i32, i32) {
    %c0_i32 = arith.constant 0 : i32
    %c0_i32_0 = arith.constant 0 : i32
    %c0_i32_1 = arith.constant 0 : i32
    return %c0_i32, %c0_i32_0 : i32, i32
  }
  func.func @transform_6(%arg0: i32) -> (i32, i32) {
    %c0_i32 = arith.constant 0 : i32
    %c0_i32_0 = arith.constant 0 : i32
    %c0_i32_1 = arith.constant 0 : i32
    return %c0_i32, %c0_i32_0 : i32, i32
  }
  func.func @transform_7(%arg0: i32) -> (i32, i32) {
    %c0_i32 = arith.constant 0 : i32
    %c0_i32_0 = arith.constant 0 : i32
    return %arg0, %c0_i32 : i32, i32
  }
}

</mosaic_0001>

<bundles_post_ra>
// kernel: model_cnn_forward.31
= control target key start
LH: loop header
LB: loop body
LE: loop exit
PB: predicated region body
PF: predicated region fallthrough
CT: control target
= control target key end

     0   :  { %s1140_s12 = smov 0   ;;  %s1341_s0 = inlined_call_operand.vmem [shape: bf16[512,144], index: 0, kind: input, shape index: {}]   ;;  %s1342_s1 = inlined_call_operand.vmem [shape: bf16[144,32], index: 1, kind: input, shape index: {}]   ;;  %s1343_s2 = inlined_call_operand.vmem [shape: f32[1,32], index: 2, kind: input, shape index: {}]   ;;  %s1344_s3 = inlined_call_operand.vmem [shape: bf16[512,32], index: 3, kind: output, shape index: {}]  }
   0x1 LB: > { %s892_s13 = sadd.s32 4294967295, %s1117_s12   ;;  %p896_p0 = scmp.ge.s32.totalorder %s1117_s12, 1  ;;  %s1117_s12 = sphi %s1140_s12, %s13_s12  }
   0x2   : > { %p139_p1 = scmp.lt.s32.totalorder %s1117_s12, 3 }
   0x4   : > { %p140_p2 = pnand %p896_p0, %p139_p1 }
   0x5   : > { %v1054_v0 = vld [vmem:[%s1342_s1] sm:$0xff] (!%p140_p2)   ;;  %v1119_v1 = vmov (!%p140_p2), 0   ;;  %s897_s16 = sshll.u32 (!%p140_p2), %s892_s13, 5  ;;  %v1055_v2 = vld [vmem:[%s1342_s1 + $0x8] sm:$0xff] (!%p140_p2)   ;;  %v1056_v3 = vld [vmem:[%s1342_s1 + $0x10] sm:$0xff] (!%p140_p2)   ;;  %vm433_vm0 = vcmask (!%p140_p2), 130048  }
   0x6   : > { %143 = sbr.rel (%p140_p2) target bundleno = 319 (0x13f), region = 32  ;;  %482 = vmatprep.subr.bf16.mxu0 (!%p140_p2), %v1119_v1  ;;  %1027 = vmatprep.subr.bf16.mxu1 (!%p140_p2), %v1119_v1  ;;  %p165_p3 = scmp.lt.s32.totalorder (!%p140_p2), %s897_s16, 63  ;;  %v1057_v4 = vld [vmem:[%s1342_s1 + $0x18] sm:$0xff] (!%p140_p2)   ;;  %v1058_v7 = vld [vmem:[%s1342_s1 + $0x20] sm:$0xff] (!%p140_p2)   ;;  %v1059_v8 = vld [vmem:[%s1342_s1 + $0x28] sm:$0xff] (!%p140_p2)   ;;  %vm803_vm1 = vcmask (!%p140_p2), 257024  }
   0x7   : > { %483 = vmatpush1.bf16.msra.mxu0 (!%p140_p2), %v1054_v0  ;;  %1036 = vmatpush1.bf16.msra.mxu1 (!%p140_p2), %v1054_v0  ;;  %v1060_v9 = vld [vmem:[%s1342_s1 + $0x30] sm:$0xff] (!%p140_p2)   ;;  %v1061_v10 = vld [vmem:[%s1342_s1 + $0x38] sm:$0xff] (!%p140_p2)   ;;  %v1062_v11 = vld [vmem:[%s1342_s1 + $0x40] sm:$0xff] (!%p140_p2)  }
   0x8   : > { %484 = vmatprep.subr.bf16.mxu0 (!%p140_p2), %v1119_v1  ;;  %1028 = vmatprep.subr.bf16.mxu1 (!%p140_p2), %v1119_v1  ;;  %v1234_v42 = vld [vmem:[%s1343_s2] ss:$0 sm:$0xff] (!%p140_p2) }
   0xb   : > { %485 = vmatpush1.bf16.msra.mxu0 (!%p140_p2), %v1055_v2  ;;  %1037 = vmatpush1.bf16.msra.mxu1 (!%p140_p2), %v1055_v2 }
   0xc   : > { %486 = vmatprep.subr.bf16.mxu0 (!%p140_p2), %v1119_v1  ;;  %1029 = vmatprep.subr.bf16.mxu1 (!%p140_p2), %v1119_v1 }
   0xd   : > { %s1346_s16 = smov (!%p165_p3, %s897_s16), 63 }
   0xe   : > { %s994_s21 = sshll.u32 %s1346_s16, 3  ;;  %s901_s13 = sshll.u32 %s1346_s16, 2 }
   0xf   : > { %s1163_s24 = scalar_lea.vmem %s1341_s0, %s994_s21  ;;  %487 = vmatpush1.bf16.msra.mxu0 %v1056_v3  ;;  %1038 = vmatpush1.bf16.msra.mxu1 %v1056_v3  ;;  %s1244_s16 = scalar_lea.vmem %s1344_s3, %s901_s13 }
  0x10   : > { %v1065_v5 = vld [vmem:[%s1163_s24 + $0x4] ss:$8 sps:$4 sm:$0xff]   ;;  %488 = vmatprep.subr.bf16.mxu0 %v1119_v1  ;;  %1030 = vmatprep.subr.bf16.mxu1 %v1119_v1  ;;  %v1063_v12 = vld [vmem:[%s1163_s24] ss:$8 sps:$4 sm:$0xff]   ;;  %v1069_v14 = vld [vmem:[%s1163_s24 + $0x14] ss:$8 sps:$4 sm:$0xff]  }
  0x11   : > { %v1068_v6 = vld [vmem:[%s1163_s24 + $0x84] ss:$8 sps:$4 sm:$0xff]   ;;  %944 = vmatprep.mubr.msk.bf16.mxu0 %vm433_vm0, %v1065_v5  ;;  %v1066_v13 = vld [vmem:[%s1163_s24 + $0x80] ss:$8 sps:$4 sm:$0xff]   ;;  %v1071_v15 = vld [vmem:[%s1163_s24 + $0x94] ss:$8 sps:$4 sm:$0xff]  }
  0x12   : > { %952 = vmatprep.mubr.msk.bf16.mxu1 %vm433_vm0, %v1068_v6  ;;  %v1073_v16 = vld [vmem:[%s1163_s24 + $0x10] ss:$8 sps:$4 sm:$0xff]   ;;  %v1075_v18 = vld [vmem:[%s1163_s24 + $0x24] ss:$8 sps:$4 sm:$0xff]   ;;  %v1079_v20 = vld [vmem:[%s1163_s24 + $0x20] ss:$8 sps:$4 sm:$0xff]  }
  0x13   : > { %489 = vmatpush1.bf16.msra.mxu0 %v1057_v4  ;;  %1039 = vmatpush1.bf16.msra.mxu1 %v1057_v4  ;;  %v1074_v17 = vld [vmem:[%s1163_s24 + $0x90] ss:$8 sps:$4 sm:$0xff]   ;;  %v1077_v19 = vld [vmem:[%s1163_s24 + $0xa4] ss:$8 sps:$4 sm:$0xff]   ;;  %v1080_v21 = vld [vmem:[%s1163_s24 + $0xa0] ss:$8 sps:$4 sm:$0xff]  }
  0x14   : > { %490 = vmatprep.subr.bf16.mxu0 %v1119_v1  ;;  %1031 = vmatprep.subr.bf16.mxu1 %v1119_v1  ;;  %v1081_v22 = vld [vmem:[%s1163_s24 + $0x34] ss:$8 sps:$4 sm:$0xff]   ;;  %v1085_v24 = vld [vmem:[%s1163_s24 + $0x30] ss:$8 sps:$4 sm:$0xff]   ;;  %v1087_v26 = vld [vmem:[%s1163_s24 + $0x44] ss:$8 sps:$4 sm:$0xff]  }
  0x15   : > { %v1083_v23 = vld [vmem:[%s1163_s24 + $0xb4] ss:$8 sps:$4 sm:$0xff]   ;;  %v1086_v25 = vld [vmem:[%s1163_s24 + $0xb0] ss:$8 sps:$4 sm:$0xff]   ;;  %v1089_v27 = vld [vmem:[%s1163_s24 + $0xc4] ss:$8 sps:$4 sm:$0xff]  }
  0x16   : > { %v1091_v28 = vld [vmem:[%s1163_s24 + $0x40] ss:$8 sps:$4 sm:$0xff]   ;;  %v1093_v30 = vld [vmem:[%s1163_s24 + $0x54] ss:$8 sps:$4 sm:$0xff]   ;;  %v1097_v32 = vld [vmem:[%s1163_s24 + $0x50] ss:$8 sps:$4 sm:$0xff]  }
  0x17   : > { %491 = vmatpush1.bf16.msra.mxu0 %v1058_v7  ;;  %1040 = vmatpush1.bf16.msra.mxu1 %v1058_v7  ;;  %v1092_v29 = vld [vmem:[%s1163_s24 + $0xc0] ss:$8 sps:$4 sm:$0xff]   ;;  %v1095_v31 = vld [vmem:[%s1163_s24 + $0xd4] ss:$8 sps:$4 sm:$0xff]   ;;  %v1098_v33 = vld [vmem:[%s1163_s24 + $0xd0] ss:$8 sps:$4 sm:$0xff]  }
  0x18   : > { %492 = vmatprep.subr.bf16.mxu0 %v1119_v1  ;;  %1032 = vmatprep.subr.bf16.mxu1 %v1119_v1  ;;  %v1099_v34 = vld [vmem:[%s1163_s24 + $0x64] ss:$8 sps:$4 sm:$0xff]   ;;  %v1103_v36 = vld [vmem:[%s1163_s24 + $0x60] ss:$8 sps:$4 sm:$0xff]   ;;  %v1105_v38 = vld [vmem:[%s1163_s24 + $0x74] ss:$8 sps:$4 sm:$0xff]  }
  0x19   : > { %v1101_v35 = vld [vmem:[%s1163_s24 + $0xe4] ss:$8 sps:$4 sm:$0xff]   ;;  %v1104_v37 = vld [vmem:[%s1163_s24 + $0xe0] ss:$8 sps:$4 sm:$0xff]   ;;  %v1107_v39 = vld [vmem:[%s1163_s24 + $0xf4] ss:$8 sps:$4 sm:$0xff]  }
  0x1a   : > { %v1109_v40 = vld [vmem:[%s1163_s24 + $0x70] ss:$8 sps:$4 sm:$0xff]  }
  0x1b   : > { %493 = vmatpush1.bf16.msra.mxu0 %v1059_v8  ;;  %1041 = vmatpush1.bf16.msra.mxu1 %v1059_v8  ;;  %v1110_v41 = vld [vmem:[%s1163_s24 + $0xf0] ss:$8 sps:$4 sm:$0xff]  }
  0x1c   : > { %494 = vmatprep.subr.bf16.mxu0 %v1119_v1  ;;  %1033 = vmatprep.subr.bf16.mxu1 %v1119_v1 }
  0x1f   : > { %495 = vmatpush1.bf16.msra.mxu0 %v1060_v9  ;;  %1042 = vmatpush1.bf16.msra.mxu1 %v1060_v9 }
  0x20   : > { %496 = vmatprep.subr.bf16.mxu0 %v1119_v1  ;;  %1034 = vmatprep.subr.bf16.mxu1 %v1119_v1 }
  0x23   : > { %497 = vmatpush1.bf16.msra.mxu0 %v1061_v10  ;;  %1043 = vmatpush1.bf16.msra.mxu1 %v1061_v10 }
  0x24   : > { %498 = vmatprep.subr.bf16.mxu0 %v1119_v1  ;;  %1035 = vmatprep.subr.bf16.mxu1 %v1119_v1 }
  0x27   : > { %499 = vmatpush1.bf16.msra.mxu0 %v1062_v11  ;;  %1044 = vmatpush1.bf16.msra.mxu1 %v1062_v11 }
  0x2a   : > { %515 = vmatmul.mubr.bf16.vlgmr.msra.gmra.mrb[0].mxu0 %v1063_v12  ;;  %579 = vmatmul.mubr.bf16.vlgmr.msra.gmra.mrb[0].mxu1 %v1066_v13 }
  0x2b   : > { %945 = vmatprep.mubr.msk.bf16.mxu0 %vm433_vm0, %v1069_v14  ;;  %953 = vmatprep.mubr.msk.bf16.mxu1 %vm433_vm0, %v1071_v15 }
  0x32   : > { %523 = vmatmul.mubr.bf16.gmra.mrb[4].mxu0 %v1073_v16  ;;  %587 = vmatmul.mubr.bf16.gmra.mrb[4].mxu1 %v1074_v17 }
  0x33   : > { %946 = vmatprep.mubr.msk.bf16.mxu0 %vm433_vm0, %v1075_v18  ;;  %954 = vmatprep.mubr.msk.bf16.mxu1 %vm433_vm0, %v1077_v19 }
  0x3a   : > { %531 = vmatmul.mubr.bf16.gmra.mrb[8].mxu0 %v1079_v20  ;;  %595 = vmatmul.mubr.bf16.gmra.mrb[8].mxu1 %v1080_v21 }
  0x3b   : > { %947 = vmatprep.mubr.msk.bf16.mxu0 %vm433_vm0, %v1081_v22  ;;  %955 = vmatprep.mubr.msk.bf16.mxu1 %vm433_vm0, %v1083_v23 }
  0x42   : > { %539 = vmatmul.mubr.bf16.gmra.mrb[12].mxu0 %v1085_v24  ;;  %603 = vmatmul.mubr.bf16.gmra.mrb[12].mxu1 %v1086_v25 }
  0x43   : > { %948 = vmatprep.mubr.msk.bf16.mxu0 %vm433_vm0, %v1087_v26  ;;  %956 = vmatprep.mubr.msk.bf16.mxu1 %vm433_vm0, %v1089_v27 }
  0x4a   : > { %547 = vmatmul.mubr.bf16.gmra.mrb[16].mxu0 %v1091_v28  ;;  %611 = vmatmul.mubr.bf16.gmra.mrb[16].mxu1 %v1092_v29 }
  0x4b   : > { %949 = vmatprep.mubr.msk.bf16.mxu0 %vm433_vm0, %v1093_v30  ;;  %957 = vmatprep.mubr.msk.bf16.mxu1 %vm433_vm0, %v1095_v31 }
  0x52   : > { %555 = vmatmul.mubr.bf16.gmra.mrb[20].mxu0 %v1097_v32  ;;  %619 = vmatmul.mubr.bf16.gmra.mrb[20].mxu1 %v1098_v33 }
  0x53   : > { %950 = vmatprep.mubr.msk.bf16.mxu0 %vm433_vm0, %v1099_v34  ;;  %958 = vmatprep.mubr.msk.bf16.mxu1 %vm433_vm0, %v1101_v35 }
  0x5a   : > { %563 = vmatmul.mubr.bf16.gmra.mrb[24].mxu0 %v1103_v36  ;;  %627 = vmatmul.mubr.bf16.gmra.mrb[24].mxu1 %v1104_v37 }
  0x5b   : > { %951 = vmatprep.mubr.msk.bf16.mxu0 %vm433_vm0, %v1105_v38  ;;  %959 = vmatprep.mubr.msk.bf16.mxu1 %vm433_vm0, %v1107_v39 }
  0x62   : > { %571 = vmatmul.mubr.bf16.gmra.mrb[28].mxu0 %v1109_v40  ;;  %635 = vmatmul.mubr.bf16.gmra.mrb[28].mxu1 %v1110_v41 }
  0xfd   : > { %v516_v43 = vpop.f32.mrb[0].mxu0  ;;  %v580_v44 = vpop.f32.mrb[0].mxu1 }
  0xfe   : > { %v517_v45 = vadd.f32 %v1234_v42, %v516_v43  ;;  %v581_v46 = vadd.f32 %v1234_v42, %v580_v44  ;;  %v518_v47 = vpop.f32.mrb[1].mxu0  ;;  %v582_v48 = vpop.f32.mrb[1].mxu1 }
  0xff   : > { %v519_v49 = vpop.f32.mrb[2].mxu0  ;;  %v583_v50 = vpop.f32.mrb[2].mxu1 }
 0x100   : > { %v643_v51 = vmax.f32 %v517_v45, 0.0  ;;  %v659_v52 = vmax.f32 %v581_v46, 0.0  ;;  %v520_v53 = vadd.f32 %v1234_v42, %v519_v49  ;;  %v584_v54 = vadd.f32 %v1234_v42, %v583_v50  ;;  %v521_v55 = vpop.f32.mrb[3].mxu0  ;;  %v585_v56 = vpop.f32.mrb[3].mxu1 }
 0x102   : > { %v995_v57 = vpack.c.bf16 %v643_v51, %v643_v51  ;;  %v1011_v58 = vpack.c.bf16 %v659_v52, %v659_v52  ;;  %v644_v59 = vmax.f32 %v520_v53, 0.0  ;;  %v660_v60 = vmax.f32 %v584_v54, 0.0 }
 0x104   : > { %804 = vst.msk [vmem:[%s1244_s16] sm:$0xf] %vm803_vm1, %v995_v57  ;;  %820 = vst.msk [vmem:[%s1244_s16 + $0x40] sm:$0xf] %vm803_vm1, %v1011_v58  ;;  %v996_v61 = vpack.c.bf16 %v644_v59, %v644_v59  ;;  %v1012_v62 = vpack.c.bf16 %v660_v60, %v660_v60 }
 0x105   : > { %v524_v63 = vpop.f32.mrb[4].mxu0  ;;  %v588_v0 = vpop.f32.mrb[4].mxu1 }
 0x106   : > { %805 = vst.msk [vmem:[%s1244_s16 + $0x4] sm:$0xf] %vm803_vm1, %v996_v61  ;;  %821 = vst.msk [vmem:[%s1244_s16 + $0x44] sm:$0xf] %vm803_vm1, %v1012_v62  ;;  %v525_v1 = vadd.f32 %v1234_v42, %v524_v63  ;;  %v589_v2 = vadd.f32 %v1234_v42, %v588_v0  ;;  %v526_v3 = vpop.f32.mrb[5].mxu0  ;;  %v590_v4 = vpop.f32.mrb[5].mxu1 }
 0x107   : > { %v527_v5 = vpop.f32.mrb[6].mxu0  ;;  %v591_v6 = vpop.f32.mrb[6].mxu1 }
 0x108   : > { %v645_v7 = vmax.f32 %v525_v1, 0.0  ;;  %v661_v8 = vmax.f32 %v589_v2, 0.0  ;;  %v528_v9 = vadd.f32 %v1234_v42, %v527_v5  ;;  %v592_v10 = vadd.f32 %v1234_v42, %v591_v6  ;;  %v529_v11 = vpop.f32.mrb[7].mxu0  ;;  %v593_v12 = vpop.f32.mrb[7].mxu1 }
 0x10a   : > { %v997_v13 = vpack.c.bf16 %v645_v7, %v645_v7  ;;  %v1013_v14 = vpack.c.bf16 %v661_v8, %v661_v8  ;;  %v646_v15 = vmax.f32 %v528_v9, 0.0  ;;  %v662_v16 = vmax.f32 %v592_v10, 0.0 }
 0x10c   : > { %806 = vst.msk [vmem:[%s1244_s16 + $0x8] sm:$0xf] %vm803_vm1, %v997_v13  ;;  %822 = vst.msk [vmem:[%s1244_s16 + $0x48] sm:$0xf] %vm803_vm1, %v1013_v14  ;;  %v998_v17 = vpack.c.bf16 %v646_v15, %v646_v15  ;;  %v1014_v18 = vpack.c.bf16 %v662_v16, %v662_v16 }
 0x10d   : > { %v532_v19 = vpop.f32.mrb[8].mxu0  ;;  %v596_v20 = vpop.f32.mrb[8].mxu1 }
 0x10e   : > { %807 = vst.msk [vmem:[%s1244_s16 + $0xc] sm:$0xf] %vm803_vm1, %v998_v17  ;;  %823 = vst.msk [vmem:[%s1244_s16 + $0x4c] sm:$0xf] %vm803_vm1, %v1014_v18  ;;  %v533_v21 = vadd.f32 %v1234_v42, %v532_v19  ;;  %v597_v22 = vadd.f32 %v1234_v42, %v596_v20  ;;  %v534_v23 = vpop.f32.mrb[9].mxu0  ;;  %v598_v24 = vpop.f32.mrb[9].mxu1 }
 0x10f   : > { %v535_v25 = vpop.f32.mrb[10].mxu0  ;;  %v599_v26 = vpop.f32.mrb[10].mxu1 }
 0x110   : > { %v647_v27 = vmax.f32 %v533_v21, 0.0  ;;  %v663_v28 = vmax.f32 %v597_v22, 0.0  ;;  %v536_v29 = vadd.f32 %v1234_v42, %v535_v25  ;;  %v600_v30 = vadd.f32 %v1234_v42, %v599_v26  ;;  %v537_v31 = vpop.f32.mrb[11].mxu0  ;;  %v601_v32 = vpop.f32.mrb[11].mxu1 }
 0x112   : > { %v999_v33 = vpack.c.bf16 %v647_v27, %v647_v27  ;;  %v1015_v34 = vpack.c.bf16 %v663_v28, %v663_v28  ;;  %v648_v35 = vmax.f32 %v536_v29, 0.0  ;;  %v664_v36 = vmax.f32 %v600_v30, 0.0 }
 0x114   : > { %808 = vst.msk [vmem:[%s1244_s16 + $0x10] sm:$0xf] %vm803_vm1, %v999_v33  ;;  %824 = vst.msk [vmem:[%s1244_s16 + $0x50] sm:$0xf] %vm803_vm1, %v1015_v34  ;;  %v1000_v37 = vpack.c.bf16 %v648_v35, %v648_v35  ;;  %v1016_v38 = vpack.c.bf16 %v664_v36, %v664_v36 }
 0x115   : > { %v540_v39 = vpop.f32.mrb[12].mxu0  ;;  %v604_v40 = vpop.f32.mrb[12].mxu1 }
 0x116   : > { %809 = vst.msk [vmem:[%s1244_s16 + $0x14] sm:$0xf] %vm803_vm1, %v1000_v37  ;;  %825 = vst.msk [vmem:[%s1244_s16 + $0x54] sm:$0xf] %vm803_vm1, %v1016_v38  ;;  %v541_v41 = vadd.f32 %v1234_v42, %v540_v39  ;;  %v605_v43 = vadd.f32 %v1234_v42, %v604_v40  ;;  %v542_v44 = vpop.f32.mrb[13].mxu0  ;;  %v606_v45 = vpop.f32.mrb[13].mxu1 }
 0x117   : > { %v543_v46 = vpop.f32.mrb[14].mxu0  ;;  %v607_v47 = vpop.f32.mrb[14].mxu1 }
 0x118   : > { %v649_v48 = vmax.f32 %v541_v41, 0.0  ;;  %v665_v49 = vmax.f32 %v605_v43, 0.0  ;;  %v544_v50 = vadd.f32 %v1234_v42, %v543_v46  ;;  %v608_v51 = vadd.f32 %v1234_v42, %v607_v47  ;;  %v545_v52 = vpop.f32.mrb[15].mxu0  ;;  %v609_v53 = vpop.f32.mrb[15].mxu1 }
 0x11a   : > { %v1001_v54 = vpack.c.bf16 %v649_v48, %v649_v48  ;;  %v1017_v55 = vpack.c.bf16 %v665_v49, %v665_v49  ;;  %v650_v56 = vmax.f32 %v544_v50, 0.0  ;;  %v666_v57 = vmax.f32 %v608_v51, 0.0 }
 0x11c   : > { %810 = vst.msk [vmem:[%s1244_s16 + $0x18] sm:$0xf] %vm803_vm1, %v1001_v54  ;;  %826 = vst.msk [vmem:[%s1244_s16 + $0x58] sm:$0xf] %vm803_vm1, %v1017_v55  ;;  %v1002_v58 = vpack.c.bf16 %v650_v56, %v650_v56  ;;  %v1018_v59 = vpack.c.bf16 %v666_v57, %v666_v57 }
 0x11d   : > { %v548_v60 = vpop.f32.mrb[16].mxu0  ;;  %v612_v61 = vpop.f32.mrb[16].mxu1 }
 0x11e   : > { %811 = vst.msk [vmem:[%s1244_s16 + $0x1c] sm:$0xf] %vm803_vm1, %v1002_v58  ;;  %827 = vst.msk [vmem:[%s1244_s16 + $0x5c] sm:$0xf] %vm803_vm1, %v1018_v59  ;;  %v549_v62 = vadd.f32 %v1234_v42, %v548_v60  ;;  %v613_v63 = vadd.f32 %v1234_v42, %v612_v61  ;;  %v550_v0 = vpop.f32.mrb[17].mxu0  ;;  %v614_v1 = vpop.f32.mrb[17].mxu1 }
 0x11f   : > { %v551_v2 = vpop.f32.mrb[18].mxu0  ;;  %v615_v3 = vpop.f32.mrb[18].mxu1 }
 0x120   : > { %v651_v4 = vmax.f32 %v549_v62, 0.0  ;;  %v667_v5 = vmax.f32 %v613_v63, 0.0  ;;  %v552_v6 = vadd.f32 %v1234_v42, %v551_v2  ;;  %v616_v7 = vadd.f32 %v1234_v42, %v615_v3  ;;  %v553_v8 = vpop.f32.mrb[19].mxu0  ;;  %v617_v9 = vpop.f32.mrb[19].mxu1 }
 0x122   : > { %v1003_v10 = vpack.c.bf16 %v651_v4, %v651_v4  ;;  %v1019_v11 = vpack.c.bf16 %v667_v5, %v667_v5  ;;  %v652_v12 = vmax.f32 %v552_v6, 0.0  ;;  %v668_v13 = vmax.f32 %v616_v7, 0.0 }
 0x124   : > { %812 = vst.msk [vmem:[%s1244_s16 + $0x20] sm:$0xf] %vm803_vm1, %v1003_v10  ;;  %828 = vst.msk [vmem:[%s1244_s16 + $0x60] sm:$0xf] %vm803_vm1, %v1019_v11  ;;  %v1004_v14 = vpack.c.bf16 %v652_v12, %v652_v12  ;;  %v1020_v15 = vpack.c.bf16 %v668_v13, %v668_v13 }
 0x125   : > { %v556_v16 = vpop.f32.mrb[20].mxu0  ;;  %v620_v17 = vpop.f32.mrb[20].mxu1 }
 0x126   : > { %813 = vst.msk [vmem:[%s1244_s16 + $0x24] sm:$0xf] %vm803_vm1, %v1004_v14  ;;  %829 = vst.msk [vmem:[%s1244_s16 + $0x64] sm:$0xf] %vm803_vm1, %v1020_v15  ;;  %v557_v18 = vadd.f32 %v1234_v42, %v556_v16  ;;  %v621_v19 = vadd.f32 %v1234_v42, %v620_v17  ;;  %v558_v20 = vpop.f32.mrb[21].mxu0  ;;  %v622_v21 = vpop.f32.mrb[21].mxu1 }
 0x127   : > { %v559_v22 = vpop.f32.mrb[22].mxu0  ;;  %v623_v23 = vpop.f32.mrb[22].mxu1 }
 0x128   : > { %v653_v24 = vmax.f32 %v557_v18, 0.0  ;;  %v669_v25 = vmax.f32 %v621_v19, 0.0  ;;  %v560_v26 = vadd.f32 %v1234_v42, %v559_v22  ;;  %v624_v27 = vadd.f32 %v1234_v42, %v623_v23  ;;  %v561_v28 = vpop.f32.mrb[23].mxu0  ;;  %v625_v29 = vpop.f32.mrb[23].mxu1 }
 0x12a   : > { %v1005_v30 = vpack.c.bf16 %v653_v24, %v653_v24  ;;  %v1021_v31 = vpack.c.bf16 %v669_v25, %v669_v25  ;;  %v654_v32 = vmax.f32 %v560_v26, 0.0  ;;  %v670_v33 = vmax.f32 %v624_v27, 0.0 }
 0x12c   : > { %814 = vst.msk [vmem:[%s1244_s16 + $0x28] sm:$0xf] %vm803_vm1, %v1005_v30  ;;  %830 = vst.msk [vmem:[%s1244_s16 + $0x68] sm:$0xf] %vm803_vm1, %v1021_v31  ;;  %v1006_v34 = vpack.c.bf16 %v654_v32, %v654_v32  ;;  %v1022_v35 = vpack.c.bf16 %v670_v33, %v670_v33 }
 0x12d   : > { %v564_v36 = vpop.f32.mrb[24].mxu0  ;;  %v628_v37 = vpop.f32.mrb[24].mxu1 }
 0x12e   : > { %815 = vst.msk [vmem:[%s1244_s16 + $0x2c] sm:$0xf] %vm803_vm1, %v1006_v34  ;;  %831 = vst.msk [vmem:[%s1244_s16 + $0x6c] sm:$0xf] %vm803_vm1, %v1022_v35  ;;  %v565_v38 = vadd.f32 %v1234_v42, %v564_v36  ;;  %v629_v39 = vadd.f32 %v1234_v42, %v628_v37  ;;  %v566_v40 = vpop.f32.mrb[25].mxu0  ;;  %v630_v41 = vpop.f32.mrb[25].mxu1 }
 0x12f   : > { %v567_v43 = vpop.f32.mrb[26].mxu0  ;;  %v631_v44 = vpop.f32.mrb[26].mxu1 }
 0x130   : > { %v655_v45 = vmax.f32 %v565_v38, 0.0  ;;  %v671_v46 = vmax.f32 %v629_v39, 0.0  ;;  %v568_v47 = vadd.f32 %v1234_v42, %v567_v43  ;;  %v632_v48 = vadd.f32 %v1234_v42, %v631_v44  ;;  %v569_v49 = vpop.f32.mrb[27].mxu0  ;;  %v633_v50 = vpop.f32.mrb[27].mxu1 }
 0x132   : > { %v1007_v51 = vpack.c.bf16 %v655_v45, %v655_v45  ;;  %v1023_v52 = vpack.c.bf16 %v671_v46, %v671_v46  ;;  %v656_v53 = vmax.f32 %v568_v47, 0.0  ;;  %v672_v54 = vmax.f32 %v632_v48, 0.0 }
 0x134   : > { %816 = vst.msk [vmem:[%s1244_s16 + $0x30] sm:$0xf] %vm803_vm1, %v1007_v51  ;;  %832 = vst.msk [vmem:[%s1244_s16 + $0x70] sm:$0xf] %vm803_vm1, %v1023_v52  ;;  %v1008_v55 = vpack.c.bf16 %v656_v53, %v656_v53  ;;  %v1024_v56 = vpack.c.bf16 %v672_v54, %v672_v54 }
 0x135   : > { %v572_v57 = vpop.f32.mrb[28].mxu0  ;;  %v636_v58 = vpop.f32.mrb[28].mxu1 }
 0x136   : > { %817 = vst.msk [vmem:[%s1244_s16 + $0x34] sm:$0xf] %vm803_vm1, %v1008_v55  ;;  %833 = vst.msk [vmem:[%s1244_s16 + $0x74] sm:$0xf] %vm803_vm1, %v1024_v56  ;;  %v573_v59 = vadd.f32 %v1234_v42, %v572_v57  ;;  %v637_v60 = vadd.f32 %v1234_v42, %v636_v58  ;;  %v574_v61 = vpop.f32.mrb[29].mxu0  ;;  %v638_v62 = vpop.f32.mrb[29].mxu1 }
 0x137   : > { %v575_v63 = vpop.f32.mrb[30].mxu0  ;;  %v639_v0 = vpop.f32.mrb[30].mxu1 }
 0x138   : > { %v657_v1 = vmax.f32 %v573_v59, 0.0  ;;  %v673_v2 = vmax.f32 %v637_v60, 0.0  ;;  %v576_v3 = vadd.f32 %v1234_v42, %v575_v63  ;;  %v640_v4 = vadd.f32 %v1234_v42, %v639_v0  ;;  %v577_v5 = vpop.f32.mrb[31].mxu0  ;;  %v641_v6 = vpop.f32.mrb[31].mxu1 }
 0x13a   : > { %v1009_v7 = vpack.c.bf16 %v657_v1, %v657_v1  ;;  %v1025_v8 = vpack.c.bf16 %v673_v2, %v673_v2  ;;  %v658_v9 = vmax.f32 %v576_v3, 0.0  ;;  %v674_v10 = vmax.f32 %v640_v4, 0.0 }
 0x13c   : > { %818 = vst.msk [vmem:[%s1244_s16 + $0x38] sm:$0xf] %vm803_vm1, %v1009_v7  ;;  %834 = vst.msk [vmem:[%s1244_s16 + $0x78] sm:$0xf] %vm803_vm1, %v1025_v8  ;;  %v1010_v11 = vpack.c.bf16 %v658_v9, %v658_v9  ;;  %v1026_v12 = vpack.c.bf16 %v674_v10, %v674_v10 }
 0x13e   : > { %819 = vst.msk [vmem:[%s1244_s16 + $0x3c] sm:$0xf] %vm803_vm1, %v1010_v11  ;;  %835 = vst.msk [vmem:[%s1244_s16 + $0x7c] sm:$0xf] %vm803_vm1, %v1026_v12 }
 0x13f PF: > { %s13_s12 = sadd.s32 1, %s1117_s12  }
 0x140   : > { %p10_p4 = scmp.ge.s32.totalorder %s13_s12, 4  }
 0x142   :  { %12 = sbr.rel (!%p10_p4) target bundleno = 1 (0x1), region = 62 }

// kernel: model_cnn_forward.30
= control target key start
LH: loop header
LB: loop body
LE: loop exit
PB: predicated region body
PF: predicated region fallthrough
CT: control target
= control target key end

     0   :  { %8 = vsyncpa [#allocation3], 0  ;;  %s1070_s12 = smov 0   ;;  %s1276_s0 = inlined_call_operand.vmem [shape: bf16[512,27], index: 0, kind: input, shape index: {}]   ;;  %s1277_s1 = inlined_call_operand.vmem [shape: bf16[27,16], index: 1, kind: input, shape index: {}]   ;;  %s1278_s2 = inlined_call_operand.hbm [shape: f32[1,16], index: 2, kind: input, shape index: {}]   ;;  %s1279_s3 = inlined_call_operand.vmem [shape: bf16[512,16], index: 3, kind: output, shape index: {}]  }
   0x1 LB: > { %s800_s13 = sadd.s32 4294967295, %s1046_s12   ;;  %p802_p0 = scmp.ge.s32.totalorder %s1046_s12, 1  ;;  %s1046_s12 = sphi %s1070_s12, %s14_s12  }
   0x2   : > { %p113_p1 = scmp.lt.s32.totalorder %s1046_s12, 3  ;;  %p1084_p3 = scmp.eq.s32.totalorder %s800_s13, 0 }
   0x3   : > { %s1048_s16 = smov [#allocation2]   ;;  %s1008_s21 = scalar_lea.hbm %s1278_s2, 16 }
   0x4   : > { %p1078_p2 = pnand %p802_p0, %p113_p1  ;;  %s129_s17 = sshll.u32 %s1048_s16, 4  ;;  %s130_s17 = int_to_ptr.vmem [resolvable:$true] %s129_s17 }
   0x5   : > { %s1284_s15 = scalar_select %p1084_p3, 1, 0 }
   0x6   : > { %s1283_s14 = scalar_select %p1078_p2, 1, 0 }
   0x7   : > { %p974_p4 = pneg %p1078_p2  ;;  %p1009_p6 = scmp.ne.s32.totalorder %s1278_s2, %s1008_s21 }
   0x8   : > { %p1015_p10 = scmp.lt.u32.totalorder %s1008_s21, %s1278_s2 }
   0x9   : > { %p1092_p5 = pnand %p1084_p3, %p974_p4 }
   0xb   : > { %p1010_p7 = pneg %p1092_p5 }
   0xd   : > { %p1011_p8 = pnand %p1010_p7, %p1009_p6 }
   0xf   : > { %p1012_p9 = pneg %p1011_p8 }
  0x11   : > { %p1017_p11 = pnand %p1015_p10, %p1012_p9 }
  0x13   : > { %1020 = shalt.err (!%p1017_p11)
}
  0x14   : > { %s1021_s26 = scalar_lea.vmem %s130_s17, 16  ;;  %s1028_s27 = scalar_lea.vmem %s130_s17, 32 }
  0x15   : > { %p1022_p12 = scmp.ne.s32.totalorder %s130_s17, %s1021_s26  ;;  %p1029_p1 = scmp.lt.s32.totalorder %s130_s17, %s130_s17 }
  0x16   : > { %p1030_p4 = scmp.lt.s32.totalorder %s1028_s27, %s1021_s26 }
  0x17   : > { %p1024_p13 = pnand %p1022_p12, %p1010_p7 }
  0x18   : > { %p1031_p3 = por %p1030_p4, %p1029_p1 }
  0x19   : > { %p1025_p0 = pneg %p1024_p13 }
  0x1b   : > { %p1032_p2 = pnand %p1031_p3, %p1025_p0 }
  0x1d   : > { %1035 = shalt.err (!%p1032_p2)
}
  0x1e   : > { %977 = dma.hbm_to_vmem [thread:$0]  (!%p1092_p5), %s1278_s2, 16, %s130_s17, [#allocation3]  }
  0x1f   : > { %p1286_p6 = scmp.ne.s32.totalorder %s1283_s14, 0 }
  0x20   : > { %p1287_p8 = scmp.ne.s32.totalorder (!%p1286_p6), %s1284_s15, 0 }
  0x21   : > { %151 = sbr.rel (%p1286_p6) target bundleno = 298 (0x12a), region = 32 }
  0x28   : > { %1041 = dma.done.wait (%p1287_p8), [#allocation3], 16  }
  0x29   : > { %1043 = vsyncadd (%p1287_p8), [#allocation3], 4294967280  ;;  %s807_s30 = sshll.u32 %s800_s13, 5  ;;  %vm371_vm0 = vcmask 1044480   ;;  %vm372_vm1 = vcmask 1045504   ;;  %v1049_v0 = vmov 65535  }
  0x2a   : > { %p176_p2 = scmp.lt.s32.totalorder %s807_s30, 63  ;;  %v373_v1 = vsel %vm371_vm0, 4294967295, %v1049_v0  ;;  %vm322_vm2 = vcmask 220160   ;;  %v990_v2 = vld [vmem:[%s1277_s1] sm:$0xff]   ;;  %v991_v4 = vld [vmem:[%s1277_s1 + $0x8] sm:$0x3f]  }
  0x2b   : > { %v374_v3 = vsel %vm372_vm1, %v373_v1, 0  ;;  %930 = vmatprep.subr.bf16.mxu0 %v990_v2  ;;  %966 = vmatprep.subr.bf16.mxu1 %v990_v2  ;;  %v1168_v22 = vld [vmem:[#allocation2] ss:$0 sm:$0xff]  ;;  %vm699_vm3 = vcmask 125952  }
  0x2c   : > { %s1289_s30 = smov (!%p176_p2, %s807_s30), 63  ;;  %931 = vmatpush3.bf16.msra.mxu0 %v990_v2  ;;  %968 = vmatpush3.bf16.msra.mxu1 %v990_v2  ;;  %v376_v6 = vand.u32 %v991_v4, %v374_v3 }
  0x2d   : > { %s808_s4 = sshll.u32 %s1289_s30, 2 }
  0x2e   : > { %s1128_s7 = scalar_lea.vmem %s1276_s0, %s808_s4  ;;  %932 = vmatprep.subr.bf16.mxu0 %v376_v6  ;;  %967 = vmatprep.subr.bf16.mxu1 %v376_v6  ;;  %s1181_s15 = scalar_lea.vmem %s1279_s3, %s808_s4 }
  0x2f   : > { %v992_v5 = vld [vmem:[%s1128_s7] sm:$0xff]   ;;  %v994_v8 = vld [vmem:[%s1128_s7 + $0x8] sm:$0xff]   ;;  %v996_v10 = vld [vmem:[%s1128_s7 + $0x10] sm:$0xff]  }
  0x30   : > { %v993_v7 = vld [vmem:[%s1128_s7 + $0x40] sm:$0xff]   ;;  %934 = vmatprep.mubr.msk.bf16.mxu0 %vm322_vm2, %v992_v5  ;;  %v995_v9 = vld [vmem:[%s1128_s7 + $0x48] sm:$0xff]   ;;  %933 = vmatpush3.bf16.msra.mxu0 %v376_v6  ;;  %v997_v11 = vld [vmem:[%s1128_s7 + $0x50] sm:$0xff]  }
  0x31   : > { %950 = vmatprep.mubr.msk.bf16.mxu1 %vm322_vm2, %v993_v7  ;;  %969 = vmatpush3.bf16.msra.mxu1 %v376_v6  ;;  %v998_v12 = vld [vmem:[%s1128_s7 + $0x18] sm:$0xff]   ;;  %v1000_v14 = vld [vmem:[%s1128_s7 + $0x20] sm:$0xff]   ;;  %v1002_v16 = vld [vmem:[%s1128_s7 + $0x28] sm:$0xff]  }
  0x32   : > { %v999_v13 = vld [vmem:[%s1128_s7 + $0x58] sm:$0xff]   ;;  %v1001_v15 = vld [vmem:[%s1128_s7 + $0x60] sm:$0xff]   ;;  %v1003_v17 = vld [vmem:[%s1128_s7 + $0x68] sm:$0xff]  }
  0x33   : > { %935 = vmatmul.mubr.msk.bf16.vlgmr.msra.gmra.mrb[0].mxu0 %vm322_vm2, %v994_v8  ;;  %v1004_v18 = vld [vmem:[%s1128_s7 + $0x30] sm:$0xff]   ;;  %v1006_v20 = vld [vmem:[%s1128_s7 + $0x38] sm:$0xff]  }
  0x34   : > { %951 = vmatmul.mubr.msk.bf16.vlgmr.msra.gmra.mrb[0].mxu1 %vm322_vm2, %v995_v9  ;;  %938 = vmatprep.mubr.msk.bf16.mxu0 %vm322_vm2, %v996_v10  ;;  %v1005_v19 = vld [vmem:[%s1128_s7 + $0x70] sm:$0xff]   ;;  %v1007_v21 = vld [vmem:[%s1128_s7 + $0x78] sm:$0xff]  }
  0x35   : > { %954 = vmatprep.mubr.msk.bf16.mxu1 %vm322_vm2, %v997_v11 }
  0x3b   : > { %939 = vmatmul.mubr.msk.bf16.gmra.mrb[4].mxu0 %vm322_vm2, %v998_v12 }
  0x3c   : > { %955 = vmatmul.mubr.msk.bf16.gmra.mrb[4].mxu1 %vm322_vm2, %v999_v13  ;;  %942 = vmatprep.mubr.msk.bf16.mxu0 %vm322_vm2, %v1000_v14 }
  0x3d   : > { %958 = vmatprep.mubr.msk.bf16.mxu1 %vm322_vm2, %v1001_v15 }
  0x43   : > { %943 = vmatmul.mubr.msk.bf16.gmra.mrb[8].mxu0 %vm322_vm2, %v1002_v16 }
  0x44   : > { %959 = vmatmul.mubr.msk.bf16.gmra.mrb[8].mxu1 %vm322_vm2, %v1003_v17  ;;  %946 = vmatprep.mubr.msk.bf16.mxu0 %vm322_vm2, %v1004_v18 }
  0x45   : > { %962 = vmatprep.mubr.msk.bf16.mxu1 %vm322_vm2, %v1005_v19 }
  0x4b   : > { %947 = vmatmul.mubr.msk.bf16.gmra.mrb[12].mxu0 %vm322_vm2, %v1006_v20 }
  0x4c   : > { %963 = vmatmul.mubr.msk.bf16.gmra.mrb[12].mxu1 %vm322_vm2, %v1007_v21 }
 0x106   : > { %v936_v23 = vpop.f32.mrb[0].mxu0 }
 0x107   : > { %v952_v24 = vpop.f32.mrb[0].mxu1  ;;  %v421_v25 = vadd.f32 %v936_v23, %v1168_v22  ;;  %v412_v27 = vpop.f32.mrb[1].mxu0 }
 0x108   : > { %v485_v26 = vadd.f32 %v952_v24, %v1168_v22  ;;  %v476_v28 = vpop.f32.mrb[1].mxu1  ;;  %v413_v29 = vadd.f32 %v1168_v22, %v412_v27  ;;  %v937_v31 = vpop.f32.mrb[2].mxu0 }
 0x109   : > { %v477_v30 = vadd.f32 %v1168_v22, %v476_v28  ;;  %v953_v32 = vpop.f32.mrb[2].mxu1  ;;  %v541_v33 = vmax.f32 %v421_v25, 0.0  ;;  %v424_v35 = vadd.f32 %v937_v31, %v1168_v22  ;;  %v415_v37 = vpop.f32.mrb[3].mxu0 }
 0x10a   : > { %v557_v34 = vmax.f32 %v485_v26, 0.0  ;;  %v488_v36 = vadd.f32 %v953_v32, %v1168_v22  ;;  %v479_v38 = vpop.f32.mrb[3].mxu1  ;;  %v539_v39 = vmax.f32 %v413_v29, 0.0  ;;  %v416_v41 = vadd.f32 %v1168_v22, %v415_v37 }
 0x10b   : > { %v555_v40 = vmax.f32 %v477_v30, 0.0  ;;  %v480_v42 = vadd.f32 %v1168_v22, %v479_v38  ;;  %v882_v43 = vpack.c.bf16 %v541_v33, %v541_v33  ;;  %v542_v45 = vmax.f32 %v424_v35, 0.0 }
 0x10c   : > { %v898_v44 = vpack.c.bf16 %v557_v34, %v557_v34  ;;  %v558_v46 = vmax.f32 %v488_v36, 0.0  ;;  %v880_v47 = vpack.c.bf16 %v539_v39, %v539_v39  ;;  %v540_v49 = vmax.f32 %v416_v41, 0.0 }
 0x10d   : > { %v896_v48 = vpack.c.bf16 %v555_v40, %v555_v40  ;;  %v556_v50 = vmax.f32 %v480_v42, 0.0  ;;  %702 = vst.msk [vmem:[%s1181_s15 + $0x8] sm:$0xf] %vm699_vm3, %v882_v43  ;;  %v883_v51 = vpack.c.bf16 %v542_v45, %v542_v45 }
 0x10e   : > { %718 = vst.msk [vmem:[%s1181_s15 + $0x48] sm:$0xf] %vm699_vm3, %v898_v44  ;;  %v899_v52 = vpack.c.bf16 %v558_v46, %v558_v46  ;;  %700 = vst.msk [vmem:[%s1181_s15] sm:$0xf] %vm699_vm3, %v880_v47  ;;  %v881_v53 = vpack.c.bf16 %v540_v49, %v540_v49  ;;  %v940_v55 = vpop.f32.mrb[4].mxu0 }
 0x10f   : > { %716 = vst.msk [vmem:[%s1181_s15 + $0x40] sm:$0xf] %vm699_vm3, %v896_v48  ;;  %v897_v54 = vpack.c.bf16 %v556_v50, %v556_v50  ;;  %v956_v56 = vpop.f32.mrb[4].mxu1  ;;  %703 = vst.msk [vmem:[%s1181_s15 + $0xc] sm:$0xf] %vm699_vm3, %v883_v51  ;;  %v437_v57 = vadd.f32 %v940_v55, %v1168_v22  ;;  %v428_v59 = vpop.f32.mrb[5].mxu0 }
 0x110   : > { %719 = vst.msk [vmem:[%s1181_s15 + $0x4c] sm:$0xf] %vm699_vm3, %v899_v52  ;;  %v501_v58 = vadd.f32 %v956_v56, %v1168_v22  ;;  %v492_v60 = vpop.f32.mrb[5].mxu1  ;;  %701 = vst.msk [vmem:[%s1181_s15 + $0x4] sm:$0xf] %vm699_vm3, %v881_v53  ;;  %v429_v61 = vadd.f32 %v1168_v22, %v428_v59  ;;  %v941_v63 = vpop.f32.mrb[6].mxu0 }
 0x111   : > { %717 = vst.msk [vmem:[%s1181_s15 + $0x44] sm:$0xf] %vm699_vm3, %v897_v54  ;;  %v493_v62 = vadd.f32 %v1168_v22, %v492_v60  ;;  %v957_v0 = vpop.f32.mrb[6].mxu1  ;;  %v545_v1 = vmax.f32 %v437_v57, 0.0  ;;  %v440_v3 = vadd.f32 %v941_v63, %v1168_v22  ;;  %v431_v5 = vpop.f32.mrb[7].mxu0 }
 0x112   : > { %v561_v2 = vmax.f32 %v501_v58, 0.0  ;;  %v504_v4 = vadd.f32 %v957_v0, %v1168_v22  ;;  %v495_v6 = vpop.f32.mrb[7].mxu1  ;;  %v543_v7 = vmax.f32 %v429_v61, 0.0  ;;  %v432_v9 = vadd.f32 %v1168_v22, %v431_v5 }
 0x113   : > { %v559_v8 = vmax.f32 %v493_v62, 0.0  ;;  %v496_v10 = vadd.f32 %v1168_v22, %v495_v6  ;;  %v886_v11 = vpack.c.bf16 %v545_v1, %v545_v1  ;;  %v546_v13 = vmax.f32 %v440_v3, 0.0 }
 0x114   : > { %v902_v12 = vpack.c.bf16 %v561_v2, %v561_v2  ;;  %v562_v14 = vmax.f32 %v504_v4, 0.0  ;;  %v884_v15 = vpack.c.bf16 %v543_v7, %v543_v7  ;;  %v544_v17 = vmax.f32 %v432_v9, 0.0 }
 0x115   : > { %v900_v16 = vpack.c.bf16 %v559_v8, %v559_v8  ;;  %v560_v18 = vmax.f32 %v496_v10, 0.0  ;;  %706 = vst.msk [vmem:[%s1181_s15 + $0x18] sm:$0xf] %vm699_vm3, %v886_v11  ;;  %v887_v19 = vpack.c.bf16 %v546_v13, %v546_v13 }
 0x116   : > { %722 = vst.msk [vmem:[%s1181_s15 + $0x58] sm:$0xf] %vm699_vm3, %v902_v12  ;;  %v903_v20 = vpack.c.bf16 %v562_v14, %v562_v14  ;;  %704 = vst.msk [vmem:[%s1181_s15 + $0x10] sm:$0xf] %vm699_vm3, %v884_v15  ;;  %v885_v21 = vpack.c.bf16 %v544_v17, %v544_v17  ;;  %v944_v24 = vpop.f32.mrb[8].mxu0 }
 0x117   : > { %720 = vst.msk [vmem:[%s1181_s15 + $0x50] sm:$0xf] %vm699_vm3, %v900_v16  ;;  %v901_v23 = vpack.c.bf16 %v560_v18, %v560_v18  ;;  %v960_v25 = vpop.f32.mrb[8].mxu1  ;;  %707 = vst.msk [vmem:[%s1181_s15 + $0x1c] sm:$0xf] %vm699_vm3, %v887_v19  ;;  %v453_v26 = vadd.f32 %v944_v24, %v1168_v22  ;;  %v444_v28 = vpop.f32.mrb[9].mxu0 }
 0x118   : > { %723 = vst.msk [vmem:[%s1181_s15 + $0x5c] sm:$0xf] %vm699_vm3, %v903_v20  ;;  %v517_v27 = vadd.f32 %v960_v25, %v1168_v22  ;;  %v508_v29 = vpop.f32.mrb[9].mxu1  ;;  %705 = vst.msk [vmem:[%s1181_s15 + $0x14] sm:$0xf] %vm699_vm3, %v885_v21  ;;  %v445_v30 = vadd.f32 %v1168_v22, %v444_v28  ;;  %v945_v32 = vpop.f32.mrb[10].mxu0 }
 0x119   : > { %721 = vst.msk [vmem:[%s1181_s15 + $0x54] sm:$0xf] %vm699_vm3, %v901_v23  ;;  %v509_v31 = vadd.f32 %v1168_v22, %v508_v29  ;;  %v961_v33 = vpop.f32.mrb[10].mxu1  ;;  %v549_v34 = vmax.f32 %v453_v26, 0.0  ;;  %v456_v36 = vadd.f32 %v945_v32, %v1168_v22  ;;  %v447_v38 = vpop.f32.mrb[11].mxu0 }
 0x11a   : > { %v565_v35 = vmax.f32 %v517_v27, 0.0  ;;  %v520_v37 = vadd.f32 %v961_v33, %v1168_v22  ;;  %v511_v39 = vpop.f32.mrb[11].mxu1  ;;  %v547_v40 = vmax.f32 %v445_v30, 0.0  ;;  %v448_v42 = vadd.f32 %v1168_v22, %v447_v38 }
 0x11b   : > { %v563_v41 = vmax.f32 %v509_v31, 0.0  ;;  %v512_v43 = vadd.f32 %v1168_v22, %v511_v39  ;;  %v890_v44 = vpack.c.bf16 %v549_v34, %v549_v34  ;;  %v550_v46 = vmax.f32 %v456_v36, 0.0 }
 0x11c   : > { %v906_v45 = vpack.c.bf16 %v565_v35, %v565_v35  ;;  %v566_v47 = vmax.f32 %v520_v37, 0.0  ;;  %v888_v48 = vpack.c.bf16 %v547_v40, %v547_v40  ;;  %v548_v50 = vmax.f32 %v448_v42, 0.0 }
 0x11d   : > { %v904_v49 = vpack.c.bf16 %v563_v41, %v563_v41  ;;  %v564_v51 = vmax.f32 %v512_v43, 0.0  ;;  %710 = vst.msk [vmem:[%s1181_s15 + $0x28] sm:$0xf] %vm699_vm3, %v890_v44  ;;  %v891_v52 = vpack.c.bf16 %v550_v46, %v550_v46 }
 0x11e   : > { %726 = vst.msk [vmem:[%s1181_s15 + $0x68] sm:$0xf] %vm699_vm3, %v906_v45  ;;  %v907_v53 = vpack.c.bf16 %v566_v47, %v566_v47  ;;  %708 = vst.msk [vmem:[%s1181_s15 + $0x20] sm:$0xf] %vm699_vm3, %v888_v48  ;;  %v889_v54 = vpack.c.bf16 %v548_v50, %v548_v50  ;;  %v948_v56 = vpop.f32.mrb[12].mxu0 }
 0x11f   : > { %724 = vst.msk [vmem:[%s1181_s15 + $0x60] sm:$0xf] %vm699_vm3, %v904_v49  ;;  %v905_v55 = vpack.c.bf16 %v564_v51, %v564_v51  ;;  %v964_v57 = vpop.f32.mrb[12].mxu1  ;;  %711 = vst.msk [vmem:[%s1181_s15 + $0x2c] sm:$0xf] %vm699_vm3, %v891_v52  ;;  %v469_v58 = vadd.f32 %v948_v56, %v1168_v22  ;;  %v460_v60 = vpop.f32.mrb[13].mxu0 }
 0x120   : > { %727 = vst.msk [vmem:[%s1181_s15 + $0x6c] sm:$0xf] %vm699_vm3, %v907_v53  ;;  %v533_v59 = vadd.f32 %v964_v57, %v1168_v22  ;;  %v524_v61 = vpop.f32.mrb[13].mxu1  ;;  %709 = vst.msk [vmem:[%s1181_s15 + $0x24] sm:$0xf] %vm699_vm3, %v889_v54  ;;  %v461_v62 = vadd.f32 %v1168_v22, %v460_v60  ;;  %v949_v0 = vpop.f32.mrb[14].mxu0 }
 0x121   : > { %725 = vst.msk [vmem:[%s1181_s15 + $0x64] sm:$0xf] %vm699_vm3, %v905_v55  ;;  %v525_v63 = vadd.f32 %v1168_v22, %v524_v61  ;;  %v965_v1 = vpop.f32.mrb[14].mxu1  ;;  %v553_v2 = vmax.f32 %v469_v58, 0.0  ;;  %v472_v4 = vadd.f32 %v949_v0, %v1168_v22  ;;  %v463_v6 = vpop.f32.mrb[15].mxu0 }
 0x122   : > { %v569_v3 = vmax.f32 %v533_v59, 0.0  ;;  %v536_v5 = vadd.f32 %v965_v1, %v1168_v22  ;;  %v527_v7 = vpop.f32.mrb[15].mxu1  ;;  %v551_v8 = vmax.f32 %v461_v62, 0.0  ;;  %v464_v10 = vadd.f32 %v1168_v22, %v463_v6 }
 0x123   : > { %v567_v9 = vmax.f32 %v525_v63, 0.0  ;;  %v528_v11 = vadd.f32 %v1168_v22, %v527_v7  ;;  %v894_v12 = vpack.c.bf16 %v553_v2, %v553_v2  ;;  %v554_v14 = vmax.f32 %v472_v4, 0.0 }
 0x124   : > { %v910_v13 = vpack.c.bf16 %v569_v3, %v569_v3  ;;  %v570_v15 = vmax.f32 %v536_v5, 0.0  ;;  %v892_v16 = vpack.c.bf16 %v551_v8, %v551_v8  ;;  %v552_v18 = vmax.f32 %v464_v10, 0.0 }
 0x125   : > { %v908_v17 = vpack.c.bf16 %v567_v9, %v567_v9  ;;  %v568_v19 = vmax.f32 %v528_v11, 0.0  ;;  %714 = vst.msk [vmem:[%s1181_s15 + $0x38] sm:$0xf] %vm699_vm3, %v894_v12  ;;  %v895_v20 = vpack.c.bf16 %v554_v14, %v554_v14 }
 0x126   : > { %730 = vst.msk [vmem:[%s1181_s15 + $0x78] sm:$0xf] %vm699_vm3, %v910_v13  ;;  %v911_v21 = vpack.c.bf16 %v570_v15, %v570_v15  ;;  %712 = vst.msk [vmem:[%s1181_s15 + $0x30] sm:$0xf] %vm699_vm3, %v892_v16  ;;  %v893_v22 = vpack.c.bf16 %v552_v18, %v552_v18 }
 0x127   : > { %728 = vst.msk [vmem:[%s1181_s15 + $0x70] sm:$0xf] %vm699_vm3, %v908_v17  ;;  %v909_v23 = vpack.c.bf16 %v568_v19, %v568_v19  ;;  %715 = vst.msk [vmem:[%s1181_s15 + $0x3c] sm:$0xf] %vm699_vm3, %v895_v20 }
 0x128   : > { %731 = vst.msk [vmem:[%s1181_s15 + $0x7c] sm:$0xf] %vm699_vm3, %v911_v21  ;;  %713 = vst.msk [vmem:[%s1181_s15 + $0x34] sm:$0xf] %vm699_vm3, %v893_v22 }
 0x129   : > { %729 = vst.msk [vmem:[%s1181_s15 + $0x74] sm:$0xf] %vm699_vm3, %v909_v23 }
 0x12a PF: > { %s14_s12 = sadd.s32 1, %s1046_s12  }
 0x12b   : > { %p11_p3 = scmp.ge.s32.totalorder %s14_s12, 4  }
 0x12d   :  { %13 = sbr.rel (!%p11_p3) target bundleno = 1 (0x1), region = 67 }
 0x134   :  { %754 = vsyncpa [#allocation3], 1 }
 0x135   :  { %756 = vsyncpa [#allocation3 + $0x1], 1 }

// kernel: model_cnn_forward.32
= control target key start
LH: loop header
LB: loop body
LE: loop exit
PB: predicated region body
PF: predicated region fallthrough
CT: control target
= control target key end

     0   :  { %s1712_s12 = smov 0   ;;  %s1986_s0 = inlined_call_operand.vmem [shape: bf16[512,288], index: 0, kind: input, shape index: {}]   ;;  %s1987_s1 = inlined_call_operand.vmem [shape: bf16[288,32], index: 1, kind: input, shape index: {}]   ;;  %s1988_s2 = inlined_call_operand.vmem [shape: f32[1,32], index: 2, kind: input, shape index: {}]   ;;  %s1989_s3 = inlined_call_operand.vmem [shape: bf16[512,32], index: 3, kind: output, shape index: {}]  }
   0x1 LB: > { %s1253_s13 = sadd.s32 4294967295, %s1690_s12   ;;  %p1257_p0 = scmp.ge.s32.totalorder %s1690_s12, 1  ;;  %s1690_s12 = sphi %s1712_s12, %s13_s12  }
   0x2   : > { %p139_p1 = scmp.lt.s32.totalorder %s1690_s12, 3 }
   0x4   : > { %p140_p2 = pnand %p1257_p0, %p139_p1 }
   0x5   : > { %v1602_v0 = vld [vmem:[%s1987_s1 + $0x40] sm:$0xff] (!%p140_p2)   ;;  %s1258_s16 = sshll.u32 (!%p140_p2), %s1253_s13, 5  ;;  %v1604_v2 = vld [vmem:[%s1987_s1 + $0x48] sm:$0xff] (!%p140_p2)   ;;  %v1606_v4 = vld [vmem:[%s1987_s1 + $0x50] sm:$0xff] (!%p140_p2)   ;;  %vm633_vm0 = vcmask (!%p140_p2), 261120   ;;  %vm1164_vm1 = vcmask (!%p140_p2), 257024  }
   0x6   : > { %143 = sbr.rel (%p140_p2) target bundleno = 352 (0x160), region = 32  ;;  %v1603_v1 = vld [vmem:[%s1987_s1] sm:$0xff] (!%p140_p2)   ;;  %1411 = vmatprep.subr.bf16.mxu0 (!%p140_p2), %v1602_v0  ;;  %1577 = vmatprep.subr.bf16.mxu1 (!%p140_p2), %v1602_v0  ;;  %p165_p3 = scmp.lt.s32.totalorder (!%p140_p2), %s1258_s16, 63  ;;  %v1605_v3 = vld [vmem:[%s1987_s1 + $0x8] sm:$0xff] (!%p140_p2)   ;;  %v1607_v5 = vld [vmem:[%s1987_s1 + $0x10] sm:$0xff] (!%p140_p2)  }
   0x7   : > { %1412 = vmatpush3.bf16.msra.mxu0 (!%p140_p2), %v1603_v1  ;;  %1585 = vmatpush3.bf16.msra.mxu1 (!%p140_p2), %v1603_v1  ;;  %v1608_v6 = vld [vmem:[%s1987_s1 + $0x58] sm:$0xff] (!%p140_p2)   ;;  %v1610_v8 = vld [vmem:[%s1987_s1 + $0x60] sm:$0xff] (!%p140_p2)   ;;  %v1612_v10 = vld [vmem:[%s1987_s1 + $0x68] sm:$0xff] (!%p140_p2)  }
   0x8   : > { %1413 = vmatprep.subr.bf16.mxu0 (!%p140_p2), %v1604_v2  ;;  %1578 = vmatprep.subr.bf16.mxu1 (!%p140_p2), %v1604_v2  ;;  %v1609_v7 = vld [vmem:[%s1987_s1 + $0x18] sm:$0xff] (!%p140_p2)   ;;  %v1611_v9 = vld [vmem:[%s1987_s1 + $0x20] sm:$0xff] (!%p140_p2)   ;;  %v1613_v13 = vld [vmem:[%s1987_s1 + $0x28] sm:$0xff] (!%p140_p2)  }
   0x9   : > { %v1614_v14 = vld [vmem:[%s1987_s1 + $0x70] sm:$0xff] (!%p140_p2)   ;;  %v1616_v16 = vld [vmem:[%s1987_s1 + $0x78] sm:$0xff] (!%p140_p2)   ;;  %v1624_v18 = vld [vmem:[%s1987_s1 + $0x80] sm:$0xff] (!%p140_p2)  }
   0xa   : > { %v1615_v15 = vld [vmem:[%s1987_s1 + $0x30] sm:$0xff] (!%p140_p2)   ;;  %v1617_v17 = vld [vmem:[%s1987_s1 + $0x38] sm:$0xff] (!%p140_p2)   ;;  %v1637_v23 = vld [vmem:[%s1987_s1 + $0x88] sm:$0xff] (!%p140_p2)  }
   0xb   : > { %1414 = vmatpush3.bf16.msra.mxu0 (!%p140_p2), %v1605_v3  ;;  %1586 = vmatpush3.bf16.msra.mxu1 (!%p140_p2), %v1605_v3 }
   0xc   : > { %1415 = vmatprep.subr.bf16.mxu0 (!%p140_p2), %v1606_v4  ;;  %1579 = vmatprep.subr.bf16.mxu1 (!%p140_p2), %v1606_v4 }
   0xd   : > { %s1991_s16 = smov (!%p165_p3, %s1258_s16), 63 }
   0xe   : > { %s1593_s29 = smul.u32 12, %s1991_s16  ;;  %s1261_s5 = sshll.u32 %s1991_s16, 2 }
   0xf   : > { %1416 = vmatpush3.bf16.msra.mxu0 %v1607_v5  ;;  %1587 = vmatpush3.bf16.msra.mxu1 %v1607_v5  ;;  %s1875_s8 = scalar_lea.vmem %s1989_s3, %s1261_s5 }
  0x10   : > { %1417 = vmatprep.subr.bf16.mxu0 %v1608_v6  ;;  %1580 = vmatprep.subr.bf16.mxu1 %v1608_v6  ;;  %s1753_s9 = scalar_lea.vmem %s1986_s0, %s1593_s29 }
  0x11   : > { %v1620_v11 = vld [vmem:[%s1753_s9 + $0x4] ss:$12 sps:$4 sm:$0xff]   ;;  %v1618_v19 = vld [vmem:[%s1753_s9] ss:$12 sps:$4 sm:$0xff]   ;;  %v1625_v21 = vld [vmem:[%s1753_s9 + $0x1c] ss:$12 sps:$4 sm:$0xff]  }
  0x12   : > { %v1623_v12 = vld [vmem:[%s1753_s9 + $0x124] ss:$12 sps:$4 sm:$0xff]   ;;  %714 = vmatprep.mubr.bf16.mxu0 %v1620_v11  ;;  %v1621_v20 = vld [vmem:[%s1753_s9 + $0x120] ss:$12 sps:$4 sm:$0xff]   ;;  %v1627_v22 = vld [vmem:[%s1753_s9 + $0x13c] ss:$12 sps:$4 sm:$0xff]  }
  0x13   : > { %1418 = vmatpush3.bf16.msra.mxu0 %v1609_v7  ;;  %1588 = vmatpush3.bf16.msra.mxu1 %v1609_v7  ;;  %v1629_v24 = vld [vmem:[%s1753_s9 + $0x18] ss:$12 sps:$4 sm:$0xff]   ;;  %v1631_v26 = vld [vmem:[%s1753_s9 + $0x34] ss:$12 sps:$4 sm:$0xff]   ;;  %v1635_v28 = vld [vmem:[%s1753_s9 + $0x30] ss:$12 sps:$4 sm:$0xff]  }
  0x14   : > { %1419 = vmatprep.subr.bf16.mxu0 %v1610_v8  ;;  %1581 = vmatprep.subr.bf16.mxu1 %v1610_v8  ;;  %v1630_v25 = vld [vmem:[%s1753_s9 + $0x138] ss:$12 sps:$4 sm:$0xff]   ;;  %v1633_v27 = vld [vmem:[%s1753_s9 + $0x154] ss:$12 sps:$4 sm:$0xff]   ;;  %v1636_v29 = vld [vmem:[%s1753_s9 + $0x150] ss:$12 sps:$4 sm:$0xff]  }
  0x15   : > { %810 = vmatprep.mubr.bf16.mxu1 %v1623_v12  ;;  %v1638_v30 = vld [vmem:[%s1753_s9 + $0x4c] ss:$12 sps:$4 sm:$0xff]   ;;  %v1642_v32 = vld [vmem:[%s1753_s9 + $0x48] ss:$12 sps:$4 sm:$0xff]   ;;  %v1644_v34 = vld [vmem:[%s1753_s9 + $0x64] ss:$12 sps:$4 sm:$0xff]  }
  0x16   : > { %v1640_v31 = vld [vmem:[%s1753_s9 + $0x16c] ss:$12 sps:$4 sm:$0xff]   ;;  %v1643_v33 = vld [vmem:[%s1753_s9 + $0x168] ss:$12 sps:$4 sm:$0xff]   ;;  %v1653_v41 = vld [vmem:[%s1753_s9 + $0x50] ss:$12 sps:$4 sm:$0xff]  }
  0x17   : > { %1420 = vmatpush3.bf16.msra.mxu0 %v1611_v9  ;;  %1589 = vmatpush3.bf16.msra.mxu1 %v1611_v9  ;;  %v1646_v35 = vld [vmem:[%s1753_s9 + $0x8] ss:$12 sps:$4 sm:$0xff]   ;;  %v1647_v36 = vld [vmem:[%s1753_s9 + $0x60] ss:$12 sps:$4 sm:$0xff]   ;;  %v1651_v39 = vld [vmem:[%s1753_s9 + $0x38] ss:$12 sps:$4 sm:$0xff]  }
  0x18   : > { %1421 = vmatprep.subr.bf16.mxu0 %v1612_v10  ;;  %1582 = vmatprep.subr.bf16.mxu1 %v1612_v10  ;;  %v1648_v37 = vld [vmem:[%s1753_s9 + $0x20] ss:$12 sps:$4 sm:$0xff]   ;;  %v1649_v38 = vld [vmem:[%s1753_s9 + $0x7c] ss:$12 sps:$4 sm:$0xff]   ;;  %v1652_v40 = vld [vmem:[%s1753_s9 + $0x78] ss:$12 sps:$4 sm:$0xff]  }
  0x19   : > { %v1654_v42 = vld [vmem:[%s1753_s9 + $0x94] ss:$12 sps:$4 sm:$0xff]   ;;  %v1657_v44 = vld [vmem:[%s1753_s9 + $0x90] ss:$12 sps:$4 sm:$0xff]   ;;  %v1659_v46 = vld [vmem:[%s1753_s9 + $0xac] ss:$12 sps:$4 sm:$0xff]  }
  0x1a   : > { %v1656_v43 = vld [vmem:[%s1753_s9 + $0x68] ss:$12 sps:$4 sm:$0xff]   ;;  %v1658_v45 = vld [vmem:[%s1753_s9 + $0x80] ss:$12 sps:$4 sm:$0xff]   ;;  %v1661_v47 = vld [vmem:[%s1753_s9 + $0x98] ss:$12 sps:$4 sm:$0xff]  }
  0x1b   : > { %1422 = vmatpush3.bf16.msra.mxu0 %v1613_v13  ;;  %1590 = vmatpush3.bf16.msra.mxu1 %v1613_v13  ;;  %v1662_v48 = vld [vmem:[%s1753_s9 + $0xa8] ss:$12 sps:$4 sm:$0xff]   ;;  %v1663_v49 = vld [vmem:[%s1753_s9 + $0xb0] ss:$12 sps:$4 sm:$0xff]   ;;  %v1667_v52 = vld [vmem:[%s1753_s9 + $0xc0] ss:$12 sps:$4 sm:$0xff]  }
  0x1c   : > { %1423 = vmatprep.subr.bf16.mxu0 %v1614_v14  ;;  %1583 = vmatprep.subr.bf16.mxu1 %v1614_v14  ;;  %v1664_v50 = vld [vmem:[%s1753_s9 + $0xc4] ss:$12 sps:$4 sm:$0xff]   ;;  %v1666_v51 = vld [vmem:[%s1753_s9 + $0xc8] ss:$12 sps:$4 sm:$0xff]   ;;  %v1668_v53 = vld [vmem:[%s1753_s9 + $0xe0] ss:$12 sps:$4 sm:$0xff]  }
  0x1d   : > { %v1669_v54 = vld [vmem:[%s1753_s9 + $0xdc] ss:$12 sps:$4 sm:$0xff]   ;;  %v1671_v55 = vld [vmem:[%s1753_s9 + $0xf8] ss:$12 sps:$4 sm:$0xff]   ;;  %v1674_v58 = vld [vmem:[%s1753_s9 + $0xf4] ss:$12 sps:$4 sm:$0xff]  }
  0x1e   : > { %v1672_v56 = vld [vmem:[%s1753_s9 + $0xd8] ss:$12 sps:$4 sm:$0xff]   ;;  %v1673_v57 = vld [vmem:[%s1753_s9 + $0x110] ss:$12 sps:$4 sm:$0xff]   ;;  %v1676_v59 = vld [vmem:[%s1753_s9 + $0x128] ss:$12 sps:$4 sm:$0xff]  }
  0x1f   : > { %1424 = vmatpush3.bf16.msra.mxu0 %v1615_v15  ;;  %1591 = vmatpush3.bf16.msra.mxu1 %v1615_v15  ;;  %v1677_v60 = vld [vmem:[%s1753_s9 + $0xf0] ss:$12 sps:$4 sm:$0xff]   ;;  %v1678_v61 = vld [vmem:[%s1753_s9 + $0x140] ss:$12 sps:$4 sm:$0xff]   ;;  %v1681_v63 = vld [vmem:[%s1753_s9 + $0x158] ss:$12 sps:$4 sm:$0xff]  }
  0x20   : > { %1425 = vmatprep.subr.bf16.mxu0 %v1616_v16  ;;  %1584 = vmatprep.subr.bf16.mxu1 %v1616_v16  ;;  %v1679_v62 = vld [vmem:[%s1753_s9 + $0x10c] ss:$12 sps:$4 sm:$0xff]   ;;  %v1682_v0 = vld [vmem:[%s1753_s9 + $0x108] ss:$12 sps:$4 sm:$0xff]   ;;  %v1683_v1 = vld [vmem:[%s1753_s9 + $0x170] ss:$12 sps:$4 sm:$0xff]  }
  0x23   : > { %1426 = vmatpush3.bf16.msra.mxu0 %v1617_v17  ;;  %1592 = vmatpush3.bf16.msra.mxu1 %v1617_v17 }
  0x24   : > { %1541 = vmatprep.subr.bf16.mxu1 %v1624_v18 }
  0x26   : > { %715 = vmatmul.mubr.bf16.vlgmr.msra.gmra.mrb[0].mxu0 %v1618_v19  ;;  %811 = vmatmul.mubr.bf16.vlgmr.msra.gmra.mrb[0].mxu1 %v1621_v20 }
  0x27   : > { %1542 = vmatpush3.bf16.msra.mxu1 %v1624_v18  ;;  %722 = vmatprep.mubr.bf16.mxu0 %v1625_v21 }
  0x28   : > { %818 = vmatprep.mubr.bf16.mxu1 %v1627_v22  ;;  %1543 = vmatprep.subr.bf16.mxu1 %v1637_v23 }
  0x2b   : > { %1544 = vmatpush3.bf16.msra.mxu1 %v1637_v23 }
  0x2e   : > { %723 = vmatmul.mubr.bf16.gmra.mrb[4].mxu0 %v1629_v24  ;;  %819 = vmatmul.mubr.bf16.gmra.mrb[4].mxu1 %v1630_v25 }
  0x2f   : > { %730 = vmatprep.mubr.bf16.mxu0 %v1631_v26  ;;  %826 = vmatprep.mubr.bf16.mxu1 %v1633_v27 }
  0x36   : > { %731 = vmatmul.mubr.bf16.gmra.mrb[8].mxu0 %v1635_v28  ;;  %827 = vmatmul.mubr.bf16.gmra.mrb[8].mxu1 %v1636_v29 }
  0x37   : > { %738 = vmatprep.mubr.bf16.mxu0 %v1638_v30  ;;  %834 = vmatprep.mubr.bf16.mxu1 %v1640_v31 }
  0x3e   : > { %739 = vmatmul.mubr.bf16.gmra.mrb[12].mxu0 %v1642_v32  ;;  %835 = vmatmul.mubr.bf16.gmra.mrb[12].mxu1 %v1643_v33 }
  0x3f   : > { %746 = vmatprep.mubr.bf16.mxu0 %v1644_v34  ;;  %1545 = vmatprep.mubr.msk.bf16.mxu1 %vm633_vm0, %v1646_v35 }
  0x46   : > { %747 = vmatmul.mubr.bf16.gmra.mrb[16].mxu0 %v1647_v36  ;;  %1546 = vmatmul.mubr.msk.bf16.vlgmr.msra.gmra.mrb[16].mxu1 %vm633_vm0, %v1648_v37 }
  0x47   : > { %754 = vmatprep.mubr.bf16.mxu0 %v1649_v38  ;;  %1549 = vmatprep.mubr.msk.bf16.mxu1 %vm633_vm0, %v1651_v39 }
  0x4e   : > { %755 = vmatmul.mubr.bf16.gmra.mrb[20].mxu0 %v1652_v40  ;;  %1550 = vmatmul.mubr.msk.bf16.gmra.mrb[20].mxu1 %vm633_vm0, %v1653_v41 }
  0x4f   : > { %762 = vmatprep.mubr.bf16.mxu0 %v1654_v42  ;;  %1553 = vmatprep.mubr.msk.bf16.mxu1 %vm633_vm0, %v1656_v43 }
  0x56   : > { %763 = vmatmul.mubr.bf16.gmra.mrb[24].mxu0 %v1657_v44  ;;  %1554 = vmatmul.mubr.msk.bf16.gmra.mrb[24].mxu1 %vm633_vm0, %v1658_v45 }
  0x57   : > { %770 = vmatprep.mubr.bf16.mxu0 %v1659_v46  ;;  %1557 = vmatprep.mubr.msk.bf16.mxu1 %vm633_vm0, %v1661_v47 }
  0x5e   : > { %771 = vmatmul.mubr.bf16.gmra.mrb[28].mxu0 %v1662_v48  ;;  %1558 = vmatmul.mubr.msk.bf16.gmra.mrb[28].mxu1 %vm633_vm0, %v1663_v49 }
  0x5f   : > { %778 = vmatprep.mubr.bf16.mxu0 %v1664_v50  ;;  %1561 = vmatprep.mubr.msk.bf16.mxu1 %vm633_vm0, %v1666_v51  ;;  %v1865_v50 = vld [vmem:[%s1988_s2] ss:$0 sm:$0xff] }
  0x66   : > { %779 = vmatmul.mubr.bf16.gmra.mrb[32].mxu0 %v1667_v52  ;;  %1562 = vmatmul.mubr.msk.bf16.gmra.mrb[32].mxu1 %vm633_vm0, %v1668_v53 }
  0x67   : > { %786 = vmatprep.mubr.bf16.mxu0 %v1669_v54  ;;  %1565 = vmatprep.mubr.msk.bf16.mxu1 %vm633_vm0, %v1671_v55 }
  0x6e   : > { %787 = vmatmul.mubr.bf16.gmra.mrb[36].mxu0 %v1672_v56  ;;  %1566 = vmatmul.mubr.msk.bf16.gmra.mrb[36].mxu1 %vm633_vm0, %v1673_v57 }
  0x6f   : > { %794 = vmatprep.mubr.bf16.mxu0 %v1674_v58  ;;  %1569 = vmatprep.mubr.msk.bf16.mxu1 %vm633_vm0, %v1676_v59 }
  0x76   : > { %795 = vmatmul.mubr.bf16.gmra.mrb[40].mxu0 %v1677_v60  ;;  %1570 = vmatmul.mubr.msk.bf16.gmra.mrb[40].mxu1 %vm633_vm0, %v1678_v61 }
  0x77   : > { %802 = vmatprep.mubr.bf16.mxu0 %v1679_v62  ;;  %1573 = vmatprep.mubr.msk.bf16.mxu1 %vm633_vm0, %v1681_v63 }
  0x7e   : > { %803 = vmatmul.mubr.bf16.gmra.mrb[44].mxu0 %v1682_v0  ;;  %1574 = vmatmul.mubr.msk.bf16.gmra.mrb[44].mxu1 %vm633_vm0, %v1683_v1 }
  0xf9   : > { %v1427_v2 = vpop.f32.mrb[0].mxu0  ;;  %v1499_v3 = vpop.f32.mrb[0].mxu1 }
  0xfa   : > { %v1428_v4 = vpop.f32.mrb[1].mxu0  ;;  %v1500_v5 = vpop.f32.mrb[1].mxu1 }
  0xfb   : > { %v1429_v6 = vadd.f32 %v1428_v4, %v1427_v2  ;;  %v1430_v7 = vpop.f32.mrb[2].mxu0  ;;  %v1846_v8 = vadd.f32 %v1500_v5, %v1499_v3  ;;  %v1502_v9 = vpop.f32.mrb[2].mxu1 }
  0xfc   : > { %v1431_v10 = vpop.f32.mrb[3].mxu0  ;;  %v1503_v11 = vpop.f32.mrb[3].mxu1 }
  0xfd   : > { %v1432_v12 = vadd.f32 %v1431_v10, %v1430_v7  ;;  %v1848_v13 = vadd.f32 %v1503_v11, %v1502_v9  ;;  %v717_v54 = vadd.f32 %v1429_v6, %v1865_v50 }
  0xff   : > { %v720_v63 = vadd.f32 %v1432_v12, %v1865_v50 }
 0x101   : > { %v1433_v14 = vpop.f32.mrb[4].mxu0  ;;  %v1505_v15 = vpop.f32.mrb[4].mxu1 }
 0x102   : > { %v1434_v16 = vpop.f32.mrb[5].mxu0  ;;  %v1506_v17 = vpop.f32.mrb[5].mxu1 }
 0x103   : > { %v1435_v18 = vadd.f32 %v1434_v16, %v1433_v14  ;;  %v1436_v19 = vpop.f32.mrb[6].mxu0  ;;  %v1850_v20 = vadd.f32 %v1506_v17, %v1505_v15  ;;  %v1508_v21 = vpop.f32.mrb[6].mxu1 }
 0x104   : > { %v1437_v22 = vpop.f32.mrb[7].mxu0  ;;  %v1509_v23 = vpop.f32.mrb[7].mxu1 }
 0x105   : > { %v1438_v24 = vadd.f32 %v1437_v22, %v1436_v19  ;;  %v1852_v25 = vadd.f32 %v1509_v23, %v1508_v21  ;;  %v725_v51 = vadd.f32 %v1435_v18, %v1865_v50 }
 0x107   : > { %v728_v58 = vadd.f32 %v1438_v24, %v1865_v50 }
 0x109   : > { %v1439_v26 = vpop.f32.mrb[8].mxu0  ;;  %v1511_v27 = vpop.f32.mrb[8].mxu1 }
 0x10a   : > { %v1440_v28 = vpop.f32.mrb[9].mxu0  ;;  %v1512_v29 = vpop.f32.mrb[9].mxu1 }
 0x10b   : > { %v1441_v30 = vadd.f32 %v1440_v28, %v1439_v26  ;;  %v1442_v31 = vpop.f32.mrb[10].mxu0  ;;  %v1854_v32 = vadd.f32 %v1512_v29, %v1511_v27  ;;  %v1514_v33 = vpop.f32.mrb[10].mxu1 }
 0x10c   : > { %v1443_v34 = vpop.f32.mrb[11].mxu0  ;;  %v1515_v35 = vpop.f32.mrb[11].mxu1 }
 0x10d   : > { %v1444_v36 = vadd.f32 %v1443_v34, %v1442_v31  ;;  %v1856_v37 = vadd.f32 %v1515_v35, %v1514_v33  ;;  %v733_v18 = vadd.f32 %v1441_v30, %v1865_v50 }
 0x10f   : > { %v736_v29 = vadd.f32 %v1444_v36, %v1865_v50 }
 0x111   : > { %v1445_v38 = vpop.f32.mrb[12].mxu0  ;;  %v1517_v39 = vpop.f32.mrb[12].mxu1 }
 0x112   : > { %v1446_v40 = vpop.f32.mrb[13].mxu0  ;;  %v1518_v41 = vpop.f32.mrb[13].mxu1 }
 0x113   : > { %v1447_v42 = vadd.f32 %v1446_v40, %v1445_v38  ;;  %v1448_v43 = vpop.f32.mrb[14].mxu0  ;;  %v1858_v44 = vadd.f32 %v1518_v41, %v1517_v39  ;;  %v1520_v45 = vpop.f32.mrb[14].mxu1 }
 0x114   : > { %v1449_v46 = vpop.f32.mrb[15].mxu0  ;;  %v1521_v47 = vpop.f32.mrb[15].mxu1 }
 0x115   : > { %v1450_v48 = vadd.f32 %v1449_v46, %v1448_v43  ;;  %v1860_v49 = vadd.f32 %v1521_v47, %v1520_v45  ;;  %v741_v14 = vadd.f32 %v1447_v42, %v1865_v50 }
 0x117   : > { %v744_v23 = vadd.f32 %v1450_v48, %v1865_v50 }
 0x119   : > { %v1451_v52 = vpop.f32.mrb[16].mxu0  ;;  %v1547_v53 = vpop.f32.mrb[16].mxu1 }
 0x11a   : > { %v886_v55 = vadd.f32 %v1547_v53, %v725_v51  ;;  %v1452_v56 = vpop.f32.mrb[17].mxu0  ;;  %v877_v57 = vpop.f32.mrb[17].mxu1 }
 0x11b   : > { %v1453_v59 = vadd.f32 %v1452_v56, %v1451_v52  ;;  %v878_v60 = vadd.f32 %v877_v57, %v717_v54  ;;  %v1454_v61 = vpop.f32.mrb[18].mxu0  ;;  %v1548_v62 = vpop.f32.mrb[18].mxu1 }
 0x11c   : > { %v1006_v0 = vmax.f32 %v886_v55, 0.0  ;;  %v889_v1 = vadd.f32 %v1548_v62, %v728_v58  ;;  %v1455_v2 = vpop.f32.mrb[19].mxu0  ;;  %v880_v3 = vpop.f32.mrb[19].mxu1 }
 0x11d   : > { %v1004_v4 = vmax.f32 %v878_v60, 0.0  ;;  %v1456_v5 = vadd.f32 %v1455_v2, %v1454_v61  ;;  %v881_v6 = vadd.f32 %v880_v3, %v720_v63  ;;  %v749_v51 = vadd.f32 %v1453_v59, %v1865_v50 }
 0x11e   : > { %v1381_v7 = vpack.c.bf16 %v1006_v0, %v1006_v0  ;;  %v1007_v9 = vmax.f32 %v889_v1, 0.0 }
 0x11f   : > { %v1379_v10 = vpack.c.bf16 %v1004_v4, %v1004_v4  ;;  %v1005_v11 = vmax.f32 %v881_v6, 0.0  ;;  %v752_v61 = vadd.f32 %v1456_v5, %v1865_v50 }
 0x120   : > { %1167 = vst.msk [vmem:[%s1875_s8 + $0x8] sm:$0xf] %vm1164_vm1, %v1381_v7  ;;  %v1382_v12 = vpack.c.bf16 %v1007_v9, %v1007_v9 }
 0x121   : > { %1165 = vst.msk [vmem:[%s1875_s8] sm:$0xf] %vm1164_vm1, %v1379_v10  ;;  %v1380_v15 = vpack.c.bf16 %v1005_v11, %v1005_v11  ;;  %v1457_v16 = vpop.f32.mrb[20].mxu0  ;;  %v1551_v17 = vpop.f32.mrb[20].mxu1 }
 0x122   : > { %1168 = vst.msk [vmem:[%s1875_s8 + $0xc] sm:$0xf] %vm1164_vm1, %v1382_v12  ;;  %v902_v19 = vadd.f32 %v1551_v17, %v741_v14  ;;  %v1458_v21 = vpop.f32.mrb[21].mxu0  ;;  %v893_v22 = vpop.f32.mrb[21].mxu1 }
 0x123   : > { %1166 = vst.msk [vmem:[%s1875_s8 + $0x4] sm:$0xf] %vm1164_vm1, %v1380_v15  ;;  %v1459_v24 = vadd.f32 %v1458_v21, %v1457_v16  ;;  %v894_v26 = vadd.f32 %v893_v22, %v733_v18  ;;  %v1460_v27 = vpop.f32.mrb[22].mxu0  ;;  %v1552_v28 = vpop.f32.mrb[22].mxu1 }
 0x124   : > { %v1010_v31 = vmax.f32 %v902_v19, 0.0  ;;  %v905_v33 = vadd.f32 %v1552_v28, %v744_v23  ;;  %v1461_v30 = vpop.f32.mrb[23].mxu0  ;;  %v896_v34 = vpop.f32.mrb[23].mxu1 }
 0x125   : > { %v1008_v35 = vmax.f32 %v894_v26, 0.0  ;;  %v1462_v38 = vadd.f32 %v1461_v30, %v1460_v27  ;;  %v897_v39 = vadd.f32 %v896_v34, %v736_v29  ;;  %v757_v46 = vadd.f32 %v1459_v24, %v1865_v50 }
 0x126   : > { %v1385_v40 = vpack.c.bf16 %v1010_v31, %v1010_v31  ;;  %v1011_v41 = vmax.f32 %v905_v33, 0.0 }
 0x127   : > { %v1383_v42 = vpack.c.bf16 %v1008_v35, %v1008_v35  ;;  %v1009_v43 = vmax.f32 %v897_v39, 0.0  ;;  %v760_v55 = vadd.f32 %v1462_v38, %v1865_v50 }
 0x128   : > { %1171 = vst.msk [vmem:[%s1875_s8 + $0x18] sm:$0xf] %vm1164_vm1, %v1385_v40  ;;  %v1386_v45 = vpack.c.bf16 %v1011_v41, %v1011_v41 }
 0x129   : > { %1169 = vst.msk [vmem:[%s1875_s8 + $0x10] sm:$0xf] %vm1164_vm1, %v1383_v42  ;;  %v1384_v36 = vpack.c.bf16 %v1009_v43, %v1009_v43  ;;  %v1463_v47 = vpop.f32.mrb[24].mxu0  ;;  %v1555_v48 = vpop.f32.mrb[24].mxu1 }
 0x12a   : > { %1172 = vst.msk [vmem:[%s1875_s8 + $0x1c] sm:$0xf] %vm1164_vm1, %v1386_v45  ;;  %v918_v52 = vadd.f32 %v1555_v48, %v757_v46  ;;  %v1464_v53 = vpop.f32.mrb[25].mxu0  ;;  %v909_v54 = vpop.f32.mrb[25].mxu1 }
 0x12b   : > { %1170 = vst.msk [vmem:[%s1875_s8 + $0x14] sm:$0xf] %vm1164_vm1, %v1384_v36  ;;  %v1465_v56 = vadd.f32 %v1464_v53, %v1463_v47  ;;  %v910_v57 = vadd.f32 %v909_v54, %v749_v51  ;;  %v1466_v58 = vpop.f32.mrb[26].mxu0  ;;  %v1556_v60 = vpop.f32.mrb[26].mxu1 }
 0x12c   : > { %v1014_v62 = vmax.f32 %v918_v52, 0.0  ;;  %v921_v63 = vadd.f32 %v1556_v60, %v760_v55  ;;  %v1467_v59 = vpop.f32.mrb[27].mxu0  ;;  %v912_v0 = vpop.f32.mrb[27].mxu1 }
 0x12d   : > { %v1012_v1 = vmax.f32 %v910_v57, 0.0  ;;  %v1468_v2 = vadd.f32 %v1467_v59, %v1466_v58  ;;  %v913_v3 = vadd.f32 %v912_v0, %v752_v61  ;;  %v765_v14 = vadd.f32 %v1465_v56, %v1865_v50 }
 0x12e   : > { %v1389_v4 = vpack.c.bf16 %v1014_v62, %v1014_v62  ;;  %v1015_v6 = vmax.f32 %v921_v63, 0.0 }
 0x12f   : > { %v1387_v7 = vpack.c.bf16 %v1012_v1, %v1012_v1  ;;  %v1013_v9 = vmax.f32 %v913_v3, 0.0  ;;  %v768_v22 = vadd.f32 %v1468_v2, %v1865_v50 }
 0x130   : > { %1175 = vst.msk [vmem:[%s1875_s8 + $0x28] sm:$0xf] %vm1164_vm1, %v1389_v4  ;;  %v1390_v10 = vpack.c.bf16 %v1015_v6, %v1015_v6 }
 0x131   : > { %1173 = vst.msk [vmem:[%s1875_s8 + $0x20] sm:$0xf] %vm1164_vm1, %v1387_v7  ;;  %v1388_v11 = vpack.c.bf16 %v1013_v9, %v1013_v9  ;;  %v1469_v5 = vpop.f32.mrb[28].mxu0  ;;  %v1559_v12 = vpop.f32.mrb[28].mxu1 }
 0x132   : > { %1176 = vst.msk [vmem:[%s1875_s8 + $0x2c] sm:$0xf] %vm1164_vm1, %v1390_v10  ;;  %v1470_v15 = vpop.f32.mrb[29].mxu0  ;;  %v925_v16 = vpop.f32.mrb[29].mxu1 }
 0x133   : > { %1174 = vst.msk [vmem:[%s1875_s8 + $0x24] sm:$0xf] %vm1164_vm1, %v1388_v11  ;;  %v1471_v17 = vadd.f32 %v1470_v15, %v1469_v5  ;;  %v926_v18 = vadd.f32 %v925_v16, %v765_v14  ;;  %v1472_v19 = vpop.f32.mrb[30].mxu0  ;;  %v1560_v21 = vpop.f32.mrb[30].mxu1  ;;  %v821_v14 = vadd.f32 %v1850_v20, %v1865_v50 }
 0x134   : > { %v1473_v23 = vpop.f32.mrb[31].mxu0  ;;  %v928_v24 = vpop.f32.mrb[31].mxu1 }
 0x135   : > { %v773_v26 = vadd.f32 %v1471_v17, %v1865_v50  ;;  %v1016_v27 = vmax.f32 %v926_v18, 0.0  ;;  %v1474_v28 = vadd.f32 %v1473_v23, %v1472_v19  ;;  %v929_v29 = vadd.f32 %v928_v24, %v768_v22 }
 0x136   : > { %v813_v19 = vadd.f32 %v1846_v8, %v1865_v50  ;;  %v824_v24 = vadd.f32 %v1852_v25, %v1865_v50  ;;  %v816_v8 = vadd.f32 %v1848_v13, %v1865_v50 }
 0x137   : > { %v934_v31 = vadd.f32 %v1559_v12, %v773_v26  ;;  %v1391_v33 = vpack.c.bf16 %v1016_v27, %v1016_v27  ;;  %v776_v30 = vadd.f32 %v1474_v28, %v1865_v50  ;;  %v1017_v34 = vmax.f32 %v929_v29, 0.0 }
 0x139   : > { %v1018_v35 = vmax.f32 %v934_v31, 0.0  ;;  %1177 = vst.msk [vmem:[%s1875_s8 + $0x30] sm:$0xf] %vm1164_vm1, %v1391_v33  ;;  %v937_v38 = vadd.f32 %v1560_v21, %v776_v30  ;;  %v1392_v39 = vpack.c.bf16 %v1017_v34, %v1017_v34  ;;  %v1475_v40 = vpop.f32.mrb[32].mxu0  ;;  %v1563_v41 = vpop.f32.mrb[32].mxu1 }
 0x13a   : > { %v1476_v42 = vpop.f32.mrb[33].mxu0  ;;  %v941_v43 = vpop.f32.mrb[33].mxu1 }
 0x13b   : > { %v1393_v45 = vpack.c.bf16 %v1018_v35, %v1018_v35  ;;  %v1019_v46 = vmax.f32 %v937_v38, 0.0  ;;  %1178 = vst.msk [vmem:[%s1875_s8 + $0x34] sm:$0xf] %vm1164_vm1, %v1392_v39  ;;  %v1477_v36 = vadd.f32 %v1476_v42, %v1475_v40  ;;  %v1478_v47 = vpop.f32.mrb[34].mxu0  ;;  %v1564_v48 = vpop.f32.mrb[34].mxu1 }
 0x13c   : > { %v1479_v51 = vpop.f32.mrb[35].mxu0  ;;  %v944_v52 = vpop.f32.mrb[35].mxu1 }
 0x13d   : > { %1179 = vst.msk [vmem:[%s1875_s8 + $0x38] sm:$0xf] %vm1164_vm1, %v1393_v45  ;;  %v1394_v53 = vpack.c.bf16 %v1019_v46, %v1019_v46  ;;  %v781_v54 = vadd.f32 %v1477_v36, %v1865_v50  ;;  %v1480_v55 = vadd.f32 %v1479_v51, %v1478_v47 }
 0x13f   : > { %1180 = vst.msk [vmem:[%s1875_s8 + $0x3c] sm:$0xf] %vm1164_vm1, %v1394_v53  ;;  %v942_v56 = vadd.f32 %v941_v43, %v781_v54  ;;  %v784_v57 = vadd.f32 %v1480_v55, %v1865_v50  ;;  %v829_v55 = vadd.f32 %v1854_v32, %v1865_v50 }
 0x141   : > { %v1020_v58 = vmax.f32 %v942_v56, 0.0  ;;  %v945_v60 = vadd.f32 %v944_v52, %v784_v57  ;;  %v1481_v61 = vpop.f32.mrb[36].mxu0  ;;  %v1923_v62 = vpop.f32.mrb[36].mxu1 }
 0x142   : > { %v1482_v63 = vpop.f32.mrb[37].mxu0  ;;  %v957_v59 = vpop.f32.mrb[37].mxu1 }
 0x143   : > { %v1395_v0 = vpack.c.bf16 %v1020_v58, %v1020_v58  ;;  %v1021_v1 = vmax.f32 %v945_v60, 0.0  ;;  %v1483_v2 = vadd.f32 %v1482_v63, %v1481_v61  ;;  %v1484_v3 = vpop.f32.mrb[38].mxu0  ;;  %v1925_v4 = vpop.f32.mrb[38].mxu1 }
 0x144   : > { %v1485_v6 = vpop.f32.mrb[39].mxu0  ;;  %v960_v7 = vpop.f32.mrb[39].mxu1 }
 0x145   : > { %1181 = vst.msk [vmem:[%s1875_s8 + $0x40] sm:$0xf] %vm1164_vm1, %v1395_v0  ;;  %v1396_v9 = vpack.c.bf16 %v1021_v1, %v1021_v1  ;;  %v789_v10 = vadd.f32 %v1483_v2, %v1865_v50  ;;  %v1486_v11 = vadd.f32 %v1485_v6, %v1484_v3 }
 0x147   : > { %1182 = vst.msk [vmem:[%s1875_s8 + $0x44] sm:$0xf] %vm1164_vm1, %v1396_v9  ;;  %v950_v5 = vadd.f32 %v1563_v41, %v789_v10  ;;  %v792_v12 = vadd.f32 %v1486_v11, %v1865_v50 }
 0x149   : > { %v1022_v15 = vmax.f32 %v950_v5, 0.0  ;;  %v953_v16 = vadd.f32 %v1564_v48, %v792_v12  ;;  %v1487_v17 = vpop.f32.mrb[40].mxu0  ;;  %v1571_v18 = vpop.f32.mrb[40].mxu1  ;;  %v837_v48 = vadd.f32 %v1858_v44, %v1865_v50  ;;  %v840_v44 = vadd.f32 %v1860_v49, %v1865_v50 }
 0x14a   : > { %v982_v21 = vadd.f32 %v1571_v18, %v821_v14  ;;  %v1488_v22 = vpop.f32.mrb[41].mxu0  ;;  %v973_v23 = vpop.f32.mrb[41].mxu1 }
 0x14b   : > { %v1397_v26 = vpack.c.bf16 %v1022_v15, %v1022_v15  ;;  %v1023_v27 = vmax.f32 %v953_v16, 0.0  ;;  %v1489_v28 = vadd.f32 %v1488_v22, %v1487_v17  ;;  %v974_v29 = vadd.f32 %v973_v23, %v813_v19  ;;  %v1490_v20 = vpop.f32.mrb[42].mxu0  ;;  %v1572_v31 = vpop.f32.mrb[42].mxu1 }
 0x14c   : > { %v1030_v33 = vmax.f32 %v982_v21, 0.0  ;;  %v985_v30 = vadd.f32 %v1572_v31, %v824_v24  ;;  %v1491_v34 = vpop.f32.mrb[43].mxu0  ;;  %v976_v35 = vpop.f32.mrb[43].mxu1 }
 0x14d   : > { %1183 = vst.msk [vmem:[%s1875_s8 + $0x48] sm:$0xf] %vm1164_vm1, %v1397_v26  ;;  %v1398_v38 = vpack.c.bf16 %v1023_v27, %v1023_v27  ;;  %v797_v25 = vadd.f32 %v1489_v28, %v1865_v50  ;;  %v1028_v39 = vmax.f32 %v974_v29, 0.0  ;;  %v1492_v40 = vadd.f32 %v1491_v34, %v1490_v20 }
 0x14e   : > { %v1405_v41 = vpack.c.bf16 %v1030_v33, %v1030_v33  ;;  %v1031_v42 = vmax.f32 %v985_v30, 0.0  ;;  %v977_v43 = vadd.f32 %v976_v35, %v816_v8 }
 0x14f   : > { %1184 = vst.msk [vmem:[%s1875_s8 + $0x4c] sm:$0xf] %vm1164_vm1, %v1398_v38  ;;  %v958_v45 = vadd.f32 %v957_v59, %v797_v25  ;;  %v1403_v46 = vpack.c.bf16 %v1028_v39, %v1028_v39  ;;  %v800_v36 = vadd.f32 %v1492_v40, %v1865_v50 }
 0x150   : > { %1191 = vst.msk [vmem:[%s1875_s8 + $0x68] sm:$0xf] %vm1164_vm1, %v1405_v41  ;;  %v1406_v13 = vpack.c.bf16 %v1031_v42, %v1031_v42  ;;  %v1029_v47 = vmax.f32 %v977_v43, 0.0 }
 0x151   : > { %v1024_v51 = vmax.f32 %v958_v45, 0.0  ;;  %1189 = vst.msk [vmem:[%s1875_s8 + $0x60] sm:$0xf] %vm1164_vm1, %v1403_v46  ;;  %v961_v52 = vadd.f32 %v960_v7, %v800_v36  ;;  %v1493_v53 = vpop.f32.mrb[44].mxu0  ;;  %v1575_v54 = vpop.f32.mrb[44].mxu1  ;;  %v832_v7 = vadd.f32 %v1856_v37, %v1865_v50 }
 0x152   : > { %1192 = vst.msk [vmem:[%s1875_s8 + $0x6c] sm:$0xf] %vm1164_vm1, %v1406_v13  ;;  %v1404_v56 = vpack.c.bf16 %v1029_v47, %v1029_v47  ;;  %v998_v57 = vadd.f32 %v1575_v54, %v837_v48  ;;  %v1494_v58 = vpop.f32.mrb[45].mxu0  ;;  %v989_v60 = vpop.f32.mrb[45].mxu1 }
 0x153   : > { %v1399_v61 = vpack.c.bf16 %v1024_v51, %v1024_v51  ;;  %v1025_v63 = vmax.f32 %v961_v52, 0.0  ;;  %v1495_v59 = vadd.f32 %v1494_v58, %v1493_v53  ;;  %v990_v0 = vadd.f32 %v989_v60, %v829_v55  ;;  %v1496_v1 = vpop.f32.mrb[46].mxu0  ;;  %v1576_v2 = vpop.f32.mrb[46].mxu1 }
 0x154   : > { %1190 = vst.msk [vmem:[%s1875_s8 + $0x64] sm:$0xf] %vm1164_vm1, %v1404_v56  ;;  %v1034_v32 = vmax.f32 %v998_v57, 0.0  ;;  %v1001_v3 = vadd.f32 %v1576_v2, %v840_v44  ;;  %v1497_v6 = vpop.f32.mrb[47].mxu0  ;;  %v992_v9 = vpop.f32.mrb[47].mxu1 }
 0x155   : > { %1185 = vst.msk [vmem:[%s1875_s8 + $0x50] sm:$0xf] %vm1164_vm1, %v1399_v61  ;;  %v1400_v49 = vpack.c.bf16 %v1025_v63, %v1025_v63  ;;  %v805_v10 = vadd.f32 %v1495_v59, %v1865_v50  ;;  %v1032_v11 = vmax.f32 %v990_v0, 0.0  ;;  %v1498_v5 = vadd.f32 %v1497_v6, %v1496_v1 }
 0x156   : > { %v1409_v12 = vpack.c.bf16 %v1034_v32, %v1034_v32  ;;  %v1035_v14 = vmax.f32 %v1001_v3, 0.0  ;;  %v993_v15 = vadd.f32 %v992_v9, %v832_v7 }
 0x157   : > { %1186 = vst.msk [vmem:[%s1875_s8 + $0x54] sm:$0xf] %vm1164_vm1, %v1400_v49  ;;  %v966_v16 = vadd.f32 %v1923_v62, %v805_v10  ;;  %v1407_v37 = vpack.c.bf16 %v1032_v11, %v1032_v11  ;;  %v808_v17 = vadd.f32 %v1498_v5, %v1865_v50 }
 0x158   : > { %1195 = vst.msk [vmem:[%s1875_s8 + $0x78] sm:$0xf] %vm1164_vm1, %v1409_v12  ;;  %v1410_v18 = vpack.c.bf16 %v1035_v14, %v1035_v14  ;;  %v1033_v19 = vmax.f32 %v993_v15, 0.0 }
 0x159   : > { %v1026_v21 = vmax.f32 %v966_v16, 0.0  ;;  %1193 = vst.msk [vmem:[%s1875_s8 + $0x70] sm:$0xf] %vm1164_vm1, %v1407_v37  ;;  %v969_v22 = vadd.f32 %v1925_v4, %v808_v17 }
 0x15a   : > { %1196 = vst.msk [vmem:[%s1875_s8 + $0x7c] sm:$0xf] %vm1164_vm1, %v1410_v18  ;;  %v1408_v23 = vpack.c.bf16 %v1033_v19, %v1033_v19 }
 0x15b   : > { %v1401_v24 = vpack.c.bf16 %v1026_v21, %v1026_v21  ;;  %v1027_v26 = vmax.f32 %v969_v22, 0.0 }
 0x15c   : > { %1194 = vst.msk [vmem:[%s1875_s8 + $0x74] sm:$0xf] %vm1164_vm1, %v1408_v23 }
 0x15d   : > { %1187 = vst.msk [vmem:[%s1875_s8 + $0x58] sm:$0xf] %vm1164_vm1, %v1401_v24  ;;  %v1402_v62 = vpack.c.bf16 %v1027_v26, %v1027_v26 }
 0x15f   : > { %1188 = vst.msk [vmem:[%s1875_s8 + $0x5c] sm:$0xf] %vm1164_vm1, %v1402_v62 }
 0x160 PF: > { %s13_s12 = sadd.s32 1, %s1690_s12  }
 0x161   : > { %p10_p4 = scmp.ge.s32.totalorder %s13_s12, 4  }
 0x163   :  { %12 = sbr.rel (!%p10_p4) target bundleno = 1 (0x1), region = 62 }

// kernel: model_cnn_forward.34
= control target key start
LH: loop header
LB: loop body
LE: loop exit
PB: predicated region body
PF: predicated region fallthrough
CT: control target
= control target key end

     0   :  { %s2506_s24 = smov 0   ;;  %s2995_s0 = inlined_call_operand.vmem [shape: bf16[512,288], index: 0, kind: input, shape index: {}]   ;;  %s2996_s1 = inlined_call_operand.vmem [shape: bf16[288,32], index: 1, kind: input, shape index: {}]   ;;  %s2997_s2 = inlined_call_operand.vmem [shape: f32[1,32], index: 2, kind: input, shape index: {}]   ;;  %s2998_s3 = inlined_call_operand.vmem [shape: bf16[32,32], index: 3, kind: input, shape index: {}]   ;;  %s2999_s4 = inlined_call_operand.vmem [shape: f32[1,32], index: 4, kind: input, shape index: {}]   ;;  %s3000_s5 = inlined_call_operand.vmem [shape: bf16[32,12], index: 5, kind: input, shape index: {}]   ;;  %s3001_s6 = inlined_call_operand.vmem [shape: f32[1,12], index: 6, kind: input, shape index: {}]   ;;  %s3002_s7 = inlined_call_operand.vmem [shape: bf16[512,12], index: 7, kind: output, shape index: {}]  }
   0x1 LB: > { %s1889_s25 = sadd.s32 4294967295, %s2464_s24   ;;  %p1893_p0 = scmp.ge.s32.totalorder %s2464_s24, 1  ;;  %s2464_s24 = sphi %s2506_s24, %s17_s24  }
   0x2   : > { %p239_p1 = scmp.lt.s32.totalorder %s2464_s24, 3 }
   0x4   : > { %p240_p2 = pnand %p1893_p0, %p239_p1 }
   0x5   : > { %v2372_v0 = vld [vmem:[%s2996_s1 + $0x40] sm:$0xff] (!%p240_p2)   ;;  %s1894_s28 = sshll.u32 (!%p240_p2), %s1889_s25, 5  ;;  %v2374_v2 = vld [vmem:[%s2996_s1 + $0x48] sm:$0xff] (!%p240_p2)   ;;  %v2376_v4 = vld [vmem:[%s2996_s1 + $0x50] sm:$0xff] (!%p240_p2)   ;;  %vm741_vm0 = vcmask (!%p240_p2), 261120   ;;  %vm1800_vm1 = vcmask (!%p240_p2), 93184  }
   0x6   : > { %243 = sbr.rel (%p240_p2) target bundleno = 886 (0x376), region = 48  ;;  %v2373_v1 = vld [vmem:[%s2996_s1] sm:$0xff] (!%p240_p2)   ;;  %2085 = vmatprep.subr.bf16.mxu0 (!%p240_p2), %v2372_v0  ;;  %p273_p3 = scmp.lt.s32.totalorder (!%p240_p2), %s1894_s28, 63  ;;  %v2375_v3 = vld [vmem:[%s2996_s1 + $0x8] sm:$0xff] (!%p240_p2)   ;;  %v2377_v5 = vld [vmem:[%s2996_s1 + $0x10] sm:$0xff] (!%p240_p2)  }
   0x7   : > { %2086 = vmatpush3.bf16.msra.mxu0 (!%p240_p2), %v2373_v1  ;;  %v2378_v6 = vld [vmem:[%s2996_s1 + $0x58] sm:$0xff] (!%p240_p2)   ;;  %v2380_v8 = vld [vmem:[%s2996_s1 + $0x60] sm:$0xff] (!%p240_p2)   ;;  %v2382_v10 = vld [vmem:[%s2996_s1 + $0x68] sm:$0xff] (!%p240_p2)  }
   0x8   : > { %2087 = vmatprep.subr.bf16.mxu0 (!%p240_p2), %v2374_v2  ;;  %v2379_v7 = vld [vmem:[%s2996_s1 + $0x18] sm:$0xff] (!%p240_p2)   ;;  %v2381_v9 = vld [vmem:[%s2996_s1 + $0x20] sm:$0xff] (!%p240_p2)   ;;  %v2383_v13 = vld [vmem:[%s2996_s1 + $0x28] sm:$0xff] (!%p240_p2)  }
   0x9   : > { %v2391_v12 = vld [vmem:[%s2996_s1 + $0x80] sm:$0xff] (!%p240_p2)   ;;  %v2384_v14 = vld [vmem:[%s2996_s1 + $0x70] sm:$0xff] (!%p240_p2)   ;;  %v2386_v16 = vld [vmem:[%s2996_s1 + $0x78] sm:$0xff] (!%p240_p2)  }
   0xa   : > { %2359 = vmatprep.subr.bf16.mxu1 (!%p240_p2), %v2391_v12  ;;  %v2385_v15 = vld [vmem:[%s2996_s1 + $0x30] sm:$0xff] (!%p240_p2)   ;;  %v2404_v17 = vld [vmem:[%s2996_s1 + $0x88] sm:$0xff] (!%p240_p2)   ;;  %v2387_v20 = vld [vmem:[%s2996_s1 + $0x38] sm:$0xff] (!%p240_p2)  }
   0xb   : > { %2088 = vmatpush3.bf16.msra.mxu0 (!%p240_p2), %v2375_v3  ;;  %2361 = vmatpush3.bf16.msra.mxu1 (!%p240_p2), %v2391_v12  ;;  %v2454_v2 = vld [vmem:[%s2998_s3] sm:$0xff] (!%p240_p2)   ;;  %v2455_v3 = vld [vmem:[%s2998_s3 + $0x8] sm:$0xff] (!%p240_p2)  }
   0xc   : > { %2089 = vmatprep.subr.bf16.mxu0 (!%p240_p2), %v2376_v4  ;;  %2360 = vmatprep.subr.bf16.mxu1 (!%p240_p2), %v2404_v17 }
   0xd   : > { %s3004_s28 = smov (!%p273_p3, %s1894_s28), 63 }
   0xe   : > { %s2363_s18 = smul.u32 12, %s3004_s28  ;;  %s1897_s16 = sshll.u32 %s3004_s28, 2 }
   0xf   : > { %2090 = vmatpush3.bf16.msra.mxu0 %v2377_v5  ;;  %2362 = vmatpush3.bf16.msra.mxu1 %v2404_v17  ;;  %s2895_s19 = scalar_lea.vmem %s3002_s7, %s1897_s16 }
  0x10   : > { %2091 = vmatprep.subr.bf16.mxu0 %v2378_v6  ;;  %s2547_s26 = scalar_lea.vmem %s2995_s0, %s2363_s18  ;;  %2287 = vmatprep.subr.bf16.mxu1 %v2454_v2 }
  0x11   : > { %v2390_v11 = vld [vmem:[%s2547_s26 + $0x4] ss:$12 sps:$4 sm:$0xff]   ;;  %v2405_v18 = vld [vmem:[%s2547_s26 + $0x68] ss:$12 sps:$4 sm:$0xff]   ;;  %v2406_v19 = vld [vmem:[%s2547_s26 + $0x80] ss:$12 sps:$4 sm:$0xff]  }
  0x12   : > { %822 = vmatprep.mubr.bf16.mxu0 %v2390_v11  ;;  %2263 = vmatprep.mubr.msk.bf16.mxu1 %vm741_vm0, %v2405_v18  ;;  %v2388_v21 = vld [vmem:[%s2547_s26] ss:$12 sps:$4 sm:$0xff]   ;;  %v2413_v22 = vld [vmem:[%s2547_s26 + $0x98] ss:$12 sps:$4 sm:$0xff]   ;;  %v2392_v23 = vld [vmem:[%s2547_s26 + $0x1c] ss:$12 sps:$4 sm:$0xff]  }
  0x13   : > { %2092 = vmatpush3.bf16.msra.mxu0 %v2379_v7  ;;  %2264 = vmatmul.mubr.msk.bf16.vlgmr.msra.gmra.mrb[0].mxu1 %vm741_vm0, %v2406_v19  ;;  %v2414_v24 = vld [vmem:[%s2547_s26 + $0xb0] ss:$12 sps:$4 sm:$0xff]   ;;  %v2421_v25 = vld [vmem:[%s2547_s26 + $0xc8] ss:$12 sps:$4 sm:$0xff]   ;;  %v2394_v26 = vld [vmem:[%s2547_s26 + $0x18] ss:$12 sps:$4 sm:$0xff]  }
  0x14   : > { %2093 = vmatprep.subr.bf16.mxu0 %v2380_v8  ;;  %2267 = vmatprep.mubr.msk.bf16.mxu1 %vm741_vm0, %v2413_v22  ;;  %v2395_v27 = vld [vmem:[%s2547_s26 + $0x34] ss:$12 sps:$4 sm:$0xff]   ;;  %v2429_v29 = vld [vmem:[%s2547_s26 + $0xf8] ss:$12 sps:$4 sm:$0xff]   ;;  %v2397_v30 = vld [vmem:[%s2547_s26 + $0x30] ss:$12 sps:$4 sm:$0xff]  }
  0x15   : > { %v2422_v28 = vld [vmem:[%s2547_s26 + $0xe0] ss:$12 sps:$4 sm:$0xff]   ;;  %v2430_v32 = vld [vmem:[%s2547_s26 + $0x110] ss:$12 sps:$4 sm:$0xff]   ;;  %v2437_v33 = vld [vmem:[%s2547_s26 + $0x128] ss:$12 sps:$4 sm:$0xff]   ;;  %2288 = vmatpush3.bf16.msra.mxu1 %v2454_v2 }
  0x16   : > { %v2398_v31 = vld [vmem:[%s2547_s26 + $0x4c] ss:$12 sps:$4 sm:$0xff]   ;;  %v2400_v34 = vld [vmem:[%s2547_s26 + $0x48] ss:$12 sps:$4 sm:$0xff]   ;;  %v2401_v35 = vld [vmem:[%s2547_s26 + $0x64] ss:$12 sps:$4 sm:$0xff]   ;;  %2289 = vmatprep.subr.bf16.mxu1 %v2455_v3 }
  0x17   : > { %2094 = vmatpush3.bf16.msra.mxu0 %v2381_v9  ;;  %v2438_v36 = vld [vmem:[%s2547_s26 + $0x140] ss:$12 sps:$4 sm:$0xff]   ;;  %v2445_v37 = vld [vmem:[%s2547_s26 + $0x158] ss:$12 sps:$4 sm:$0xff]   ;;  %v2407_v39 = vld [vmem:[%s2547_s26 + $0x7c] ss:$12 sps:$4 sm:$0xff]  }
  0x18   : > { %2095 = vmatprep.subr.bf16.mxu0 %v2382_v10  ;;  %v2403_v38 = vld [vmem:[%s2547_s26 + $0x60] ss:$12 sps:$4 sm:$0xff]   ;;  %v2446_v40 = vld [vmem:[%s2547_s26 + $0x170] ss:$12 sps:$4 sm:$0xff]   ;;  %v2409_v41 = vld [vmem:[%s2547_s26 + $0x78] ss:$12 sps:$4 sm:$0xff]  }
  0x19   : > { %v2410_v42 = vld [vmem:[%s2547_s26 + $0x94] ss:$12 sps:$4 sm:$0xff]   ;;  %v2412_v43 = vld [vmem:[%s2547_s26 + $0x90] ss:$12 sps:$4 sm:$0xff]   ;;  %v2415_v44 = vld [vmem:[%s2547_s26 + $0xac] ss:$12 sps:$4 sm:$0xff]   ;;  %2290 = vmatpush3.bf16.msra.mxu1 %v2455_v3 }
  0x1a   : > { %v2417_v45 = vld [vmem:[%s2547_s26 + $0xa8] ss:$12 sps:$4 sm:$0xff]   ;;  %v2418_v46 = vld [vmem:[%s2547_s26 + $0xc4] ss:$12 sps:$4 sm:$0xff]   ;;  %v2420_v47 = vld [vmem:[%s2547_s26 + $0xc0] ss:$12 sps:$4 sm:$0xff]  }
  0x1b   : > { %2096 = vmatpush3.bf16.msra.mxu0 %v2383_v13  ;;  %2268 = vmatmul.mubr.msk.bf16.gmra.mrb[4].mxu1 %vm741_vm0, %v2414_v24  ;;  %v2423_v48 = vld [vmem:[%s2547_s26 + $0xdc] ss:$12 sps:$4 sm:$0xff]   ;;  %v2425_v49 = vld [vmem:[%s2547_s26 + $0xd8] ss:$12 sps:$4 sm:$0xff]   ;;  %v2426_v50 = vld [vmem:[%s2547_s26 + $0xf4] ss:$12 sps:$4 sm:$0xff]  }
  0x1c   : > { %2097 = vmatprep.subr.bf16.mxu0 %v2384_v14  ;;  %2271 = vmatprep.mubr.msk.bf16.mxu1 %vm741_vm0, %v2421_v25  ;;  %v2428_v51 = vld [vmem:[%s2547_s26 + $0xf0] ss:$12 sps:$4 sm:$0xff]   ;;  %v2431_v52 = vld [vmem:[%s2547_s26 + $0x10c] ss:$12 sps:$4 sm:$0xff]   ;;  %v2433_v53 = vld [vmem:[%s2547_s26 + $0x108] ss:$12 sps:$4 sm:$0xff]  }
  0x1d   : > { %v2434_v54 = vld [vmem:[%s2547_s26 + $0x124] ss:$12 sps:$4 sm:$0xff]   ;;  %v2436_v55 = vld [vmem:[%s2547_s26 + $0x120] ss:$12 sps:$4 sm:$0xff]   ;;  %v2439_v56 = vld [vmem:[%s2547_s26 + $0x13c] ss:$12 sps:$4 sm:$0xff]  }
  0x1e   : > { %v2441_v57 = vld [vmem:[%s2547_s26 + $0x138] ss:$12 sps:$4 sm:$0xff]   ;;  %v2442_v58 = vld [vmem:[%s2547_s26 + $0x154] ss:$12 sps:$4 sm:$0xff]   ;;  %v2444_v59 = vld [vmem:[%s2547_s26 + $0x150] ss:$12 sps:$4 sm:$0xff]  }
  0x1f   : > { %2098 = vmatpush3.bf16.msra.mxu0 %v2385_v15  ;;  %v2447_v60 = vld [vmem:[%s2547_s26 + $0x16c] ss:$12 sps:$4 sm:$0xff]   ;;  %v2449_v61 = vld [vmem:[%s2547_s26 + $0x168] ss:$12 sps:$4 sm:$0xff]   ;;  %v2453_v1 = vld [vmem:[%s2547_s26 + $0x50] ss:$12 sps:$4 sm:$0xff]  }
  0x20   : > { %2099 = vmatprep.subr.bf16.mxu0 %v2386_v16  ;;  %v2450_v62 = vld [vmem:[%s2547_s26 + $0x8] ss:$12 sps:$4 sm:$0xff]   ;;  %v2451_v63 = vld [vmem:[%s2547_s26 + $0x20] ss:$12 sps:$4 sm:$0xff]   ;;  %v2452_v0 = vld [vmem:[%s2547_s26 + $0x38] ss:$12 sps:$4 sm:$0xff]  }
  0x23   : > { %2100 = vmatpush3.bf16.msra.mxu0 %v2387_v20  ;;  %2272 = vmatmul.mubr.msk.bf16.gmra.mrb[8].mxu1 %vm741_vm0, %v2422_v28 }
  0x24   : > { %2251 = vmatprep.subr.bf16.mxu0 %v2391_v12  ;;  %2275 = vmatprep.mubr.msk.bf16.mxu1 %vm741_vm0, %v2429_v29 }
  0x26   : > { %823 = vmatmul.mubr.bf16.vlgmr.msra.gmra.mrb[0].mxu0 %v2388_v21 }
  0x27   : > { %2252 = vmatpush3.bf16.msra.mxu0 %v2391_v12  ;;  %830 = vmatprep.mubr.bf16.mxu0 %v2392_v23 }
  0x28   : > { %2253 = vmatprep.subr.bf16.mxu0 %v2404_v17 }
  0x2b   : > { %2254 = vmatpush3.bf16.msra.mxu0 %v2404_v17  ;;  %2276 = vmatmul.mubr.msk.bf16.gmra.mrb[12].mxu1 %vm741_vm0, %v2430_v32 }
  0x2c   : > { %2279 = vmatprep.mubr.msk.bf16.mxu1 %vm741_vm0, %v2437_v33 }
  0x2e   : > { %831 = vmatmul.mubr.bf16.gmra.mrb[4].mxu0 %v2394_v26 }
  0x2f   : > { %838 = vmatprep.mubr.bf16.mxu0 %v2395_v27 }
  0x33   : > { %2280 = vmatmul.mubr.msk.bf16.gmra.mrb[16].mxu1 %vm741_vm0, %v2438_v36 }
  0x34   : > { %2283 = vmatprep.mubr.msk.bf16.mxu1 %vm741_vm0, %v2445_v37 }
  0x36   : > { %839 = vmatmul.mubr.bf16.gmra.mrb[8].mxu0 %v2397_v30 }
  0x37   : > { %846 = vmatprep.mubr.bf16.mxu0 %v2398_v31 }
  0x3b   : > { %2284 = vmatmul.mubr.msk.bf16.gmra.mrb[20].mxu1 %vm741_vm0, %v2446_v40 }
  0x3e   : > { %847 = vmatmul.mubr.bf16.gmra.mrb[12].mxu0 %v2400_v34 }
  0x3f   : > { %854 = vmatprep.mubr.bf16.mxu0 %v2401_v35 }
  0x46   : > { %855 = vmatmul.mubr.bf16.gmra.mrb[16].mxu0 %v2403_v38 }
  0x47   : > { %862 = vmatprep.mubr.bf16.mxu0 %v2407_v39 }
  0x4e   : > { %863 = vmatmul.mubr.bf16.gmra.mrb[20].mxu0 %v2409_v41 }
  0x4f   : > { %870 = vmatprep.mubr.bf16.mxu0 %v2410_v42 }
  0x56   : > { %871 = vmatmul.mubr.bf16.gmra.mrb[24].mxu0 %v2412_v43 }
  0x57   : > { %878 = vmatprep.mubr.bf16.mxu0 %v2415_v44 }
  0x5e   : > { %879 = vmatmul.mubr.bf16.gmra.mrb[28].mxu0 %v2417_v45 }
  0x5f   : > { %886 = vmatprep.mubr.bf16.mxu0 %v2418_v46 }
  0x66   : > { %887 = vmatmul.mubr.bf16.gmra.mrb[32].mxu0 %v2420_v47 }
  0x67   : > { %894 = vmatprep.mubr.bf16.mxu0 %v2423_v48 }
  0x6e   : > { %895 = vmatmul.mubr.bf16.gmra.mrb[36].mxu0 %v2425_v49 }
  0x6f   : > { %902 = vmatprep.mubr.bf16.mxu0 %v2426_v50 }
  0x76   : > { %903 = vmatmul.mubr.bf16.gmra.mrb[40].mxu0 %v2428_v51 }
  0x77   : > { %910 = vmatprep.mubr.bf16.mxu0 %v2431_v52 }
  0x7e   : > { %911 = vmatmul.mubr.bf16.gmra.mrb[44].mxu0 %v2433_v53  ;;  %v2701_v53 = vld [vmem:[%s2997_s2] ss:$0 sm:$0xff] }
  0x7f   : > { %918 = vmatprep.mubr.bf16.mxu0 %v2434_v54 }
  0x86   : > { %919 = vmatmul.mubr.bf16.gmra.mrb[48].mxu0 %v2436_v55 }
  0x87   : > { %926 = vmatprep.mubr.bf16.mxu0 %v2439_v56 }
  0x8e   : > { %927 = vmatmul.mubr.bf16.gmra.mrb[52].mxu0 %v2441_v57 }
  0x8f   : > { %934 = vmatprep.mubr.bf16.mxu0 %v2442_v58 }
  0x96   : > { %935 = vmatmul.mubr.bf16.gmra.mrb[56].mxu0 %v2444_v59 }
  0x97   : > { %942 = vmatprep.mubr.bf16.mxu0 %v2447_v60 }
  0x9e   : > { %943 = vmatmul.mubr.bf16.gmra.mrb[60].mxu0 %v2449_v61 }
  0x9f   : > { %2255 = vmatprep.mubr.msk.bf16.mxu0 %vm741_vm0, %v2450_v62 }
  0xa6   : > { %2256 = vmatmul.mubr.msk.bf16.vlgmr.msra.gmra.mrb[64].mxu0 %vm741_vm0, %v2451_v63 }
  0xa7   : > { %2259 = vmatprep.mubr.msk.bf16.mxu0 %vm741_vm0, %v2452_v0 }
  0xae   : > { %2260 = vmatmul.mubr.msk.bf16.gmra.mrb[68].mxu0 %vm741_vm0, %v2453_v1 }
  0xe6   : > { %v2646_v4 = vpop.f32.mrb[0].mxu1 }
  0xe7   : > { %v1017_v5 = vpop.f32.mrb[1].mxu1 }
  0xe8   : > { %v2648_v6 = vpop.f32.mrb[2].mxu1 }
  0xe9   : > { %v1020_v7 = vpop.f32.mrb[3].mxu1 }
  0xee   : > { %v2654_v14 = vpop.f32.mrb[4].mxu1 }
  0xef   : > { %v2656_v15 = vpop.f32.mrb[5].mxu1 }
  0xf0   : > { %v2658_v16 = vpop.f32.mrb[6].mxu1 }
  0xf1   : > { %v2660_v17 = vpop.f32.mrb[7].mxu1 }
  0xf6   : > { %v2666_v24 = vpop.f32.mrb[8].mxu1 }
  0xf7   : > { %v2668_v25 = vpop.f32.mrb[9].mxu1 }
  0xf8   : > { %v2670_v26 = vpop.f32.mrb[10].mxu1 }
  0xf9   : > { %v2101_v8 = vpop.f32.mrb[0].mxu0  ;;  %v2672_v27 = vpop.f32.mrb[11].mxu1 }
  0xfa   : > { %v2102_v9 = vpop.f32.mrb[1].mxu0 }
  0xfb   : > { %v2650_v10 = vadd.f32 %v2102_v9, %v2101_v8  ;;  %v2104_v11 = vpop.f32.mrb[2].mxu0 }
  0xfc   : > { %v2105_v12 = vpop.f32.mrb[3].mxu0 }
  0xfd   : > { %v2652_v13 = vadd.f32 %v2105_v12, %v2104_v11 }
  0xfe   : > { %v2678_v34 = vpop.f32.mrb[12].mxu1 }
  0xff   : > { %v2680_v35 = vpop.f32.mrb[13].mxu1 }
 0x100   : > { %v2682_v36 = vpop.f32.mrb[14].mxu1 }
 0x101   : > { %v2107_v18 = vpop.f32.mrb[4].mxu0  ;;  %v2684_v37 = vpop.f32.mrb[15].mxu1 }
 0x102   : > { %v2108_v19 = vpop.f32.mrb[5].mxu0 }
 0x103   : > { %v2662_v20 = vadd.f32 %v2108_v19, %v2107_v18  ;;  %v2110_v21 = vpop.f32.mrb[6].mxu0 }
 0x104   : > { %v2111_v22 = vpop.f32.mrb[7].mxu0 }
 0x105   : > { %v2664_v23 = vadd.f32 %v2111_v22, %v2110_v21 }
 0x106   : > { %v2690_v44 = vpop.f32.mrb[16].mxu1 }
 0x107   : > { %v2692_v45 = vpop.f32.mrb[17].mxu1 }
 0x108   : > { %v2694_v46 = vpop.f32.mrb[18].mxu1 }
 0x109   : > { %v2113_v28 = vpop.f32.mrb[8].mxu0  ;;  %v2696_v47 = vpop.f32.mrb[19].mxu1 }
 0x10a   : > { %v2114_v29 = vpop.f32.mrb[9].mxu0 }
 0x10b   : > { %v2674_v30 = vadd.f32 %v2114_v29, %v2113_v28  ;;  %v2116_v31 = vpop.f32.mrb[10].mxu0 }
 0x10c   : > { %v2117_v32 = vpop.f32.mrb[11].mxu0 }
 0x10d   : > { %v2676_v33 = vadd.f32 %v2117_v32, %v2116_v31 }
 0x10e   : > { %v2704_v56 = vpop.f32.mrb[20].mxu1 }
 0x10f   : > { %v2706_v57 = vpop.f32.mrb[21].mxu1 }
 0x110   : > { %v2709_v60 = vpop.f32.mrb[22].mxu1 }
 0x111   : > { %v2119_v38 = vpop.f32.mrb[12].mxu0  ;;  %v2711_v61 = vpop.f32.mrb[23].mxu1 }
 0x112   : > { %v2120_v39 = vpop.f32.mrb[13].mxu0 }
 0x113   : > { %v2686_v40 = vadd.f32 %v2120_v39, %v2119_v38  ;;  %v2122_v41 = vpop.f32.mrb[14].mxu0 }
 0x114   : > { %v2123_v42 = vpop.f32.mrb[15].mxu0 }
 0x115   : > { %v2688_v43 = vadd.f32 %v2123_v42, %v2122_v41 }
 0x119   : > { %v2125_v48 = vpop.f32.mrb[16].mxu0 }
 0x11a   : > { %v2126_v49 = vpop.f32.mrb[17].mxu0 }
 0x11b   : > { %v2127_v50 = vadd.f32 %v2126_v49, %v2125_v48  ;;  %v2128_v51 = vpop.f32.mrb[18].mxu0 }
 0x11c   : > { %v2129_v52 = vpop.f32.mrb[19].mxu0 }
 0x11d   : > { %v2130_v54 = vadd.f32 %v2129_v52, %v2128_v51  ;;  %v857_v55 = vadd.f32 %v2127_v50, %v2701_v53 }
 0x11f   : > { %v1018_v58 = vadd.f32 %v1017_v5, %v857_v55  ;;  %v860_v59 = vadd.f32 %v2130_v54, %v2701_v53 }
 0x121   : > { %v1021_v62 = vadd.f32 %v1020_v7, %v860_v59  ;;  %v2131_v63 = vpop.f32.mrb[20].mxu0  ;;  %v1120_v1 = vmax.f32 %v1018_v58, 0.0 }
 0x122   : > { %v2132_v0 = vpop.f32.mrb[21].mxu0 }
 0x123   : > { %v1121_v2 = vmax.f32 %v1021_v62, 0.0  ;;  %v2133_v3 = vadd.f32 %v2132_v0, %v2131_v63  ;;  %v2134_v8 = vpop.f32.mrb[22].mxu0 }
 0x124   : > { %v2135_v9 = vpop.f32.mrb[23].mxu0 }
 0x125   : > { %v2713_v11 = vpack.c.bf16 %v1121_v2, %v1120_v1  ;;  %v865_v12 = vadd.f32 %v2133_v3, %v2701_v53  ;;  %v2136_v18 = vadd.f32 %v2135_v9, %v2134_v8 }
 0x127   : > { %v1026_v5 = vadd.f32 %v2646_v4, %v865_v12  ;;  %v868_v19 = vadd.f32 %v2136_v18, %v2701_v53 }
 0x129   : > { %v1029_v21 = vadd.f32 %v2648_v6, %v868_v19  ;;  %v2137_v22 = vpop.f32.mrb[24].mxu0  ;;  %v1122_v28 = vmax.f32 %v1026_v5, 0.0  ;;  %v2734_v5 = vld [vmem:[%s3000_s5] sm:$0xff]  }
 0x12a   : > { %v2138_v7 = vpop.f32.mrb[25].mxu0  ;;  %2323 = vmatprep.subr.bf16.mxu1 %v2734_v5 }
 0x12b   : > { %v1123_v29 = vmax.f32 %v1029_v21, 0.0  ;;  %v2139_v31 = vadd.f32 %v2138_v7, %v2137_v22  ;;  %v2140_v32 = vpop.f32.mrb[26].mxu0 }
 0x12c   : > { %v2141_v38 = vpop.f32.mrb[27].mxu0 }
 0x12d   : > { %v2719_v39 = vpack.c.bf16 %v1123_v29, %v1122_v28  ;;  %v2142_v41 = vadd.f32 %v2141_v38, %v2140_v32  ;;  %v873_v42 = vadd.f32 %v2139_v31, %v2701_v53 }
 0x12f   : > { %v1034_v48 = vadd.f32 %v2656_v15, %v873_v42  ;;  %v876_v4 = vadd.f32 %v2142_v41, %v2701_v53 }
 0x131   : > { %v1037_v49 = vadd.f32 %v2660_v17, %v876_v4  ;;  %v2143_v50 = vpop.f32.mrb[28].mxu0  ;;  %v1124_v51 = vmax.f32 %v1034_v48, 0.0 }
 0x132   : > { %v2144_v6 = vpop.f32.mrb[29].mxu0 }
 0x133   : > { %v1125_v52 = vmax.f32 %v1037_v49, 0.0  ;;  %v2145_v54 = vadd.f32 %v2144_v6, %v2143_v50  ;;  %v2146_v55 = vpop.f32.mrb[30].mxu0 }
 0x134   : > { %v2147_v58 = vpop.f32.mrb[31].mxu0 }
 0x135   : > { %v2725_v59 = vpack.c.bf16 %v1125_v52, %v1124_v51  ;;  %v881_v62 = vadd.f32 %v2145_v54, %v2701_v53  ;;  %v2148_v63 = vadd.f32 %v2147_v58, %v2146_v55 }
 0x137   : > { %v1042_v0 = vadd.f32 %v2654_v14, %v881_v62  ;;  %v884_v15 = vadd.f32 %v2148_v63, %v2701_v53 }
 0x139   : > { %v1045_v1 = vadd.f32 %v2658_v16, %v884_v15  ;;  %v2149_v2 = vpop.f32.mrb[32].mxu0  ;;  %v1126_v3 = vmax.f32 %v1042_v0, 0.0 }
 0x13a   : > { %v2150_v17 = vpop.f32.mrb[33].mxu0 }
 0x13b   : > { %v1127_v8 = vmax.f32 %v1045_v1, 0.0  ;;  %v2151_v9 = vadd.f32 %v2150_v17, %v2149_v2  ;;  %v2152_v12 = vpop.f32.mrb[34].mxu0 }
 0x13c   : > { %v2153_v18 = vpop.f32.mrb[35].mxu0 }
 0x13d   : > { %v2736_v19 = vpack.c.bf16 %v1127_v8, %v1126_v3  ;;  %v2154_v21 = vadd.f32 %v2153_v18, %v2152_v12  ;;  %v889_v14 = vadd.f32 %v2151_v9, %v2701_v53 }
 0x13f   : > { %v1050_v16 = vadd.f32 %v2668_v25, %v889_v14  ;;  %v892_v22 = vadd.f32 %v2154_v21, %v2701_v53 }
 0x141   : > { %v1053_v7 = vadd.f32 %v2672_v27, %v892_v22  ;;  %v2155_v28 = vpop.f32.mrb[36].mxu0  ;;  %v1128_v31 = vmax.f32 %v1050_v16, 0.0 }
 0x142   : > { %v2156_v29 = vpop.f32.mrb[37].mxu0 }
 0x143   : > { %v1129_v32 = vmax.f32 %v1053_v7, 0.0  ;;  %v2157_v38 = vadd.f32 %v2156_v29, %v2155_v28  ;;  %v2158_v41 = vpop.f32.mrb[38].mxu0 }
 0x144   : > { %v2159_v42 = vpop.f32.mrb[39].mxu0 }
 0x145   : > { %v2743_v48 = vpack.c.bf16 %v1129_v32, %v1128_v31  ;;  %v897_v4 = vadd.f32 %v2157_v38, %v2701_v53  ;;  %v2160_v49 = vadd.f32 %v2159_v42, %v2158_v41 }
 0x147   : > { %v1058_v50 = vadd.f32 %v2666_v24, %v897_v4  ;;  %v900_v25 = vadd.f32 %v2160_v49, %v2701_v53 }
 0x149   : > { %v1061_v6 = vadd.f32 %v2670_v26, %v900_v25  ;;  %v2161_v51 = vpop.f32.mrb[40].mxu0  ;;  %v1130_v52 = vmax.f32 %v1058_v50, 0.0 }
 0x14a   : > { %v2162_v27 = vpop.f32.mrb[41].mxu0 }
 0x14b   : > { %v1131_v54 = vmax.f32 %v1061_v6, 0.0  ;;  %v2163_v55 = vadd.f32 %v2162_v27, %v2161_v51  ;;  %v2164_v58 = vpop.f32.mrb[42].mxu0 }
 0x14c   : > { %v2165_v62 = vpop.f32.mrb[43].mxu0 }
 0x14d   : > { %v2749_v63 = vpack.c.bf16 %v1131_v54, %v1130_v52  ;;  %v2166_v0 = vadd.f32 %v2165_v62, %v2164_v58  ;;  %v905_v15 = vadd.f32 %v2163_v55, %v2701_v53 }
 0x14f   : > { %v1066_v1 = vadd.f32 %v2680_v35, %v905_v15  ;;  %v908_v24 = vadd.f32 %v2166_v0, %v2701_v53 }
 0x151   : > { %v1069_v2 = vadd.f32 %v2684_v37, %v908_v24  ;;  %v2167_v17 = vpop.f32.mrb[44].mxu0  ;;  %v1132_v3 = vmax.f32 %v1066_v1, 0.0 }
 0x152   : > { %v2168_v26 = vpop.f32.mrb[45].mxu0 }
 0x153   : > { %v1133_v8 = vmax.f32 %v1069_v2, 0.0  ;;  %v2169_v9 = vadd.f32 %v2168_v26, %v2167_v17  ;;  %v2170_v12 = vpop.f32.mrb[46].mxu0 }
 0x154   : > { %v2171_v18 = vpop.f32.mrb[47].mxu0 }
 0x155   : > { %v2755_v21 = vpack.c.bf16 %v1133_v8, %v1132_v3  ;;  %v913_v14 = vadd.f32 %v2169_v9, %v2701_v53  ;;  %v2172_v16 = vadd.f32 %v2171_v18, %v2170_v12 }
 0x157   : > { %v1074_v22 = vadd.f32 %v2678_v34, %v913_v14  ;;  %v916_v35 = vadd.f32 %v2172_v16, %v2701_v53 }
 0x159   : > { %v1077_v7 = vadd.f32 %v2682_v36, %v916_v35  ;;  %v2173_v28 = vpop.f32.mrb[48].mxu0  ;;  %v1134_v29 = vmax.f32 %v1074_v22, 0.0 }
 0x15a   : > { %v2174_v37 = vpop.f32.mrb[49].mxu0 }
 0x15b   : > { %v1135_v31 = vmax.f32 %v1077_v7, 0.0  ;;  %v2175_v32 = vadd.f32 %v2174_v37, %v2173_v28  ;;  %v2176_v38 = vpop.f32.mrb[50].mxu0 }
 0x15c   : > { %v2177_v41 = vpop.f32.mrb[51].mxu0 }
 0x15d   : > { %v2761_v42 = vpack.c.bf16 %v1135_v31, %v1134_v29  ;;  %v2178_v4 = vadd.f32 %v2177_v41, %v2176_v38  ;;  %v921_v49 = vadd.f32 %v2175_v32, %v2701_v53 }
 0x15f   : > { %v1082_v50 = vadd.f32 %v2692_v45, %v921_v49  ;;  %v924_v34 = vadd.f32 %v2178_v4, %v2701_v53  ;;  %v833_v4 = vadd.f32 %v2662_v20, %v2701_v53 }
 0x161   : > { %v1085_v25 = vadd.f32 %v2696_v47, %v924_v34  ;;  %v2179_v6 = vpop.f32.mrb[52].mxu0  ;;  %v1136_v51 = vmax.f32 %v1082_v50, 0.0  ;;  %v825_v50 = vadd.f32 %v2650_v10, %v2701_v53 }
 0x162   : > { %v2180_v36 = vpop.f32.mrb[53].mxu0 }
 0x163   : > { %v1137_v27 = vmax.f32 %v1085_v25, 0.0  ;;  %v2181_v52 = vadd.f32 %v2180_v36, %v2179_v6  ;;  %v2182_v54 = vpop.f32.mrb[54].mxu0  ;;  %v836_v6 = vadd.f32 %v2664_v23, %v2701_v53 }
 0x164   : > { %v2183_v55 = vpop.f32.mrb[55].mxu0 }
 0x165   : > { %v2767_v58 = vpack.c.bf16 %v1137_v27, %v1136_v51  ;;  %v929_v62 = vadd.f32 %v2181_v52, %v2701_v53  ;;  %v2184_v0 = vadd.f32 %v2183_v55, %v2182_v54  ;;  %v828_v52 = vadd.f32 %v2652_v13, %v2701_v53 }
 0x166   : > { %v852_v13 = vadd.f32 %v2688_v43, %v2701_v53 }
 0x167   : > { %v1090_v15 = vadd.f32 %v2690_v44, %v929_v62  ;;  %v932_v45 = vadd.f32 %v2184_v0, %v2701_v53 }
 0x169   : > { %v1093_v1 = vadd.f32 %v2694_v46, %v932_v45  ;;  %v2185_v24 = vpop.f32.mrb[56].mxu0  ;;  %v1138_v2 = vmax.f32 %v1090_v15, 0.0 }
 0x16a   : > { %v2186_v47 = vpop.f32.mrb[57].mxu0 }
 0x16b   : > { %v1139_v17 = vmax.f32 %v1093_v1, 0.0  ;;  %v2187_v26 = vadd.f32 %v2186_v47, %v2185_v24  ;;  %v2188_v3 = vpop.f32.mrb[58].mxu0  ;;  %v849_v1 = vadd.f32 %v2686_v40, %v2701_v53  ;;  %v841_v47 = vadd.f32 %v2674_v30, %v2701_v53 }
 0x16c   : > { %v2189_v8 = vpop.f32.mrb[59].mxu0  ;;  %v844_v40 = vadd.f32 %v2676_v33, %v2701_v53  ;;  %v2835_v33 = vld [vmem:[%s2999_s4] ss:$0 sm:$0xff] }
 0x16d   : > { %v2773_v9 = vpack.c.bf16 %v1139_v17, %v1138_v2  ;;  %v2190_v12 = vadd.f32 %v2189_v8, %v2188_v3  ;;  %v937_v18 = vadd.f32 %v2187_v26, %v2701_v53  ;;  %v2457_v26 = vld [vmem:[%s3000_s5 + $0x8] sm:$0xff]  }
 0x16f   : > { %v1098_v14 = vadd.f32 %v2706_v57, %v937_v18  ;;  %v940_v44 = vadd.f32 %v2190_v12, %v2701_v53 }
 0x171   : > { %v1101_v16 = vadd.f32 %v2711_v61, %v940_v44  ;;  %v2191_v22 = vpop.f32.mrb[60].mxu0  ;;  %v1140_v35 = vmax.f32 %v1098_v14, 0.0 }
 0x172   : > { %v2192_v46 = vpop.f32.mrb[61].mxu0 }
 0x173   : > { %v1141_v7 = vmax.f32 %v1101_v16, 0.0  ;;  %v2193_v28 = vadd.f32 %v2192_v46, %v2191_v22  ;;  %v2194_v37 = vpop.f32.mrb[62].mxu0 }
 0x174   : > { %v2195_v29 = vpop.f32.mrb[63].mxu0 }
 0x175   : > { %v2779_v31 = vpack.c.bf16 %v1141_v7, %v1140_v35  ;;  %v945_v32 = vadd.f32 %v2193_v28, %v2701_v53  ;;  %v2196_v38 = vadd.f32 %v2195_v29, %v2194_v37 }
 0x177   : > { %v1106_v41 = vadd.f32 %v2704_v56, %v945_v32  ;;  %v948_v57 = vadd.f32 %v2196_v38, %v2701_v53 }
 0x179   : > { %v1109_v61 = vadd.f32 %v2709_v60, %v948_v57  ;;  %v2257_v49 = vpop.f32.mrb[64].mxu0  ;;  %v1142_v36 = vmax.f32 %v1106_v41, 0.0 }
 0x17a   : > { %v994_v34 = vadd.f32 %v2257_v49, %v833_v4  ;;  %v985_v25 = vpop.f32.mrb[65].mxu0 }
 0x17b   : > { %v1143_v51 = vmax.f32 %v1109_v61, 0.0  ;;  %v986_v27 = vadd.f32 %v985_v25, %v825_v50  ;;  %v2258_v56 = vpop.f32.mrb[66].mxu0 }
 0x17c   : > { %v997_v54 = vadd.f32 %v2258_v56, %v836_v6  ;;  %v988_v20 = vpop.f32.mrb[67].mxu0  ;;  %v1114_v62 = vmax.f32 %v994_v34, 0.0 }
 0x17d   : > { %v1159_v55 = vpack.c.bf16 %v1143_v51, %v1142_v36  ;;  %v989_v60 = vadd.f32 %v988_v20, %v828_v52  ;;  %v1112_v15 = vmax.f32 %v986_v27, 0.0 }
 0x17e   : > { %v1115_v0 = vmax.f32 %v997_v54, 0.0 }
 0x17f   : > { %v1113_v10 = vmax.f32 %v989_v60, 0.0 }
 0x180   : > { %v1145_v45 = vpack.c.bf16 %v1115_v0, %v1114_v62 }
 0x181   : > { %v1144_v23 = vpack.c.bf16 %v1113_v10, %v1112_v15  ;;  %v2261_v24 = vpop.f32.mrb[68].mxu0 }
 0x182   : > { %v1010_v2 = vadd.f32 %v2261_v24, %v849_v1  ;;  %v1001_v17 = vpop.f32.mrb[69].mxu0 }
 0x183   : > { %v1002_v3 = vadd.f32 %v1001_v17, %v841_v47  ;;  %v2262_v8 = vpop.f32.mrb[70].mxu0  ;;  %2291 = vmatprep.mubr.msk.bf16.mxu1 %vm741_vm0, %v1144_v23 }
 0x184   : > { %v1013_v12 = vadd.f32 %v2262_v8, %v852_v13  ;;  %v1004_v18 = vpop.f32.mrb[71].mxu0  ;;  %2292 = vmatmul.mubr.msk.bf16.vlgmr.msra.gmra.mrb[24].mxu1 %vm741_vm0, %v1145_v45  ;;  %v1118_v14 = vmax.f32 %v1010_v2, 0.0 }
 0x185   : > { %v1005_v30 = vadd.f32 %v1004_v18, %v844_v40  ;;  %2324 = vmatpush3.bf16.msra.mxu1 %v2734_v5  ;;  %v1116_v44 = vmax.f32 %v1002_v3, 0.0 }
 0x186   : > { %v1119_v43 = vmax.f32 %v1013_v12, 0.0  ;;  %2325 = vmatprep.subr.bf16.mxu1 %v2457_v26 }
 0x187   : > { %v1117_v16 = vmax.f32 %v1005_v30, 0.0 }
 0x188   : > { %v1147_v22 = vpack.c.bf16 %v1119_v43, %v1118_v14 }
 0x189   : > { %v1146_v46 = vpack.c.bf16 %v1117_v16, %v1116_v44  ;;  %2326 = vmatpush3.bf16.msra.mxu1 %v2457_v26 }
 0x18b   : > { %2295 = vmatprep.mubr.msk.bf16.mxu1 %vm741_vm0, %v1146_v46 }
 0x18c   : > { %2296 = vmatmul.mubr.msk.bf16.gmra.mrb[28].mxu1 %vm741_vm0, %v1147_v22 }
 0x18d   : > { %2299 = vmatprep.mubr.msk.bf16.mxu1 %vm741_vm0, %v2713_v11 }
 0x194   : > { %2300 = vmatmul.mubr.msk.bf16.gmra.mrb[32].mxu1 %vm741_vm0, %v2719_v39 }
 0x195   : > { %2303 = vmatprep.mubr.msk.bf16.mxu1 %vm741_vm0, %v2725_v59 }
 0x19c   : > { %2304 = vmatmul.mubr.msk.bf16.gmra.mrb[36].mxu1 %vm741_vm0, %v2736_v19 }
 0x19d   : > { %2307 = vmatprep.mubr.msk.bf16.mxu1 %vm741_vm0, %v2743_v48 }
 0x1a4   : > { %2308 = vmatmul.mubr.msk.bf16.gmra.mrb[40].mxu1 %vm741_vm0, %v2749_v63 }
 0x1a5   : > { %2311 = vmatprep.mubr.msk.bf16.mxu1 %vm741_vm0, %v2755_v21 }
 0x1ac   : > { %2312 = vmatmul.mubr.msk.bf16.gmra.mrb[44].mxu1 %vm741_vm0, %v2761_v42 }
 0x1ad   : > { %2315 = vmatprep.mubr.msk.bf16.mxu1 %vm741_vm0, %v2767_v58 }
 0x1b4   : > { %2316 = vmatmul.mubr.msk.bf16.gmra.mrb[48].mxu1 %vm741_vm0, %v2773_v9 }
 0x1b5   : > { %2319 = vmatprep.mubr.msk.bf16.mxu1 %vm741_vm0, %v2779_v31 }
 0x1bc   : > { %2320 = vmatmul.mubr.msk.bf16.gmra.mrb[52].mxu1 %vm741_vm0, %v1159_v55 }
 0x257   : > { %v2293_v53 = vpop.f32.mrb[24].mxu1 }
 0x258   : > { %v1274_v11 = vadd.f32 %v2293_v53, %v2835_v33  ;;  %v1265_v39 = vpop.f32.mrb[25].mxu1 }
 0x259   : > { %v1266_v59 = vadd.f32 %v2835_v33, %v1265_v39  ;;  %v2294_v5 = vpop.f32.mrb[26].mxu1 }
 0x25a   : > { %v1277_v19 = vadd.f32 %v2294_v5, %v2835_v33  ;;  %v1268_v48 = vpop.f32.mrb[27].mxu1  ;;  %v1394_v21 = vmax.f32 %v1274_v11, 0.0 }
 0x25b   : > { %v1269_v63 = vadd.f32 %v2835_v33, %v1268_v48  ;;  %v1392_v58 = vmax.f32 %v1266_v59, 0.0 }
 0x25c   : > { %v1395_v42 = vmax.f32 %v1277_v19, 0.0 }
 0x25d   : > { %v1393_v9 = vmax.f32 %v1269_v63, 0.0 }
 0x25e   : > { %v1425_v35 = vpack.c.bf16 %v1395_v42, %v1394_v21 }
 0x25f   : > { %v1424_v7 = vpack.c.bf16 %v1393_v9, %v1392_v58  ;;  %v2297_v28 = vpop.f32.mrb[28].mxu1 }
 0x260   : > { %v1290_v37 = vadd.f32 %v2297_v28, %v2835_v33  ;;  %v1281_v29 = vpop.f32.mrb[29].mxu1 }
 0x261   : > { %v1282_v31 = vadd.f32 %v2835_v33, %v1281_v29  ;;  %v2298_v32 = vpop.f32.mrb[30].mxu1  ;;  %2327 = vmatprep.mubr.msk.bf16.mxu1 %vm741_vm0, %v1424_v7 }
 0x262   : > { %v1293_v38 = vadd.f32 %v2298_v32, %v2835_v33  ;;  %v1284_v41 = vpop.f32.mrb[31].mxu1  ;;  %2328 = vmatmul.mubr.msk.bf16.vlgmr.msra.gmra.mrb[56].mxu1 %vm741_vm0, %v1425_v35  ;;  %v1398_v4 = vmax.f32 %v1290_v37, 0.0 }
 0x263   : > { %v1285_v57 = vadd.f32 %v2835_v33, %v1284_v41  ;;  %v1396_v49 = vmax.f32 %v1282_v31, 0.0 }
 0x264   : > { %v1399_v61 = vmax.f32 %v1293_v38, 0.0 }
 0x265   : > { %v1397_v50 = vmax.f32 %v1285_v57, 0.0 }
 0x266   : > { %v1427_v34 = vpack.c.bf16 %v1399_v61, %v1398_v4 }
 0x267   : > { %v1426_v25 = vpack.c.bf16 %v1397_v50, %v1396_v49  ;;  %v2301_v6 = vpop.f32.mrb[32].mxu1 }
 0x268   : > { %v1306_v36 = vadd.f32 %v2301_v6, %v2835_v33  ;;  %v1297_v51 = vpop.f32.mrb[33].mxu1 }
 0x269   : > { %v1298_v27 = vadd.f32 %v2835_v33, %v1297_v51  ;;  %v2302_v56 = vpop.f32.mrb[34].mxu1  ;;  %2331 = vmatprep.mubr.msk.bf16.mxu1 %vm741_vm0, %v1426_v25 }
 0x26a   : > { %v1309_v52 = vadd.f32 %v2302_v56, %v2835_v33  ;;  %v1300_v54 = vpop.f32.mrb[35].mxu1  ;;  %2332 = vmatmul.mubr.msk.bf16.gmra.mrb[60].mxu1 %vm741_vm0, %v1427_v34  ;;  %v1402_v55 = vmax.f32 %v1306_v36, 0.0 }
 0x26b   : > { %v1301_v20 = vadd.f32 %v2835_v33, %v1300_v54  ;;  %v1400_v62 = vmax.f32 %v1298_v27, 0.0 }
 0x26c   : > { %v1403_v60 = vmax.f32 %v1309_v52, 0.0 }
 0x26d   : > { %v1401_v0 = vmax.f32 %v1301_v20, 0.0 }
 0x26e   : > { %v1429_v15 = vpack.c.bf16 %v1403_v60, %v1402_v55 }
 0x26f   : > { %v1428_v10 = vpack.c.bf16 %v1401_v0, %v1400_v62  ;;  %v2305_v45 = vpop.f32.mrb[36].mxu1 }
 0x270   : > { %v1322_v1 = vadd.f32 %v2305_v45, %v2835_v33  ;;  %v1313_v23 = vpop.f32.mrb[37].mxu1 }
 0x271   : > { %v1314_v24 = vadd.f32 %v2835_v33, %v1313_v23  ;;  %v2306_v47 = vpop.f32.mrb[38].mxu1  ;;  %2335 = vmatprep.mubr.msk.bf16.mxu1 %vm741_vm0, %v1428_v10 }
 0x272   : > { %v1325_v2 = vadd.f32 %v2306_v47, %v2835_v33  ;;  %v1316_v17 = vpop.f32.mrb[39].mxu1  ;;  %2336 = vmatmul.mubr.msk.bf16.gmra.mrb[64].mxu1 %vm741_vm0, %v1429_v15  ;;  %v1406_v26 = vmax.f32 %v1322_v1, 0.0 }
 0x273   : > { %v1317_v13 = vadd.f32 %v2835_v33, %v1316_v17  ;;  %v1404_v8 = vmax.f32 %v1314_v24, 0.0 }
 0x274   : > { %v1407_v3 = vmax.f32 %v1325_v2, 0.0 }
 0x275   : > { %v1405_v40 = vmax.f32 %v1317_v13, 0.0  ;;  %v2888_v13 = vld [vmem:[%s3001_s6] ss:$0 sm:$0xff] }
 0x276   : > { %v1431_v12 = vpack.c.bf16 %v1407_v3, %v1406_v26 }
 0x277   : > { %v1430_v18 = vpack.c.bf16 %v1405_v40, %v1404_v8  ;;  %v2309_v30 = vpop.f32.mrb[40].mxu1 }
 0x278   : > { %v1338_v14 = vadd.f32 %v2309_v30, %v2835_v33  ;;  %v1329_v43 = vpop.f32.mrb[41].mxu1 }
 0x279   : > { %v1330_v44 = vadd.f32 %v2835_v33, %v1329_v43  ;;  %v2310_v16 = vpop.f32.mrb[42].mxu1  ;;  %2339 = vmatprep.mubr.msk.bf16.mxu1 %vm741_vm0, %v1430_v18 }
 0x27a   : > { %v1341_v22 = vadd.f32 %v2310_v16, %v2835_v33  ;;  %v1332_v46 = vpop.f32.mrb[43].mxu1  ;;  %2340 = vmatmul.mubr.msk.bf16.gmra.mrb[68].mxu1 %vm741_vm0, %v1431_v12  ;;  %v1410_v11 = vmax.f32 %v1338_v14, 0.0 }
 0x27b   : > { %v1333_v53 = vadd.f32 %v2835_v33, %v1332_v46  ;;  %v1408_v59 = vmax.f32 %v1330_v44, 0.0 }
 0x27c   : > { %v1411_v39 = vmax.f32 %v1341_v22, 0.0 }
 0x27d   : > { %v1409_v5 = vmax.f32 %v1333_v53, 0.0 }
 0x27e   : > { %v1433_v19 = vpack.c.bf16 %v1411_v39, %v1410_v11 }
 0x27f   : > { %v1432_v48 = vpack.c.bf16 %v1409_v5, %v1408_v59  ;;  %v2313_v63 = vpop.f32.mrb[44].mxu1 }
 0x280   : > { %v1354_v21 = vadd.f32 %v2313_v63, %v2835_v33  ;;  %v1345_v42 = vpop.f32.mrb[45].mxu1 }
 0x281   : > { %v1346_v58 = vadd.f32 %v2835_v33, %v1345_v42  ;;  %v2314_v9 = vpop.f32.mrb[46].mxu1  ;;  %2343 = vmatprep.mubr.msk.bf16.mxu1 %vm741_vm0, %v1432_v48 }
 0x282   : > { %v1357_v35 = vadd.f32 %v2314_v9, %v2835_v33  ;;  %v1348_v7 = vpop.f32.mrb[47].mxu1  ;;  %2344 = vmatmul.mubr.msk.bf16.gmra.mrb[72].mxu1 %vm741_vm0, %v1433_v19  ;;  %v1414_v37 = vmax.f32 %v1354_v21, 0.0 }
 0x283   : > { %v1349_v28 = vadd.f32 %v2835_v33, %v1348_v7  ;;  %v1412_v31 = vmax.f32 %v1346_v58, 0.0 }
 0x284   : > { %v1415_v29 = vmax.f32 %v1357_v35, 0.0 }
 0x285   : > { %v1413_v32 = vmax.f32 %v1349_v28, 0.0 }
 0x286   : > { %v1435_v38 = vpack.c.bf16 %v1415_v29, %v1414_v37 }
 0x287   : > { %v1434_v41 = vpack.c.bf16 %v1413_v32, %v1412_v31  ;;  %v2317_v57 = vpop.f32.mrb[48].mxu1 }
 0x288   : > { %v1370_v4 = vadd.f32 %v2317_v57, %v2835_v33  ;;  %v1361_v61 = vpop.f32.mrb[49].mxu1 }
 0x289   : > { %v1362_v49 = vadd.f32 %v2835_v33, %v1361_v61  ;;  %v2318_v50 = vpop.f32.mrb[50].mxu1  ;;  %2347 = vmatprep.mubr.msk.bf16.mxu1 %vm741_vm0, %v1434_v41 }
 0x28a   : > { %v1373_v34 = vadd.f32 %v2318_v50, %v2835_v33  ;;  %v1364_v25 = vpop.f32.mrb[51].mxu1  ;;  %2348 = vmatmul.mubr.msk.bf16.gmra.mrb[76].mxu1 %vm741_vm0, %v1435_v38  ;;  %v1418_v36 = vmax.f32 %v1370_v4, 0.0 }
 0x28b   : > { %v1365_v6 = vadd.f32 %v2835_v33, %v1364_v25  ;;  %v1416_v27 = vmax.f32 %v1362_v49, 0.0 }
 0x28c   : > { %v1419_v51 = vmax.f32 %v1373_v34, 0.0 }
 0x28d   : > { %v1417_v56 = vmax.f32 %v1365_v6, 0.0 }
 0x28e   : > { %v1437_v52 = vpack.c.bf16 %v1419_v51, %v1418_v36 }
 0x28f   : > { %v1436_v54 = vpack.c.bf16 %v1417_v56, %v1416_v27  ;;  %v2321_v20 = vpop.f32.mrb[52].mxu1 }
 0x290   : > { %v1386_v55 = vadd.f32 %v2321_v20, %v2835_v33  ;;  %v1377_v60 = vpop.f32.mrb[53].mxu1 }
 0x291   : > { %v1378_v62 = vadd.f32 %v2835_v33, %v1377_v60  ;;  %v2322_v0 = vpop.f32.mrb[54].mxu1  ;;  %2351 = vmatprep.mubr.msk.bf16.mxu1 %vm741_vm0, %v1436_v54 }
 0x292   : > { %v1389_v15 = vadd.f32 %v2322_v0, %v2835_v33  ;;  %v1380_v10 = vpop.f32.mrb[55].mxu1  ;;  %2352 = vmatmul.mubr.msk.bf16.gmra.mrb[80].mxu1 %vm741_vm0, %v1437_v52  ;;  %v1422_v1 = vmax.f32 %v1386_v55, 0.0 }
 0x293   : > { %v1381_v45 = vadd.f32 %v2835_v33, %v1380_v10  ;;  %v1420_v24 = vmax.f32 %v1378_v62, 0.0 }
 0x294   : > { %v1423_v23 = vmax.f32 %v1389_v15, 0.0 }
 0x295   : > { %v1421_v47 = vmax.f32 %v1381_v45, 0.0 }
 0x296   : > { %v1439_v2 = vpack.c.bf16 %v1423_v23, %v1422_v1 }
 0x297   : > { %v1438_v17 = vpack.c.bf16 %v1421_v47, %v1420_v24 }
 0x299   : > { %2355 = vmatprep.mubr.msk.bf16.mxu1 %vm741_vm0, %v1438_v17 }
 0x29a   : > { %2356 = vmatmul.mubr.msk.bf16.gmra.mrb[84].mxu1 %vm741_vm0, %v1439_v2 }
 0x335   : > { %v2329_v26 = vpop.f32.mrb[56].mxu1 }
 0x336   : > { %v1554_v3 = vadd.f32 %v2329_v26, %v2888_v13  ;;  %v1545_v33 = vpop.f32.mrb[57].mxu1 }
 0x337   : > { %v1546_v8 = vadd.f32 %v2888_v13, %v1545_v33  ;;  %v2330_v40 = vpop.f32.mrb[58].mxu1 }
 0x338   : > { %v2055_v12 = vpack.c.bf16 %v1554_v3, %v1554_v3  ;;  %v1557_v18 = vadd.f32 %v2330_v40, %v2888_v13  ;;  %v1548_v30 = vpop.f32.mrb[59].mxu1 }
 0x339   : > { %v2053_v14 = vpack.c.bf16 %v1546_v8, %v1546_v8  ;;  %v1549_v43 = vadd.f32 %v2888_v13, %v1548_v30 }
 0x33a   : > { %1803 = vst.msk [vmem:[%s2895_s19 + $0x8] sm:$0xf] %vm1800_vm1, %v2055_v12  ;;  %v2056_v44 = vpack.c.bf16 %v1557_v18, %v1557_v18 }
 0x33b   : > { %1801 = vst.msk [vmem:[%s2895_s19] sm:$0xf] %vm1800_vm1, %v2053_v14  ;;  %v2054_v16 = vpack.c.bf16 %v1549_v43, %v1549_v43 }
 0x33c   : > { %1804 = vst.msk [vmem:[%s2895_s19 + $0xc] sm:$0xf] %vm1800_vm1, %v2056_v44 }
 0x33d   : > { %1802 = vst.msk [vmem:[%s2895_s19 + $0x4] sm:$0xf] %vm1800_vm1, %v2054_v16  ;;  %v2333_v22 = vpop.f32.mrb[60].mxu1 }
 0x33e   : > { %v1570_v46 = vadd.f32 %v2333_v22, %v2888_v13  ;;  %v1561_v53 = vpop.f32.mrb[61].mxu1 }
 0x33f   : > { %v1562_v11 = vadd.f32 %v2888_v13, %v1561_v53  ;;  %v2334_v39 = vpop.f32.mrb[62].mxu1 }
 0x340   : > { %v2059_v59 = vpack.c.bf16 %v1570_v46, %v1570_v46  ;;  %v1573_v5 = vadd.f32 %v2334_v39, %v2888_v13  ;;  %v1564_v19 = vpop.f32.mrb[63].mxu1 }
 0x341   : > { %v2057_v48 = vpack.c.bf16 %v1562_v11, %v1562_v11  ;;  %v1565_v63 = vadd.f32 %v2888_v13, %v1564_v19 }
 0x342   : > { %1807 = vst.msk [vmem:[%s2895_s19 + $0x18] sm:$0xf] %vm1800_vm1, %v2059_v59  ;;  %v2060_v21 = vpack.c.bf16 %v1573_v5, %v1573_v5 }
 0x343   : > { %1805 = vst.msk [vmem:[%s2895_s19 + $0x10] sm:$0xf] %vm1800_vm1, %v2057_v48  ;;  %v2058_v42 = vpack.c.bf16 %v1565_v63, %v1565_v63 }
 0x344   : > { %1808 = vst.msk [vmem:[%s2895_s19 + $0x1c] sm:$0xf] %vm1800_vm1, %v2060_v21 }
 0x345   : > { %1806 = vst.msk [vmem:[%s2895_s19 + $0x14] sm:$0xf] %vm1800_vm1, %v2058_v42  ;;  %v2337_v58 = vpop.f32.mrb[64].mxu1 }
 0x346   : > { %v1586_v9 = vadd.f32 %v2337_v58, %v2888_v13  ;;  %v1577_v35 = vpop.f32.mrb[65].mxu1 }
 0x347   : > { %v1578_v7 = vadd.f32 %v2888_v13, %v1577_v35  ;;  %v2338_v28 = vpop.f32.mrb[66].mxu1 }
 0x348   : > { %v2063_v37 = vpack.c.bf16 %v1586_v9, %v1586_v9  ;;  %v1589_v29 = vadd.f32 %v2338_v28, %v2888_v13  ;;  %v1580_v31 = vpop.f32.mrb[67].mxu1 }
 0x349   : > { %v2061_v32 = vpack.c.bf16 %v1578_v7, %v1578_v7  ;;  %v1581_v38 = vadd.f32 %v2888_v13, %v1580_v31 }
 0x34a   : > { %1811 = vst.msk [vmem:[%s2895_s19 + $0x28] sm:$0xf] %vm1800_vm1, %v2063_v37  ;;  %v2064_v41 = vpack.c.bf16 %v1589_v29, %v1589_v29 }
 0x34b   : > { %1809 = vst.msk [vmem:[%s2895_s19 + $0x20] sm:$0xf] %vm1800_vm1, %v2061_v32  ;;  %v2062_v57 = vpack.c.bf16 %v1581_v38, %v1581_v38 }
 0x34c   : > { %1812 = vst.msk [vmem:[%s2895_s19 + $0x2c] sm:$0xf] %vm1800_vm1, %v2064_v41 }
 0x34d   : > { %1810 = vst.msk [vmem:[%s2895_s19 + $0x24] sm:$0xf] %vm1800_vm1, %v2062_v57  ;;  %v2341_v4 = vpop.f32.mrb[68].mxu1 }
 0x34e   : > { %v1602_v61 = vadd.f32 %v2341_v4, %v2888_v13  ;;  %v1593_v49 = vpop.f32.mrb[69].mxu1 }
 0x34f   : > { %v1594_v50 = vadd.f32 %v2888_v13, %v1593_v49  ;;  %v2342_v34 = vpop.f32.mrb[70].mxu1 }
 0x350   : > { %v2067_v25 = vpack.c.bf16 %v1602_v61, %v1602_v61  ;;  %v1605_v6 = vadd.f32 %v2342_v34, %v2888_v13  ;;  %v1596_v36 = vpop.f32.mrb[71].mxu1 }
 0x351   : > { %v2065_v51 = vpack.c.bf16 %v1594_v50, %v1594_v50  ;;  %v1597_v27 = vadd.f32 %v2888_v13, %v1596_v36 }
 0x352   : > { %1815 = vst.msk [vmem:[%s2895_s19 + $0x38] sm:$0xf] %vm1800_vm1, %v2067_v25  ;;  %v2068_v56 = vpack.c.bf16 %v1605_v6, %v1605_v6 }
 0x353   : > { %1813 = vst.msk [vmem:[%s2895_s19 + $0x30] sm:$0xf] %vm1800_vm1, %v2065_v51  ;;  %v2066_v52 = vpack.c.bf16 %v1597_v27, %v1597_v27 }
 0x354   : > { %1816 = vst.msk [vmem:[%s2895_s19 + $0x3c] sm:$0xf] %vm1800_vm1, %v2068_v56 }
 0x355   : > { %1814 = vst.msk [vmem:[%s2895_s19 + $0x34] sm:$0xf] %vm1800_vm1, %v2066_v52  ;;  %v2345_v54 = vpop.f32.mrb[72].mxu1 }
 0x356   : > { %v1618_v20 = vadd.f32 %v2345_v54, %v2888_v13  ;;  %v1609_v55 = vpop.f32.mrb[73].mxu1 }
 0x357   : > { %v1610_v60 = vadd.f32 %v2888_v13, %v1609_v55  ;;  %v2346_v62 = vpop.f32.mrb[74].mxu1 }
 0x358   : > { %v2071_v0 = vpack.c.bf16 %v1618_v20, %v1618_v20  ;;  %v1621_v15 = vadd.f32 %v2346_v62, %v2888_v13  ;;  %v1612_v10 = vpop.f32.mrb[75].mxu1 }
 0x359   : > { %v2069_v45 = vpack.c.bf16 %v1610_v60, %v1610_v60  ;;  %v1613_v1 = vadd.f32 %v2888_v13, %v1612_v10 }
 0x35a   : > { %1819 = vst.msk [vmem:[%s2895_s19 + $0x48] sm:$0xf] %vm1800_vm1, %v2071_v0  ;;  %v2072_v23 = vpack.c.bf16 %v1621_v15, %v1621_v15 }
 0x35b   : > { %1817 = vst.msk [vmem:[%s2895_s19 + $0x40] sm:$0xf] %vm1800_vm1, %v2069_v45  ;;  %v2070_v24 = vpack.c.bf16 %v1613_v1, %v1613_v1 }
 0x35c   : > { %1820 = vst.msk [vmem:[%s2895_s19 + $0x4c] sm:$0xf] %vm1800_vm1, %v2072_v23 }
 0x35d   : > { %1818 = vst.msk [vmem:[%s2895_s19 + $0x44] sm:$0xf] %vm1800_vm1, %v2070_v24  ;;  %v2349_v47 = vpop.f32.mrb[76].mxu1 }
 0x35e   : > { %v1634_v2 = vadd.f32 %v2349_v47, %v2888_v13  ;;  %v1625_v17 = vpop.f32.mrb[77].mxu1 }
 0x35f   : > { %v1626_v26 = vadd.f32 %v2888_v13, %v1625_v17  ;;  %v2350_v3 = vpop.f32.mrb[78].mxu1 }
 0x360   : > { %v2075_v33 = vpack.c.bf16 %v1634_v2, %v1634_v2  ;;  %v1637_v8 = vadd.f32 %v2350_v3, %v2888_v13  ;;  %v1628_v40 = vpop.f32.mrb[79].mxu1 }
 0x361   : > { %v2073_v12 = vpack.c.bf16 %v1626_v26, %v1626_v26  ;;  %v1629_v18 = vadd.f32 %v2888_v13, %v1628_v40 }
 0x362   : > { %1823 = vst.msk [vmem:[%s2895_s19 + $0x58] sm:$0xf] %vm1800_vm1, %v2075_v33  ;;  %v2076_v30 = vpack.c.bf16 %v1637_v8, %v1637_v8 }
 0x363   : > { %1821 = vst.msk [vmem:[%s2895_s19 + $0x50] sm:$0xf] %vm1800_vm1, %v2073_v12  ;;  %v2074_v14 = vpack.c.bf16 %v1629_v18, %v1629_v18 }
 0x364   : > { %1824 = vst.msk [vmem:[%s2895_s19 + $0x5c] sm:$0xf] %vm1800_vm1, %v2076_v30 }
 0x365   : > { %1822 = vst.msk [vmem:[%s2895_s19 + $0x54] sm:$0xf] %vm1800_vm1, %v2074_v14  ;;  %v2353_v43 = vpop.f32.mrb[80].mxu1 }
 0x366   : > { %v1650_v44 = vadd.f32 %v2353_v43, %v2888_v13  ;;  %v1641_v16 = vpop.f32.mrb[81].mxu1 }
 0x367   : > { %v1642_v22 = vadd.f32 %v2888_v13, %v1641_v16  ;;  %v2354_v46 = vpop.f32.mrb[82].mxu1 }
 0x368   : > { %v2079_v53 = vpack.c.bf16 %v1650_v44, %v1650_v44  ;;  %v1653_v11 = vadd.f32 %v2354_v46, %v2888_v13  ;;  %v1644_v39 = vpop.f32.mrb[83].mxu1 }
 0x369   : > { %v2077_v59 = vpack.c.bf16 %v1642_v22, %v1642_v22  ;;  %v1645_v5 = vadd.f32 %v2888_v13, %v1644_v39 }
 0x36a   : > { %1827 = vst.msk [vmem:[%s2895_s19 + $0x68] sm:$0xf] %vm1800_vm1, %v2079_v53  ;;  %v2080_v19 = vpack.c.bf16 %v1653_v11, %v1653_v11 }
 0x36b   : > { %1825 = vst.msk [vmem:[%s2895_s19 + $0x60] sm:$0xf] %vm1800_vm1, %v2077_v59  ;;  %v2078_v48 = vpack.c.bf16 %v1645_v5, %v1645_v5 }
 0x36c   : > { %1828 = vst.msk [vmem:[%s2895_s19 + $0x6c] sm:$0xf] %vm1800_vm1, %v2080_v19 }
 0x36d   : > { %1826 = vst.msk [vmem:[%s2895_s19 + $0x64] sm:$0xf] %vm1800_vm1, %v2078_v48  ;;  %v2357_v63 = vpop.f32.mrb[84].mxu1 }
 0x36e   : > { %v1666_v21 = vadd.f32 %v2357_v63, %v2888_v13  ;;  %v1657_v42 = vpop.f32.mrb[85].mxu1 }
 0x36f   : > { %v1658_v58 = vadd.f32 %v2888_v13, %v1657_v42  ;;  %v2358_v9 = vpop.f32.mrb[86].mxu1 }
 0x370   : > { %v2083_v35 = vpack.c.bf16 %v1666_v21, %v1666_v21  ;;  %v1669_v7 = vadd.f32 %v2358_v9, %v2888_v13  ;;  %v1660_v28 = vpop.f32.mrb[87].mxu1 }
 0x371   : > { %v2081_v37 = vpack.c.bf16 %v1658_v58, %v1658_v58  ;;  %v1661_v29 = vadd.f32 %v2888_v13, %v1660_v28 }
 0x372   : > { %1831 = vst.msk [vmem:[%s2895_s19 + $0x78] sm:$0xf] %vm1800_vm1, %v2083_v35  ;;  %v2084_v31 = vpack.c.bf16 %v1669_v7, %v1669_v7 }
 0x373   : > { %1829 = vst.msk [vmem:[%s2895_s19 + $0x70] sm:$0xf] %vm1800_vm1, %v2081_v37  ;;  %v2082_v32 = vpack.c.bf16 %v1661_v29, %v1661_v29 }
 0x374   : > { %1832 = vst.msk [vmem:[%s2895_s19 + $0x7c] sm:$0xf] %vm1800_vm1, %v2084_v31 }
 0x375   : > { %1830 = vst.msk [vmem:[%s2895_s19 + $0x74] sm:$0xf] %vm1800_vm1, %v2082_v32 }
 0x376 PF: > { %s17_s24 = sadd.s32 1, %s2464_s24  }
 0x377   : > { %p14_p4 = scmp.ge.s32.totalorder %s17_s24, 4  }
 0x379   :  { %16 = sbr.rel (!%p14_p4) target bundleno = 1 (0x1), region = 78 }

// kernel: model_cnn_forward.35
= control target key start
LH: loop header
LB: loop body
LE: loop exit
PB: predicated region body
PF: predicated region fallthrough
CT: control target
= control target key end

     0   :  { %s6716_s12 = smov 0   ;;  %s8279_s0 = inlined_call_operand.vmem [shape: bf16[512,2156], index: 0, kind: input, shape index: {}]   ;;  %s8280_s1 = inlined_call_operand.vmem [shape: bf16[2156,32], index: 1, kind: input, shape index: {}]   ;;  %s8281_s2 = inlined_call_operand.vmem [shape: f32[1,32], index: 2, kind: input, shape index: {}]   ;;  %s8282_s3 = inlined_call_operand.vmem [shape: bf16[512,32], index: 3, kind: output, shape index: {}]  }
   0x1 LB: > { %s4663_s13 = sadd.s32 4294967295, %s6694_s12   ;;  %p4667_p0 = scmp.ge.s32.totalorder %s6694_s12, 1  ;;  %s6694_s12 = sphi %s6716_s12, %s13_s12  }
   0x2   : > { %p139_p1 = scmp.lt.s32.totalorder %s6694_s12, 3 }
   0x4   : > { %p140_p2 = pnand %p4667_p0, %p139_p1 }
   0x5   : > { %v6153_v0 = vld [vmem:[%s8280_s1 + $0x40] sm:$0xff] (!%p140_p2)   ;;  %s4668_s16 = sshll.u32 (!%p140_p2), %s4663_s13, 5  ;;  %v6155_v2 = vld [vmem:[%s8280_s1 + $0x48] sm:$0xff] (!%p140_p2)   ;;  %v6157_v4 = vld [vmem:[%s8280_s1 + $0x50] sm:$0xff] (!%p140_p2)   ;;  %vm2961_vm0 = vcmask (!%p140_p2), 1045504   ;;  %vm2912_vm1 = vcmask (!%p140_p2), 883712  }
   0x6   : > { %143 = sbr.rel (%p140_p2) target bundleno = 800 (0x320), region = 32  ;;  %v6154_v1 = vld [vmem:[%s8280_s1] sm:$0xff] (!%p140_p2)   ;;  %5162 = vmatprep.subr.bf16.mxu0 (!%p140_p2), %v6153_v0  ;;  %6127 = vmatprep.subr.bf16.mxu1 (!%p140_p2), %v6153_v0  ;;  %p165_p3 = scmp.lt.s32.totalorder (!%p140_p2), %s4668_s16, 63  ;;  %v6156_v3 = vld [vmem:[%s8280_s1 + $0x8] sm:$0xff] (!%p140_p2)   ;;  %v6158_v5 = vld [vmem:[%s8280_s1 + $0x10] sm:$0xff] (!%p140_p2)   ;;  %vm4574_vm2 = vcmask (!%p140_p2), 257024  }
   0x7   : > { %5163 = vmatpush3.bf16.msra.mxu0 (!%p140_p2), %v6154_v1  ;;  %6135 = vmatpush3.bf16.msra.mxu1 (!%p140_p2), %v6154_v1  ;;  %v6159_v6 = vld [vmem:[%s8280_s1 + $0x58] sm:$0xff] (!%p140_p2)   ;;  %v6161_v8 = vld [vmem:[%s8280_s1 + $0x60] sm:$0xff] (!%p140_p2)   ;;  %v6163_v10 = vld [vmem:[%s8280_s1 + $0x68] sm:$0xff] (!%p140_p2)  }
   0x8   : > { %5164 = vmatprep.subr.bf16.mxu0 (!%p140_p2), %v6155_v2  ;;  %6128 = vmatprep.subr.bf16.mxu1 (!%p140_p2), %v6155_v2  ;;  %v6160_v7 = vld [vmem:[%s8280_s1 + $0x18] sm:$0xff] (!%p140_p2)   ;;  %v6162_v9 = vld [vmem:[%s8280_s1 + $0x20] sm:$0xff] (!%p140_p2)   ;;  %v6164_v13 = vld [vmem:[%s8280_s1 + $0x28] sm:$0xff] (!%p140_p2)  }
   0x9   : > { %v6165_v14 = vld [vmem:[%s8280_s1 + $0x70] sm:$0xff] (!%p140_p2)   ;;  %v6167_v16 = vld [vmem:[%s8280_s1 + $0x78] sm:$0xff] (!%p140_p2)   ;;  %v6175_v18 = vld [vmem:[%s8280_s1 + $0xc0] sm:$0xff] (!%p140_p2)  }
   0xa   : > { %v6166_v15 = vld [vmem:[%s8280_s1 + $0x30] sm:$0xff] (!%p140_p2)   ;;  %v6168_v17 = vld [vmem:[%s8280_s1 + $0x38] sm:$0xff] (!%p140_p2)   ;;  %v6178_v21 = vld [vmem:[%s8280_s1 + $0x140] sm:$0xff] (!%p140_p2)  }
   0xb   : > { %5165 = vmatpush3.bf16.msra.mxu0 (!%p140_p2), %v6156_v3  ;;  %6136 = vmatpush3.bf16.msra.mxu1 (!%p140_p2), %v6156_v3  ;;  %v6176_v22 = vld [vmem:[%s8280_s1 + $0x80] sm:$0xff] (!%p140_p2)   ;;  %v6177_v23 = vld [vmem:[%s8280_s1 + $0xc8] sm:$0xff] (!%p140_p2)   ;;  %v6187_v31 = vld [vmem:[%s8280_s1 + $0xd0] sm:$0xff] (!%p140_p2)  }
   0xc   : > { %5166 = vmatprep.subr.bf16.mxu0 (!%p140_p2), %v6157_v4  ;;  %6129 = vmatprep.subr.bf16.mxu1 (!%p140_p2), %v6157_v4  ;;  %v6180_v24 = vld [vmem:[%s8280_s1 + $0x100] sm:$0xff] (!%p140_p2)   ;;  %v6179_v27 = vld [vmem:[%s8280_s1 + $0x88] sm:$0xff] (!%p140_p2)   ;;  %v6188_v32 = vld [vmem:[%s8280_s1 + $0x90] sm:$0xff] (!%p140_p2)  }
   0xd   : > { %s8284_s16 = smov (!%p165_p3, %s4668_s16), 63  ;;  %v6198_v28 = vld [vmem:[%s8280_s1 + $0x148] sm:$0xff]   ;;  %v6189_v34 = vld [vmem:[%s8280_s1 + $0xd8] sm:$0xff]   ;;  %v6197_v40 = vld [vmem:[%s8280_s1 + $0xe0] sm:$0xff]  }
   0xe   : > { %s6144_s29 = smul.u32 68, %s8284_s16  ;;  %v6200_v33 = vld [vmem:[%s8280_s1 + $0x108] sm:$0xff]   ;;  %v6190_v37 = vld [vmem:[%s8280_s1 + $0x98] sm:$0xff]   ;;  %v6199_v41 = vld [vmem:[%s8280_s1 + $0xa0] sm:$0xff]  }
   0xf   : > { %5167 = vmatpush3.bf16.msra.mxu0 %v6158_v5  ;;  %6137 = vmatpush3.bf16.msra.mxu1 %v6158_v5  ;;  %v6201_v42 = vld [vmem:[%s8280_s1 + $0xe8] sm:$0xff]   ;;  %v6212_v43 = vld [vmem:[%s8280_s1 + $0x150] sm:$0xff]   ;;  %v6211_v52 = vld [vmem:[%s8280_s1 + $0xf8] sm:$0xff]  }
  0x10   : > { %5168 = vmatprep.subr.bf16.mxu0 %v6159_v6  ;;  %6130 = vmatprep.subr.bf16.mxu1 %v6159_v6  ;;  %s6757_s9 = scalar_lea.vmem %s8279_s0, %s6144_s29  ;;  %v6214_v46 = vld [vmem:[%s8280_s1 + $0x110] sm:$0xff]   ;;  %v6202_v47 = vld [vmem:[%s8280_s1 + $0xa8] sm:$0xff]   ;;  %v6229_v55 = vld [vmem:[%s8280_s1 + $0x158] sm:$0xff]  }
  0x11   : > { %v6171_v11 = vld [vmem:[%s6757_s9 + $0x4] ss:$68 sps:$4 sm:$0xff]   ;;  %v6181_v25 = vld [vmem:[%s6757_s9 + $0x8c] ss:$68 sps:$4 sm:$0xff]   ;;  %v6191_v35 = vld [vmem:[%s6757_s9 + $0x114] ss:$68 sps:$4 sm:$0xff]  }
  0x12   : > { %v6174_v12 = vld [vmem:[%s6757_s9 + $0x664] ss:$68 sps:$4 sm:$0xff]   ;;  %2997 = vmatprep.mubr.bf16.mxu0 %v6171_v11  ;;  %v6183_v26 = vld [vmem:[%s6757_s9 + $0x6ec] ss:$68 sps:$4 sm:$0xff]   ;;  %v6193_v36 = vld [vmem:[%s6757_s9 + $0x774] ss:$68 sps:$4 sm:$0xff]  }
  0x13   : > { %5169 = vmatpush3.bf16.msra.mxu0 %v6160_v7  ;;  %6138 = vmatpush3.bf16.msra.mxu1 %v6160_v7  ;;  %v6169_v19 = vld [vmem:[%s6757_s9] ss:$68 sps:$4 sm:$0xff]   ;;  %v6185_v29 = vld [vmem:[%s6757_s9 + $0x88] ss:$68 sps:$4 sm:$0xff]   ;;  %v6195_v38 = vld [vmem:[%s6757_s9 + $0x110] ss:$68 sps:$4 sm:$0xff]  }
  0x14   : > { %5170 = vmatprep.subr.bf16.mxu0 %v6161_v8  ;;  %6131 = vmatprep.subr.bf16.mxu1 %v6161_v8  ;;  %v6172_v20 = vld [vmem:[%s6757_s9 + $0x660] ss:$68 sps:$4 sm:$0xff]   ;;  %v6186_v30 = vld [vmem:[%s6757_s9 + $0x6e8] ss:$68 sps:$4 sm:$0xff]   ;;  %v6196_v39 = vld [vmem:[%s6757_s9 + $0x770] ss:$68 sps:$4 sm:$0xff]  }
  0x15   : > { %3093 = vmatprep.mubr.bf16.mxu1 %v6174_v12  ;;  %v6203_v44 = vld [vmem:[%s6757_s9 + $0x19c] ss:$68 sps:$4 sm:$0xff]   ;;  %v6209_v48 = vld [vmem:[%s8280_s1 + $0xf0] sm:$0xff]   ;;  %v6215_v53 = vld [vmem:[%s6757_s9 + $0x224] ss:$68 sps:$4 sm:$0xff]  }
  0x16   : > { %v6205_v45 = vld [vmem:[%s6757_s9 + $0x7fc] ss:$68 sps:$4 sm:$0xff]   ;;  %v6210_v51 = vld [vmem:[%s8280_s1 + $0xb0] sm:$0xff]   ;;  %v6217_v58 = vld [vmem:[%s6757_s9 + $0x8] ss:$68 sps:$4 sm:$0xff]  }
  0x17   : > { %5171 = vmatpush3.bf16.msra.mxu0 %v6162_v9  ;;  %6139 = vmatpush3.bf16.msra.mxu1 %v6162_v9  ;;  %v6207_v49 = vld [vmem:[%s6757_s9 + $0x198] ss:$68 sps:$4 sm:$0xff]   ;;  %v6219_v54 = vld [vmem:[%s6757_s9 + $0xc] ss:$68 sps:$4 sm:$0xff]   ;;  %v6220_v59 = vld [vmem:[%s6757_s9 + $0x220] ss:$68 sps:$4 sm:$0xff]  }
  0x18   : > { %5172 = vmatprep.subr.bf16.mxu0 %v6163_v10  ;;  %6132 = vmatprep.subr.bf16.mxu1 %v6163_v10  ;;  %v6208_v50 = vld [vmem:[%s6757_s9 + $0x7f8] ss:$68 sps:$4 sm:$0xff]   ;;  %v6221_v60 = vld [vmem:[%s8280_s1 + $0x1c0] sm:$0xff]   ;;  %v6223_v62 = vld [vmem:[%s6757_s9 + $0x2ac] ss:$68 sps:$4 sm:$0xff]  }
  0x19   : > { %v6230_v56 = vld [vmem:[%s8280_s1 + $0x118] sm:$0xff]   ;;  %v6222_v61 = vld [vmem:[%s8280_s1 + $0x180] sm:$0xff]   ;;  %v6237_v1 = vld [vmem:[%s8280_s1 + $0x1c8] sm:$0xff]  }
  0x1a   : > { %v6213_v57 = vld [vmem:[%s8280_s1 + $0xb8] sm:$0xff]   ;;  %v6239_v0 = vld [vmem:[%s8280_s1 + $0x160] sm:$0xff]   ;;  %v6238_v3 = vld [vmem:[%s8280_s1 + $0x188] sm:$0xff]  }
  0x1b   : > { %5173 = vmatpush3.bf16.msra.mxu0 %v6164_v13  ;;  %6140 = vmatpush3.bf16.msra.mxu1 %v6164_v13  ;;  %v6225_v63 = vld [vmem:[%s6757_s9 + $0x94] ss:$68 sps:$4 sm:$0xff]   ;;  %v6240_v2 = vld [vmem:[%s8280_s1 + $0x120] sm:$0xff]   ;;  %v6227_v4 = vld [vmem:[%s6757_s9 + $0x2a8] ss:$68 sps:$4 sm:$0xff]  }
  0x1c   : > { %5174 = vmatprep.subr.bf16.mxu0 %v6165_v14  ;;  %6133 = vmatprep.subr.bf16.mxu1 %v6165_v14  ;;  %v6228_v5 = vld [vmem:[%s6757_s9 + $0x90] ss:$68 sps:$4 sm:$0xff]   ;;  %v6233_v7 = vld [vmem:[%s6757_s9 + $0x11c] ss:$68 sps:$4 sm:$0xff]   ;;  %v6253_v8 = vld [vmem:[%s8280_s1 + $0x168] sm:$0xff]  }
  0x1d   : > { %v6231_v6 = vld [vmem:[%s6757_s9 + $0x334] ss:$68 sps:$4 sm:$0xff]   ;;  %v6255_v10 = vld [vmem:[%s8280_s1 + $0x128] sm:$0xff]   ;;  %v6241_v14 = vld [vmem:[%s6757_s9 + $0x3bc] ss:$68 sps:$4 sm:$0xff]  }
  0x1e   : > { %v6254_v9 = vld [vmem:[%s8280_s1 + $0x1d0] sm:$0xff]   ;;  %v6236_v13 = vld [vmem:[%s6757_s9 + $0x118] ss:$68 sps:$4 sm:$0xff]  }
  0x1f   : > { %5175 = vmatpush3.bf16.msra.mxu0 %v6166_v15  ;;  %6141 = vmatpush3.bf16.msra.mxu1 %v6166_v15  ;;  %v6256_v11 = vld [vmem:[%s8280_s1 + $0x190] sm:$0xff]  }
  0x20   : > { %5176 = vmatprep.subr.bf16.mxu0 %v6167_v16  ;;  %6134 = vmatprep.subr.bf16.mxu1 %v6167_v16  ;;  %v6235_v12 = vld [vmem:[%s6757_s9 + $0x330] ss:$68 sps:$4 sm:$0xff]  }
  0x21   : > { %v6263_v15 = vld [vmem:[%s8280_s1 + $0x170] sm:$0xff]  }
  0x22   : > { %v6264_v16 = vld [vmem:[%s8280_s1 + $0x130] sm:$0xff]  }
  0x23   : > { %5177 = vmatpush3.bf16.msra.mxu0 %v6168_v17  ;;  %6142 = vmatpush3.bf16.msra.mxu1 %v6168_v17  ;;  %v6243_v17 = vld [vmem:[%s6757_s9 + $0x1a4] ss:$68 sps:$4 sm:$0xff]  }
  0x24   : > { %5274 = vmatprep.subr.bf16.mxu1 %v6175_v18  ;;  %5386 = vmatprep.subr.bf16.mxu0 %v6178_v21  ;;  %v6271_v18 = vld [vmem:[%s8280_s1 + $0x1d8] sm:$0xff]   ;;  %v6246_v21 = vld [vmem:[%s6757_s9 + $0x1a0] ss:$68 sps:$4 sm:$0xff]  }
  0x26   : > { %2998 = vmatmul.mubr.bf16.vlgmr.msra.gmra.mrb[0].mxu0 %v6169_v19  ;;  %3094 = vmatmul.mubr.bf16.vlgmr.msra.gmra.mrb[0].mxu1 %v6172_v20  ;;  %v6272_v19 = vld [vmem:[%s8280_s1 + $0x198] sm:$0xff]  }
  0x27   : > { %5275 = vmatpush3.bf16.msra.mxu1 %v6176_v22  ;;  %5387 = vmatpush3.bf16.msra.mxu0 %v6180_v24  ;;  %v6245_v20 = vld [vmem:[%s6757_s9 + $0x3b8] ss:$68 sps:$4 sm:$0xff]   ;;  %v6247_v22 = vld [vmem:[%s6757_s9 + $0x444] ss:$68 sps:$4 sm:$0xff]  }
  0x28   : > { %5276 = vmatprep.subr.bf16.mxu1 %v6177_v23  ;;  %3005 = vmatprep.mubr.bf16.mxu0 %v6181_v25  ;;  %v6249_v23 = vld [vmem:[%s6757_s9 + $0x22c] ss:$68 sps:$4 sm:$0xff]   ;;  %v6279_v24 = vld [vmem:[%s8280_s1 + $0x178] sm:$0xff]  }
  0x29   : > { %3101 = vmatprep.mubr.bf16.mxu1 %v6183_v26  ;;  %5388 = vmatprep.subr.bf16.mxu0 %v6198_v28  ;;  %v6280_v25 = vld [vmem:[%s8280_s1 + $0x138] sm:$0xff]   ;;  %v6287_v26 = vld [vmem:[%s8280_s1 + $0x1e0] sm:$0xff]   ;;  %v6252_v28 = vld [vmem:[%s6757_s9 + $0x228] ss:$68 sps:$4 sm:$0xff]  }
  0x2b   : > { %5277 = vmatpush3.bf16.msra.mxu1 %v6179_v27  ;;  %5389 = vmatpush3.bf16.msra.mxu0 %v6200_v33  ;;  %v6251_v27 = vld [vmem:[%s6757_s9 + $0x440] ss:$68 sps:$4 sm:$0xff]   ;;  %v6261_v33 = vld [vmem:[%s6757_s9 + $0x4c8] ss:$68 sps:$4 sm:$0xff]  }
  0x2c   : > { %5278 = vmatprep.subr.bf16.mxu1 %v6187_v31  ;;  %5390 = vmatprep.subr.bf16.mxu0 %v6212_v43  ;;  %v6257_v31 = vld [vmem:[%s6757_s9 + $0x4cc] ss:$68 sps:$4 sm:$0xff]  }
  0x2d   : > { %v6319_v43 = vld [vmem:[%s8280_s1 + $0x1f0] sm:$0xff]  }
  0x2e   : > { %3006 = vmatmul.mubr.bf16.gmra.mrb[4].mxu0 %v6185_v29  ;;  %3102 = vmatmul.mubr.bf16.gmra.mrb[4].mxu1 %v6186_v30  ;;  %v6288_v29 = vld [vmem:[%s8280_s1 + $0x1a0] sm:$0xff]  }
  0x2f   : > { %5279 = vmatpush3.bf16.msra.mxu1 %v6188_v32  ;;  %3013 = vmatprep.mubr.bf16.mxu0 %v6191_v35  ;;  %v6289_v30 = vld [vmem:[%s8280_s1 + $0x240] sm:$0xff]   ;;  %v6259_v32 = vld [vmem:[%s6757_s9 + $0x2b4] ss:$68 sps:$4 sm:$0xff]   ;;  %v6303_v35 = vld [vmem:[%s8280_s1 + $0x1e8] sm:$0xff]  }
  0x30   : > { %5280 = vmatprep.subr.bf16.mxu1 %v6189_v34  ;;  %3109 = vmatprep.mubr.bf16.mxu1 %v6193_v36  ;;  %v6262_v34 = vld [vmem:[%s6757_s9 + $0x2b0] ss:$68 sps:$4 sm:$0xff]   ;;  %v6304_v36 = vld [vmem:[%s8280_s1 + $0x1a8] sm:$0xff]  }
  0x31   : > { %5391 = vmatpush3.bf16.msra.mxu0 %v6214_v46  ;;  %v6278_v46 = vld [vmem:[%s6757_s9 + $0x3c0] ss:$68 sps:$4 sm:$0xff]  }
  0x32   : > { %5392 = vmatprep.subr.bf16.mxu0 %v6229_v55  ;;  %v6293_v55 = vld [vmem:[%s6757_s9 + $0x9c] ss:$68 sps:$4 sm:$0xff]  }
  0x33   : > { %5281 = vmatpush3.bf16.msra.mxu1 %v6190_v37  ;;  %v6265_v37 = vld [vmem:[%s6757_s9 + $0x554] ss:$68 sps:$4 sm:$0xff]  }
  0x34   : > { %5282 = vmatprep.subr.bf16.mxu1 %v6197_v40  ;;  %v6270_v40 = vld [vmem:[%s6757_s9 + $0x338] ss:$68 sps:$4 sm:$0xff]  }
  0x35   : > { %5393 = vmatpush3.bf16.msra.mxu0 %v6230_v56  ;;  %v6305_v56 = vld [vmem:[%s8280_s1 + $0x248] sm:$0xff]  }
  0x36   : > { %3014 = vmatmul.mubr.bf16.gmra.mrb[8].mxu0 %v6195_v38  ;;  %3110 = vmatmul.mubr.bf16.gmra.mrb[8].mxu1 %v6196_v39  ;;  %v6267_v38 = vld [vmem:[%s6757_s9 + $0x33c] ss:$68 sps:$4 sm:$0xff]   ;;  %v6269_v39 = vld [vmem:[%s6757_s9 + $0x550] ss:$68 sps:$4 sm:$0xff]  }
  0x37   : > { %5283 = vmatpush3.bf16.msra.mxu1 %v6199_v41  ;;  %3021 = vmatprep.mubr.bf16.mxu0 %v6203_v44  ;;  %v6273_v41 = vld [vmem:[%s6757_s9 + $0x5dc] ss:$68 sps:$4 sm:$0xff]   ;;  %v6320_v44 = vld [vmem:[%s8280_s1 + $0x1b0] sm:$0xff]  }
  0x38   : > { %5284 = vmatprep.subr.bf16.mxu1 %v6201_v42  ;;  %3117 = vmatprep.mubr.bf16.mxu1 %v6205_v45  ;;  %v6275_v42 = vld [vmem:[%s6757_s9 + $0x3c4] ss:$68 sps:$4 sm:$0xff]   ;;  %v6277_v45 = vld [vmem:[%s6757_s9 + $0x5d8] ss:$68 sps:$4 sm:$0xff]  }
  0x39   : > { %5394 = vmatprep.subr.bf16.mxu0 %v6239_v0  ;;  %v6322_v0 = vld [vmem:[%s8280_s1 + $0x210] sm:$0xff]  }
  0x3a   : > { %5395 = vmatpush3.bf16.msra.mxu0 %v6240_v2  ;;  %v6301_v2 = vld [vmem:[%s6757_s9 + $0x558] ss:$68 sps:$4 sm:$0xff]  }
  0x3b   : > { %5285 = vmatpush3.bf16.msra.mxu1 %v6202_v47  ;;  %5396 = vmatprep.subr.bf16.mxu0 %v6253_v8  ;;  %v6281_v47 = vld [vmem:[%s6757_s9 + $0x44c] ss:$68 sps:$4 sm:$0xff]   ;;  %v6354_v8 = vld [vmem:[%s8280_s1 + $0x220] sm:$0xff]  }
  0x3c   : > { %5286 = vmatprep.subr.bf16.mxu1 %v6209_v48  ;;  %v6285_v48 = vld [vmem:[%s6757_s9 + $0x14] ss:$68 sps:$4 sm:$0xff]  }
  0x3e   : > { %3022 = vmatmul.mubr.bf16.gmra.mrb[12].mxu0 %v6207_v49  ;;  %3118 = vmatmul.mubr.bf16.gmra.mrb[12].mxu1 %v6208_v50  ;;  %v6335_v49 = vld [vmem:[%s8280_s1 + $0x1f8] sm:$0xff]  }
  0x3f   : > { %5287 = vmatpush3.bf16.msra.mxu1 %v6210_v51  ;;  %3029 = vmatprep.mubr.bf16.mxu0 %v6215_v53  ;;  %v6336_v50 = vld [vmem:[%s8280_s1 + $0x1b8] sm:$0xff]   ;;  %v6283_v51 = vld [vmem:[%s6757_s9 + $0x10] ss:$68 sps:$4 sm:$0xff]   ;;  %v6290_v53 = vld [vmem:[%s8280_s1 + $0x200] sm:$0xff]  }
  0x40   : > { %5288 = vmatprep.subr.bf16.mxu1 %v6211_v52  ;;  %3158 = vmatprep.mubr.bf16.mxu1 %v6219_v54  ;;  %v6286_v52 = vld [vmem:[%s6757_s9 + $0x448] ss:$68 sps:$4 sm:$0xff]   ;;  %v6291_v54 = vld [vmem:[%s6757_s9 + $0x4d4] ss:$68 sps:$4 sm:$0xff]  }
  0x41   : > { %5397 = vmatpush3.bf16.msra.mxu0 %v6255_v10  ;;  %v6311_v10 = vld [vmem:[%s6757_s9 + $0x5e0] ss:$68 sps:$4 sm:$0xff]  }
  0x42   : > { %5398 = vmatprep.subr.bf16.mxu0 %v6263_v15  ;;  %v6315_v15 = vld [vmem:[%s6757_s9 + $0x234] ss:$68 sps:$4 sm:$0xff]  }
  0x43   : > { %5289 = vmatpush3.bf16.msra.mxu1 %v6213_v57  ;;  %v6351_v57 = vld [vmem:[%s8280_s1 + $0x2c0] sm:$0xff]  }
  0x44   : > { %5498 = vmatprep.subr.bf16.mxu1 %v6221_v60  ;;  %v6295_v60 = vld [vmem:[%s6757_s9 + $0x4d0] ss:$68 sps:$4 sm:$0xff]  }
  0x45   : > { %5399 = vmatpush3.bf16.msra.mxu0 %v6264_v16  ;;  %v6386_v16 = vld [vmem:[%s8280_s1 + $0x230] sm:$0xff]  }
  0x46   : > { %3030 = vmatmul.mubr.bf16.gmra.mrb[16].mxu0 %v6220_v59  ;;  %3159 = vmatmul.mubr.bf16.vlgmr.msra.gmra.mrb[16].mxu1 %v6217_v58  ;;  %v6306_v58 = vld [vmem:[%s8280_s1 + $0x208] sm:$0xff]   ;;  %v6321_v59 = vld [vmem:[%s8280_s1 + $0x250] sm:$0xff]  }
  0x47   : > { %5499 = vmatpush3.bf16.msra.mxu1 %v6222_v61  ;;  %3037 = vmatprep.mubr.bf16.mxu0 %v6223_v62  ;;  %v6296_v61 = vld [vmem:[%s6757_s9 + $0x98] ss:$68 sps:$4 sm:$0xff]  }
  0x48   : > { %3166 = vmatprep.mubr.bf16.mxu1 %v6225_v63  ;;  %5500 = vmatprep.subr.bf16.mxu1 %v6237_v1  ;;  %v6297_v62 = vld [vmem:[%s6757_s9 + $0x55c] ss:$68 sps:$4 sm:$0xff]   ;;  %v6299_v63 = vld [vmem:[%s6757_s9 + $0x124] ss:$68 sps:$4 sm:$0xff]  }
  0x49   : > { %5400 = vmatprep.subr.bf16.mxu0 %v6279_v24  ;;  %v6337_v1 = vld [vmem:[%s8280_s1 + $0x258] sm:$0xff]  }
  0x4a   : > { %5401 = vmatpush3.bf16.msra.mxu0 %v6280_v25  ;;  %v6328_v24 = vld [vmem:[%s6757_s9 + $0x2b8] ss:$68 sps:$4 sm:$0xff]  }
  0x4b   : > { %5501 = vmatpush3.bf16.msra.mxu1 %v6238_v3  ;;  %5610 = vmatprep.subr.bf16.mxu0 %v6289_v30  ;;  %v6338_v3 = vld [vmem:[%s8280_s1 + $0x218] sm:$0xff]   ;;  %v6339_v30 = vld [vmem:[%s6757_s9 + $0x804] ss:$68 sps:$4 sm:$0xff]  }
  0x4c   : > { %5502 = vmatprep.subr.bf16.mxu1 %v6254_v9  ;;  %v6369_v9 = vld [vmem:[%s8280_s1 + $0x268] sm:$0xff]   ;;  %v6329_v25 = vld [vmem:[%s6757_s9 + $0x77c] ss:$68 sps:$4 sm:$0xff]  }
  0x4e   : > { %3038 = vmatmul.mubr.bf16.gmra.mrb[20].mxu0 %v6227_v4  ;;  %3167 = vmatmul.mubr.bf16.gmra.mrb[20].mxu1 %v6228_v5  ;;  %v6353_v4 = vld [vmem:[%s8280_s1 + $0x260] sm:$0xff]  }
  0x4f   : > { %3045 = vmatprep.mubr.bf16.mxu0 %v6231_v6  ;;  %3174 = vmatprep.mubr.bf16.mxu1 %v6233_v7  ;;  %v6302_v5 = vld [vmem:[%s6757_s9 + $0x120] ss:$68 sps:$4 sm:$0xff]   ;;  %v6309_v7 = vld [vmem:[%s6757_s9 + $0x1ac] ss:$68 sps:$4 sm:$0xff]  }
  0x50   : > { %5503 = vmatpush3.bf16.msra.mxu1 %v6256_v11  ;;  %v6307_v6 = vld [vmem:[%s6757_s9 + $0x5e4] ss:$68 sps:$4 sm:$0xff]  }
  0x51   : > { %5504 = vmatprep.subr.bf16.mxu1 %v6271_v18  ;;  %v6312_v11 = vld [vmem:[%s6757_s9 + $0x1a8] ss:$68 sps:$4 sm:$0xff]   ;;  %v6318_v18 = vld [vmem:[%s6757_s9 + $0x230] ss:$68 sps:$4 sm:$0xff]  }
  0x54   : > { %5505 = vmatpush3.bf16.msra.mxu1 %v6272_v19  ;;  %v6323_v19 = vld [vmem:[%s6757_s9 + $0x6f4] ss:$68 sps:$4 sm:$0xff]  }
  0x55   : > { %5506 = vmatprep.subr.bf16.mxu1 %v6287_v26  ;;  %v6331_v26 = vld [vmem:[%s6757_s9 + $0x344] ss:$68 sps:$4 sm:$0xff]  }
  0x56   : > { %3046 = vmatmul.mubr.bf16.gmra.mrb[24].mxu0 %v6235_v12  ;;  %3175 = vmatmul.mubr.bf16.gmra.mrb[24].mxu1 %v6236_v13  ;;  %v6370_v12 = vld [vmem:[%s8280_s1 + $0x228] sm:$0xff]   ;;  %v6385_v13 = vld [vmem:[%s8280_s1 + $0x270] sm:$0xff]  }
  0x57   : > { %3053 = vmatprep.mubr.bf16.mxu0 %v6241_v14  ;;  %3182 = vmatprep.mubr.bf16.mxu1 %v6243_v17  ;;  %v6313_v14 = vld [vmem:[%s6757_s9 + $0x66c] ss:$68 sps:$4 sm:$0xff]  }
  0x58   : > { %5507 = vmatpush3.bf16.msra.mxu1 %v6288_v29  ;;  %v6317_v17 = vld [vmem:[%s6757_s9 + $0x668] ss:$68 sps:$4 sm:$0xff]   ;;  %v6334_v29 = vld [vmem:[%s6757_s9 + $0x340] ss:$68 sps:$4 sm:$0xff]  }
  0x59   : > { %5508 = vmatprep.subr.bf16.mxu1 %v6303_v35  ;;  %v6349_v35 = vld [vmem:[%s6757_s9 + $0x1c] ss:$68 sps:$4 sm:$0xff]  }
  0x5c   : > { %5509 = vmatpush3.bf16.msra.mxu1 %v6304_v36  ;;  %v6347_v36 = vld [vmem:[%s6757_s9 + $0x18] ss:$68 sps:$4 sm:$0xff]  }
  0x5d   : > { %5510 = vmatprep.subr.bf16.mxu1 %v6319_v43  ;;  %v6383_v43 = vld [vmem:[%s8280_s1 + $0x2d0] sm:$0xff]  }
  0x5e   : > { %3054 = vmatmul.mubr.bf16.gmra.mrb[28].mxu0 %v6245_v20  ;;  %3183 = vmatmul.mubr.bf16.gmra.mrb[28].mxu1 %v6246_v21  ;;  %v6325_v20 = vld [vmem:[%s6757_s9 + $0x2bc] ss:$68 sps:$4 sm:$0xff]  }
  0x5f   : > { %3061 = vmatprep.mubr.bf16.mxu0 %v6247_v22  ;;  %3190 = vmatprep.mubr.bf16.mxu1 %v6249_v23  ;;  %v6401_v21 = vld [vmem:[%s8280_s1 + $0x278] sm:$0xff]   ;;  %v6327_v23 = vld [vmem:[%s6757_s9 + $0x6f0] ss:$68 sps:$4 sm:$0xff]  }
  0x60   : > { %5511 = vmatpush3.bf16.msra.mxu1 %v6320_v44  ;;  %v6402_v22 = vld [vmem:[%s8280_s1 + $0x238] sm:$0xff]  }
  0x61   : > { %5512 = vmatprep.subr.bf16.mxu1 %v6335_v49  ;;  %v6359_v44 = vld [vmem:[%s6757_s9 + $0x4d8] ss:$68 sps:$4 sm:$0xff]  }
  0x62   : > { %v6399_v49 = vld [vmem:[%s8280_s1 + $0x2d8] sm:$0xff]  }
  0x64   : > { %5513 = vmatpush3.bf16.msra.mxu1 %v6336_v50  ;;  %v6365_v50 = vld [vmem:[%s6757_s9 + $0x560] ss:$68 sps:$4 sm:$0xff]  }
  0x65   : > { %5722 = vmatprep.subr.bf16.mxu1 %v6351_v57  ;;  %v6431_v57 = vld [vmem:[%s8280_s1 + $0x2e8] sm:$0xff]  }
  0x66   : > { %3062 = vmatmul.mubr.bf16.gmra.mrb[32].mxu0 %v6251_v27  ;;  %3191 = vmatmul.mubr.bf16.gmra.mrb[32].mxu1 %v6252_v28  ;;  %v6417_v27 = vld [vmem:[%s8280_s1 + $0x340] sm:$0xff]   ;;  %v6333_v28 = vld [vmem:[%s6757_s9 + $0x778] ss:$68 sps:$4 sm:$0xff]  }
  0x67   : > { %3069 = vmatprep.mubr.bf16.mxu0 %v6257_v31  ;;  %3198 = vmatprep.mubr.bf16.mxu1 %v6259_v32  ;;  %v6341_v31 = vld [vmem:[%s6757_s9 + $0x3cc] ss:$68 sps:$4 sm:$0xff]   ;;  %v6343_v32 = vld [vmem:[%s6757_s9 + $0x800] ss:$68 sps:$4 sm:$0xff]  }
  0x6e   : > { %3070 = vmatmul.mubr.bf16.gmra.mrb[36].mxu0 %v6261_v33  ;;  %3199 = vmatmul.mubr.bf16.gmra.mrb[36].mxu1 %v6262_v34  ;;  %v6344_v33 = vld [vmem:[%s6757_s9 + $0x3c8] ss:$68 sps:$4 sm:$0xff]   ;;  %v6345_v34 = vld [vmem:[%s6757_s9 + $0x454] ss:$68 sps:$4 sm:$0xff]  }
  0x6f   : > { %3077 = vmatprep.mubr.bf16.mxu0 %v6265_v37  ;;  %3206 = vmatprep.mubr.bf16.mxu1 %v6267_v38  ;;  %v6350_v37 = vld [vmem:[%s6757_s9 + $0x450] ss:$68 sps:$4 sm:$0xff]   ;;  %v6352_v38 = vld [vmem:[%s8280_s1 + $0x280] sm:$0xff]  }
  0x76   : > { %3078 = vmatmul.mubr.bf16.gmra.mrb[40].mxu0 %v6269_v39  ;;  %3207 = vmatmul.mubr.bf16.gmra.mrb[40].mxu1 %v6270_v40  ;;  %v6355_v39 = vld [vmem:[%s6757_s9 + $0x4dc] ss:$68 sps:$4 sm:$0xff]   ;;  %v6357_v40 = vld [vmem:[%s6757_s9 + $0xa4] ss:$68 sps:$4 sm:$0xff]  }
  0x77   : > { %3085 = vmatprep.mubr.bf16.mxu0 %v6273_v41  ;;  %3214 = vmatprep.mubr.bf16.mxu1 %v6275_v42  ;;  %v6367_v41 = vld [vmem:[%s8280_s1 + $0x2c8] sm:$0xff]  }
  0x78   : > { %v6368_v42 = vld [vmem:[%s8280_s1 + $0x288] sm:$0xff]  }
  0x7e   : > { %3086 = vmatmul.mubr.bf16.gmra.mrb[44].mxu0 %v6277_v45  ;;  %3215 = vmatmul.mubr.bf16.gmra.mrb[44].mxu1 %v6278_v46  ;;  %v6360_v45 = vld [vmem:[%s6757_s9 + $0xa0] ss:$68 sps:$4 sm:$0xff]  }
  0x7f   : > { %3222 = vmatprep.mubr.bf16.mxu1 %v6281_v47  ;;  %3319 = vmatprep.mubr.bf16.mxu0 %v6285_v48  ;;  %v6361_v46 = vld [vmem:[%s6757_s9 + $0x564] ss:$68 sps:$4 sm:$0xff]   ;;  %v6363_v47 = vld [vmem:[%s6757_s9 + $0x12c] ss:$68 sps:$4 sm:$0xff]  }
  0x80   : > { %v6384_v48 = vld [vmem:[%s8280_s1 + $0x290] sm:$0xff]  }
  0x86   : > { %3223 = vmatmul.mubr.bf16.gmra.mrb[48].mxu1 %v6286_v52  ;;  %3320 = vmatmul.mubr.bf16.vlgmr.msra.gmra.mrb[48].mxu0 %v6283_v51  ;;  %v6366_v51 = vld [vmem:[%s6757_s9 + $0x128] ss:$68 sps:$4 sm:$0xff]   ;;  %v6400_v52 = vld [vmem:[%s8280_s1 + $0x298] sm:$0xff]  }
  0x87   : > { %5611 = vmatpush3.bf16.msra.mxu0 %v6290_v53  ;;  %3230 = vmatprep.mubr.bf16.mxu1 %v6291_v54  ;;  %v6415_v53 = vld [vmem:[%s8280_s1 + $0x2e0] sm:$0xff]   ;;  %v6371_v54 = vld [vmem:[%s6757_s9 + $0x5ec] ss:$68 sps:$4 sm:$0xff]  }
  0x88   : > { %3327 = vmatprep.mubr.bf16.mxu0 %v6293_v55  ;;  %5612 = vmatprep.subr.bf16.mxu0 %v6305_v56  ;;  %v6373_v55 = vld [vmem:[%s6757_s9 + $0x1b4] ss:$68 sps:$4 sm:$0xff]   ;;  %v6416_v56 = vld [vmem:[%s8280_s1 + $0x2a0] sm:$0xff]  }
  0x8b   : > { %5613 = vmatpush3.bf16.msra.mxu0 %v6306_v58  ;;  %v6375_v58 = vld [vmem:[%s6757_s9 + $0x5e8] ss:$68 sps:$4 sm:$0xff]  }
  0x8c   : > { %5614 = vmatprep.subr.bf16.mxu0 %v6321_v59  ;;  %v6376_v59 = vld [vmem:[%s6757_s9 + $0x1b0] ss:$68 sps:$4 sm:$0xff]  }
  0x8e   : > { %3231 = vmatmul.mubr.bf16.gmra.mrb[52].mxu1 %v6295_v60  ;;  %3328 = vmatmul.mubr.bf16.gmra.mrb[52].mxu0 %v6296_v61  ;;  %v6432_v60 = vld [vmem:[%s8280_s1 + $0x2a8] sm:$0xff]   ;;  %v6377_v61 = vld [vmem:[%s6757_s9 + $0x674] ss:$68 sps:$4 sm:$0xff]  }
  0x8f   : > { %3238 = vmatprep.mubr.bf16.mxu1 %v6297_v62  ;;  %3335 = vmatprep.mubr.bf16.mxu0 %v6299_v63  ;;  %v6447_v62 = vld [vmem:[%s8280_s1 + $0x2f0] sm:$0xff]   ;;  %v6379_v63 = vld [vmem:[%s6757_s9 + $0x23c] ss:$68 sps:$4 sm:$0xff]  }
  0x90   : > { %5615 = vmatpush3.bf16.msra.mxu0 %v6322_v0  ;;  %v6448_v0 = vld [vmem:[%s8280_s1 + $0x2b0] sm:$0xff]  }
  0x91   : > { %5616 = vmatprep.subr.bf16.mxu0 %v6337_v1  ;;  %v6463_v1 = vld [vmem:[%s8280_s1 + $0x2f8] sm:$0xff]  }
  0x94   : > { %5617 = vmatpush3.bf16.msra.mxu0 %v6338_v3  ;;  %v6479_v3 = vld [vmem:[%s8280_s1 + $0x3c0] sm:$0xff]  }
  0x95   : > { %5618 = vmatprep.subr.bf16.mxu0 %v6353_v4  ;;  %v6381_v4 = vld [vmem:[%s6757_s9 + $0x670] ss:$68 sps:$4 sm:$0xff]  }
  0x96   : > { %3239 = vmatmul.mubr.bf16.gmra.mrb[56].mxu1 %v6301_v2  ;;  %3336 = vmatmul.mubr.bf16.gmra.mrb[56].mxu0 %v6302_v5  ;;  %v6464_v2 = vld [vmem:[%s8280_s1 + $0x2b8] sm:$0xff]  }
  0x97   : > { %3246 = vmatprep.mubr.bf16.mxu1 %v6307_v6  ;;  %3343 = vmatprep.mubr.bf16.mxu0 %v6309_v7  ;;  %v6382_v5 = vld [vmem:[%s6757_s9 + $0x238] ss:$68 sps:$4 sm:$0xff]   ;;  %v6389_v7 = vld [vmem:[%s6757_s9 + $0x2c4] ss:$68 sps:$4 sm:$0xff]  }
  0x98   : > { %5619 = vmatpush3.bf16.msra.mxu0 %v6354_v8  ;;  %v6387_v6 = vld [vmem:[%s6757_s9 + $0x6fc] ss:$68 sps:$4 sm:$0xff]  }
  0x99   : > { %5620 = vmatprep.subr.bf16.mxu0 %v6369_v9  ;;  %v6391_v8 = vld [vmem:[%s6757_s9 + $0x6f8] ss:$68 sps:$4 sm:$0xff]   ;;  %v6392_v9 = vld [vmem:[%s6757_s9 + $0x2c0] ss:$68 sps:$4 sm:$0xff]  }
  0x9c   : > { %5621 = vmatpush3.bf16.msra.mxu0 %v6370_v12  ;;  %v6397_v12 = vld [vmem:[%s6757_s9 + $0x780] ss:$68 sps:$4 sm:$0xff]  }
  0x9d   : > { %5622 = vmatprep.subr.bf16.mxu0 %v6385_v13  ;;  %v6398_v13 = vld [vmem:[%s6757_s9 + $0x348] ss:$68 sps:$4 sm:$0xff]  }
  0x9e   : > { %3247 = vmatmul.mubr.bf16.gmra.mrb[60].mxu1 %v6311_v10  ;;  %3344 = vmatmul.mubr.bf16.gmra.mrb[60].mxu0 %v6312_v11  ;;  %v6393_v10 = vld [vmem:[%s6757_s9 + $0x784] ss:$68 sps:$4 sm:$0xff]   ;;  %v6395_v11 = vld [vmem:[%s6757_s9 + $0x34c] ss:$68 sps:$4 sm:$0xff]  }
  0x9f   : > { %3254 = vmatprep.mubr.bf16.mxu1 %v6313_v14  ;;  %3351 = vmatprep.mubr.bf16.mxu0 %v6315_v15  ;;  %v6403_v14 = vld [vmem:[%s6757_s9 + $0x80c] ss:$68 sps:$4 sm:$0xff]   ;;  %v6405_v15 = vld [vmem:[%s6757_s9 + $0x3d4] ss:$68 sps:$4 sm:$0xff]  }
  0xa0   : > { %5623 = vmatpush3.bf16.msra.mxu0 %v6386_v16  ;;  %v6407_v16 = vld [vmem:[%s6757_s9 + $0x808] ss:$68 sps:$4 sm:$0xff]  }
  0xa1   : > { %5624 = vmatprep.subr.bf16.mxu0 %v6401_v21 }
  0xa4   : > { %5625 = vmatpush3.bf16.msra.mxu0 %v6402_v22 }
  0xa5   : > { %5834 = vmatprep.subr.bf16.mxu0 %v6417_v27  ;;  %v6413_v27 = vld [vmem:[%s6757_s9 + $0x24] ss:$68 sps:$4 sm:$0xff]  }
  0xa6   : > { %3255 = vmatmul.mubr.bf16.gmra.mrb[64].mxu1 %v6317_v17  ;;  %3352 = vmatmul.mubr.bf16.gmra.mrb[64].mxu0 %v6318_v18  ;;  %v6408_v17 = vld [vmem:[%s6757_s9 + $0x3d0] ss:$68 sps:$4 sm:$0xff]  }
  0xa7   : > { %3262 = vmatprep.mubr.bf16.mxu1 %v6323_v19  ;;  %3359 = vmatprep.mubr.bf16.mxu0 %v6325_v20 }
  0xae   : > { %3263 = vmatmul.mubr.bf16.gmra.mrb[68].mxu1 %v6327_v23  ;;  %3360 = vmatmul.mubr.bf16.gmra.mrb[68].mxu0 %v6328_v24 }
  0xaf   : > { %3270 = vmatprep.mubr.bf16.mxu1 %v6329_v25  ;;  %3367 = vmatprep.mubr.bf16.mxu0 %v6331_v26  ;;  %v6409_v26 = vld [vmem:[%s6757_s9 + $0x45c] ss:$68 sps:$4 sm:$0xff]  }
  0xb6   : > { %3271 = vmatmul.mubr.bf16.gmra.mrb[72].mxu1 %v6333_v28  ;;  %3368 = vmatmul.mubr.bf16.gmra.mrb[72].mxu0 %v6334_v29 }
  0xb7   : > { %3278 = vmatprep.mubr.bf16.mxu1 %v6339_v30  ;;  %3375 = vmatprep.mubr.bf16.mxu0 %v6341_v31 }
  0xbe   : > { %3279 = vmatmul.mubr.bf16.gmra.mrb[76].mxu1 %v6343_v32  ;;  %3376 = vmatmul.mubr.bf16.gmra.mrb[76].mxu0 %v6344_v33  ;;  %v6411_v32 = vld [vmem:[%s6757_s9 + $0x20] ss:$68 sps:$4 sm:$0xff]   ;;  %v6414_v33 = vld [vmem:[%s6757_s9 + $0x458] ss:$68 sps:$4 sm:$0xff]  }
  0xbf   : > { %3383 = vmatprep.mubr.bf16.mxu0 %v6345_v34  ;;  %3480 = vmatprep.mubr.bf16.mxu1 %v6349_v35 }
  0xc6   : > { %3384 = vmatmul.mubr.bf16.gmra.mrb[80].mxu0 %v6350_v37  ;;  %3481 = vmatmul.mubr.bf16.vlgmr.msra.gmra.mrb[80].mxu1 %v6347_v36 }
  0xc7   : > { %5723 = vmatpush3.bf16.msra.mxu1 %v6352_v38  ;;  %3391 = vmatprep.mubr.bf16.mxu0 %v6355_v39 }
  0xc8   : > { %3488 = vmatprep.mubr.bf16.mxu1 %v6357_v40  ;;  %5724 = vmatprep.subr.bf16.mxu1 %v6367_v41 }
  0xcb   : > { %5725 = vmatpush3.bf16.msra.mxu1 %v6368_v42  ;;  %v6418_v42 = vld [vmem:[%s8280_s1 + $0x300] sm:$0xff]  }
  0xcc   : > { %5726 = vmatprep.subr.bf16.mxu1 %v6383_v43  ;;  %v6419_v43 = vld [vmem:[%s6757_s9 + $0x4e4] ss:$68 sps:$4 sm:$0xff]  }
  0xce   : > { %3392 = vmatmul.mubr.bf16.gmra.mrb[84].mxu0 %v6359_v44  ;;  %3489 = vmatmul.mubr.bf16.gmra.mrb[84].mxu1 %v6360_v45 }
  0xcf   : > { %3399 = vmatprep.mubr.bf16.mxu0 %v6361_v46  ;;  %3496 = vmatprep.mubr.bf16.mxu1 %v6363_v47  ;;  %v6421_v46 = vld [vmem:[%s6757_s9 + $0xac] ss:$68 sps:$4 sm:$0xff]  }
  0xd0   : > { %5727 = vmatpush3.bf16.msra.mxu1 %v6384_v48  ;;  %v6433_v47 = vld [vmem:[%s8280_s1 + $0x348] sm:$0xff]  }
  0xd1   : > { %5728 = vmatprep.subr.bf16.mxu1 %v6399_v49 }
  0xd4   : > { %5729 = vmatpush3.bf16.msra.mxu1 %v6400_v52  ;;  %v6423_v52 = vld [vmem:[%s6757_s9 + $0x4e0] ss:$68 sps:$4 sm:$0xff]  }
  0xd5   : > { %5730 = vmatprep.subr.bf16.mxu1 %v6415_v53  ;;  %v6424_v53 = vld [vmem:[%s6757_s9 + $0xa8] ss:$68 sps:$4 sm:$0xff]  }
  0xd6   : > { %3400 = vmatmul.mubr.bf16.gmra.mrb[88].mxu0 %v6365_v50  ;;  %3497 = vmatmul.mubr.bf16.gmra.mrb[88].mxu1 %v6366_v51  ;;  %v6434_v50 = vld [vmem:[%s8280_s1 + $0x308] sm:$0xff]   ;;  %v6449_v51 = vld [vmem:[%s8280_s1 + $0x350] sm:$0xff]  }
  0xd7   : > { %3407 = vmatprep.mubr.bf16.mxu0 %v6371_v54  ;;  %3504 = vmatprep.mubr.bf16.mxu1 %v6373_v55 }
  0xd8   : > { %5731 = vmatpush3.bf16.msra.mxu1 %v6416_v56 }
  0xd9   : > { %5732 = vmatprep.subr.bf16.mxu1 %v6431_v57 }
  0xdc   : > { %5733 = vmatpush3.bf16.msra.mxu1 %v6432_v60 }
  0xdd   : > { %5734 = vmatprep.subr.bf16.mxu1 %v6447_v62  ;;  %v6425_v62 = vld [vmem:[%s6757_s9 + $0x56c] ss:$68 sps:$4 sm:$0xff]  }
  0xde   : > { %3408 = vmatmul.mubr.bf16.gmra.mrb[92].mxu0 %v6375_v58  ;;  %3505 = vmatmul.mubr.bf16.gmra.mrb[92].mxu1 %v6376_v59 }
  0xdf   : > { %3415 = vmatprep.mubr.bf16.mxu0 %v6377_v61  ;;  %3512 = vmatprep.mubr.bf16.mxu1 %v6379_v63  ;;  %v6427_v63 = vld [vmem:[%s6757_s9 + $0x134] ss:$68 sps:$4 sm:$0xff]  }
  0xe0   : > { %5735 = vmatpush3.bf16.msra.mxu1 %v6448_v0 }
  0xe1   : > { %5736 = vmatprep.subr.bf16.mxu1 %v6463_v1 }
  0xe4   : > { %5737 = vmatpush3.bf16.msra.mxu1 %v6464_v2  ;;  %v6450_v2 = vld [vmem:[%s8280_s1 + $0x310] sm:$0xff]  }
  0xe5   : > { %5946 = vmatprep.subr.bf16.mxu1 %v6479_v3 }
  0xe6   : > { %3416 = vmatmul.mubr.bf16.gmra.mrb[96].mxu0 %v6381_v4  ;;  %3513 = vmatmul.mubr.bf16.gmra.mrb[96].mxu1 %v6382_v5  ;;  %v6465_v5 = vld [vmem:[%s8280_s1 + $0x358] sm:$0xff]  }
  0xe7   : > { %3423 = vmatprep.mubr.bf16.mxu0 %v6387_v6  ;;  %3520 = vmatprep.mubr.bf16.mxu1 %v6389_v7  ;;  %v6466_v6 = vld [vmem:[%s8280_s1 + $0x318] sm:$0xff]   ;;  %v6481_v7 = vld [vmem:[%s8280_s1 + $0x360] sm:$0xff]  }
  0xee   : > { %3424 = vmatmul.mubr.bf16.gmra.mrb[100].mxu0 %v6391_v8  ;;  %3521 = vmatmul.mubr.bf16.gmra.mrb[100].mxu1 %v6392_v9  ;;  %v6429_v8 = vld [vmem:[%s6757_s9 + $0x568] ss:$68 sps:$4 sm:$0xff]   ;;  %v6430_v9 = vld [vmem:[%s6757_s9 + $0x130] ss:$68 sps:$4 sm:$0xff]  }
  0xef   : > { %3431 = vmatprep.mubr.bf16.mxu0 %v6393_v10  ;;  %3528 = vmatprep.mubr.bf16.mxu1 %v6395_v11 }
  0xf6   : > { %3432 = vmatmul.mubr.bf16.gmra.mrb[104].mxu0 %v6397_v12  ;;  %3529 = vmatmul.mubr.bf16.gmra.mrb[104].mxu1 %v6398_v13 }
  0xf7   : > { %3439 = vmatprep.mubr.bf16.mxu0 %v6403_v14  ;;  %3536 = vmatprep.mubr.bf16.mxu1 %v6405_v15 }
  0xf9   : > { %v5250_v18 = vpop.f32.mrb[0].mxu1  ;;  %v5178_v19 = vpop.f32.mrb[0].mxu0 }
  0xfa   : > { %v5251_v20 = vpop.f32.mrb[1].mxu1  ;;  %v5179_v21 = vpop.f32.mrb[1].mxu0 }
  0xfb   : > { %v7138_v22 = vadd.f32 %v5251_v20, %v5250_v18  ;;  %v5253_v23 = vpop.f32.mrb[2].mxu1  ;;  %v7140_v24 = vadd.f32 %v5179_v21, %v5178_v19  ;;  %v5181_v25 = vpop.f32.mrb[2].mxu0  ;;  %v6435_v18 = vld [vmem:[%s6757_s9 + $0x5f4] ss:$68 sps:$4 sm:$0xff]   ;;  %v6437_v19 = vld [vmem:[%s6757_s9 + $0x1bc] ss:$68 sps:$4 sm:$0xff]  }
  0xfc   : > { %v5254_v28 = vpop.f32.mrb[3].mxu1  ;;  %v5182_v29 = vpop.f32.mrb[3].mxu0 }
  0xfd   : > { %v7144_v30 = vadd.f32 %v5254_v28, %v5253_v23  ;;  %v7146_v31 = vadd.f32 %v5182_v29, %v5181_v25  ;;  %v6482_v23 = vld [vmem:[%s8280_s1 + $0x320] sm:$0xff]   ;;  %v6497_v25 = vld [vmem:[%s8280_s1 + $0x368] sm:$0xff]   ;;  %v6513_v29 = vld [vmem:[%s8280_s1 + $0x370] sm:$0xff]  }
  0xfe   : > { %3440 = vmatmul.mubr.bf16.gmra.mrb[108].mxu0 %v6407_v16  ;;  %3537 = vmatmul.mubr.bf16.gmra.mrb[108].mxu1 %v6408_v17  ;;  %v6498_v28 = vld [vmem:[%s8280_s1 + $0x328] sm:$0xff]  }
  0xff   : > { %3544 = vmatprep.mubr.bf16.mxu1 %v6409_v26  ;;  %3641 = vmatprep.mubr.bf16.mxu0 %v6413_v27 }
 0x101   : > { %v5256_v34 = vpop.f32.mrb[4].mxu1  ;;  %v5184_v35 = vpop.f32.mrb[4].mxu0 }
 0x102   : > { %v5257_v36 = vpop.f32.mrb[5].mxu1  ;;  %v5185_v37 = vpop.f32.mrb[5].mxu0 }
 0x103   : > { %v7150_v38 = vadd.f32 %v5257_v36, %v5256_v34  ;;  %v5259_v39 = vpop.f32.mrb[6].mxu1  ;;  %v7152_v40 = vadd.f32 %v5185_v37, %v5184_v35  ;;  %v5187_v41 = vpop.f32.mrb[6].mxu0  ;;  %v6440_v34 = vld [vmem:[%s6757_s9 + $0x1b8] ss:$68 sps:$4 sm:$0xff]  }
 0x104   : > { %v5260_v44 = vpop.f32.mrb[7].mxu1  ;;  %v5188_v45 = vpop.f32.mrb[7].mxu0 }
 0x105   : > { %v7162_v48 = vadd.f32 %v5260_v44, %v5259_v39  ;;  %v7164_v49 = vadd.f32 %v5188_v45, %v5187_v41 }
 0x106   : > { %3545 = vmatmul.mubr.bf16.gmra.mrb[112].mxu1 %v6414_v33  ;;  %3642 = vmatmul.mubr.bf16.vlgmr.msra.gmra.mrb[112].mxu0 %v6411_v32  ;;  %v7223_v32 = vld [vmem:[%s8281_s2] ss:$0 sm:$0xff]  ;;  %v6439_v33 = vld [vmem:[%s6757_s9 + $0x5f0] ss:$68 sps:$4 sm:$0xff]  }
 0x107   : > { %5835 = vmatpush3.bf16.msra.mxu0 %v6418_v42  ;;  %3552 = vmatprep.mubr.bf16.mxu1 %v6419_v43  ;;  %v3000_v41 = vadd.f32 %v7140_v24, %v7223_v32  ;;  %v6529_v24 = vld [vmem:[%s8280_s1 + $0x378] sm:$0xff]  }
 0x108   : > { %3649 = vmatprep.mubr.bf16.mxu0 %v6421_v46  ;;  %5836 = vmatprep.subr.bf16.mxu0 %v6433_v47  ;;  %v6441_v46 = vld [vmem:[%s6757_s9 + $0x67c] ss:$68 sps:$4 sm:$0xff]   ;;  %v6443_v47 = vld [vmem:[%s6757_s9 + $0x244] ss:$68 sps:$4 sm:$0xff]  }
 0x109   : > { %v5262_v54 = vpop.f32.mrb[8].mxu1  ;;  %v5190_v55 = vpop.f32.mrb[8].mxu0 }
 0x10a   : > { %v5263_v56 = vpop.f32.mrb[9].mxu1  ;;  %v5191_v57 = vpop.f32.mrb[9].mxu0 }
 0x10b   : > { %v7174_v58 = vadd.f32 %v5263_v56, %v5262_v54  ;;  %v5265_v59 = vpop.f32.mrb[10].mxu1  ;;  %v7176_v60 = vadd.f32 %v5191_v57, %v5190_v55  ;;  %v5193_v61 = vpop.f32.mrb[10].mxu0  ;;  %5837 = vmatpush3.bf16.msra.mxu0 %v6434_v50  ;;  %v3003_v54 = vadd.f32 %v7146_v31, %v7223_v32  ;;  %v6530_v57 = vld [vmem:[%s8280_s1 + $0x338] sm:$0xff]   ;;  %v7253_v31 = vld [vmem:[%s8280_s1 + $0x400] sm:$0xff]  }
 0x10c   : > { %v5266_v0 = vpop.f32.mrb[11].mxu1  ;;  %v5194_v1 = vpop.f32.mrb[11].mxu0  ;;  %5838 = vmatprep.subr.bf16.mxu0 %v6449_v51 }
 0x10d   : > { %v7183_v3 = vadd.f32 %v5266_v0, %v5265_v59  ;;  %v7185_v4 = vadd.f32 %v5194_v1, %v5193_v61  ;;  %v6445_v61 = vld [vmem:[%s6757_s9 + $0x678] ss:$68 sps:$4 sm:$0xff]  }
 0x10e   : > { %3553 = vmatmul.mubr.bf16.gmra.mrb[116].mxu1 %v6423_v52  ;;  %3650 = vmatmul.mubr.bf16.gmra.mrb[116].mxu0 %v6424_v53  ;;  %v6514_v52 = vld [vmem:[%s8280_s1 + $0x330] sm:$0xff]  }
 0x10f   : > { %3560 = vmatprep.mubr.bf16.mxu1 %v6425_v62  ;;  %3657 = vmatprep.mubr.bf16.mxu0 %v6427_v63  ;;  %v6446_v62 = vld [vmem:[%s6757_s9 + $0x240] ss:$68 sps:$4 sm:$0xff]  }
 0x110   : > { %5839 = vmatpush3.bf16.msra.mxu0 %v6450_v2 }
 0x111   : > { %v5268_v10 = vpop.f32.mrb[12].mxu1  ;;  %v5196_v11 = vpop.f32.mrb[12].mxu0  ;;  %5840 = vmatprep.subr.bf16.mxu0 %v6465_v5  ;;  %v3008_v5 = vadd.f32 %v7152_v40, %v7223_v32 }
 0x112   : > { %v5269_v12 = vpop.f32.mrb[13].mxu1  ;;  %v5197_v13 = vpop.f32.mrb[13].mxu0 }
 0x113   : > { %v7198_v14 = vadd.f32 %v5269_v12, %v5268_v10  ;;  %v5271_v15 = vpop.f32.mrb[14].mxu1  ;;  %v7200_v16 = vadd.f32 %v5197_v13, %v5196_v11  ;;  %v5199_v17 = vpop.f32.mrb[14].mxu0  ;;  %v6451_v10 = vld [vmem:[%s6757_s9 + $0x704] ss:$68 sps:$4 sm:$0xff]   ;;  %v6453_v11 = vld [vmem:[%s6757_s9 + $0x2cc] ss:$68 sps:$4 sm:$0xff]  }
 0x114   : > { %v5272_v20 = vpop.f32.mrb[15].mxu1  ;;  %v5200_v21 = vpop.f32.mrb[15].mxu0  ;;  %5841 = vmatpush3.bf16.msra.mxu0 %v6466_v6 }
 0x115   : > { %v7210_v26 = vadd.f32 %v5272_v20, %v5271_v15  ;;  %v7212_v27 = vadd.f32 %v5200_v21, %v5199_v17  ;;  %5842 = vmatprep.subr.bf16.mxu0 %v6481_v7  ;;  %v3011_v17 = vadd.f32 %v7164_v49, %v7223_v32  ;;  %v6455_v20 = vld [vmem:[%s6757_s9 + $0x700] ss:$68 sps:$4 sm:$0xff]   ;;  %v6456_v21 = vld [vmem:[%s6757_s9 + $0x2c8] ss:$68 sps:$4 sm:$0xff]   ;;  %v3016_v49 = vadd.f32 %v7176_v60, %v7223_v32 }
 0x116   : > { %3561 = vmatmul.mubr.bf16.gmra.mrb[120].mxu1 %v6429_v8  ;;  %3658 = vmatmul.mubr.bf16.gmra.mrb[120].mxu0 %v6430_v9 }
 0x117   : > { %3568 = vmatprep.mubr.bf16.mxu1 %v6435_v18  ;;  %3665 = vmatprep.mubr.bf16.mxu0 %v6437_v19 }
 0x118   : > { %5843 = vmatpush3.bf16.msra.mxu0 %v6482_v23 }
 0x119   : > { %v5290_v35 = vpop.f32.mrb[16].mxu1  ;;  %v5202_v36 = vpop.f32.mrb[16].mxu0  ;;  %5844 = vmatprep.subr.bf16.mxu0 %v6497_v25 }
 0x11a   : > { %v5291_v37 = vpop.f32.mrb[17].mxu1  ;;  %v5203_v39 = vpop.f32.mrb[17].mxu0 }
 0x11b   : > { %v5292_v42 = vadd.f32 %v5291_v37, %v5290_v35  ;;  %v5293_v43 = vpop.f32.mrb[18].mxu1  ;;  %v7229_v44 = vadd.f32 %v5203_v39, %v5202_v36  ;;  %v5205_v45 = vpop.f32.mrb[18].mxu0  ;;  %v6457_v37 = vld [vmem:[%s6757_s9 + $0x78c] ss:$68 sps:$4 sm:$0xff]   ;;  %v6459_v39 = vld [vmem:[%s6757_s9 + $0x354] ss:$68 sps:$4 sm:$0xff]  }
 0x11c   : > { %v5294_v50 = vpop.f32.mrb[19].mxu1  ;;  %v5206_v51 = vpop.f32.mrb[19].mxu0  ;;  %5845 = vmatpush3.bf16.msra.mxu0 %v6498_v28 }
 0x11d   : > { %v7239_v53 = vadd.f32 %v5292_v42, %v3000_v41  ;;  %v5295_v55 = vadd.f32 %v5294_v50, %v5293_v43  ;;  %v7243_v56 = vadd.f32 %v5206_v51, %v5205_v45  ;;  %5846 = vmatprep.subr.bf16.mxu0 %v6513_v29  ;;  %v3019_v45 = vadd.f32 %v7185_v4, %v7223_v32 }
 0x11e   : > { %3569 = vmatmul.mubr.bf16.gmra.mrb[124].mxu1 %v6439_v33  ;;  %3666 = vmatmul.mubr.bf16.gmra.mrb[124].mxu0 %v6440_v34  ;;  %v3024_v4 = vadd.f32 %v7200_v16, %v7223_v32 }
 0x11f   : > { %v7248_v59 = vadd.f32 %v5295_v55, %v3003_v54  ;;  %3576 = vmatprep.mubr.bf16.mxu1 %v6441_v46  ;;  %3673 = vmatprep.mubr.bf16.mxu0 %v6443_v47  ;;  %v6461_v54 = vld [vmem:[%s6757_s9 + $0x788] ss:$68 sps:$4 sm:$0xff]   ;;  %v6462_v55 = vld [vmem:[%s6757_s9 + $0x350] ss:$68 sps:$4 sm:$0xff]  }
 0x120   : > { %5847 = vmatpush3.bf16.msra.mxu0 %v6514_v52 }
 0x121   : > { %v5296_v63 = vpop.f32.mrb[20].mxu1  ;;  %v5208_v0 = vpop.f32.mrb[20].mxu0  ;;  %5848 = vmatprep.subr.bf16.mxu0 %v6529_v24 }
 0x122   : > { %v5297_v1 = vpop.f32.mrb[21].mxu1  ;;  %v5209_v2 = vpop.f32.mrb[21].mxu0 }
 0x123   : > { %v5298_v6 = vadd.f32 %v5297_v1, %v5296_v63  ;;  %v5299_v7 = vpop.f32.mrb[22].mxu1  ;;  %v7259_v8 = vadd.f32 %v5209_v2, %v5208_v0  ;;  %v5211_v9 = vpop.f32.mrb[22].mxu0  ;;  %v6467_v0 = vld [vmem:[%s6757_s9 + $0x814] ss:$68 sps:$4 sm:$0xff]   ;;  %v6469_v1 = vld [vmem:[%s6757_s9 + $0x3dc] ss:$68 sps:$4 sm:$0xff]  }
 0x124   : > { %v5300_v12 = vpop.f32.mrb[23].mxu1  ;;  %v5212_v13 = vpop.f32.mrb[23].mxu0  ;;  %5849 = vmatpush3.bf16.msra.mxu0 %v6530_v57 }
 0x125   : > { %v7263_v15 = vadd.f32 %v5298_v6, %v3008_v5  ;;  %v5301_v18 = vadd.f32 %v5300_v12, %v5299_v7  ;;  %v7267_v19 = vadd.f32 %v5212_v13, %v5211_v9  ;;  %6081 = vmatprep.subr.bf16.mxu0 %v7253_v31  ;;  %v3027_v7 = vadd.f32 %v7212_v27, %v7223_v32 }
 0x126   : > { %3577 = vmatmul.mubr.bf16.gmra.mrb[128].mxu1 %v6445_v61  ;;  %3674 = vmatmul.mubr.bf16.gmra.mrb[128].mxu0 %v6446_v62  ;;  %v3032_v27 = vadd.f32 %v7229_v44, %v7223_v32 }
 0x127   : > { %v7270_v40 = vadd.f32 %v5301_v18, %v3011_v17  ;;  %3584 = vmatprep.mubr.bf16.mxu1 %v6451_v10  ;;  %3681 = vmatprep.mubr.bf16.mxu0 %v6453_v11  ;;  %v6471_v18 = vld [vmem:[%s6757_s9 + $0x810] ss:$68 sps:$4 sm:$0xff]  }
 0x129   : > { %v5302_v23 = vpop.f32.mrb[24].mxu1  ;;  %v5214_v25 = vpop.f32.mrb[24].mxu0 }
 0x12a   : > { %v5303_v28 = vpop.f32.mrb[25].mxu1  ;;  %v5215_v29 = vpop.f32.mrb[25].mxu0 }
 0x12b   : > { %v5304_v33 = vadd.f32 %v5303_v28, %v5302_v23  ;;  %v5305_v34 = vpop.f32.mrb[26].mxu1  ;;  %v7276_v35 = vadd.f32 %v5215_v29, %v5214_v25  ;;  %v5217_v36 = vpop.f32.mrb[26].mxu0  ;;  %v6473_v29 = vld [vmem:[%s6757_s9 + $0x464] ss:$68 sps:$4 sm:$0xff]  }
 0x12c   : > { %v5306_v41 = vpop.f32.mrb[27].mxu1  ;;  %v5218_v42 = vpop.f32.mrb[27].mxu0 }
 0x12d   : > { %v7280_v43 = vadd.f32 %v5304_v33, %v3016_v49  ;;  %v5307_v46 = vadd.f32 %v5306_v41, %v5305_v34  ;;  %v7284_v47 = vadd.f32 %v5218_v42, %v5217_v36  ;;  %v6477_v49 = vld [vmem:[%s6757_s9 + $0x2c] ss:$68 sps:$4 sm:$0xff]   ;;  %v3035_v36 = vadd.f32 %v7243_v56, %v7223_v32 }
 0x12e   : > { %3585 = vmatmul.mubr.bf16.gmra.mrb[132].mxu1 %v6455_v20  ;;  %3682 = vmatmul.mubr.bf16.gmra.mrb[132].mxu0 %v6456_v21  ;;  %v6472_v20 = vld [vmem:[%s6757_s9 + $0x3d8] ss:$68 sps:$4 sm:$0xff]   ;;  %v3040_v56 = vadd.f32 %v7259_v8, %v7223_v32  ;;  %v3043_v8 = vadd.f32 %v7267_v19, %v7223_v32  ;;  %v6511_v19 = vld [vmem:[%s8280_s1 + $0x3d0] sm:$0xff]  }
 0x12f   : > { %v7286_v60 = vadd.f32 %v5307_v46, %v3019_v45  ;;  %3592 = vmatprep.mubr.bf16.mxu1 %v6457_v37  ;;  %3689 = vmatprep.mubr.bf16.mxu0 %v6459_v39 }
 0x131   : > { %v5308_v50 = vpop.f32.mrb[28].mxu1  ;;  %v5220_v51 = vpop.f32.mrb[28].mxu0 }
 0x132   : > { %v5309_v52 = vpop.f32.mrb[29].mxu1  ;;  %v5221_v24 = vpop.f32.mrb[29].mxu0 }
 0x133   : > { %v5310_v57 = vadd.f32 %v5309_v52, %v5308_v50  ;;  %v5311_v61 = vpop.f32.mrb[30].mxu1  ;;  %v7292_v62 = vadd.f32 %v5221_v24, %v5220_v51  ;;  %v5223_v63 = vpop.f32.mrb[30].mxu0  ;;  %v6475_v51 = vld [vmem:[%s6757_s9 + $0x28] ss:$68 sps:$4 sm:$0xff]   ;;  %v6478_v52 = vld [vmem:[%s6757_s9 + $0x460] ss:$68 sps:$4 sm:$0xff]  }
 0x134   : > { %v5312_v2 = vpop.f32.mrb[31].mxu1  ;;  %v5224_v5 = vpop.f32.mrb[31].mxu0 }
 0x135   : > { %v7296_v6 = vadd.f32 %v5310_v57, %v3024_v4  ;;  %v5313_v9 = vadd.f32 %v5312_v2, %v5311_v61  ;;  %v7300_v10 = vadd.f32 %v5224_v5, %v5223_v63  ;;  %v6480_v57 = vld [vmem:[%s8280_s1 + $0x380] sm:$0xff]   ;;  %v6483_v61 = vld [vmem:[%s6757_s9 + $0x4ec] ss:$68 sps:$4 sm:$0xff]  }
 0x136   : > { %3593 = vmatmul.mubr.bf16.gmra.mrb[136].mxu1 %v6461_v54  ;;  %3690 = vmatmul.mubr.bf16.gmra.mrb[136].mxu0 %v6462_v55  ;;  %v6495_v2 = vld [vmem:[%s8280_s1 + $0x3c8] sm:$0xff]  }
 0x137   : > { %v7302_v16 = vadd.f32 %v5313_v9, %v3027_v7  ;;  %3600 = vmatprep.mubr.bf16.mxu1 %v6467_v0  ;;  %3697 = vmatprep.mubr.bf16.mxu0 %v6469_v1  ;;  %v6485_v1 = vld [vmem:[%s6757_s9 + $0xb4] ss:$68 sps:$4 sm:$0xff]  }
 0x139   : > { %v5314_v11 = vpop.f32.mrb[32].mxu1  ;;  %v5226_v12 = vpop.f32.mrb[32].mxu0 }
 0x13a   : > { %v5315_v13 = vpop.f32.mrb[33].mxu1  ;;  %v5227_v17 = vpop.f32.mrb[33].mxu0 }
 0x13b   : > { %v5316_v21 = vadd.f32 %v5315_v13, %v5314_v11  ;;  %v5317_v23 = vpop.f32.mrb[34].mxu1  ;;  %v7308_v25 = vadd.f32 %v5227_v17, %v5226_v12  ;;  %v5229_v28 = vpop.f32.mrb[34].mxu0  ;;  %v6496_v12 = vld [vmem:[%s8280_s1 + $0x388] sm:$0xff]  }
 0x13c   : > { %v5318_v33 = vpop.f32.mrb[35].mxu1  ;;  %v5230_v34 = vpop.f32.mrb[35].mxu0 }
 0x13d   : > { %v7314_v37 = vadd.f32 %v5316_v21, %v3032_v27  ;;  %v5319_v39 = vadd.f32 %v5318_v33, %v5317_v23  ;;  %v7316_v41 = vadd.f32 %v5230_v34, %v5229_v28  ;;  %v6487_v27 = vld [vmem:[%s6757_s9 + $0x4e8] ss:$68 sps:$4 sm:$0xff]   ;;  %v6488_v21 = vld [vmem:[%s6757_s9 + $0xb0] ss:$68 sps:$4 sm:$0xff]   ;;  %v3048_v23 = vadd.f32 %v7276_v35, %v7223_v32 }
 0x13e   : > { %3601 = vmatmul.mubr.bf16.gmra.mrb[140].mxu1 %v6471_v18  ;;  %3698 = vmatmul.mubr.bf16.gmra.mrb[140].mxu0 %v6472_v20  ;;  %v6489_v34 = vld [vmem:[%s6757_s9 + $0x574] ss:$68 sps:$4 sm:$0xff]  }
 0x13f   : > { %v7318_v44 = vadd.f32 %v5319_v39, %v3035_v36  ;;  %3705 = vmatprep.mubr.bf16.mxu0 %v6473_v29  ;;  %3802 = vmatprep.mubr.bf16.mxu1 %v6477_v49  ;;  %v6491_v36 = vld [vmem:[%s6757_s9 + $0x13c] ss:$68 sps:$4 sm:$0xff]  }
 0x141   : > { %v5320_v42 = vpop.f32.mrb[36].mxu1  ;;  %v5232_v45 = vpop.f32.mrb[36].mxu0 }
 0x142   : > { %v5321_v46 = vpop.f32.mrb[37].mxu1  ;;  %v5233_v50 = vpop.f32.mrb[37].mxu0 }
 0x143   : > { %v5322_v24 = vadd.f32 %v5321_v46, %v5320_v42  ;;  %v5323_v54 = vpop.f32.mrb[38].mxu1  ;;  %v7324_v55 = vadd.f32 %v5233_v50, %v5232_v45  ;;  %v5235_v4 = vpop.f32.mrb[38].mxu0  ;;  %v6512_v45 = vld [vmem:[%s8280_s1 + $0x390] sm:$0xff]   ;;  %v3051_v46 = vadd.f32 %v7284_v47, %v7223_v32  ;;  %v6528_v47 = vld [vmem:[%s8280_s1 + $0x398] sm:$0xff]  }
 0x144   : > { %v5324_v63 = vpop.f32.mrb[39].mxu1  ;;  %v5236_v0 = vpop.f32.mrb[39].mxu0 }
 0x145   : > { %v7336_v5 = vadd.f32 %v5322_v24, %v3040_v56  ;;  %v5325_v7 = vadd.f32 %v5324_v63, %v5323_v54  ;;  %v7338_v9 = vadd.f32 %v5236_v0, %v5235_v4  ;;  %v6543_v4 = vld [vmem:[%s8280_s1 + $0x3e0] sm:$0xff]   ;;  %v6493_v63 = vld [vmem:[%s6757_s9 + $0x570] ss:$68 sps:$4 sm:$0xff]   ;;  %v6494_v0 = vld [vmem:[%s6757_s9 + $0x138] ss:$68 sps:$4 sm:$0xff]  }
 0x146   : > { %3706 = vmatmul.mubr.bf16.gmra.mrb[144].mxu0 %v6478_v52  ;;  %3803 = vmatmul.mubr.bf16.vlgmr.msra.gmra.mrb[144].mxu1 %v6475_v51  ;;  %v6527_v52 = vld [vmem:[%s8280_s1 + $0x3d8] sm:$0xff]  }
 0x147   : > { %v7340_v11 = vadd.f32 %v5325_v7, %v3043_v8  ;;  %5947 = vmatpush3.bf16.msra.mxu1 %v6480_v57  ;;  %3713 = vmatprep.mubr.bf16.mxu0 %v6483_v61 }
 0x148   : > { %3810 = vmatprep.mubr.bf16.mxu1 %v6485_v1  ;;  %5948 = vmatprep.subr.bf16.mxu1 %v6495_v2  ;;  %v3056_v1 = vadd.f32 %v7292_v62, %v7223_v32 }
 0x149   : > { %v5326_v13 = vpop.f32.mrb[40].mxu1  ;;  %v5238_v17 = vpop.f32.mrb[40].mxu0 }
 0x14a   : > { %v5327_v18 = vpop.f32.mrb[41].mxu1  ;;  %v5239_v20 = vpop.f32.mrb[41].mxu0 }
 0x14b   : > { %v5328_v28 = vadd.f32 %v5327_v18, %v5326_v13  ;;  %v5329_v29 = vpop.f32.mrb[42].mxu1  ;;  %v7352_v49 = vadd.f32 %v5239_v20, %v5238_v17  ;;  %v5241_v33 = vpop.f32.mrb[42].mxu0  ;;  %5949 = vmatpush3.bf16.msra.mxu1 %v6496_v12  ;;  %v6501_v13 = vld [vmem:[%s6757_s9 + $0x1c4] ss:$68 sps:$4 sm:$0xff]  }
 0x14c   : > { %v5330_v39 = vpop.f32.mrb[43].mxu1  ;;  %v5242_v42 = vpop.f32.mrb[43].mxu0  ;;  %5950 = vmatprep.subr.bf16.mxu1 %v6511_v19  ;;  %v6499_v19 = vld [vmem:[%s6757_s9 + $0x5fc] ss:$68 sps:$4 sm:$0xff]  }
 0x14d   : > { %v7361_v50 = vadd.f32 %v5328_v28, %v3048_v23  ;;  %v5331_v35 = vadd.f32 %v5330_v39, %v5329_v29  ;;  %v7363_v51 = vadd.f32 %v5242_v42, %v5241_v33  ;;  %v6544_v20 = vld [vmem:[%s8280_s1 + $0x3a0] sm:$0xff]   ;;  %v6558_v28 = vld [vmem:[%s8280_s1 + $0x3e8] sm:$0xff]  }
 0x14e   : > { %3714 = vmatmul.mubr.bf16.gmra.mrb[148].mxu0 %v6487_v27  ;;  %3811 = vmatmul.mubr.bf16.gmra.mrb[148].mxu1 %v6488_v21  ;;  %v3059_v27 = vadd.f32 %v7300_v10, %v7223_v32  ;;  %v6559_v10 = vld [vmem:[%s8280_s1 + $0x3a8] sm:$0xff]  }
 0x14f   : > { %v7368_v56 = vadd.f32 %v5331_v35, %v3051_v46  ;;  %3721 = vmatprep.mubr.bf16.mxu0 %v6489_v34  ;;  %3818 = vmatprep.mubr.bf16.mxu1 %v6491_v36  ;;  %v6573_v36 = vld [vmem:[%s8280_s1 + $0x3f0] sm:$0xff]   ;;  %v6504_v46 = vld [vmem:[%s6757_s9 + $0x1c0] ss:$68 sps:$4 sm:$0xff]   ;;  %v3064_v35 = vadd.f32 %v7308_v25, %v7223_v32 }
 0x150   : > { %5951 = vmatpush3.bf16.msra.mxu1 %v6512_v45  ;;  %v6503_v45 = vld [vmem:[%s6757_s9 + $0x5f8] ss:$68 sps:$4 sm:$0xff]  }
 0x151   : > { %v5332_v24 = vpop.f32.mrb[44].mxu1  ;;  %v5244_v54 = vpop.f32.mrb[44].mxu0  ;;  %5952 = vmatprep.subr.bf16.mxu1 %v6527_v52 }
 0x152   : > { %v5333_v57 = vpop.f32.mrb[45].mxu1  ;;  %v5245_v61 = vpop.f32.mrb[45].mxu0 }
 0x153   : > { %v5334_v2 = vadd.f32 %v5333_v57, %v5332_v24  ;;  %v5335_v8 = vpop.f32.mrb[46].mxu1  ;;  %v7380_v7 = vadd.f32 %v5245_v61, %v5244_v54  ;;  %v5247_v12 = vpop.f32.mrb[46].mxu0  ;;  %v6507_v57 = vld [vmem:[%s6757_s9 + $0x24c] ss:$68 sps:$4 sm:$0xff]   ;;  %v3067_v61 = vadd.f32 %v7316_v41, %v7223_v32  ;;  %v6588_v41 = vld [vmem:[%s8280_s1 + $0x3f8] sm:$0xff]  }
 0x154   : > { %v5336_v17 = vpop.f32.mrb[47].mxu1  ;;  %v5248_v18 = vpop.f32.mrb[47].mxu0  ;;  %5953 = vmatpush3.bf16.msra.mxu1 %v6528_v47 }
 0x155   : > { %v7389_v21 = vadd.f32 %v5334_v2, %v3056_v1  ;;  %v5337_v62 = vadd.f32 %v5336_v17, %v5335_v8  ;;  %v7391_v23 = vadd.f32 %v5248_v18, %v5247_v12  ;;  %5954 = vmatprep.subr.bf16.mxu1 %v6543_v4  ;;  %v6505_v4 = vld [vmem:[%s6757_s9 + $0x684] ss:$68 sps:$4 sm:$0xff]   ;;  %v6574_v1 = vld [vmem:[%s8280_s1 + $0x3b0] sm:$0xff]  }
 0x156   : > { %3722 = vmatmul.mubr.bf16.gmra.mrb[152].mxu0 %v6493_v63  ;;  %3819 = vmatmul.mubr.bf16.gmra.mrb[152].mxu1 %v6494_v0 }
 0x157   : > { %v7396_v29 = vadd.f32 %v5337_v62, %v3059_v27  ;;  %3729 = vmatprep.mubr.bf16.mxu0 %v6499_v19  ;;  %3826 = vmatprep.mubr.bf16.mxu1 %v6501_v13  ;;  %v6509_v62 = vld [vmem:[%s6757_s9 + $0x680] ss:$68 sps:$4 sm:$0xff]  }
 0x158   : > { %5955 = vmatpush3.bf16.msra.mxu1 %v6544_v20 }
 0x159   : > { %v5338_v33 = vpop.f32.mrb[48].mxu1  ;;  %v5402_v34 = vpop.f32.mrb[48].mxu0  ;;  %5956 = vmatprep.subr.bf16.mxu1 %v6558_v28  ;;  %v6510_v28 = vld [vmem:[%s6757_s9 + $0x248] ss:$68 sps:$4 sm:$0xff]  }
 0x15a   : > { %v5339_v39 = vpop.f32.mrb[49].mxu1  ;;  %v5403_v42 = vpop.f32.mrb[49].mxu0 }
 0x15b   : > { %v5340_v52 = vadd.f32 %v5339_v39, %v5338_v33  ;;  %v5404_v47 = vadd.f32 %v5403_v42, %v5402_v34  ;;  %v5341_v24 = vpop.f32.mrb[50].mxu1  ;;  %v5405_v54 = vpop.f32.mrb[50].mxu0  ;;  %v6515_v39 = vld [vmem:[%s6757_s9 + $0x70c] ss:$68 sps:$4 sm:$0xff]   ;;  %v6517_v42 = vld [vmem:[%s6757_s9 + $0x2d4] ss:$68 sps:$4 sm:$0xff]  }
 0x15c   : > { %v5342_v63 = vpop.f32.mrb[51].mxu1  ;;  %v5406_v0 = vpop.f32.mrb[51].mxu0  ;;  %5957 = vmatpush3.bf16.msra.mxu1 %v6559_v10 }
 0x15d   : > { %v7415_v2 = vadd.f32 %v5340_v52, %v3064_v35  ;;  %v7418_v25 = vadd.f32 %v5404_v47, %v7239_v53  ;;  %v5343_v8 = vadd.f32 %v5342_v63, %v5341_v24  ;;  %v5407_v12 = vadd.f32 %v5406_v0, %v5405_v54  ;;  %5958 = vmatprep.subr.bf16.mxu1 %v6573_v36  ;;  %v6589_v53 = vld [vmem:[%s8280_s1 + $0x3b8] sm:$0xff]   ;;  %v6519_v0 = vld [vmem:[%s6757_s9 + $0x708] ss:$68 sps:$4 sm:$0xff]  }
 0x15e   : > { %3730 = vmatmul.mubr.bf16.gmra.mrb[156].mxu0 %v6503_v45  ;;  %3827 = vmatmul.mubr.bf16.gmra.mrb[156].mxu1 %v6504_v46  ;;  %v3075_v45 = vadd.f32 %v7338_v9, %v7223_v32 }
 0x15f   : > { %v7423_v19 = vadd.f32 %v5343_v8, %v3067_v61  ;;  %v7426_v13 = vadd.f32 %v5407_v12, %v7248_v59  ;;  %3737 = vmatprep.mubr.bf16.mxu0 %v6505_v4  ;;  %3834 = vmatprep.mubr.bf16.mxu1 %v6507_v57  ;;  %v3072_v59 = vadd.f32 %v7324_v55, %v7223_v32 }
 0x160   : > { %5959 = vmatpush3.bf16.msra.mxu1 %v6574_v1  ;;  %v3080_v1 = vadd.f32 %v7352_v49, %v7223_v32 }
 0x161   : > { %v5344_v17 = vpop.f32.mrb[52].mxu1  ;;  %v5408_v18 = vpop.f32.mrb[52].mxu0  ;;  %5960 = vmatprep.subr.bf16.mxu1 %v6588_v41 }
 0x162   : > { %v5345_v20 = vpop.f32.mrb[53].mxu1  ;;  %v5409_v27 = vpop.f32.mrb[53].mxu0 }
 0x163   : > { %v5346_v10 = vadd.f32 %v5345_v20, %v5344_v17  ;;  %v5410_v33 = vadd.f32 %v5409_v27, %v5408_v18  ;;  %v5347_v34 = vpop.f32.mrb[54].mxu1  ;;  %v5411_v36 = vpop.f32.mrb[54].mxu0  ;;  %v6521_v17 = vld [vmem:[%s6757_s9 + $0x794] ss:$68 sps:$4 sm:$0xff]   ;;  %v6523_v18 = vld [vmem:[%s6757_s9 + $0x35c] ss:$68 sps:$4 sm:$0xff]  }
 0x164   : > { %v5348_v46 = vpop.f32.mrb[55].mxu1  ;;  %v5412_v35 = vpop.f32.mrb[55].mxu0  ;;  %5961 = vmatpush3.bf16.msra.mxu1 %v6589_v53 }
 0x165   : > { %v7439_v52 = vadd.f32 %v5346_v10, %v3072_v59  ;;  %v7442_v47 = vadd.f32 %v5410_v33, %v7263_v15  ;;  %v5349_v55 = vadd.f32 %v5348_v46, %v5347_v34  ;;  %v5413_v24 = vadd.f32 %v5412_v35, %v5411_v36  ;;  %v6520_v15 = vld [vmem:[%s6757_s9 + $0x2d0] ss:$68 sps:$4 sm:$0xff]  }
 0x166   : > { %3738 = vmatmul.mubr.bf16.gmra.mrb[160].mxu0 %v6509_v62  ;;  %3835 = vmatmul.mubr.bf16.gmra.mrb[160].mxu1 %v6510_v28 }
 0x167   : > { %v7444_v54 = vadd.f32 %v5349_v55, %v3075_v45  ;;  %v7447_v9 = vadd.f32 %v5413_v24, %v7270_v40  ;;  %3745 = vmatprep.mubr.bf16.mxu0 %v6515_v39  ;;  %3842 = vmatprep.mubr.bf16.mxu1 %v6517_v42  ;;  %v3083_v40 = vadd.f32 %v7363_v51, %v7223_v32  ;;  %v6525_v42 = vld [vmem:[%s6757_s9 + $0x790] ss:$68 sps:$4 sm:$0xff]  }
 0x168   : > { %v3088_v45 = vadd.f32 %v7380_v7, %v7223_v32 }
 0x169   : > { %v5350_v4 = vpop.f32.mrb[56].mxu1  ;;  %v5414_v57 = vpop.f32.mrb[56].mxu0 }
 0x16a   : > { %v5351_v61 = vpop.f32.mrb[57].mxu1  ;;  %v5415_v63 = vpop.f32.mrb[57].mxu0 }
 0x16b   : > { %v5352_v8 = vadd.f32 %v5351_v61, %v5350_v4  ;;  %v5416_v12 = vadd.f32 %v5415_v63, %v5414_v57  ;;  %v5353_v41 = vpop.f32.mrb[58].mxu1  ;;  %v5417_v53 = vpop.f32.mrb[58].mxu0  ;;  %v6531_v4 = vld [vmem:[%s6757_s9 + $0x81c] ss:$68 sps:$4 sm:$0xff]   ;;  %v6533_v57 = vld [vmem:[%s6757_s9 + $0x3e4] ss:$68 sps:$4 sm:$0xff]  }
 0x16c   : > { %v5354_v20 = vpop.f32.mrb[59].mxu1  ;;  %v5418_v27 = vpop.f32.mrb[59].mxu0 }
 0x16d   : > { %v7457_v62 = vadd.f32 %v5352_v8, %v3080_v1  ;;  %v7460_v28 = vadd.f32 %v5416_v12, %v7280_v43  ;;  %v5355_v59 = vadd.f32 %v5354_v20, %v5353_v41  ;;  %v5419_v49 = vadd.f32 %v5418_v27, %v5417_v53  ;;  %v6526_v43 = vld [vmem:[%s6757_s9 + $0x358] ss:$68 sps:$4 sm:$0xff]  }
 0x16e   : > { %3746 = vmatmul.mubr.bf16.gmra.mrb[164].mxu0 %v6519_v0  ;;  %3843 = vmatmul.mubr.bf16.gmra.mrb[164].mxu1 %v6520_v15 }
 0x16f   : > { %v7462_v10 = vadd.f32 %v5355_v59, %v3083_v40  ;;  %v7465_v33 = vadd.f32 %v5419_v49, %v7286_v60  ;;  %3753 = vmatprep.mubr.bf16.mxu0 %v6521_v17  ;;  %3850 = vmatprep.mubr.bf16.mxu1 %v6523_v18  ;;  %v3091_v60 = vadd.f32 %v7391_v23, %v7223_v32  ;;  %v6535_v18 = vld [vmem:[%s6757_s9 + $0x818] ss:$68 sps:$4 sm:$0xff]  }
 0x170   : > { %v3096_v40 = vadd.f32 %v7138_v22, %v7223_v32 }
 0x171   : > { %v5356_v51 = vpop.f32.mrb[60].mxu1  ;;  %v5420_v34 = vpop.f32.mrb[60].mxu0 }
 0x172   : > { %v5357_v36 = vpop.f32.mrb[61].mxu1  ;;  %v5421_v39 = vpop.f32.mrb[61].mxu0 }
 0x173   : > { %v5358_v46 = vadd.f32 %v5357_v36, %v5356_v51  ;;  %v5422_v35 = vadd.f32 %v5421_v39, %v5420_v34  ;;  %v5359_v55 = vpop.f32.mrb[62].mxu1  ;;  %v5423_v24 = vpop.f32.mrb[62].mxu0  ;;  %v6537_v51 = vld [vmem:[%s6757_s9 + $0x46c] ss:$68 sps:$4 sm:$0xff]   ;;  %v6541_v34 = vld [vmem:[%s6757_s9 + $0x34] ss:$68 sps:$4 sm:$0xff]  }
 0x174   : > { %v5360_v61 = vpop.f32.mrb[63].mxu1  ;;  %v5424_v63 = vpop.f32.mrb[63].mxu0 }
 0x175   : > { %v7475_v0 = vadd.f32 %v5358_v46, %v3088_v45  ;;  %v7478_v15 = vadd.f32 %v5422_v35, %v7296_v6  ;;  %v5361_v1 = vadd.f32 %v5360_v61, %v5359_v55  ;;  %v5425_v7 = vadd.f32 %v5424_v63, %v5423_v24  ;;  %v6536_v6 = vld [vmem:[%s6757_s9 + $0x3e0] ss:$68 sps:$4 sm:$0xff]  }
 0x176   : > { %3754 = vmatmul.mubr.bf16.gmra.mrb[168].mxu0 %v6525_v42  ;;  %3851 = vmatmul.mubr.bf16.gmra.mrb[168].mxu1 %v6526_v43 }
 0x177   : > { %v7480_v8 = vadd.f32 %v5361_v1, %v3091_v60  ;;  %v7483_v12 = vadd.f32 %v5425_v7, %v7302_v16  ;;  %3761 = vmatprep.mubr.bf16.mxu0 %v6531_v4  ;;  %3858 = vmatprep.mubr.bf16.mxu1 %v6533_v57  ;;  %v3099_v16 = vadd.f32 %v7144_v30, %v7223_v32  ;;  %v6539_v57 = vld [vmem:[%s6757_s9 + $0x30] ss:$68 sps:$4 sm:$0xff]  }
 0x178   : > { %v3104_v60 = vadd.f32 %v7150_v38, %v7223_v32 }
 0x179   : > { %v5362_v23 = vpop.f32.mrb[64].mxu1  ;;  %v5426_v41 = vpop.f32.mrb[64].mxu0 }
 0x17a   : > { %v5363_v53 = vpop.f32.mrb[65].mxu1  ;;  %v5427_v17 = vpop.f32.mrb[65].mxu0 }
 0x17b   : > { %v5364_v20 = vadd.f32 %v5363_v53, %v5362_v23  ;;  %v5428_v27 = vadd.f32 %v5427_v17, %v5426_v41  ;;  %v5365_v59 = vpop.f32.mrb[66].mxu1  ;;  %v5429_v49 = vpop.f32.mrb[66].mxu0  ;;  %v6546_v23 = vld [vmem:[%s6757_s9 + $0x4f4] ss:$68 sps:$4 sm:$0xff]   ;;  %v6548_v17 = vld [vmem:[%s6757_s9 + $0xbc] ss:$68 sps:$4 sm:$0xff]  }
 0x17c   : > { %v5366_v36 = vpop.f32.mrb[67].mxu1  ;;  %v5430_v39 = vpop.f32.mrb[67].mxu0 }
 0x17d   : > { %v7493_v42 = vadd.f32 %v5364_v20, %v3096_v40  ;;  %v7496_v43 = vadd.f32 %v5428_v27, %v7314_v37  ;;  %v5367_v45 = vadd.f32 %v5366_v36, %v5365_v59  ;;  %v5431_v22 = vadd.f32 %v5430_v39, %v5429_v49  ;;  %v6542_v37 = vld [vmem:[%s6757_s9 + $0x468] ss:$68 sps:$4 sm:$0xff]   ;;  %v6551_v36 = vld [vmem:[%s6757_s9 + $0xb8] ss:$68 sps:$4 sm:$0xff]  }
 0x17e   : > { %3762 = vmatmul.mubr.bf16.gmra.mrb[172].mxu0 %v6535_v18  ;;  %3859 = vmatmul.mubr.bf16.gmra.mrb[172].mxu1 %v6536_v6  ;;  %v6564_v18 = vld [vmem:[%s8280_s1 + $0x408] sm:$0xff]  }
 0x17f   : > { %v7498_v46 = vadd.f32 %v5367_v45, %v3099_v16  ;;  %v7501_v35 = vadd.f32 %v5431_v22, %v7318_v44  ;;  %3866 = vmatprep.mubr.bf16.mxu1 %v6537_v51  ;;  %3963 = vmatprep.mubr.bf16.mxu0 %v6541_v34  ;;  %v3107_v44 = vadd.f32 %v7162_v48, %v7223_v32  ;;  %v6550_v16 = vld [vmem:[%s6757_s9 + $0x4f0] ss:$68 sps:$4 sm:$0xff]  }
 0x181   : > { %v5368_v30 = vpop.f32.mrb[68].mxu1  ;;  %v5432_v55 = vpop.f32.mrb[68].mxu0 }
 0x182   : > { %v5369_v24 = vpop.f32.mrb[69].mxu1  ;;  %v5433_v4 = vpop.f32.mrb[69].mxu0 }
 0x183   : > { %v5370_v61 = vadd.f32 %v5369_v24, %v5368_v30  ;;  %v5434_v63 = vadd.f32 %v5433_v4, %v5432_v55  ;;  %v5371_v1 = vpop.f32.mrb[70].mxu1  ;;  %v5435_v7 = vpop.f32.mrb[70].mxu0  ;;  %v6552_v30 = vld [vmem:[%s6757_s9 + $0x57c] ss:$68 sps:$4 sm:$0xff]   ;;  %v6554_v55 = vld [vmem:[%s6757_s9 + $0x144] ss:$68 sps:$4 sm:$0xff]   ;;  %v3115_v24 = vadd.f32 %v7183_v3, %v7223_v32 }
 0x184   : > { %v5372_v41 = vpop.f32.mrb[71].mxu1  ;;  %v5436_v53 = vpop.f32.mrb[71].mxu0 }
 0x185   : > { %v7514_v6 = vadd.f32 %v5370_v61, %v3104_v60  ;;  %v7517_v40 = vadd.f32 %v5434_v63, %v7336_v5  ;;  %v5373_v38 = vadd.f32 %v5372_v41, %v5371_v1  ;;  %v5437_v20 = vadd.f32 %v5436_v53, %v5435_v7  ;;  %v6581_v5 = vld [vmem:[%s8280_s1 + $0x410] sm:$0xff]   ;;  %v6596_v63 = vld [vmem:[%s8280_s1 + $0x418] sm:$0xff]  }
 0x186   : > { %3867 = vmatmul.mubr.bf16.gmra.mrb[176].mxu1 %v6542_v37  ;;  %3964 = vmatmul.mubr.bf16.vlgmr.msra.gmra.mrb[176].mxu0 %v6539_v57  ;;  %v6556_v53 = vld [vmem:[%s6757_s9 + $0x578] ss:$68 sps:$4 sm:$0xff]  }
 0x187   : > { %v7519_v27 = vadd.f32 %v5373_v38, %v3107_v44  ;;  %v7522_v48 = vadd.f32 %v5437_v20, %v7340_v11  ;;  %6082 = vmatpush3.bf16.msra.mxu0 %v7253_v31  ;;  %3874 = vmatprep.mubr.bf16.mxu1 %v6546_v23  ;;  %v3112_v11 = vadd.f32 %v7174_v58, %v7223_v32  ;;  %v6609_v23 = vld [vmem:[%s8280_s1 + $0x420] sm:$0xff]  }
 0x188   : > { %3971 = vmatprep.mubr.bf16.mxu0 %v6548_v17  ;;  %6083 = vmatprep.subr.bf16.mxu0 %v6564_v18  ;;  %v6557_v17 = vld [vmem:[%s6757_s9 + $0x140] ss:$68 sps:$4 sm:$0xff]  }
 0x189   : > { %v5374_v59 = vpop.f32.mrb[72].mxu1  ;;  %v5438_v49 = vpop.f32.mrb[72].mxu0 }
 0x18a   : > { %v5375_v51 = vpop.f32.mrb[73].mxu1  ;;  %v5439_v34 = vpop.f32.mrb[73].mxu0 }
 0x18b   : > { %v5376_v39 = vadd.f32 %v5375_v51, %v5374_v59  ;;  %v5440_v31 = vadd.f32 %v5439_v34, %v5438_v49  ;;  %v5377_v45 = vpop.f32.mrb[74].mxu1  ;;  %v5441_v22 = vpop.f32.mrb[74].mxu0  ;;  %6084 = vmatpush3.bf16.msra.mxu0 %v6564_v18  ;;  %v6560_v49 = vld [vmem:[%s6757_s9 + $0x604] ss:$68 sps:$4 sm:$0xff]   ;;  %v3123_v51 = vadd.f32 %v7210_v26, %v7223_v32 }
 0x18c   : > { %v5378_v4 = vpop.f32.mrb[75].mxu1  ;;  %v5442_v57 = vpop.f32.mrb[75].mxu0  ;;  %6085 = vmatprep.subr.bf16.mxu0 %v6581_v5 }
 0x18d   : > { %v7536_v37 = vadd.f32 %v5376_v39, %v3112_v11  ;;  %v7539_v60 = vadd.f32 %v5440_v31, %v7361_v50  ;;  %v5379_v61 = vadd.f32 %v5378_v4, %v5377_v45  ;;  %v5443_v58 = vadd.f32 %v5442_v57, %v5441_v22  ;;  %v6566_v4 = vld [vmem:[%s6757_s9 + $0x1c8] ss:$68 sps:$4 sm:$0xff]  }
 0x18e   : > { %3875 = vmatmul.mubr.bf16.gmra.mrb[180].mxu1 %v6550_v16  ;;  %3972 = vmatmul.mubr.bf16.gmra.mrb[180].mxu0 %v6551_v36 }
 0x18f   : > { %v7544_v1 = vadd.f32 %v5379_v61, %v3115_v24  ;;  %v7547_v3 = vadd.f32 %v5443_v58, %v7368_v56  ;;  %3882 = vmatprep.mubr.bf16.mxu1 %v6552_v30  ;;  %3979 = vmatprep.mubr.bf16.mxu0 %v6554_v55  ;;  %v3120_v56 = vadd.f32 %v7198_v14, %v7223_v32  ;;  %v6628_v14 = vld [vmem:[%s8280_s1 + $0x428] sm:$0xff]   ;;  %v6565_v24 = vld [vmem:[%s6757_s9 + $0x600] ss:$68 sps:$4 sm:$0xff]  }
 0x190   : > { %6086 = vmatpush3.bf16.msra.mxu0 %v6581_v5  ;;  %v6562_v5 = vld [vmem:[%s6757_s9 + $0x1cc] ss:$68 sps:$4 sm:$0xff]  }
 0x191   : > { %v5380_v50 = vpop.f32.mrb[76].mxu1  ;;  %v5444_v7 = vpop.f32.mrb[76].mxu0  ;;  %6087 = vmatprep.subr.bf16.mxu0 %v6596_v63 }
 0x192   : > { %v5381_v44 = vpop.f32.mrb[77].mxu1  ;;  %v5445_v41 = vpop.f32.mrb[77].mxu0 }
 0x193   : > { %v5382_v18 = vadd.f32 %v5381_v44, %v5380_v50  ;;  %v5446_v38 = vadd.f32 %v5445_v41, %v5444_v7  ;;  %v5383_v20 = vpop.f32.mrb[78].mxu1  ;;  %v5447_v59 = vpop.f32.mrb[78].mxu0  ;;  %v6569_v50 = vld [vmem:[%s6757_s9 + $0x254] ss:$68 sps:$4 sm:$0xff]  }
 0x194   : > { %v5384_v34 = vpop.f32.mrb[79].mxu1  ;;  %v5448_v16 = vpop.f32.mrb[79].mxu0  ;;  %6088 = vmatpush3.bf16.msra.mxu0 %v6596_v63  ;;  %v6567_v63 = vld [vmem:[%s6757_s9 + $0x68c] ss:$68 sps:$4 sm:$0xff]  }
 0x195   : > { %v7560_v36 = vadd.f32 %v5382_v18, %v3120_v56  ;;  %v7563_v11 = vadd.f32 %v5446_v38, %v7389_v21  ;;  %v5385_v39 = vadd.f32 %v5384_v34, %v5383_v20  ;;  %v5449_v31 = vadd.f32 %v5448_v16, %v5447_v59  ;;  %6089 = vmatprep.subr.bf16.mxu0 %v6609_v23  ;;  %v6641_v21 = vld [vmem:[%s8280_s1 + $0x430] sm:$0x3f]  }
 0x196   : > { %3883 = vmatmul.mubr.bf16.gmra.mrb[184].mxu1 %v6556_v53  ;;  %3980 = vmatmul.mubr.bf16.gmra.mrb[184].mxu0 %v6557_v17  ;;  %v2963_v44 = vsel %vm2961_vm0, %v6641_v21, 0 }
 0x197   : > { %v7568_v26 = vadd.f32 %v5385_v39, %v3123_v51  ;;  %v7571_v32 = vadd.f32 %v5449_v31, %v7396_v29  ;;  %3890 = vmatprep.mubr.bf16.mxu1 %v6560_v49  ;;  %3987 = vmatprep.mubr.bf16.mxu0 %v6562_v5  ;;  %v6571_v49 = vld [vmem:[%s6757_s9 + $0x688] ss:$68 sps:$4 sm:$0xff]   ;;  %v6572_v5 = vld [vmem:[%s6757_s9 + $0x250] ss:$68 sps:$4 sm:$0xff]  }
 0x198   : > { %6090 = vmatpush3.bf16.msra.mxu0 %v6609_v23  ;;  %v6575_v31 = vld [vmem:[%s6757_s9 + $0x714] ss:$68 sps:$4 sm:$0xff]  }
 0x199   : > { %v5450_v45 = vpop.f32.mrb[80].mxu0  ;;  %v5514_v22 = vpop.f32.mrb[80].mxu1  ;;  %6091 = vmatprep.subr.bf16.mxu0 %v6628_v14 }
 0x19a   : > { %v5451_v30 = vpop.f32.mrb[81].mxu0  ;;  %v5515_v55 = vpop.f32.mrb[81].mxu1 }
 0x19b   : > { %v5452_v57 = vadd.f32 %v5451_v30, %v5450_v45  ;;  %v5516_v29 = vadd.f32 %v5515_v55, %v5514_v22  ;;  %v5453_v61 = vpop.f32.mrb[82].mxu0  ;;  %v5517_v58 = vpop.f32.mrb[82].mxu1 }
 0x19c   : > { %v5454_v7 = vpop.f32.mrb[83].mxu0  ;;  %v5518_v23 = vpop.f32.mrb[83].mxu1  ;;  %6092 = vmatpush3.bf16.msra.mxu0 %v6628_v14 }
 0x19d   : > { %v7582_v41 = vadd.f32 %v5452_v57, %v7415_v2  ;;  %v7585_v53 = vadd.f32 %v5516_v29, %v7418_v25  ;;  %v5455_v17 = vadd.f32 %v5454_v7, %v5453_v61  ;;  %v5519_v56 = vadd.f32 %v5518_v23, %v5517_v58  ;;  %6143 = vmatprep.subr.msk.bf16.mxu0 %vm2961_vm0, %v6641_v21  ;;  %v6580_v61 = vld [vmem:[%s6757_s9 + $0x2d8] ss:$68 sps:$4 sm:$0xff]  }
 0x19e   : > { %3891 = vmatmul.mubr.bf16.gmra.mrb[188].mxu1 %v6565_v24  ;;  %3988 = vmatmul.mubr.bf16.gmra.mrb[188].mxu0 %v6566_v4  ;;  %v6582_v23 = vld [vmem:[%s6757_s9 + $0x79c] ss:$68 sps:$4 sm:$0xff]  }
 0x19f   : > { %v7589_v18 = vadd.f32 %v5455_v17, %v7423_v19  ;;  %v7592_v38 = vadd.f32 %v5519_v56, %v7426_v13  ;;  %3898 = vmatprep.mubr.bf16.mxu1 %v6567_v63  ;;  %3995 = vmatprep.mubr.bf16.mxu0 %v6569_v50  ;;  %v6577_v19 = vld [vmem:[%s6757_s9 + $0x2dc] ss:$68 sps:$4 sm:$0xff]  }
 0x1a0   : > { %6094 = vmatpush3.bf16.msra.mxu0 %v2963_v44  ;;  %v6584_v44 = vld [vmem:[%s6757_s9 + $0x364] ss:$68 sps:$4 sm:$0xff]  }
 0x1a1   : > { %v5456_v2 = vpop.f32.mrb[84].mxu0  ;;  %v5520_v25 = vpop.f32.mrb[84].mxu1 }
 0x1a2   : > { %v5457_v20 = vpop.f32.mrb[85].mxu0  ;;  %v5521_v59 = vpop.f32.mrb[85].mxu1 }
 0x1a3   : > { %v5458_v51 = vadd.f32 %v5457_v20, %v5456_v2  ;;  %v5522_v34 = vadd.f32 %v5521_v59, %v5520_v25  ;;  %v5459_v16 = vpop.f32.mrb[86].mxu0  ;;  %v5523_v39 = vpop.f32.mrb[86].mxu1 }
 0x1a4   : > { %v5460_v14 = vpop.f32.mrb[87].mxu0  ;;  %v5524_v21 = vpop.f32.mrb[87].mxu1 }
 0x1a5   : > { %v7599_v13 = vadd.f32 %v5458_v51, %v7439_v52  ;;  %v7602_v45 = vadd.f32 %v5522_v34, %v7442_v47  ;;  %v5461_v22 = vadd.f32 %v5460_v14, %v5459_v16  ;;  %v5525_v30 = vadd.f32 %v5524_v21, %v5523_v39  ;;  %v6579_v47 = vld [vmem:[%s6757_s9 + $0x710] ss:$68 sps:$4 sm:$0xff]   ;;  %v6587_v34 = vld [vmem:[%s6757_s9 + $0x360] ss:$68 sps:$4 sm:$0xff]  }
 0x1a6   : > { %3899 = vmatmul.mubr.bf16.gmra.mrb[192].mxu1 %v6571_v49  ;;  %3996 = vmatmul.mubr.bf16.gmra.mrb[192].mxu0 %v6572_v5  ;;  %v6590_v14 = vld [vmem:[%s6757_s9 + $0x824] ss:$68 sps:$4 sm:$0xff]   ;;  %v6592_v21 = vld [vmem:[%s6757_s9 + $0x3ec] ss:$68 sps:$4 sm:$0xff]  }
 0x1a7   : > { %v7605_v55 = vadd.f32 %v5461_v22, %v7444_v54  ;;  %v7608_v24 = vadd.f32 %v5525_v30, %v7447_v9  ;;  %3906 = vmatprep.mubr.bf16.mxu1 %v6575_v31  ;;  %4003 = vmatprep.mubr.bf16.mxu0 %v6577_v19 }
 0x1a9   : > { %v5462_v4 = vpop.f32.mrb[88].mxu0  ;;  %v5526_v52 = vpop.f32.mrb[88].mxu1 }
 0x1aa   : > { %v5463_v57 = vpop.f32.mrb[89].mxu0  ;;  %v5527_v29 = vpop.f32.mrb[89].mxu1 }
 0x1ab   : > { %v5464_v58 = vadd.f32 %v5463_v57, %v5462_v4  ;;  %v5528_v63 = vadd.f32 %v5527_v29, %v5526_v52  ;;  %v5465_v50 = vpop.f32.mrb[90].mxu0  ;;  %v5529_v7 = vpop.f32.mrb[90].mxu1 }
 0x1ac   : > { %v5466_v17 = vpop.f32.mrb[91].mxu0  ;;  %v5530_v54 = vpop.f32.mrb[91].mxu1 }
 0x1ad   : > { %v7615_v9 = vadd.f32 %v5464_v58, %v7457_v62  ;;  %v7618_v56 = vadd.f32 %v5528_v63, %v7460_v28  ;;  %v5467_v2 = vadd.f32 %v5466_v17, %v5465_v50  ;;  %v5531_v25 = vadd.f32 %v5530_v54, %v5529_v7  ;;  %v6586_v28 = vld [vmem:[%s6757_s9 + $0x798] ss:$68 sps:$4 sm:$0xff]   ;;  %v6595_v63 = vld [vmem:[%s6757_s9 + $0x3e8] ss:$68 sps:$4 sm:$0xff]  }
 0x1ae   : > { %3907 = vmatmul.mubr.bf16.gmra.mrb[196].mxu1 %v6579_v47  ;;  %4004 = vmatmul.mubr.bf16.gmra.mrb[196].mxu0 %v6580_v61  ;;  %v6597_v17 = vld [vmem:[%s6757_s9 + $0x474] ss:$68 sps:$4 sm:$0xff]   ;;  %v6601_v54 = vld [vmem:[%s6757_s9 + $0x3c] ss:$68 sps:$4 sm:$0xff]  }
 0x1af   : > { %v7621_v20 = vadd.f32 %v5467_v2, %v7462_v10  ;;  %v7624_v59 = vadd.f32 %v5531_v25, %v7465_v33  ;;  %3914 = vmatprep.mubr.bf16.mxu1 %v6582_v23  ;;  %4011 = vmatprep.mubr.bf16.mxu0 %v6584_v44 }
 0x1b1   : > { %v5468_v49 = vpop.f32.mrb[92].mxu0  ;;  %v5532_v62 = vpop.f32.mrb[92].mxu1 }
 0x1b2   : > { %v5469_v5 = vpop.f32.mrb[93].mxu0  ;;  %v5533_v51 = vpop.f32.mrb[93].mxu1 }
 0x1b3   : > { %v5470_v16 = vadd.f32 %v5469_v5, %v5468_v49  ;;  %v5534_v39 = vadd.f32 %v5533_v51, %v5532_v62  ;;  %v5471_v31 = vpop.f32.mrb[94].mxu0  ;;  %v5535_v19 = vpop.f32.mrb[94].mxu1 }
 0x1b4   : > { %v5472_v22 = vpop.f32.mrb[95].mxu0  ;;  %v5536_v10 = vpop.f32.mrb[95].mxu1 }
 0x1b5   : > { %v7631_v33 = vadd.f32 %v5470_v16, %v7475_v0  ;;  %v7634_v30 = vadd.f32 %v5534_v39, %v7478_v15  ;;  %v5473_v4 = vadd.f32 %v5472_v22, %v5471_v31  ;;  %v5537_v52 = vadd.f32 %v5536_v10, %v5535_v19  ;;  %v6594_v15 = vld [vmem:[%s6757_s9 + $0x820] ss:$68 sps:$4 sm:$0xff]   ;;  %v6602_v39 = vld [vmem:[%s6757_s9 + $0x470] ss:$68 sps:$4 sm:$0xff]  }
 0x1b6   : > { %3915 = vmatmul.mubr.bf16.gmra.mrb[200].mxu1 %v6586_v28  ;;  %4012 = vmatmul.mubr.bf16.gmra.mrb[200].mxu0 %v6587_v34  ;;  %v6603_v22 = vld [vmem:[%s6757_s9 + $0x4fc] ss:$68 sps:$4 sm:$0xff]   ;;  %v6605_v10 = vld [vmem:[%s6757_s9 + $0xc4] ss:$68 sps:$4 sm:$0xff]  }
 0x1b7   : > { %v7637_v57 = vadd.f32 %v5473_v4, %v7480_v8  ;;  %v7640_v29 = vadd.f32 %v5537_v52, %v7483_v12  ;;  %3922 = vmatprep.mubr.bf16.mxu1 %v6590_v14  ;;  %4019 = vmatprep.mubr.bf16.mxu0 %v6592_v21 }
 0x1b9   : > { %v5474_v47 = vpop.f32.mrb[96].mxu0  ;;  %v5538_v0 = vpop.f32.mrb[96].mxu1 }
 0x1ba   : > { %v5475_v61 = vpop.f32.mrb[97].mxu0  ;;  %v5539_v58 = vpop.f32.mrb[97].mxu1 }
 0x1bb   : > { %v5476_v50 = vadd.f32 %v5475_v61, %v5474_v47  ;;  %v5540_v7 = vadd.f32 %v5539_v58, %v5538_v0  ;;  %v5477_v23 = vpop.f32.mrb[98].mxu0  ;;  %v5541_v44 = vpop.f32.mrb[98].mxu1 }
 0x1bc   : > { %v5478_v2 = vpop.f32.mrb[99].mxu0  ;;  %v5542_v8 = vpop.f32.mrb[99].mxu1 }
 0x1bd   : > { %v7647_v12 = vadd.f32 %v5476_v50, %v7493_v42  ;;  %v7650_v25 = vadd.f32 %v5540_v7, %v7496_v43  ;;  %v5479_v49 = vadd.f32 %v5478_v2, %v5477_v23  ;;  %v5543_v62 = vadd.f32 %v5542_v8, %v5541_v44  ;;  %v6599_v43 = vld [vmem:[%s6757_s9 + $0x38] ss:$68 sps:$4 sm:$0xff]   ;;  %v6608_v7 = vld [vmem:[%s6757_s9 + $0xc0] ss:$68 sps:$4 sm:$0xff]   ;;  %v6612_v8 = vld [vmem:[%s6757_s9 + $0x14c] ss:$68 sps:$4 sm:$0xff]  }
 0x1be   : > { %3923 = vmatmul.mubr.bf16.gmra.mrb[204].mxu1 %v6594_v15  ;;  %4020 = vmatmul.mubr.bf16.gmra.mrb[204].mxu0 %v6595_v63  ;;  %v6610_v2 = vld [vmem:[%s6757_s9 + $0x584] ss:$68 sps:$4 sm:$0xff]  }
 0x1bf   : > { %v7653_v5 = vadd.f32 %v5479_v49, %v7498_v46  ;;  %v7656_v51 = vadd.f32 %v5543_v62, %v7501_v35  ;;  %4027 = vmatprep.mubr.bf16.mxu0 %v6597_v17  ;;  %4124 = vmatprep.mubr.bf16.mxu1 %v6601_v54 }
 0x1c1   : > { %v5480_v28 = vpop.f32.mrb[100].mxu0  ;;  %v5544_v42 = vpop.f32.mrb[100].mxu1 }
 0x1c2   : > { %v5481_v34 = vpop.f32.mrb[101].mxu0  ;;  %v5545_v16 = vpop.f32.mrb[101].mxu1 }
 0x1c3   : > { %v5482_v31 = vadd.f32 %v5481_v34, %v5480_v28  ;;  %v5546_v19 = vadd.f32 %v5545_v16, %v5544_v42  ;;  %v5483_v14 = vpop.f32.mrb[102].mxu0  ;;  %v5547_v21 = vpop.f32.mrb[102].mxu1 }
 0x1c4   : > { %v5484_v4 = vpop.f32.mrb[103].mxu0  ;;  %v5548_v46 = vpop.f32.mrb[103].mxu1 }
 0x1c5   : > { %v7663_v35 = vadd.f32 %v5482_v31, %v7514_v6  ;;  %v7666_v52 = vadd.f32 %v5546_v19, %v7517_v40  ;;  %v5485_v47 = vadd.f32 %v5484_v4, %v5483_v14  ;;  %v5549_v0 = vadd.f32 %v5548_v46, %v5547_v21  ;;  %v6607_v40 = vld [vmem:[%s6757_s9 + $0x4f8] ss:$68 sps:$4 sm:$0xff]   ;;  %v6615_v19 = vld [vmem:[%s6757_s9 + $0x148] ss:$68 sps:$4 sm:$0xff]  }
 0x1c6   : > { %4028 = vmatmul.mubr.bf16.gmra.mrb[208].mxu0 %v6602_v39  ;;  %4125 = vmatmul.mubr.bf16.vlgmr.msra.gmra.mrb[208].mxu1 %v6599_v43  ;;  %v6616_v4 = vld [vmem:[%s6757_s9 + $0x60c] ss:$68 sps:$4 sm:$0xff]   ;;  %v6618_v46 = vld [vmem:[%s6757_s9 + $0x1d4] ss:$68 sps:$4 sm:$0xff]  }
 0x1c7   : > { %v7669_v61 = vadd.f32 %v5485_v47, %v7519_v27  ;;  %v7672_v58 = vadd.f32 %v5549_v0, %v7522_v48  ;;  %4035 = vmatprep.mubr.bf16.mxu0 %v6603_v22  ;;  %4132 = vmatprep.mubr.bf16.mxu1 %v6605_v10 }
 0x1c9   : > { %v5486_v15 = vpop.f32.mrb[104].mxu0  ;;  %v5550_v6 = vpop.f32.mrb[104].mxu1 }
 0x1ca   : > { %v5487_v63 = vpop.f32.mrb[105].mxu0  ;;  %v5551_v50 = vpop.f32.mrb[105].mxu1 }
 0x1cb   : > { %v5488_v23 = vadd.f32 %v5487_v63, %v5486_v15  ;;  %v5552_v44 = vadd.f32 %v5551_v50, %v5550_v6  ;;  %v5489_v17 = vpop.f32.mrb[106].mxu0  ;;  %v5553_v54 = vpop.f32.mrb[106].mxu1 }
 0x1cc   : > { %v5490_v49 = vpop.f32.mrb[107].mxu0  ;;  %v5554_v27 = vpop.f32.mrb[107].mxu1 }
 0x1cd   : > { %v7679_v48 = vadd.f32 %v5488_v23, %v7536_v37  ;;  %v7682_v62 = vadd.f32 %v5552_v44, %v7539_v60  ;;  %v5491_v28 = vadd.f32 %v5490_v49, %v5489_v17  ;;  %v5555_v42 = vadd.f32 %v5554_v27, %v5553_v54  ;;  %v6614_v60 = vld [vmem:[%s6757_s9 + $0x580] ss:$68 sps:$4 sm:$0xff]   ;;  %v6621_v44 = vld [vmem:[%s6757_s9 + $0x1d0] ss:$68 sps:$4 sm:$0xff]  }
 0x1ce   : > { %4036 = vmatmul.mubr.bf16.gmra.mrb[212].mxu0 %v6607_v40  ;;  %4133 = vmatmul.mubr.bf16.gmra.mrb[212].mxu1 %v6608_v7  ;;  %v6622_v49 = vld [vmem:[%s6757_s9 + $0x694] ss:$68 sps:$4 sm:$0xff]   ;;  %v6624_v27 = vld [vmem:[%s6757_s9 + $0x25c] ss:$68 sps:$4 sm:$0xff]  }
 0x1cf   : > { %v7685_v34 = vadd.f32 %v5491_v28, %v7544_v1  ;;  %v7688_v16 = vadd.f32 %v5555_v42, %v7547_v3  ;;  %4043 = vmatprep.mubr.bf16.mxu0 %v6610_v2  ;;  %4140 = vmatprep.mubr.bf16.mxu1 %v6612_v8 }
 0x1d1   : > { %v5492_v43 = vpop.f32.mrb[108].mxu0  ;;  %v5556_v37 = vpop.f32.mrb[108].mxu1 }
 0x1d2   : > { %v5493_v39 = vpop.f32.mrb[109].mxu0  ;;  %v5557_v31 = vpop.f32.mrb[109].mxu1 }
 0x1d3   : > { %v5494_v14 = vadd.f32 %v5493_v39, %v5492_v43  ;;  %v5558_v21 = vadd.f32 %v5557_v31, %v5556_v37  ;;  %v5495_v22 = vpop.f32.mrb[110].mxu0  ;;  %v5559_v10 = vpop.f32.mrb[110].mxu1 }
 0x1d4   : > { %v5496_v47 = vpop.f32.mrb[111].mxu0  ;;  %v5560_v1 = vpop.f32.mrb[111].mxu1 }
 0x1d5   : > { %v7695_v3 = vadd.f32 %v5494_v14, %v7560_v36  ;;  %v7698_v0 = vadd.f32 %v5558_v21, %v7563_v11  ;;  %v5497_v15 = vadd.f32 %v5496_v47, %v5495_v22  ;;  %v5561_v6 = vadd.f32 %v5560_v1, %v5559_v10  ;;  %v6620_v11 = vld [vmem:[%s6757_s9 + $0x608] ss:$68 sps:$4 sm:$0xff]   ;;  %v6627_v21 = vld [vmem:[%s6757_s9 + $0x258] ss:$68 sps:$4 sm:$0xff]  }
 0x1d6   : > { %4044 = vmatmul.mubr.bf16.gmra.mrb[216].mxu0 %v6614_v60  ;;  %4141 = vmatmul.mubr.bf16.gmra.mrb[216].mxu1 %v6615_v19  ;;  %v6629_v47 = vld [vmem:[%s6757_s9 + $0x71c] ss:$68 sps:$4 sm:$0xff]   ;;  %v6631_v1 = vld [vmem:[%s6757_s9 + $0x2e4] ss:$68 sps:$4 sm:$0xff]  }
 0x1d7   : > { %v7701_v63 = vadd.f32 %v5497_v15, %v7568_v26  ;;  %v7704_v50 = vadd.f32 %v5561_v6, %v7571_v32  ;;  %4051 = vmatprep.mubr.bf16.mxu0 %v6616_v4  ;;  %4148 = vmatprep.mubr.bf16.mxu1 %v6618_v46 }
 0x1d9   : > { %v5562_v40 = vpop.f32.mrb[112].mxu1  ;;  %v5626_v36 = vpop.f32.mrb[112].mxu0 }
 0x1da   : > { %v5563_v7 = vpop.f32.mrb[113].mxu1  ;;  %v5627_v23 = vpop.f32.mrb[113].mxu0 }
 0x1db   : > { %v5564_v17 = vadd.f32 %v5563_v7, %v5562_v40  ;;  %v5628_v54 = vadd.f32 %v5627_v23, %v5626_v36  ;;  %v5565_v2 = vpop.f32.mrb[114].mxu1  ;;  %v5629_v8 = vpop.f32.mrb[114].mxu0 }
 0x1dc   : > { %v5566_v28 = vpop.f32.mrb[115].mxu1  ;;  %v5630_v26 = vpop.f32.mrb[115].mxu0 }
 0x1dd   : > { %v7711_v32 = vadd.f32 %v5564_v17, %v7582_v41  ;;  %v7714_v42 = vadd.f32 %v5628_v54, %v7585_v53  ;;  %v5567_v43 = vadd.f32 %v5566_v28, %v5565_v2  ;;  %v5631_v37 = vadd.f32 %v5630_v26, %v5629_v8  ;;  %v6626_v53 = vld [vmem:[%s6757_s9 + $0x690] ss:$68 sps:$4 sm:$0xff]   ;;  %v6634_v54 = vld [vmem:[%s6757_s9 + $0x2e0] ss:$68 sps:$4 sm:$0xff]  }
 0x1de   : > { %4052 = vmatmul.mubr.bf16.gmra.mrb[220].mxu0 %v6620_v11  ;;  %4149 = vmatmul.mubr.bf16.gmra.mrb[220].mxu1 %v6621_v44  ;;  %v6635_v28 = vld [vmem:[%s6757_s9 + $0x7a4] ss:$68 sps:$4 sm:$0xff]   ;;  %v6637_v26 = vld [vmem:[%s6757_s9 + $0x36c] ss:$68 sps:$4 sm:$0xff]  }
 0x1df   : > { %v7717_v39 = vadd.f32 %v5567_v43, %v7589_v18  ;;  %v7720_v31 = vadd.f32 %v5631_v37, %v7592_v38  ;;  %4059 = vmatprep.mubr.bf16.mxu0 %v6622_v49  ;;  %4156 = vmatprep.mubr.bf16.mxu1 %v6624_v27 }
 0x1e1   : > { %v5568_v60 = vpop.f32.mrb[116].mxu1  ;;  %v5632_v41 = vpop.f32.mrb[116].mxu0 }
 0x1e2   : > { %v5569_v19 = vpop.f32.mrb[117].mxu1  ;;  %v5633_v14 = vpop.f32.mrb[117].mxu0 }
 0x1e3   : > { %v5570_v22 = vadd.f32 %v5569_v19, %v5568_v60  ;;  %v5634_v10 = vadd.f32 %v5633_v14, %v5632_v41  ;;  %v5571_v4 = vpop.f32.mrb[118].mxu1  ;;  %v5635_v46 = vpop.f32.mrb[118].mxu0 }
 0x1e4   : > { %v5572_v15 = vpop.f32.mrb[119].mxu1  ;;  %v5636_v18 = vpop.f32.mrb[119].mxu0 }
 0x1e5   : > { %v7727_v38 = vadd.f32 %v5570_v22, %v7599_v13  ;;  %v7730_v6 = vadd.f32 %v5634_v10, %v7602_v45  ;;  %v5573_v40 = vadd.f32 %v5572_v15, %v5571_v4  ;;  %v5637_v36 = vadd.f32 %v5636_v18, %v5635_v46  ;;  %v6633_v45 = vld [vmem:[%s6757_s9 + $0x718] ss:$68 sps:$4 sm:$0xff]   ;;  %v6640_v10 = vld [vmem:[%s6757_s9 + $0x368] ss:$68 sps:$4 sm:$0xff]  }
 0x1e6   : > { %4060 = vmatmul.mubr.bf16.gmra.mrb[224].mxu0 %v6626_v53  ;;  %4157 = vmatmul.mubr.bf16.gmra.mrb[224].mxu1 %v6627_v21  ;;  %v6642_v15 = vld [vmem:[%s6757_s9 + $0x82c] ss:$68 sps:$4 sm:$0xff]   ;;  %v6644_v18 = vld [vmem:[%s6757_s9 + $0x3f4] ss:$68 sps:$4 sm:$0xff]  }
 0x1e7   : > { %v7733_v7 = vadd.f32 %v5573_v40, %v7605_v55  ;;  %v7736_v23 = vadd.f32 %v5637_v36, %v7608_v24  ;;  %4067 = vmatprep.mubr.bf16.mxu0 %v6629_v47  ;;  %4164 = vmatprep.mubr.bf16.mxu1 %v6631_v1 }
 0x1e9   : > { %v5574_v11 = vpop.f32.mrb[120].mxu1  ;;  %v5638_v13 = vpop.f32.mrb[120].mxu0 }
 0x1ea   : > { %v5575_v44 = vpop.f32.mrb[121].mxu1  ;;  %v5639_v17 = vpop.f32.mrb[121].mxu0 }
 0x1eb   : > { %v5576_v2 = vadd.f32 %v5575_v44, %v5574_v11  ;;  %v5640_v8 = vadd.f32 %v5639_v17, %v5638_v13  ;;  %v5577_v49 = vpop.f32.mrb[122].mxu1  ;;  %v5641_v27 = vpop.f32.mrb[122].mxu0 }
 0x1ec   : > { %v5578_v43 = vpop.f32.mrb[123].mxu1  ;;  %v5642_v55 = vpop.f32.mrb[123].mxu0 }
 0x1ed   : > { %v7743_v24 = vadd.f32 %v5576_v2, %v7615_v9  ;;  %v7746_v37 = vadd.f32 %v5640_v8, %v7618_v56  ;;  %v5579_v60 = vadd.f32 %v5578_v43, %v5577_v49  ;;  %v5643_v41 = vadd.f32 %v5642_v55, %v5641_v27  ;;  %v6639_v56 = vld [vmem:[%s6757_s9 + $0x7a0] ss:$68 sps:$4 sm:$0xff]   ;;  %v6647_v8 = vld [vmem:[%s6757_s9 + $0x3f0] ss:$68 sps:$4 sm:$0xff]  }
 0x1ee   : > { %4068 = vmatmul.mubr.bf16.gmra.mrb[228].mxu0 %v6633_v45  ;;  %4165 = vmatmul.mubr.bf16.gmra.mrb[228].mxu1 %v6634_v54  ;;  %v6648_v43 = vld [vmem:[%s6757_s9 + $0x47c] ss:$68 sps:$4 sm:$0xff]  }
 0x1ef   : > { %v7749_v19 = vadd.f32 %v5579_v60, %v7621_v20  ;;  %v7752_v14 = vadd.f32 %v5643_v41, %v7624_v59  ;;  %4075 = vmatprep.mubr.bf16.mxu0 %v6635_v28  ;;  %4172 = vmatprep.mubr.bf16.mxu1 %v6637_v26  ;;  %v6650_v55 = vld [vmem:[%s6757_s9 + $0x40] ss:$68 sps:$4 sm:$0xff]  }
 0x1f1   : > { %v5580_v53 = vpop.f32.mrb[124].mxu1  ;;  %v5644_v9 = vpop.f32.mrb[124].mxu0 }
 0x1f2   : > { %v5581_v21 = vpop.f32.mrb[125].mxu1  ;;  %v5645_v22 = vpop.f32.mrb[125].mxu0 }
 0x1f3   : > { %v5582_v4 = vadd.f32 %v5581_v21, %v5580_v53  ;;  %v5646_v46 = vadd.f32 %v5645_v22, %v5644_v9  ;;  %v5583_v47 = vpop.f32.mrb[126].mxu1  ;;  %v5647_v1 = vpop.f32.mrb[126].mxu0 }
 0x1f4   : > { %v5584_v40 = vpop.f32.mrb[127].mxu1  ;;  %v5648_v20 = vpop.f32.mrb[127].mxu0 }
 0x1f5   : > { %v7759_v59 = vadd.f32 %v5582_v4, %v7631_v33  ;;  %v7762_v36 = vadd.f32 %v5646_v46, %v7634_v30  ;;  %v5585_v11 = vadd.f32 %v5584_v40, %v5583_v47  ;;  %v5649_v13 = vadd.f32 %v5648_v20, %v5647_v1  ;;  %v6646_v30 = vld [vmem:[%s6757_s9 + $0x828] ss:$68 sps:$4 sm:$0xff]   ;;  %v6651_v4 = vld [vmem:[%s6757_s9 + $0x478] ss:$68 sps:$4 sm:$0xff]   ;;  %v6655_v20 = vld [vmem:[%s6757_s9 + $0x150] ss:$68 sps:$4 sm:$0xff]  }
 0x1f6   : > { %4076 = vmatmul.mubr.bf16.gmra.mrb[232].mxu0 %v6639_v56  ;;  %4173 = vmatmul.mubr.bf16.gmra.mrb[232].mxu1 %v6640_v10  ;;  %v6652_v46 = vld [vmem:[%s6757_s9 + $0xc8] ss:$68 sps:$4 sm:$0xff]  }
 0x1f7   : > { %v7765_v44 = vadd.f32 %v5585_v11, %v7637_v57  ;;  %v7768_v17 = vadd.f32 %v5649_v13, %v7640_v29  ;;  %4083 = vmatprep.mubr.bf16.mxu0 %v6642_v15  ;;  %4180 = vmatprep.mubr.bf16.mxu1 %v6644_v18  ;;  %v6653_v40 = vld [vmem:[%s6757_s9 + $0x504] ss:$68 sps:$4 sm:$0xff]  }
 0x1f9   : > { %v5586_v45 = vpop.f32.mrb[128].mxu1  ;;  %v5650_v33 = vpop.f32.mrb[128].mxu0 }
 0x1fa   : > { %v5587_v54 = vpop.f32.mrb[129].mxu1  ;;  %v5651_v2 = vpop.f32.mrb[129].mxu0 }
 0x1fb   : > { %v5588_v49 = vadd.f32 %v5587_v54, %v5586_v45  ;;  %v5652_v27 = vadd.f32 %v5651_v2, %v5650_v33  ;;  %v5589_v28 = vpop.f32.mrb[130].mxu1  ;;  %v5653_v26 = vpop.f32.mrb[130].mxu0 }
 0x1fc   : > { %v5590_v60 = vpop.f32.mrb[131].mxu1  ;;  %v5654_v57 = vpop.f32.mrb[131].mxu0 }
 0x1fd   : > { %v7775_v29 = vadd.f32 %v5588_v49, %v7647_v12  ;;  %v7778_v41 = vadd.f32 %v5652_v27, %v7650_v25  ;;  %v5591_v53 = vadd.f32 %v5590_v60, %v5589_v28  ;;  %v5655_v9 = vadd.f32 %v5654_v57, %v5653_v26  ;;  %v6656_v49 = vld [vmem:[%s6757_s9 + $0x500] ss:$68 sps:$4 sm:$0xff]   ;;  %v6657_v27 = vld [vmem:[%s6757_s9 + $0x1d8] ss:$68 sps:$4 sm:$0xff]   ;;  %v6658_v60 = vld [vmem:[%s6757_s9 + $0x58c] ss:$68 sps:$4 sm:$0xff]  }
 0x1fe   : > { %4084 = vmatmul.mubr.bf16.gmra.mrb[236].mxu0 %v6646_v30  ;;  %4181 = vmatmul.mubr.bf16.gmra.mrb[236].mxu1 %v6647_v8  ;;  %v6660_v57 = vld [vmem:[%s6757_s9 + $0x260] ss:$68 sps:$4 sm:$0xff]  }
 0x1ff   : > { %v7781_v21 = vadd.f32 %v5591_v53, %v7653_v5  ;;  %v7784_v22 = vadd.f32 %v5655_v9, %v7656_v51  ;;  %4188 = vmatprep.mubr.bf16.mxu1 %v6648_v43  ;;  %6095 = vmatprep.mubr.msk.bf16.mxu0 %vm2912_vm1, %v6650_v55 }
 0x201   : > { %v5592_v12 = vpop.f32.mrb[132].mxu1  ;;  %v5656_v56 = vpop.f32.mrb[132].mxu0 }
 0x202   : > { %v5593_v10 = vpop.f32.mrb[133].mxu1  ;;  %v5657_v25 = vpop.f32.mrb[133].mxu0 }
 0x203   : > { %v5594_v47 = vadd.f32 %v5593_v10, %v5592_v12  ;;  %v5658_v1 = vadd.f32 %v5657_v25, %v5656_v56  ;;  %v5595_v15 = vpop.f32.mrb[134].mxu1  ;;  %v5659_v18 = vpop.f32.mrb[134].mxu0 }
 0x204   : > { %v5596_v5 = vpop.f32.mrb[135].mxu1  ;;  %v5660_v11 = vpop.f32.mrb[135].mxu0 }
 0x205   : > { %v7792_v51 = vadd.f32 %v5594_v47, %v7663_v35  ;;  %v7795_v13 = vadd.f32 %v5658_v1, %v7666_v52  ;;  %v5597_v45 = vadd.f32 %v5596_v5, %v5595_v15  ;;  %v5661_v33 = vadd.f32 %v5660_v11, %v5659_v18  ;;  %v6661_v47 = vld [vmem:[%s6757_s9 + $0x588] ss:$68 sps:$4 sm:$0xff]   ;;  %v6663_v5 = vld [vmem:[%s6757_s9 + $0x614] ss:$68 sps:$4 sm:$0xff]  }
 0x206   : > { %4189 = vmatmul.mubr.bf16.gmra.mrb[240].mxu1 %v6651_v4  ;;  %6096 = vmatmul.mubr.msk.bf16.vlgmr.msra.gmra.mrb[240].mxu0 %vm2912_vm1, %v6652_v46  ;;  %v6662_v1 = vld [vmem:[%s6757_s9 + $0x2e8] ss:$68 sps:$4 sm:$0xff]   ;;  %v6665_v11 = vld [vmem:[%s6757_s9 + $0x370] ss:$68 sps:$4 sm:$0xff]  }
 0x207   : > { %v7799_v54 = vadd.f32 %v5597_v45, %v7669_v61  ;;  %v7802_v2 = vadd.f32 %v5661_v33, %v7672_v58  ;;  %4196 = vmatprep.mubr.bf16.mxu1 %v6653_v40  ;;  %6099 = vmatprep.mubr.msk.bf16.mxu0 %vm2912_vm1, %v6655_v20 }
 0x209   : > { %v5598_v35 = vpop.f32.mrb[136].mxu1  ;;  %v5662_v30 = vpop.f32.mrb[136].mxu0 }
 0x20a   : > { %v5599_v52 = vpop.f32.mrb[137].mxu1  ;;  %v5663_v8 = vpop.f32.mrb[137].mxu0 }
 0x20b   : > { %v5600_v28 = vadd.f32 %v5599_v52, %v5598_v35  ;;  %v5664_v26 = vadd.f32 %v5663_v8, %v5662_v30  ;;  %v5601_v43 = vpop.f32.mrb[138].mxu1  ;;  %v5665_v55 = vpop.f32.mrb[138].mxu0 }
 0x20c   : > { %v5602_v61 = vpop.f32.mrb[139].mxu1  ;;  %v5666_v53 = vpop.f32.mrb[139].mxu0 }
 0x20d   : > { %v7810_v58 = vadd.f32 %v5600_v28, %v7679_v48  ;;  %v7813_v9 = vadd.f32 %v5664_v26, %v7682_v62  ;;  %v5603_v12 = vadd.f32 %v5602_v61, %v5601_v43  ;;  %v5667_v56 = vadd.f32 %v5666_v53, %v5665_v55  ;;  %v6666_v28 = vld [vmem:[%s6757_s9 + $0x610] ss:$68 sps:$4 sm:$0xff]   ;;  %v6667_v26 = vld [vmem:[%s6757_s9 + $0x3f8] ss:$68 sps:$4 sm:$0xff]   ;;  %v6671_v53 = vld [vmem:[%s6757_s9 + $0x480] ss:$68 sps:$4 sm:$0xff]  }
 0x20e   : > { %4197 = vmatmul.mubr.bf16.gmra.mrb[244].mxu1 %v6656_v49  ;;  %6100 = vmatmul.mubr.msk.bf16.gmra.mrb[244].mxu0 %vm2912_vm1, %v6657_v27  ;;  %v6670_v61 = vld [vmem:[%s6757_s9 + $0x69c] ss:$68 sps:$4 sm:$0xff]  }
 0x20f   : > { %v7817_v10 = vadd.f32 %v5603_v12, %v7685_v34  ;;  %v7820_v25 = vadd.f32 %v5667_v56, %v7688_v16  ;;  %4204 = vmatprep.mubr.bf16.mxu1 %v6658_v60  ;;  %6103 = vmatprep.mubr.msk.bf16.mxu0 %vm2912_vm1, %v6660_v57 }
 0x211   : > { %v5604_v48 = vpop.f32.mrb[140].mxu1  ;;  %v5668_v4 = vpop.f32.mrb[140].mxu0 }
 0x212   : > { %v5605_v62 = vpop.f32.mrb[141].mxu1  ;;  %v5669_v46 = vpop.f32.mrb[141].mxu0 }
 0x213   : > { %v5606_v15 = vadd.f32 %v5605_v62, %v5604_v48  ;;  %v5670_v18 = vadd.f32 %v5669_v46, %v5668_v4  ;;  %v5607_v40 = vpop.f32.mrb[142].mxu1  ;;  %v5671_v20 = vpop.f32.mrb[142].mxu0 }
 0x214   : > { %v5608_v34 = vpop.f32.mrb[143].mxu1  ;;  %v5672_v45 = vpop.f32.mrb[143].mxu0 }
 0x215   : > { %v7828_v16 = vadd.f32 %v5606_v15, %v7695_v3  ;;  %v7831_v33 = vadd.f32 %v5670_v18, %v7698_v0  ;;  %v5609_v35 = vadd.f32 %v5608_v34, %v5607_v40  ;;  %v5673_v30 = vadd.f32 %v5672_v45, %v5671_v20  ;;  %v6668_v15 = vld [vmem:[%s6757_s9 + $0x698] ss:$68 sps:$4 sm:$0xff]   ;;  %v6672_v18 = vld [vmem:[%s6757_s9 + $0x508] ss:$68 sps:$4 sm:$0xff]   ;;  %v6676_v45 = vld [vmem:[%s6757_s9 + $0x590] ss:$68 sps:$4 sm:$0xff]  }
 0x216   : > { %4205 = vmatmul.mubr.bf16.gmra.mrb[248].mxu1 %v6661_v47  ;;  %6104 = vmatmul.mubr.msk.bf16.gmra.mrb[248].mxu0 %vm2912_vm1, %v6662_v1  ;;  %v6675_v34 = vld [vmem:[%s6757_s9 + $0x724] ss:$68 sps:$4 sm:$0xff]  }
 0x217   : > { %v7835_v52 = vadd.f32 %v5609_v35, %v7701_v63  ;;  %v7838_v8 = vadd.f32 %v5673_v30, %v7704_v50  ;;  %4212 = vmatprep.mubr.bf16.mxu1 %v6663_v5  ;;  %6107 = vmatprep.mubr.msk.bf16.mxu0 %vm2912_vm1, %v6665_v11 }
 0x219   : > { %v5674_v3 = vpop.f32.mrb[144].mxu0  ;;  %v5738_v49 = vpop.f32.mrb[144].mxu1 }
 0x21a   : > { %v5675_v0 = vpop.f32.mrb[145].mxu0  ;;  %v5739_v27 = vpop.f32.mrb[145].mxu1 }
 0x21b   : > { %v5676_v43 = vadd.f32 %v5675_v0, %v5674_v3  ;;  %v5740_v55 = vadd.f32 %v5739_v27, %v5738_v49  ;;  %v5677_v60 = vpop.f32.mrb[146].mxu0  ;;  %v5741_v57 = vpop.f32.mrb[146].mxu1 }
 0x21c   : > { %v5678_v63 = vpop.f32.mrb[147].mxu0  ;;  %v5742_v12 = vpop.f32.mrb[147].mxu1 }
 0x21d   : > { %v7846_v50 = vadd.f32 %v5676_v43, %v7711_v32  ;;  %v7849_v56 = vadd.f32 %v5740_v55, %v7714_v42  ;;  %v5679_v48 = vadd.f32 %v5678_v63, %v5677_v60  ;;  %v5743_v4 = vadd.f32 %v5742_v12, %v5741_v57  ;;  %v6673_v43 = vld [vmem:[%s6757_s9 + $0x720] ss:$68 sps:$4 sm:$0xff]   ;;  %v6677_v55 = vld [vmem:[%s6757_s9 + $0x618] ss:$68 sps:$4 sm:$0xff]   ;;  %v6680_v63 = vld [vmem:[%s6757_s9 + $0x7ac] ss:$68 sps:$4 sm:$0xff]  }
 0x21e   : > { %4213 = vmatmul.mubr.bf16.gmra.mrb[252].mxu1 %v6666_v28  ;;  %6108 = vmatmul.mubr.msk.bf16.gmra.mrb[252].mxu0 %vm2912_vm1, %v6667_v26  ;;  %v6681_v12 = vld [vmem:[%s6757_s9 + $0x6a0] ss:$68 sps:$4 sm:$0xff]  }
 0x21f   : > { %v7853_v62 = vadd.f32 %v5679_v48, %v7717_v39  ;;  %v7856_v46 = vadd.f32 %v5743_v4, %v7720_v31  ;;  %4220 = vmatprep.mubr.bf16.mxu1 %v6670_v61  ;;  %6111 = vmatprep.mubr.msk.bf16.mxu0 %vm2912_vm1, %v6671_v53 }
 0x221   : > { %v5680_v32 = vpop.f32.mrb[148].mxu0  ;;  %v5744_v47 = vpop.f32.mrb[148].mxu1 }
 0x222   : > { %v5681_v42 = vpop.f32.mrb[149].mxu0  ;;  %v5745_v1 = vpop.f32.mrb[149].mxu1 }
 0x223   : > { %v5682_v40 = vadd.f32 %v5681_v42, %v5680_v32  ;;  %v5746_v20 = vadd.f32 %v5745_v1, %v5744_v47  ;;  %v5683_v5 = vpop.f32.mrb[150].mxu0  ;;  %v5747_v11 = vpop.f32.mrb[150].mxu1 }
 0x224   : > { %v5684_v39 = vpop.f32.mrb[151].mxu0  ;;  %v5748_v35 = vpop.f32.mrb[151].mxu1 }
 0x225   : > { %v7864_v31 = vadd.f32 %v5682_v40, %v7727_v38  ;;  %v7867_v30 = vadd.f32 %v5746_v20, %v7730_v6  ;;  %v5685_v3 = vadd.f32 %v5684_v39, %v5683_v5  ;;  %v5749_v49 = vadd.f32 %v5748_v35, %v5747_v11  ;;  %v6678_v40 = vld [vmem:[%s6757_s9 + $0x7a8] ss:$68 sps:$4 sm:$0xff]   ;;  %v6685_v39 = vld [vmem:[%s6757_s9 + $0x834] ss:$68 sps:$4 sm:$0xff]  }
 0x226   : > { %4221 = vmatmul.mubr.bf16.gmra.mrb[0].mxu1 %v6668_v15  ;;  %6112 = vmatmul.mubr.msk.bf16.gmra.mrb[0].mxu0 %vm2912_vm1, %v6672_v18  ;;  %v6682_v20 = vld [vmem:[%s6757_s9 + $0x728] ss:$68 sps:$4 sm:$0xff]   ;;  %v6686_v35 = vld [vmem:[%s6757_s9 + $0x7b0] ss:$68 sps:$4 sm:$0xff]  }
 0x227   : > { %v7871_v0 = vadd.f32 %v5685_v3, %v7733_v7  ;;  %v7874_v27 = vadd.f32 %v5749_v49, %v7736_v23  ;;  %4228 = vmatprep.mubr.bf16.mxu1 %v6675_v34  ;;  %6115 = vmatprep.mubr.msk.bf16.mxu0 %vm2912_vm1, %v6676_v45 }
 0x229   : > { %v5686_v38 = vpop.f32.mrb[152].mxu0  ;;  %v5750_v28 = vpop.f32.mrb[152].mxu1 }
 0x22a   : > { %v5687_v6 = vpop.f32.mrb[153].mxu0  ;;  %v5751_v26 = vpop.f32.mrb[153].mxu1 }
 0x22b   : > { %v5688_v60 = vadd.f32 %v5687_v6, %v5686_v38  ;;  %v5752_v57 = vadd.f32 %v5751_v26, %v5750_v28  ;;  %v5689_v61 = vpop.f32.mrb[154].mxu0  ;;  %v5753_v53 = vpop.f32.mrb[154].mxu1 }
 0x22c   : > { %v5690_v7 = vpop.f32.mrb[155].mxu0  ;;  %v5754_v48 = vpop.f32.mrb[155].mxu1 }
 0x22d   : > { %v7882_v23 = vadd.f32 %v5688_v60, %v7743_v24  ;;  %v7885_v4 = vadd.f32 %v5752_v57, %v7746_v37  ;;  %v5691_v32 = vadd.f32 %v5690_v7, %v5689_v61  ;;  %v5755_v47 = vadd.f32 %v5754_v48, %v5753_v53  ;;  %v6687_v57 = vld [vmem:[%s6757_s9 + $0x838] ss:$68 sps:$4 sm:$0xff]  }
 0x22e   : > { %4229 = vmatmul.mubr.bf16.gmra.mrb[4].mxu1 %v6673_v43  ;;  %6116 = vmatmul.mubr.msk.bf16.gmra.mrb[4].mxu0 %vm2912_vm1, %v6677_v55 }
 0x22f   : > { %v7889_v42 = vadd.f32 %v5691_v32, %v7749_v19  ;;  %v7892_v1 = vadd.f32 %v5755_v47, %v7752_v14  ;;  %4236 = vmatprep.mubr.bf16.mxu1 %v6680_v63  ;;  %6119 = vmatprep.mubr.msk.bf16.mxu0 %vm2912_vm1, %v6681_v12 }
 0x231   : > { %v5692_v24 = vpop.f32.mrb[156].mxu0  ;;  %v5756_v15 = vpop.f32.mrb[156].mxu1 }
 0x232   : > { %v5693_v37 = vpop.f32.mrb[157].mxu0  ;;  %v5757_v18 = vpop.f32.mrb[157].mxu1 }
 0x233   : > { %v5694_v5 = vadd.f32 %v5693_v37, %v5692_v24  ;;  %v5758_v11 = vadd.f32 %v5757_v18, %v5756_v15  ;;  %v5695_v34 = vpop.f32.mrb[158].mxu0  ;;  %v5759_v45 = vpop.f32.mrb[158].mxu1 }
 0x234   : > { %v5696_v19 = vpop.f32.mrb[159].mxu0  ;;  %v5760_v3 = vpop.f32.mrb[159].mxu1 }
 0x235   : > { %v7900_v14 = vadd.f32 %v5694_v5, %v7759_v59  ;;  %v7903_v49 = vadd.f32 %v5758_v11, %v7762_v36  ;;  %v5697_v38 = vadd.f32 %v5696_v19, %v5695_v34  ;;  %v5761_v28 = vadd.f32 %v5760_v3, %v5759_v45  ;;  %v6683_v36 = vld [vmem:[%s6757_s9 + $0x830] ss:$68 sps:$4 sm:$0xff]   ;;  %s4671_s9 = sshll.u32 %s8284_s16, 2 }
 0x236   : > { %4237 = vmatmul.mubr.bf16.gmra.mrb[8].mxu1 %v6678_v40  ;;  %6120 = vmatmul.mubr.msk.bf16.gmra.mrb[8].mxu0 %vm2912_vm1, %v6682_v20  ;;  %s8163_s28 = scalar_lea.vmem %s8282_s3, %s4671_s9 }
 0x237   : > { %v7907_v6 = vadd.f32 %v5697_v38, %v7765_v44  ;;  %v7910_v26 = vadd.f32 %v5761_v28, %v7768_v17  ;;  %4244 = vmatprep.mubr.bf16.mxu1 %v6685_v39  ;;  %6123 = vmatprep.mubr.msk.bf16.mxu0 %vm2912_vm1, %v6686_v35 }
 0x239   : > { %v5698_v43 = vpop.f32.mrb[160].mxu0  ;;  %v5762_v59 = vpop.f32.mrb[160].mxu1 }
 0x23a   : > { %v5699_v55 = vpop.f32.mrb[161].mxu0  ;;  %v5763_v60 = vpop.f32.mrb[161].mxu1 }
 0x23b   : > { %v5700_v61 = vadd.f32 %v5699_v55, %v5698_v43  ;;  %v5764_v53 = vadd.f32 %v5763_v60, %v5762_v59  ;;  %v5701_v63 = vpop.f32.mrb[162].mxu0  ;;  %v5765_v12 = vpop.f32.mrb[162].mxu1 }
 0x23c   : > { %v5702_v7 = vpop.f32.mrb[163].mxu0  ;;  %v5766_v48 = vpop.f32.mrb[163].mxu1 }
 0x23d   : > { %v7916_v44 = vadd.f32 %v5700_v61, %v7775_v29  ;;  %v7919_v17 = vadd.f32 %v5764_v53, %v7778_v41  ;;  %v5703_v32 = vadd.f32 %v5702_v7, %v5701_v63  ;;  %v5767_v47 = vadd.f32 %v5766_v48, %v5765_v12 }
 0x23e   : > { %4245 = vmatmul.mubr.bf16.gmra.mrb[12].mxu1 %v6683_v36  ;;  %6124 = vmatmul.mubr.msk.bf16.gmra.mrb[12].mxu0 %vm2912_vm1, %v6687_v57 }
 0x23f   : > { %v7923_v24 = vadd.f32 %v5703_v32, %v7781_v21  ;;  %v7926_v15 = vadd.f32 %v5767_v47, %v7784_v22 }
 0x241   : > { %v5704_v37 = vpop.f32.mrb[164].mxu0  ;;  %v5768_v18 = vpop.f32.mrb[164].mxu1 }
 0x242   : > { %v5705_v40 = vpop.f32.mrb[165].mxu0  ;;  %v5769_v20 = vpop.f32.mrb[165].mxu1 }
 0x243   : > { %v5706_v29 = vadd.f32 %v5705_v40, %v5704_v37  ;;  %v5770_v5 = vadd.f32 %v5769_v20, %v5768_v18  ;;  %v5707_v11 = vpop.f32.mrb[166].mxu0  ;;  %v5771_v41 = vpop.f32.mrb[166].mxu1 }
 0x244   : > { %v5708_v34 = vpop.f32.mrb[167].mxu0  ;;  %v5772_v45 = vpop.f32.mrb[167].mxu1 }
 0x245   : > { %v7929_v39 = vadd.f32 %v5706_v29, %v7792_v51  ;;  %v7932_v35 = vadd.f32 %v5770_v5, %v7795_v13  ;;  %v5709_v21 = vadd.f32 %v5708_v34, %v5707_v11  ;;  %v5773_v19 = vadd.f32 %v5772_v45, %v5771_v41 }
 0x247   : > { %v7935_v22 = vadd.f32 %v5709_v21, %v7799_v54  ;;  %v7938_v3 = vadd.f32 %v5773_v19, %v7802_v2 }
 0x249   : > { %v5710_v38 = vpop.f32.mrb[168].mxu0  ;;  %v5774_v28 = vpop.f32.mrb[168].mxu1 }
 0x24a   : > { %v5711_v43 = vpop.f32.mrb[169].mxu0  ;;  %v5775_v59 = vpop.f32.mrb[169].mxu1 }
 0x24b   : > { %v5712_v55 = vadd.f32 %v5711_v43, %v5710_v38  ;;  %v5776_v60 = vadd.f32 %v5775_v59, %v5774_v28  ;;  %v5713_v36 = vpop.f32.mrb[170].mxu0  ;;  %v5777_v51 = vpop.f32.mrb[170].mxu1 }
 0x24c   : > { %v5714_v57 = vpop.f32.mrb[171].mxu0  ;;  %v5778_v61 = vpop.f32.mrb[171].mxu1 }
 0x24d   : > { %v7941_v13 = vadd.f32 %v5712_v55, %v7810_v58  ;;  %v7944_v53 = vadd.f32 %v5776_v60, %v7813_v9  ;;  %v5715_v54 = vadd.f32 %v5714_v57, %v5713_v36  ;;  %v5779_v63 = vadd.f32 %v5778_v61, %v5777_v51 }
 0x24f   : > { %v7947_v2 = vadd.f32 %v5715_v54, %v7817_v10  ;;  %v7950_v12 = vadd.f32 %v5779_v63, %v7820_v25 }
 0x251   : > { %v5716_v7 = vpop.f32.mrb[172].mxu0  ;;  %v5780_v48 = vpop.f32.mrb[172].mxu1 }
 0x252   : > { %v5717_v32 = vpop.f32.mrb[173].mxu0  ;;  %v5781_v47 = vpop.f32.mrb[173].mxu1 }
 0x253   : > { %v5718_v37 = vadd.f32 %v5717_v32, %v5716_v7  ;;  %v5782_v18 = vadd.f32 %v5781_v47, %v5780_v48  ;;  %v5719_v40 = vpop.f32.mrb[174].mxu0  ;;  %v5783_v58 = vpop.f32.mrb[174].mxu1 }
 0x254   : > { %v5720_v20 = vpop.f32.mrb[175].mxu0  ;;  %v5784_v29 = vpop.f32.mrb[175].mxu1 }
 0x255   : > { %v7953_v9 = vadd.f32 %v5718_v37, %v7828_v16  ;;  %v7956_v5 = vadd.f32 %v5782_v18, %v7831_v33  ;;  %v5721_v10 = vadd.f32 %v5720_v20, %v5719_v40  ;;  %v5785_v11 = vadd.f32 %v5784_v29, %v5783_v58 }
 0x257   : > { %v7959_v25 = vadd.f32 %v5721_v10, %v7835_v52  ;;  %v7962_v41 = vadd.f32 %v5785_v11, %v7838_v8 }
 0x259   : > { %v5786_v34 = vpop.f32.mrb[176].mxu1  ;;  %v5850_v45 = vpop.f32.mrb[176].mxu0 }
 0x25a   : > { %v5787_v21 = vpop.f32.mrb[177].mxu1  ;;  %v5851_v19 = vpop.f32.mrb[177].mxu0 }
 0x25b   : > { %v5788_v38 = vadd.f32 %v5787_v21, %v5786_v34  ;;  %v5852_v28 = vadd.f32 %v5851_v19, %v5850_v45  ;;  %v5789_v43 = vpop.f32.mrb[178].mxu1  ;;  %v5853_v16 = vpop.f32.mrb[178].mxu0 }
 0x25c   : > { %v5790_v59 = vpop.f32.mrb[179].mxu1  ;;  %v5854_v55 = vpop.f32.mrb[179].mxu0 }
 0x25d   : > { %v7965_v33 = vadd.f32 %v5788_v38, %v7846_v50  ;;  %v7968_v60 = vadd.f32 %v5852_v28, %v7849_v56  ;;  %v5791_v52 = vadd.f32 %v5790_v59, %v5789_v43  ;;  %v5855_v36 = vadd.f32 %v5854_v55, %v5853_v16 }
 0x25f   : > { %v7971_v8 = vadd.f32 %v5791_v52, %v7853_v62  ;;  %v7974_v51 = vadd.f32 %v5855_v36, %v7856_v46 }
 0x261   : > { %v5792_v57 = vpop.f32.mrb[180].mxu1  ;;  %v5856_v61 = vpop.f32.mrb[180].mxu0 }
 0x262   : > { %v5793_v54 = vpop.f32.mrb[181].mxu1  ;;  %v5857_v63 = vpop.f32.mrb[181].mxu0 }
 0x263   : > { %v5794_v7 = vadd.f32 %v5793_v54, %v5792_v57  ;;  %v5858_v48 = vadd.f32 %v5857_v63, %v5856_v61  ;;  %v5795_v32 = vpop.f32.mrb[182].mxu1  ;;  %v5859_v50 = vpop.f32.mrb[182].mxu0 }
 0x264   : > { %v5796_v47 = vpop.f32.mrb[183].mxu1  ;;  %v5860_v37 = vpop.f32.mrb[183].mxu0 }
 0x265   : > { %v7977_v56 = vadd.f32 %v5794_v7, %v7864_v31  ;;  %v7980_v18 = vadd.f32 %v5858_v48, %v7867_v30  ;;  %v5797_v62 = vadd.f32 %v5796_v47, %v5795_v32  ;;  %v5861_v40 = vadd.f32 %v5860_v37, %v5859_v50 }
 0x267   : > { %v7983_v46 = vadd.f32 %v5797_v62, %v7871_v0  ;;  %v7986_v58 = vadd.f32 %v5861_v40, %v7874_v27 }
 0x269   : > { %v5798_v20 = vpop.f32.mrb[184].mxu1  ;;  %v5862_v29 = vpop.f32.mrb[184].mxu0 }
 0x26a   : > { %v5799_v10 = vpop.f32.mrb[185].mxu1  ;;  %v5863_v11 = vpop.f32.mrb[185].mxu0 }
 0x26b   : > { %v5800_v34 = vadd.f32 %v5799_v10, %v5798_v20  ;;  %v5864_v45 = vadd.f32 %v5863_v11, %v5862_v29  ;;  %v5801_v21 = vpop.f32.mrb[186].mxu1  ;;  %v5865_v31 = vpop.f32.mrb[186].mxu0 }
 0x26c   : > { %v5802_v19 = vpop.f32.mrb[187].mxu1  ;;  %v5866_v38 = vpop.f32.mrb[187].mxu0 }
 0x26d   : > { %v7989_v30 = vadd.f32 %v5800_v34, %v7882_v23  ;;  %v7992_v28 = vadd.f32 %v5864_v45, %v7885_v4  ;;  %v5803_v0 = vadd.f32 %v5802_v19, %v5801_v21  ;;  %v5867_v43 = vadd.f32 %v5866_v38, %v5865_v31 }
 0x26f   : > { %v7995_v27 = vadd.f32 %v5803_v0, %v7889_v42  ;;  %v7998_v16 = vadd.f32 %v5867_v43, %v7892_v1 }
 0x271   : > { %v5804_v59 = vpop.f32.mrb[188].mxu1  ;;  %v5868_v55 = vpop.f32.mrb[188].mxu0 }
 0x272   : > { %v5805_v52 = vpop.f32.mrb[189].mxu1  ;;  %v5869_v36 = vpop.f32.mrb[189].mxu0 }
 0x273   : > { %v5806_v57 = vadd.f32 %v5805_v52, %v5804_v59  ;;  %v5870_v61 = vadd.f32 %v5869_v36, %v5868_v55  ;;  %v5807_v54 = vpop.f32.mrb[190].mxu1  ;;  %v5871_v23 = vpop.f32.mrb[190].mxu0 }
 0x274   : > { %v5808_v63 = vpop.f32.mrb[191].mxu1  ;;  %v5872_v7 = vpop.f32.mrb[191].mxu0 }
 0x275   : > { %v8001_v4 = vadd.f32 %v5806_v57, %v7900_v14  ;;  %v8004_v48 = vadd.f32 %v5870_v61, %v7903_v49  ;;  %v5809_v42 = vadd.f32 %v5808_v63, %v5807_v54  ;;  %v5873_v32 = vadd.f32 %v5872_v7, %v5871_v23 }
 0x277   : > { %v8007_v1 = vadd.f32 %v5809_v42, %v7907_v6  ;;  %v8010_v50 = vadd.f32 %v5873_v32, %v7910_v26 }
 0x279   : > { %v5810_v47 = vpop.f32.mrb[192].mxu1  ;;  %v5874_v37 = vpop.f32.mrb[192].mxu0 }
 0x27a   : > { %v5811_v62 = vpop.f32.mrb[193].mxu1  ;;  %v5875_v40 = vpop.f32.mrb[193].mxu0 }
 0x27b   : > { %v5812_v20 = vadd.f32 %v5811_v62, %v5810_v47  ;;  %v5876_v29 = vadd.f32 %v5875_v40, %v5874_v37  ;;  %v5813_v10 = vpop.f32.mrb[194].mxu1  ;;  %v5877_v14 = vpop.f32.mrb[194].mxu0 }
 0x27c   : > { %v5814_v11 = vpop.f32.mrb[195].mxu1  ;;  %v5878_v34 = vpop.f32.mrb[195].mxu0 }
 0x27d   : > { %v8013_v49 = vadd.f32 %v5812_v20, %v7916_v44  ;;  %v8016_v45 = vadd.f32 %v5876_v29, %v7919_v17  ;;  %v5815_v6 = vadd.f32 %v5814_v11, %v5813_v10  ;;  %v5879_v21 = vadd.f32 %v5878_v34, %v5877_v14 }
 0x27f   : > { %v8019_v26 = vadd.f32 %v5815_v6, %v7923_v24  ;;  %v8022_v31 = vadd.f32 %v5879_v21, %v7926_v15 }
 0x281   : > { %v5816_v19 = vpop.f32.mrb[196].mxu1  ;;  %v5880_v38 = vpop.f32.mrb[196].mxu0 }
 0x282   : > { %v5817_v0 = vpop.f32.mrb[197].mxu1  ;;  %v5881_v43 = vpop.f32.mrb[197].mxu0 }
 0x283   : > { %v5818_v59 = vadd.f32 %v5817_v0, %v5816_v19  ;;  %v5882_v55 = vadd.f32 %v5881_v43, %v5880_v38  ;;  %v5819_v52 = vpop.f32.mrb[198].mxu1  ;;  %v5883_v44 = vpop.f32.mrb[198].mxu0 }
 0x284   : > { %v5820_v36 = vpop.f32.mrb[199].mxu1  ;;  %v5884_v57 = vpop.f32.mrb[199].mxu0 }
 0x285   : > { %v8025_v17 = vadd.f32 %v5818_v59, %v7929_v39  ;;  %v8028_v61 = vadd.f32 %v5882_v55, %v7932_v35  ;;  %v5821_v24 = vadd.f32 %v5820_v36, %v5819_v52  ;;  %v5885_v54 = vadd.f32 %v5884_v57, %v5883_v44 }
 0x287   : > { %v8031_v15 = vadd.f32 %v5821_v24, %v7935_v22  ;;  %v8034_v23 = vadd.f32 %v5885_v54, %v7938_v3 }
 0x289   : > { %v5822_v63 = vpop.f32.mrb[200].mxu1  ;;  %v5886_v7 = vpop.f32.mrb[200].mxu0 }
 0x28a   : > { %v5823_v42 = vpop.f32.mrb[201].mxu1  ;;  %v5887_v32 = vpop.f32.mrb[201].mxu0 }
 0x28b   : > { %v5824_v47 = vadd.f32 %v5823_v42, %v5822_v63  ;;  %v5888_v37 = vadd.f32 %v5887_v32, %v5886_v7  ;;  %v5825_v62 = vpop.f32.mrb[202].mxu1  ;;  %v5889_v39 = vpop.f32.mrb[202].mxu0 }
 0x28c   : > { %v5826_v40 = vpop.f32.mrb[203].mxu1  ;;  %v5890_v20 = vpop.f32.mrb[203].mxu0 }
 0x28d   : > { %v8037_v35 = vadd.f32 %v5824_v47, %v7941_v13  ;;  %v8040_v29 = vadd.f32 %v5888_v37, %v7944_v53  ;;  %v5827_v22 = vadd.f32 %v5826_v40, %v5825_v62  ;;  %v5891_v10 = vadd.f32 %v5890_v20, %v5889_v39 }
 0x28f   : > { %v8043_v3 = vadd.f32 %v5827_v22, %v7947_v2  ;;  %v8046_v14 = vadd.f32 %v5891_v10, %v7950_v12 }
 0x291   : > { %v5828_v11 = vpop.f32.mrb[204].mxu1  ;;  %v5892_v34 = vpop.f32.mrb[204].mxu0 }
 0x292   : > { %v5829_v6 = vpop.f32.mrb[205].mxu1  ;;  %v5893_v21 = vpop.f32.mrb[205].mxu0 }
 0x293   : > { %v5830_v19 = vadd.f32 %v5829_v6, %v5828_v11  ;;  %v5894_v38 = vadd.f32 %v5893_v21, %v5892_v34  ;;  %v5831_v0 = vpop.f32.mrb[206].mxu1  ;;  %v5895_v13 = vpop.f32.mrb[206].mxu0 }
 0x294   : > { %v5832_v43 = vpop.f32.mrb[207].mxu1  ;;  %v5896_v59 = vpop.f32.mrb[207].mxu0 }
 0x295   : > { %v8049_v53 = vadd.f32 %v5830_v19, %v7953_v9  ;;  %v8052_v55 = vadd.f32 %v5894_v38, %v7956_v5  ;;  %v5833_v2 = vadd.f32 %v5832_v43, %v5831_v0  ;;  %v5897_v52 = vadd.f32 %v5896_v59, %v5895_v13 }
 0x297   : > { %v8055_v12 = vadd.f32 %v5833_v2, %v7959_v25  ;;  %v8058_v44 = vadd.f32 %v5897_v52, %v7962_v41 }
 0x299   : > { %v5898_v36 = vpop.f32.mrb[208].mxu0  ;;  %v5962_v57 = vpop.f32.mrb[208].mxu1 }
 0x29a   : > { %v5899_v24 = vpop.f32.mrb[209].mxu0  ;;  %v5963_v54 = vpop.f32.mrb[209].mxu1 }
 0x29b   : > { %v5900_v63 = vadd.f32 %v5899_v24, %v5898_v36  ;;  %v5964_v7 = vadd.f32 %v5963_v54, %v5962_v57  ;;  %v5901_v42 = vpop.f32.mrb[210].mxu0  ;;  %v5965_v9 = vpop.f32.mrb[210].mxu1 }
 0x29c   : > { %v5902_v32 = vpop.f32.mrb[211].mxu0  ;;  %v5966_v47 = vpop.f32.mrb[211].mxu1 }
 0x29d   : > { %v8061_v5 = vadd.f32 %v5900_v63, %v7965_v33  ;;  %v5903_v37 = vadd.f32 %v5902_v32, %v5901_v42  ;;  %v5967_v62 = vadd.f32 %v5966_v47, %v5965_v9  ;;  %v8064_v25 = vadd.f32 %v5964_v7, %v7968_v60 }
 0x29f   : > { %v8067_v41 = vadd.f32 %v5903_v37, %v7971_v8  ;;  %v8070_v39 = vadd.f32 %v5967_v62, %v7974_v51 }
 0x2a1   : > { %v5904_v40 = vpop.f32.mrb[212].mxu0  ;;  %v5968_v20 = vpop.f32.mrb[212].mxu1 }
 0x2a2   : > { %v5905_v22 = vpop.f32.mrb[213].mxu0  ;;  %v5969_v10 = vpop.f32.mrb[213].mxu1 }
 0x2a3   : > { %v5906_v11 = vadd.f32 %v5905_v22, %v5904_v40  ;;  %v5970_v34 = vadd.f32 %v5969_v10, %v5968_v20  ;;  %v5907_v6 = vpop.f32.mrb[214].mxu0  ;;  %v5971_v33 = vpop.f32.mrb[214].mxu1 }
 0x2a4   : > { %v5908_v21 = vpop.f32.mrb[215].mxu0  ;;  %v5972_v19 = vpop.f32.mrb[215].mxu1 }
 0x2a5   : > { %v8073_v38 = vadd.f32 %v5906_v11, %v7977_v56  ;;  %v5909_v60 = vadd.f32 %v5908_v21, %v5907_v6  ;;  %v5973_v0 = vadd.f32 %v5972_v19, %v5971_v33  ;;  %v8076_v8 = vadd.f32 %v5970_v34, %v7980_v18 }
 0x2a7   : > { %v8079_v51 = vadd.f32 %v5909_v60, %v7983_v46  ;;  %v8082_v13 = vadd.f32 %v5973_v0, %v7986_v58 }
 0x2a9   : > { %v5910_v43 = vpop.f32.mrb[216].mxu0  ;;  %v5974_v59 = vpop.f32.mrb[216].mxu1 }
 0x2aa   : > { %v5911_v2 = vpop.f32.mrb[217].mxu0  ;;  %v5975_v52 = vpop.f32.mrb[217].mxu1 }
 0x2ab   : > { %v5912_v36 = vadd.f32 %v5911_v2, %v5910_v43  ;;  %v5976_v57 = vadd.f32 %v5975_v52, %v5974_v59  ;;  %v5913_v24 = vpop.f32.mrb[218].mxu0  ;;  %v5977_v56 = vpop.f32.mrb[218].mxu1 }
 0x2ac   : > { %v5914_v54 = vpop.f32.mrb[219].mxu0  ;;  %v5978_v63 = vpop.f32.mrb[219].mxu1 }
 0x2ad   : > { %v8085_v7 = vadd.f32 %v5912_v36, %v7989_v30  ;;  %v5915_v18 = vadd.f32 %v5914_v54, %v5913_v24  ;;  %v5979_v42 = vadd.f32 %v5978_v63, %v5977_v56  ;;  %v8088_v46 = vadd.f32 %v5976_v57, %v7992_v28 }
 0x2af   : > { %v8091_v58 = vadd.f32 %v5915_v18, %v7995_v27  ;;  %v8094_v9 = vadd.f32 %v5979_v42, %v7998_v16 }
 0x2b1   : > { %v5916_v32 = vpop.f32.mrb[220].mxu0  ;;  %v5980_v47 = vpop.f32.mrb[220].mxu1 }
 0x2b2   : > { %v5917_v37 = vpop.f32.mrb[221].mxu0  ;;  %v5981_v62 = vpop.f32.mrb[221].mxu1 }
 0x2b3   : > { %v5918_v40 = vadd.f32 %v5917_v37, %v5916_v32  ;;  %v5982_v20 = vadd.f32 %v5981_v62, %v5980_v47  ;;  %v5919_v22 = vpop.f32.mrb[222].mxu0  ;;  %v5983_v30 = vpop.f32.mrb[222].mxu1 }
 0x2b4   : > { %v5920_v10 = vpop.f32.mrb[223].mxu0  ;;  %v5984_v11 = vpop.f32.mrb[223].mxu1 }
 0x2b5   : > { %v8097_v34 = vadd.f32 %v5918_v40, %v8001_v4  ;;  %v5921_v28 = vadd.f32 %v5920_v10, %v5919_v22  ;;  %v5985_v6 = vadd.f32 %v5984_v11, %v5983_v30  ;;  %v8100_v27 = vadd.f32 %v5982_v20, %v8004_v48 }
 0x2b7   : > { %v8103_v16 = vadd.f32 %v5921_v28, %v8007_v1  ;;  %v8106_v33 = vadd.f32 %v5985_v6, %v8010_v50 }
 0x2b9   : > { %v5922_v21 = vpop.f32.mrb[224].mxu0  ;;  %v5986_v19 = vpop.f32.mrb[224].mxu1 }
 0x2ba   : > { %v5923_v60 = vpop.f32.mrb[225].mxu0  ;;  %v5987_v0 = vpop.f32.mrb[225].mxu1 }
 0x2bb   : > { %v5924_v43 = vadd.f32 %v5923_v60, %v5922_v21  ;;  %v5988_v59 = vadd.f32 %v5987_v0, %v5986_v19  ;;  %v5925_v2 = vpop.f32.mrb[226].mxu0  ;;  %v5989_v4 = vpop.f32.mrb[226].mxu1 }
 0x2bc   : > { %v5926_v52 = vpop.f32.mrb[227].mxu0  ;;  %v5990_v36 = vpop.f32.mrb[227].mxu1 }
 0x2bd   : > { %v8109_v57 = vadd.f32 %v5924_v43, %v8013_v49  ;;  %v5927_v48 = vadd.f32 %v5926_v52, %v5925_v2  ;;  %v5991_v24 = vadd.f32 %v5990_v36, %v5989_v4  ;;  %v8112_v1 = vadd.f32 %v5988_v59, %v8016_v45 }
 0x2bf   : > { %v8115_v50 = vadd.f32 %v5927_v48, %v8019_v26  ;;  %v8118_v56 = vadd.f32 %v5991_v24, %v8022_v31 }
 0x2c1   : > { %v5928_v54 = vpop.f32.mrb[228].mxu0  ;;  %v5992_v63 = vpop.f32.mrb[228].mxu1 }
 0x2c2   : > { %v5929_v18 = vpop.f32.mrb[229].mxu0  ;;  %v5993_v42 = vpop.f32.mrb[229].mxu1 }
 0x2c3   : > { %v5930_v32 = vadd.f32 %v5929_v18, %v5928_v54  ;;  %v5994_v47 = vadd.f32 %v5993_v42, %v5992_v63  ;;  %v5931_v37 = vpop.f32.mrb[230].mxu0  ;;  %v5995_v49 = vpop.f32.mrb[230].mxu1 }
 0x2c4   : > { %v5932_v62 = vpop.f32.mrb[231].mxu0  ;;  %v5996_v40 = vpop.f32.mrb[231].mxu1 }
 0x2c5   : > { %v8121_v20 = vadd.f32 %v5930_v32, %v8025_v17  ;;  %v5933_v45 = vadd.f32 %v5932_v62, %v5931_v37  ;;  %v5997_v22 = vadd.f32 %v5996_v40, %v5995_v49  ;;  %v8124_v26 = vadd.f32 %v5994_v47, %v8028_v61 }
 0x2c7   : > { %v8127_v31 = vadd.f32 %v5933_v45, %v8031_v15  ;;  %v8130_v30 = vadd.f32 %v5997_v22, %v8034_v23 }
 0x2c9   : > { %v5934_v10 = vpop.f32.mrb[232].mxu0  ;;  %v5998_v11 = vpop.f32.mrb[232].mxu1 }
 0x2ca   : > { %v5935_v28 = vpop.f32.mrb[233].mxu0  ;;  %v5999_v6 = vpop.f32.mrb[233].mxu1 }
 0x2cb   : > { %v5936_v21 = vadd.f32 %v5935_v28, %v5934_v10  ;;  %v6000_v19 = vadd.f32 %v5999_v6, %v5998_v11  ;;  %v5937_v60 = vpop.f32.mrb[234].mxu0  ;;  %v6001_v17 = vpop.f32.mrb[234].mxu1 }
 0x2cc   : > { %v5938_v0 = vpop.f32.mrb[235].mxu0  ;;  %v6002_v43 = vpop.f32.mrb[235].mxu1 }
 0x2cd   : > { %v8133_v59 = vadd.f32 %v5936_v21, %v8037_v35  ;;  %v5939_v61 = vadd.f32 %v5938_v0, %v5937_v60  ;;  %v6003_v2 = vadd.f32 %v6002_v43, %v6001_v17  ;;  %v8136_v15 = vadd.f32 %v6000_v19, %v8040_v29 }
 0x2cf   : > { %v8139_v23 = vadd.f32 %v5939_v61, %v8043_v3  ;;  %v8142_v4 = vadd.f32 %v6003_v2, %v8046_v14 }
 0x2d1   : > { %v5940_v52 = vpop.f32.mrb[236].mxu0  ;;  %v6004_v36 = vpop.f32.mrb[236].mxu1 }
 0x2d2   : > { %v5941_v48 = vpop.f32.mrb[237].mxu0  ;;  %v6005_v24 = vpop.f32.mrb[237].mxu1 }
 0x2d3   : > { %v5942_v54 = vadd.f32 %v5941_v48, %v5940_v52  ;;  %v6006_v63 = vadd.f32 %v6005_v24, %v6004_v36  ;;  %v5943_v35 = vpop.f32.mrb[238].mxu0  ;;  %v6007_v18 = vpop.f32.mrb[238].mxu1 }
 0x2d4   : > { %v5944_v42 = vpop.f32.mrb[239].mxu0  ;;  %v6008_v32 = vpop.f32.mrb[239].mxu1 }
 0x2d5   : > { %v8145_v29 = vadd.f32 %v5942_v54, %v8049_v53  ;;  %v5945_v47 = vadd.f32 %v5944_v42, %v5943_v35  ;;  %v6009_v3 = vadd.f32 %v6008_v32, %v6007_v18  ;;  %v8148_v37 = vadd.f32 %v6006_v63, %v8052_v55 }
 0x2d7   : > { %v8151_v14 = vadd.f32 %v5945_v47, %v8055_v12  ;;  %v8154_v49 = vadd.f32 %v6009_v3, %v8058_v44 }
 0x2d9   : > { %v6010_v62 = vpop.f32.mrb[240].mxu1  ;;  %v6097_v40 = vpop.f32.mrb[240].mxu0 }
 0x2da   : > { %v4296_v45 = vadd.f32 %v6097_v40, %v8076_v8  ;;  %v6011_v22 = vpop.f32.mrb[241].mxu1  ;;  %v4287_v10 = vpop.f32.mrb[241].mxu0 }
 0x2db   : > { %v6012_v53 = vadd.f32 %v6011_v22, %v6010_v62  ;;  %v4288_v11 = vadd.f32 %v4287_v10, %v8064_v25  ;;  %v6013_v28 = vpop.f32.mrb[242].mxu1  ;;  %v6098_v6 = vpop.f32.mrb[242].mxu0 }
 0x2dc   : > { %v4416_v55 = vmax.f32 %v4296_v45, 0.0  ;;  %v4299_v12 = vadd.f32 %v6098_v6, %v8082_v13  ;;  %v6014_v21 = vpop.f32.mrb[243].mxu1  ;;  %v4290_v19 = vpop.f32.mrb[243].mxu0 }
 0x2dd   : > { %v4414_v44 = vmax.f32 %v4288_v11, 0.0  ;;  %v6015_v8 = vadd.f32 %v6014_v21, %v6013_v28  ;;  %v4291_v25 = vadd.f32 %v4290_v19, %v8070_v39  ;;  %v8167_v60 = vadd.f32 %v6012_v53, %v8061_v5 }
 0x2de   : > { %v5132_v17 = vpack.c.bf16 %v4416_v55, %v4416_v55  ;;  %v4417_v13 = vmax.f32 %v4299_v12, 0.0 }
 0x2df   : > { %v5130_v0 = vpack.c.bf16 %v4414_v44, %v4414_v44  ;;  %v4415_v43 = vmax.f32 %v4291_v25, 0.0  ;;  %v8170_v61 = vadd.f32 %v6015_v8, %v8067_v41 }
 0x2e0   : > { %4577 = vst.msk [vmem:[%s8163_s28 + $0x8] sm:$0xf] %vm4574_vm2, %v5132_v17  ;;  %v5133_v2 = vpack.c.bf16 %v4417_v13, %v4417_v13 }
 0x2e1   : > { %4575 = vst.msk [vmem:[%s8163_s28] sm:$0xf] %vm4574_vm2, %v5130_v0  ;;  %v5131_v52 = vpack.c.bf16 %v4415_v43, %v4415_v43  ;;  %v6016_v36 = vpop.f32.mrb[244].mxu1  ;;  %v6101_v48 = vpop.f32.mrb[244].mxu0 }
 0x2e2   : > { %4578 = vst.msk [vmem:[%s8163_s28 + $0xc] sm:$0xf] %vm4574_vm2, %v5133_v2  ;;  %v4312_v5 = vadd.f32 %v6101_v48, %v8100_v27  ;;  %v6017_v39 = vpop.f32.mrb[245].mxu1  ;;  %v4303_v24 = vpop.f32.mrb[245].mxu0 }
 0x2e3   : > { %4576 = vst.msk [vmem:[%s8163_s28 + $0x4] sm:$0xf] %vm4574_vm2, %v5131_v52  ;;  %v6018_v54 = vadd.f32 %v6017_v39, %v6016_v36  ;;  %v4304_v41 = vadd.f32 %v4303_v24, %v8088_v46  ;;  %v6019_v63 = vpop.f32.mrb[246].mxu1  ;;  %v6102_v35 = vpop.f32.mrb[246].mxu0 }
 0x2e4   : > { %v4420_v18 = vmax.f32 %v4312_v5, 0.0  ;;  %v4315_v42 = vadd.f32 %v6102_v35, %v8106_v33  ;;  %v6020_v32 = vpop.f32.mrb[247].mxu1  ;;  %v4306_v47 = vpop.f32.mrb[247].mxu0 }
 0x2e5   : > { %v4418_v3 = vmax.f32 %v4304_v41, 0.0  ;;  %v6021_v62 = vadd.f32 %v6020_v32, %v6019_v63  ;;  %v4307_v27 = vadd.f32 %v4306_v47, %v8094_v9  ;;  %v8185_v40 = vadd.f32 %v6018_v54, %v8073_v38 }
 0x2e6   : > { %v5136_v45 = vpack.c.bf16 %v4420_v18, %v4420_v18  ;;  %v4421_v46 = vmax.f32 %v4315_v42, 0.0 }
 0x2e7   : > { %v5134_v22 = vpack.c.bf16 %v4418_v3, %v4418_v3  ;;  %v4419_v10 = vmax.f32 %v4307_v27, 0.0  ;;  %v8188_v53 = vadd.f32 %v6021_v62, %v8079_v51 }
 0x2e8   : > { %4581 = vst.msk [vmem:[%s8163_s28 + $0x18] sm:$0xf] %vm4574_vm2, %v5136_v45  ;;  %v5137_v33 = vpack.c.bf16 %v4421_v46, %v4421_v46 }
 0x2e9   : > { %4579 = vst.msk [vmem:[%s8163_s28 + $0x10] sm:$0xf] %vm4574_vm2, %v5134_v22  ;;  %v5135_v11 = vpack.c.bf16 %v4419_v10, %v4419_v10  ;;  %v6022_v28 = vpop.f32.mrb[248].mxu1  ;;  %v6105_v6 = vpop.f32.mrb[248].mxu0 }
 0x2ea   : > { %4582 = vst.msk [vmem:[%s8163_s28 + $0x1c] sm:$0xf] %vm4574_vm2, %v5137_v33  ;;  %v4328_v38 = vadd.f32 %v6105_v6, %v8124_v26  ;;  %v6023_v9 = vpop.f32.mrb[249].mxu1  ;;  %v4319_v55 = vpop.f32.mrb[249].mxu0 }
 0x2eb   : > { %4580 = vst.msk [vmem:[%s8163_s28 + $0x14] sm:$0xf] %vm4574_vm2, %v5135_v11  ;;  %v6024_v12 = vadd.f32 %v6023_v9, %v6022_v28  ;;  %v4320_v51 = vadd.f32 %v4319_v55, %v8112_v1  ;;  %v6025_v21 = vpop.f32.mrb[250].mxu1  ;;  %v6106_v19 = vpop.f32.mrb[250].mxu0 }
 0x2ec   : > { %v4424_v44 = vmax.f32 %v4328_v38, 0.0  ;;  %v4331_v8 = vadd.f32 %v6106_v19, %v8130_v30  ;;  %v6026_v25 = vpop.f32.mrb[251].mxu1  ;;  %v4322_v17 = vpop.f32.mrb[251].mxu0 }
 0x2ed   : > { %v4422_v13 = vmax.f32 %v4320_v51, 0.0  ;;  %v6027_v0 = vadd.f32 %v6026_v25, %v6025_v21  ;;  %v4323_v26 = vadd.f32 %v4322_v17, %v8118_v56  ;;  %v8203_v43 = vadd.f32 %v6024_v12, %v8085_v7 }
 0x2ee   : > { %v5140_v2 = vpack.c.bf16 %v4424_v44, %v4424_v44  ;;  %v4425_v1 = vmax.f32 %v4331_v8, 0.0 }
 0x2ef   : > { %v5138_v52 = vpack.c.bf16 %v4422_v13, %v4422_v13  ;;  %v4423_v36 = vmax.f32 %v4323_v26, 0.0  ;;  %v8206_v48 = vadd.f32 %v6027_v0, %v8091_v58 }
 0x2f0   : > { %4585 = vst.msk [vmem:[%s8163_s28 + $0x28] sm:$0xf] %vm4574_vm2, %v5140_v2  ;;  %v5141_v30 = vpack.c.bf16 %v4425_v1, %v4425_v1 }
 0x2f1   : > { %4583 = vst.msk [vmem:[%s8163_s28 + $0x20] sm:$0xf] %vm4574_vm2, %v5138_v52  ;;  %v5139_v5 = vpack.c.bf16 %v4423_v36, %v4423_v36  ;;  %v6028_v39 = vpop.f32.mrb[252].mxu1  ;;  %v6109_v24 = vpop.f32.mrb[252].mxu0 }
 0x2f2   : > { %4586 = vst.msk [vmem:[%s8163_s28 + $0x2c] sm:$0xf] %vm4574_vm2, %v5141_v30  ;;  %v4344_v7 = vadd.f32 %v6109_v24, %v8148_v37  ;;  %v6029_v56 = vpop.f32.mrb[253].mxu1  ;;  %v4335_v54 = vpop.f32.mrb[253].mxu0 }
 0x2f3   : > { %4584 = vst.msk [vmem:[%s8163_s28 + $0x24] sm:$0xf] %vm4574_vm2, %v5139_v5  ;;  %v6030_v41 = vadd.f32 %v6029_v56, %v6028_v39  ;;  %v4336_v58 = vadd.f32 %v4335_v54, %v8136_v15  ;;  %v6031_v63 = vpop.f32.mrb[254].mxu1  ;;  %v6110_v35 = vpop.f32.mrb[254].mxu0 }
 0x2f4   : > { %v4428_v18 = vmax.f32 %v4344_v7, 0.0  ;;  %v4347_v42 = vadd.f32 %v6110_v35, %v8154_v49  ;;  %v6032_v32 = vpop.f32.mrb[255].mxu1  ;;  %v4338_v47 = vpop.f32.mrb[255].mxu0 }
 0x2f5   : > { %v4426_v3 = vmax.f32 %v4336_v58, 0.0  ;;  %v6033_v62 = vadd.f32 %v6032_v32, %v6031_v63  ;;  %v4339_v37 = vadd.f32 %v4338_v47, %v8142_v4  ;;  %v4215_v27 = vadd.f32 %v6030_v41, %v8097_v34 }
 0x2f6   : > { %v5144_v45 = vpack.c.bf16 %v4428_v18, %v4428_v18  ;;  %v4429_v46 = vmax.f32 %v4347_v42, 0.0 }
 0x2f7   : > { %v5142_v15 = vpack.c.bf16 %v4426_v3, %v4426_v3  ;;  %v4427_v22 = vmax.f32 %v4339_v37, 0.0  ;;  %v4218_v10 = vadd.f32 %v6033_v62, %v8103_v16 }
 0x2f8   : > { %4589 = vst.msk [vmem:[%s8163_s28 + $0x38] sm:$0xf] %vm4574_vm2, %v5144_v45  ;;  %v5145_v33 = vpack.c.bf16 %v4429_v46, %v4429_v46 }
 0x2f9   : > { %4587 = vst.msk [vmem:[%s8163_s28 + $0x30] sm:$0xf] %vm4574_vm2, %v5142_v15  ;;  %v5143_v49 = vpack.c.bf16 %v4427_v22, %v4427_v22  ;;  %v6034_v11 = vpop.f32.mrb[0].mxu1  ;;  %v6113_v28 = vpop.f32.mrb[0].mxu0 }
 0x2fa   : > { %4590 = vst.msk [vmem:[%s8163_s28 + $0x3c] sm:$0xf] %vm4574_vm2, %v5145_v33  ;;  %v4360_v4 = vadd.f32 %v6113_v28, %v8185_v40  ;;  %v6035_v34 = vpop.f32.mrb[1].mxu1  ;;  %v4351_v6 = vpop.f32.mrb[1].mxu0 }
 0x2fb   : > { %4588 = vst.msk [vmem:[%s8163_s28 + $0x34] sm:$0xf] %vm4574_vm2, %v5143_v49  ;;  %v6036_v38 = vadd.f32 %v6035_v34, %v6034_v11  ;;  %v4352_v9 = vadd.f32 %v4351_v6, %v8167_v60  ;;  %v6037_v16 = vpop.f32.mrb[2].mxu1  ;;  %v6114_v55 = vpop.f32.mrb[2].mxu0 }
 0x2fc   : > { %v4432_v12 = vmax.f32 %v4360_v4, 0.0  ;;  %v4363_v51 = vadd.f32 %v6114_v55, %v8188_v53  ;;  %v6038_v21 = vpop.f32.mrb[3].mxu1  ;;  %v4354_v19 = vpop.f32.mrb[3].mxu0 }
 0x2fd   : > { %v4430_v44 = vmax.f32 %v4352_v9, 0.0  ;;  %v6039_v8 = vadd.f32 %v6038_v21, %v6037_v16  ;;  %v4355_v40 = vadd.f32 %v4354_v19, %v8170_v61  ;;  %v4223_v25 = vadd.f32 %v6036_v38, %v8109_v57 }
 0x2fe   : > { %v5148_v17 = vpack.c.bf16 %v4432_v12, %v4432_v12  ;;  %v4433_v13 = vmax.f32 %v4363_v51, 0.0 }
 0x2ff   : > { %v5146_v60 = vpack.c.bf16 %v4430_v44, %v4430_v44  ;;  %v4431_v0 = vmax.f32 %v4355_v40, 0.0  ;;  %v4226_v26 = vadd.f32 %v6039_v8, %v8115_v50 }
 0x300   : > { %4593 = vst.msk [vmem:[%s8163_s28 + $0x48] sm:$0xf] %vm4574_vm2, %v5148_v17  ;;  %v5149_v2 = vpack.c.bf16 %v4433_v13, %v4433_v13 }
 0x301   : > { %4591 = vst.msk [vmem:[%s8163_s28 + $0x40] sm:$0xf] %vm4574_vm2, %v5146_v60  ;;  %v5147_v53 = vpack.c.bf16 %v4431_v0, %v4431_v0  ;;  %v6040_v1 = vpop.f32.mrb[4].mxu1  ;;  %v6117_v52 = vpop.f32.mrb[4].mxu0 }
 0x302   : > { %4594 = vst.msk [vmem:[%s8163_s28 + $0x4c] sm:$0xf] %vm4574_vm2, %v5149_v2  ;;  %v4376_v61 = vadd.f32 %v6117_v52, %v4215_v27  ;;  %v6041_v36 = vpop.f32.mrb[5].mxu1  ;;  %v4367_v57 = vpop.f32.mrb[5].mxu0 }
 0x303   : > { %4592 = vst.msk [vmem:[%s8163_s28 + $0x44] sm:$0xf] %vm4574_vm2, %v5147_v53  ;;  %v6042_v30 = vadd.f32 %v6041_v36, %v6040_v1  ;;  %v4368_v5 = vadd.f32 %v4367_v57, %v8203_v43  ;;  %v6043_v50 = vpop.f32.mrb[6].mxu1  ;;  %v6118_v39 = vpop.f32.mrb[6].mxu0 }
 0x304   : > { %v4436_v24 = vmax.f32 %v4376_v61, 0.0  ;;  %v4379_v7 = vadd.f32 %v6118_v39, %v4218_v10  ;;  %v6044_v56 = vpop.f32.mrb[7].mxu1  ;;  %v4370_v54 = vpop.f32.mrb[7].mxu0 }
 0x305   : > { %v4434_v41 = vmax.f32 %v4368_v5, 0.0  ;;  %v6045_v58 = vadd.f32 %v6044_v56, %v6043_v50  ;;  %v4371_v63 = vadd.f32 %v4370_v54, %v8206_v48  ;;  %v4231_v35 = vadd.f32 %v6042_v30, %v8121_v20 }
 0x306   : > { %v5152_v18 = vpack.c.bf16 %v4436_v24, %v4436_v24  ;;  %v4437_v42 = vmax.f32 %v4379_v7, 0.0 }
 0x307   : > { %v5150_v32 = vpack.c.bf16 %v4434_v41, %v4434_v41  ;;  %v4435_v43 = vmax.f32 %v4371_v63, 0.0  ;;  %v4234_v47 = vadd.f32 %v6045_v58, %v8127_v31 }
 0x308   : > { %4597 = vst.msk [vmem:[%s8163_s28 + $0x58] sm:$0xf] %vm4574_vm2, %v5152_v18  ;;  %v5153_v3 = vpack.c.bf16 %v4437_v42, %v4437_v42 }
 0x309   : > { %4595 = vst.msk [vmem:[%s8163_s28 + $0x50] sm:$0xf] %vm4574_vm2, %v5150_v32  ;;  %v5151_v62 = vpack.c.bf16 %v4435_v43, %v4435_v43  ;;  %v6046_v37 = vpop.f32.mrb[8].mxu1  ;;  %v6121_v27 = vpop.f32.mrb[8].mxu0 }
 0x30a   : > { %4598 = vst.msk [vmem:[%s8163_s28 + $0x5c] sm:$0xf] %vm4574_vm2, %v5153_v3  ;;  %v4392_v48 = vadd.f32 %v6121_v27, %v4231_v35  ;;  %v6047_v45 = vpop.f32.mrb[9].mxu1  ;;  %v4383_v20 = vpop.f32.mrb[9].mxu0 }
 0x30b   : > { %4596 = vst.msk [vmem:[%s8163_s28 + $0x54] sm:$0xf] %vm4574_vm2, %v5151_v62  ;;  %v6048_v46 = vadd.f32 %v6047_v45, %v6046_v37  ;;  %v4384_v15 = vadd.f32 %v4383_v20, %v4223_v25  ;;  %v6049_v22 = vpop.f32.mrb[10].mxu1  ;;  %v6122_v31 = vpop.f32.mrb[10].mxu0 }
 0x30c   : > { %v4440_v10 = vmax.f32 %v4392_v48, 0.0  ;;  %v4395_v33 = vadd.f32 %v6122_v31, %v4234_v47  ;;  %v6050_v49 = vpop.f32.mrb[11].mxu1  ;;  %v4386_v11 = vpop.f32.mrb[11].mxu0 }
 0x30d   : > { %v4438_v28 = vmax.f32 %v4384_v15, 0.0  ;;  %v6051_v4 = vadd.f32 %v6050_v49, %v6049_v22  ;;  %v4387_v34 = vadd.f32 %v4386_v11, %v4226_v26  ;;  %v4239_v6 = vadd.f32 %v6048_v46, %v8133_v59 }
 0x30e   : > { %v5156_v38 = vpack.c.bf16 %v4440_v10, %v4440_v10  ;;  %v4441_v9 = vmax.f32 %v4395_v33, 0.0 }
 0x30f   : > { %v5154_v16 = vpack.c.bf16 %v4438_v28, %v4438_v28  ;;  %v4439_v55 = vmax.f32 %v4387_v34, 0.0  ;;  %v4242_v12 = vadd.f32 %v6051_v4, %v8139_v23 }
 0x310   : > { %4601 = vst.msk [vmem:[%s8163_s28 + $0x68] sm:$0xf] %vm4574_vm2, %v5156_v38  ;;  %v5157_v51 = vpack.c.bf16 %v4441_v9, %v4441_v9 }
 0x311   : > { %4599 = vst.msk [vmem:[%s8163_s28 + $0x60] sm:$0xf] %vm4574_vm2, %v5154_v16  ;;  %v5155_v21 = vpack.c.bf16 %v4439_v55, %v4439_v55  ;;  %v6052_v19 = vpop.f32.mrb[12].mxu1  ;;  %v6125_v44 = vpop.f32.mrb[12].mxu0 }
 0x312   : > { %4602 = vst.msk [vmem:[%s8163_s28 + $0x6c] sm:$0xf] %vm4574_vm2, %v5157_v51  ;;  %v6053_v8 = vpop.f32.mrb[13].mxu1  ;;  %v4399_v40 = vpop.f32.mrb[13].mxu0 }
 0x313   : > { %4600 = vst.msk [vmem:[%s8163_s28 + $0x64] sm:$0xf] %vm4574_vm2, %v5155_v21  ;;  %v6054_v59 = vadd.f32 %v6053_v8, %v6052_v19  ;;  %v4400_v25 = vadd.f32 %v4399_v40, %v4239_v6  ;;  %v6055_v17 = vpop.f32.mrb[14].mxu1  ;;  %v6126_v13 = vpop.f32.mrb[14].mxu0 }
 0x314   : > { %v6056_v23 = vpop.f32.mrb[15].mxu1  ;;  %v4402_v60 = vpop.f32.mrb[15].mxu0 }
 0x315   : > { %v4247_v0 = vadd.f32 %v6054_v59, %v8145_v29  ;;  %v4442_v26 = vmax.f32 %v4400_v25, 0.0  ;;  %v6057_v2 = vadd.f32 %v6056_v23, %v6055_v17  ;;  %v4403_v53 = vadd.f32 %v4402_v60, %v4242_v12 }
 0x317   : > { %v4408_v1 = vadd.f32 %v6125_v44, %v4247_v0  ;;  %v5158_v52 = vpack.c.bf16 %v4442_v26, %v4442_v26  ;;  %v4250_v61 = vadd.f32 %v6057_v2, %v8151_v14  ;;  %v4443_v36 = vmax.f32 %v4403_v53, 0.0 }
 0x319   : > { %v4444_v57 = vmax.f32 %v4408_v1, 0.0  ;;  %4603 = vst.msk [vmem:[%s8163_s28 + $0x70] sm:$0xf] %vm4574_vm2, %v5158_v52  ;;  %v4411_v30 = vadd.f32 %v6126_v13, %v4250_v61  ;;  %v5159_v5 = vpack.c.bf16 %v4443_v36, %v4443_v36 }
 0x31b   : > { %v5160_v50 = vpack.c.bf16 %v4444_v57, %v4444_v57  ;;  %v4445_v39 = vmax.f32 %v4411_v30, 0.0  ;;  %4604 = vst.msk [vmem:[%s8163_s28 + $0x74] sm:$0xf] %vm4574_vm2, %v5159_v5 }
 0x31d   : > { %4605 = vst.msk [vmem:[%s8163_s28 + $0x78] sm:$0xf] %vm4574_vm2, %v5160_v50  ;;  %v5161_v29 = vpack.c.bf16 %v4445_v39, %v4445_v39 }
 0x31f   : > { %4606 = vst.msk [vmem:[%s8163_s28 + $0x7c] sm:$0xf] %vm4574_vm2, %v5161_v29 }
 0x320 PF: > { %s13_s12 = sadd.s32 1, %s6694_s12  }
 0x321   : > { %p10_p4 = scmp.ge.s32.totalorder %s13_s12, 4  }
 0x323   :  { %12 = sbr.rel (!%p10_p4) target bundleno = 1 (0x1), region = 62 }

// kernel: model_cnn_forward.36
= control target key start
LH: loop header
LB: loop body
LE: loop exit
PB: predicated region body
PF: predicated region fallthrough
CT: control target
= control target key end

     0   :  { %s5237_s12 = smov 0   ;;  %s6431_s0 = inlined_call_operand.vmem [shape: bf16[512,1568], index: 0, kind: input, shape index: {}]   ;;  %s6432_s1 = inlined_call_operand.vmem [shape: bf16[1568,32], index: 1, kind: input, shape index: {}]   ;;  %s6433_s2 = inlined_call_operand.vmem [shape: f32[1,32], index: 2, kind: input, shape index: {}]   ;;  %s6434_s3 = inlined_call_operand.vmem [shape: bf16[512,32], index: 3, kind: output, shape index: {}]  }
   0x1 LB: > { %s3658_s13 = sadd.s32 4294967295, %s5215_s12   ;;  %p3662_p0 = scmp.ge.s32.totalorder %s5215_s12, 1  ;;  %s5215_s12 = sphi %s5237_s12, %s13_s12  }
   0x2   : > { %p139_p1 = scmp.lt.s32.totalorder %s5215_s12, 3 }
   0x4   : > { %p140_p2 = pnand %p3662_p0, %p139_p1 }
   0x5   : > { %v4807_v0 = vld [vmem:[%s6432_s1 + $0x40] sm:$0xff] (!%p140_p2)   ;;  %s3663_s16 = sshll.u32 (!%p140_p2), %s3658_s13, 5  ;;  %v4809_v2 = vld [vmem:[%s6432_s1 + $0x48] sm:$0xff] (!%p140_p2)   ;;  %v4811_v4 = vld [vmem:[%s6432_s1 + $0x50] sm:$0xff] (!%p140_p2)   ;;  %vm2233_vm0 = vcmask (!%p140_p2), 261120   ;;  %vm3569_vm1 = vcmask (!%p140_p2), 257024  }
   0x6   : > { %143 = sbr.rel (%p140_p2) target bundleno = 672 (0x2a0), region = 32  ;;  %v4808_v1 = vld [vmem:[%s6432_s1] sm:$0xff] (!%p140_p2)   ;;  %4056 = vmatprep.subr.bf16.mxu0 (!%p140_p2), %v4807_v0  ;;  %4782 = vmatprep.subr.bf16.mxu1 (!%p140_p2), %v4807_v0  ;;  %p165_p3 = scmp.lt.s32.totalorder (!%p140_p2), %s3663_s16, 63  ;;  %v4810_v3 = vld [vmem:[%s6432_s1 + $0x8] sm:$0xff] (!%p140_p2)   ;;  %v4812_v5 = vld [vmem:[%s6432_s1 + $0x10] sm:$0xff] (!%p140_p2)  }
   0x7   : > { %4057 = vmatpush3.bf16.msra.mxu0 (!%p140_p2), %v4808_v1  ;;  %4790 = vmatpush3.bf16.msra.mxu1 (!%p140_p2), %v4808_v1  ;;  %v4813_v6 = vld [vmem:[%s6432_s1 + $0x58] sm:$0xff] (!%p140_p2)   ;;  %v4815_v8 = vld [vmem:[%s6432_s1 + $0x60] sm:$0xff] (!%p140_p2)   ;;  %v4817_v10 = vld [vmem:[%s6432_s1 + $0x68] sm:$0xff] (!%p140_p2)  }
   0x8   : > { %4058 = vmatprep.subr.bf16.mxu0 (!%p140_p2), %v4809_v2  ;;  %4783 = vmatprep.subr.bf16.mxu1 (!%p140_p2), %v4809_v2  ;;  %v4814_v7 = vld [vmem:[%s6432_s1 + $0x18] sm:$0xff] (!%p140_p2)   ;;  %v4816_v9 = vld [vmem:[%s6432_s1 + $0x20] sm:$0xff] (!%p140_p2)   ;;  %v4818_v13 = vld [vmem:[%s6432_s1 + $0x28] sm:$0xff] (!%p140_p2)  }
   0x9   : > { %v4819_v14 = vld [vmem:[%s6432_s1 + $0x70] sm:$0xff] (!%p140_p2)   ;;  %v4821_v16 = vld [vmem:[%s6432_s1 + $0x78] sm:$0xff] (!%p140_p2)   ;;  %v4829_v18 = vld [vmem:[%s6432_s1 + $0xc0] sm:$0xff] (!%p140_p2)  }
   0xa   : > { %v4820_v15 = vld [vmem:[%s6432_s1 + $0x30] sm:$0xff] (!%p140_p2)   ;;  %v4822_v17 = vld [vmem:[%s6432_s1 + $0x38] sm:$0xff] (!%p140_p2)   ;;  %v4832_v21 = vld [vmem:[%s6432_s1 + $0x140] sm:$0xff] (!%p140_p2)  }
   0xb   : > { %4059 = vmatpush3.bf16.msra.mxu0 (!%p140_p2), %v4810_v3  ;;  %4791 = vmatpush3.bf16.msra.mxu1 (!%p140_p2), %v4810_v3  ;;  %v4830_v22 = vld [vmem:[%s6432_s1 + $0x80] sm:$0xff] (!%p140_p2)   ;;  %v4831_v23 = vld [vmem:[%s6432_s1 + $0xc8] sm:$0xff] (!%p140_p2)   ;;  %v4841_v31 = vld [vmem:[%s6432_s1 + $0xd0] sm:$0xff] (!%p140_p2)  }
   0xc   : > { %4060 = vmatprep.subr.bf16.mxu0 (!%p140_p2), %v4811_v4  ;;  %4784 = vmatprep.subr.bf16.mxu1 (!%p140_p2), %v4811_v4  ;;  %v4834_v24 = vld [vmem:[%s6432_s1 + $0x100] sm:$0xff] (!%p140_p2)   ;;  %v4833_v27 = vld [vmem:[%s6432_s1 + $0x88] sm:$0xff] (!%p140_p2)   ;;  %v4842_v32 = vld [vmem:[%s6432_s1 + $0x90] sm:$0xff] (!%p140_p2)  }
   0xd   : > { %s6436_s16 = smov (!%p165_p3, %s3663_s16), 63  ;;  %v4852_v28 = vld [vmem:[%s6432_s1 + $0x148] sm:$0xff]   ;;  %v4843_v34 = vld [vmem:[%s6432_s1 + $0xd8] sm:$0xff]   ;;  %v4851_v40 = vld [vmem:[%s6432_s1 + $0xe0] sm:$0xff]  }
   0xe   : > { %s4798_s29 = smul.u32 52, %s6436_s16  ;;  %v4854_v33 = vld [vmem:[%s6432_s1 + $0x108] sm:$0xff]   ;;  %v4844_v37 = vld [vmem:[%s6432_s1 + $0x98] sm:$0xff]   ;;  %v4853_v41 = vld [vmem:[%s6432_s1 + $0xa0] sm:$0xff]  }
   0xf   : > { %4061 = vmatpush3.bf16.msra.mxu0 %v4812_v5  ;;  %4792 = vmatpush3.bf16.msra.mxu1 %v4812_v5  ;;  %v4855_v42 = vld [vmem:[%s6432_s1 + $0xe8] sm:$0xff]   ;;  %v4866_v43 = vld [vmem:[%s6432_s1 + $0x150] sm:$0xff]   ;;  %v4865_v52 = vld [vmem:[%s6432_s1 + $0xf8] sm:$0xff]  }
  0x10   : > { %4062 = vmatprep.subr.bf16.mxu0 %v4813_v6  ;;  %4785 = vmatprep.subr.bf16.mxu1 %v4813_v6  ;;  %s5278_s9 = scalar_lea.vmem %s6431_s0, %s4798_s29  ;;  %v4868_v46 = vld [vmem:[%s6432_s1 + $0x110] sm:$0xff]   ;;  %v4856_v47 = vld [vmem:[%s6432_s1 + $0xa8] sm:$0xff]   ;;  %v4883_v55 = vld [vmem:[%s6432_s1 + $0x158] sm:$0xff]  }
  0x11   : > { %v4825_v11 = vld [vmem:[%s5278_s9 + $0x4] ss:$52 sps:$4 sm:$0xff]   ;;  %v4823_v19 = vld [vmem:[%s5278_s9] ss:$52 sps:$4 sm:$0xff]   ;;  %v4839_v29 = vld [vmem:[%s5278_s9 + $0x68] ss:$52 sps:$4 sm:$0xff]  }
  0x12   : > { %v4828_v12 = vld [vmem:[%s5278_s9 + $0x4e4] ss:$52 sps:$4 sm:$0xff]   ;;  %2314 = vmatprep.mubr.bf16.mxu0 %v4825_v11  ;;  %v4826_v20 = vld [vmem:[%s5278_s9 + $0x4e0] ss:$52 sps:$4 sm:$0xff]   ;;  %v4840_v30 = vld [vmem:[%s5278_s9 + $0x548] ss:$52 sps:$4 sm:$0xff]  }
  0x13   : > { %4063 = vmatpush3.bf16.msra.mxu0 %v4814_v7  ;;  %4793 = vmatpush3.bf16.msra.mxu1 %v4814_v7  ;;  %v4835_v25 = vld [vmem:[%s5278_s9 + $0x6c] ss:$52 sps:$4 sm:$0xff]   ;;  %v4845_v35 = vld [vmem:[%s5278_s9 + $0xd4] ss:$52 sps:$4 sm:$0xff]   ;;  %v4849_v38 = vld [vmem:[%s5278_s9 + $0xd0] ss:$52 sps:$4 sm:$0xff]  }
  0x14   : > { %4064 = vmatprep.subr.bf16.mxu0 %v4815_v8  ;;  %4786 = vmatprep.subr.bf16.mxu1 %v4815_v8  ;;  %v4837_v26 = vld [vmem:[%s5278_s9 + $0x54c] ss:$52 sps:$4 sm:$0xff]   ;;  %v4847_v36 = vld [vmem:[%s5278_s9 + $0x5b4] ss:$52 sps:$4 sm:$0xff]   ;;  %v4850_v39 = vld [vmem:[%s5278_s9 + $0x5b0] ss:$52 sps:$4 sm:$0xff]  }
  0x15   : > { %2410 = vmatprep.mubr.bf16.mxu1 %v4828_v12  ;;  %v4857_v44 = vld [vmem:[%s5278_s9 + $0x13c] ss:$52 sps:$4 sm:$0xff]   ;;  %v4861_v49 = vld [vmem:[%s5278_s9 + $0x138] ss:$52 sps:$4 sm:$0xff]   ;;  %v4874_v59 = vld [vmem:[%s5278_s9 + $0x1a0] ss:$52 sps:$4 sm:$0xff]  }
  0x16   : > { %v4859_v45 = vld [vmem:[%s5278_s9 + $0x61c] ss:$52 sps:$4 sm:$0xff]   ;;  %v4862_v50 = vld [vmem:[%s5278_s9 + $0x618] ss:$52 sps:$4 sm:$0xff]   ;;  %v4875_v60 = vld [vmem:[%s6432_s1 + $0x1c0] sm:$0xff]  }
  0x17   : > { %4065 = vmatpush3.bf16.msra.mxu0 %v4816_v9  ;;  %4794 = vmatpush3.bf16.msra.mxu1 %v4816_v9  ;;  %v4863_v48 = vld [vmem:[%s6432_s1 + $0xf0] sm:$0xff]   ;;  %v4869_v53 = vld [vmem:[%s5278_s9 + $0x1a4] ss:$52 sps:$4 sm:$0xff]   ;;  %v4873_v54 = vld [vmem:[%s5278_s9 + $0xc] ss:$52 sps:$4 sm:$0xff]  }
  0x18   : > { %4066 = vmatprep.subr.bf16.mxu0 %v4817_v10  ;;  %4787 = vmatprep.subr.bf16.mxu1 %v4817_v10  ;;  %v4864_v51 = vld [vmem:[%s6432_s1 + $0xb0] sm:$0xff]   ;;  %v4884_v56 = vld [vmem:[%s6432_s1 + $0x118] sm:$0xff]   ;;  %v4876_v61 = vld [vmem:[%s6432_s1 + $0x180] sm:$0xff]  }
  0x19   : > { %v4867_v57 = vld [vmem:[%s6432_s1 + $0xb8] sm:$0xff]   ;;  %v4877_v62 = vld [vmem:[%s5278_s9 + $0x20c] ss:$52 sps:$4 sm:$0xff]   ;;  %v4879_v63 = vld [vmem:[%s5278_s9 + $0x74] ss:$52 sps:$4 sm:$0xff]  }
  0x1a   : > { %v4871_v58 = vld [vmem:[%s5278_s9 + $0x8] ss:$52 sps:$4 sm:$0xff]   ;;  %v4893_v0 = vld [vmem:[%s6432_s1 + $0x160] sm:$0xff]   ;;  %v4908_v9 = vld [vmem:[%s6432_s1 + $0x1d0] sm:$0xff]  }
  0x1b   : > { %4067 = vmatpush3.bf16.msra.mxu0 %v4818_v13  ;;  %4795 = vmatpush3.bf16.msra.mxu1 %v4818_v13  ;;  %v4891_v1 = vld [vmem:[%s6432_s1 + $0x1c8] sm:$0xff]   ;;  %v4894_v2 = vld [vmem:[%s6432_s1 + $0x120] sm:$0xff]   ;;  %v4887_v7 = vld [vmem:[%s5278_s9 + $0xdc] ss:$52 sps:$4 sm:$0xff]  }
  0x1c   : > { %4068 = vmatprep.subr.bf16.mxu0 %v4819_v14  ;;  %4788 = vmatprep.subr.bf16.mxu1 %v4819_v14  ;;  %v4892_v3 = vld [vmem:[%s6432_s1 + $0x188] sm:$0xff]   ;;  %v4882_v5 = vld [vmem:[%s5278_s9 + $0x70] ss:$52 sps:$4 sm:$0xff]  }
  0x1d   : > { %v4881_v4 = vld [vmem:[%s5278_s9 + $0x208] ss:$52 sps:$4 sm:$0xff]   ;;  %v4910_v11 = vld [vmem:[%s6432_s1 + $0x190] sm:$0xff]   ;;  %v4890_v13 = vld [vmem:[%s5278_s9 + $0xd8] ss:$52 sps:$4 sm:$0xff]  }
  0x1e   : > { %v4885_v6 = vld [vmem:[%s5278_s9 + $0x274] ss:$52 sps:$4 sm:$0xff]   ;;  %v4889_v12 = vld [vmem:[%s5278_s9 + $0x270] ss:$52 sps:$4 sm:$0xff]  }
  0x1f   : > { %4069 = vmatpush3.bf16.msra.mxu0 %v4820_v15  ;;  %4796 = vmatpush3.bf16.msra.mxu1 %v4820_v15  ;;  %v4907_v8 = vld [vmem:[%s6432_s1 + $0x168] sm:$0xff]   ;;  %v4895_v14 = vld [vmem:[%s5278_s9 + $0x2dc] ss:$52 sps:$4 sm:$0xff]  }
  0x20   : > { %4070 = vmatprep.subr.bf16.mxu0 %v4821_v16  ;;  %4789 = vmatprep.subr.bf16.mxu1 %v4821_v16  ;;  %v4909_v10 = vld [vmem:[%s6432_s1 + $0x128] sm:$0xff]   ;;  %v4917_v15 = vld [vmem:[%s6432_s1 + $0x170] sm:$0xff]  }
  0x21   : > { %v4918_v16 = vld [vmem:[%s6432_s1 + $0x130] sm:$0xff]  }
  0x23   : > { %4071 = vmatpush3.bf16.msra.mxu0 %v4822_v17  ;;  %4797 = vmatpush3.bf16.msra.mxu1 %v4822_v17  ;;  %v4897_v17 = vld [vmem:[%s5278_s9 + $0x144] ss:$52 sps:$4 sm:$0xff]  }
  0x24   : > { %4168 = vmatprep.subr.bf16.mxu1 %v4829_v18  ;;  %4280 = vmatprep.subr.bf16.mxu0 %v4832_v21  ;;  %v4925_v18 = vld [vmem:[%s6432_s1 + $0x1d8] sm:$0xff]   ;;  %v4900_v21 = vld [vmem:[%s5278_s9 + $0x140] ss:$52 sps:$4 sm:$0xff]  }
  0x26   : > { %2315 = vmatmul.mubr.bf16.vlgmr.msra.gmra.mrb[0].mxu0 %v4823_v19  ;;  %2411 = vmatmul.mubr.bf16.vlgmr.msra.gmra.mrb[0].mxu1 %v4826_v20  ;;  %v4926_v19 = vld [vmem:[%s6432_s1 + $0x198] sm:$0xff]  }
  0x27   : > { %4169 = vmatpush3.bf16.msra.mxu1 %v4830_v22  ;;  %4281 = vmatpush3.bf16.msra.mxu0 %v4834_v24  ;;  %v4899_v20 = vld [vmem:[%s5278_s9 + $0x2d8] ss:$52 sps:$4 sm:$0xff]  }
  0x28   : > { %4170 = vmatprep.subr.bf16.mxu1 %v4831_v23  ;;  %2322 = vmatprep.mubr.bf16.mxu0 %v4835_v25  ;;  %v4901_v22 = vld [vmem:[%s5278_s9 + $0x344] ss:$52 sps:$4 sm:$0xff]   ;;  %v4903_v23 = vld [vmem:[%s5278_s9 + $0x1ac] ss:$52 sps:$4 sm:$0xff]  }
  0x29   : > { %2418 = vmatprep.mubr.bf16.mxu1 %v4837_v26  ;;  %4282 = vmatprep.subr.bf16.mxu0 %v4852_v28  ;;  %v4933_v24 = vld [vmem:[%s6432_s1 + $0x178] sm:$0xff]   ;;  %v4941_v26 = vld [vmem:[%s6432_s1 + $0x1e0] sm:$0xff]  }
  0x2a   : > { %v4934_v25 = vld [vmem:[%s6432_s1 + $0x138] sm:$0xff]  }
  0x2b   : > { %4171 = vmatpush3.bf16.msra.mxu1 %v4833_v27  ;;  %4283 = vmatpush3.bf16.msra.mxu0 %v4854_v33  ;;  %v4905_v27 = vld [vmem:[%s5278_s9 + $0x340] ss:$52 sps:$4 sm:$0xff]   ;;  %v4906_v28 = vld [vmem:[%s5278_s9 + $0x1a8] ss:$52 sps:$4 sm:$0xff]  }
  0x2c   : > { %4172 = vmatprep.subr.bf16.mxu1 %v4841_v31  ;;  %4284 = vmatprep.subr.bf16.mxu0 %v4866_v43  ;;  %v4911_v31 = vld [vmem:[%s5278_s9 + $0x3ac] ss:$52 sps:$4 sm:$0xff]   ;;  %v4915_v33 = vld [vmem:[%s5278_s9 + $0x3a8] ss:$52 sps:$4 sm:$0xff]   ;;  %v4973_v43 = vld [vmem:[%s6432_s1 + $0x1f0] sm:$0xff]  }
  0x2e   : > { %2323 = vmatmul.mubr.bf16.gmra.mrb[4].mxu0 %v4839_v29  ;;  %2419 = vmatmul.mubr.bf16.gmra.mrb[4].mxu1 %v4840_v30  ;;  %v4942_v29 = vld [vmem:[%s6432_s1 + $0x1a0] sm:$0xff]  }
  0x2f   : > { %4173 = vmatpush3.bf16.msra.mxu1 %v4842_v32  ;;  %2330 = vmatprep.mubr.bf16.mxu0 %v4845_v35  ;;  %v4943_v30 = vld [vmem:[%s6432_s1 + $0x240] sm:$0xff]   ;;  %v4913_v32 = vld [vmem:[%s5278_s9 + $0x214] ss:$52 sps:$4 sm:$0xff]  }
  0x30   : > { %4174 = vmatprep.subr.bf16.mxu1 %v4843_v34  ;;  %2426 = vmatprep.mubr.bf16.mxu1 %v4847_v36  ;;  %v4916_v34 = vld [vmem:[%s5278_s9 + $0x210] ss:$52 sps:$4 sm:$0xff]   ;;  %v4957_v35 = vld [vmem:[%s6432_s1 + $0x1e8] sm:$0xff]  }
  0x31   : > { %4285 = vmatpush3.bf16.msra.mxu0 %v4868_v46  ;;  %v4958_v36 = vld [vmem:[%s6432_s1 + $0x1a8] sm:$0xff]   ;;  %v4932_v46 = vld [vmem:[%s5278_s9 + $0x2e0] ss:$52 sps:$4 sm:$0xff]  }
  0x32   : > { %4286 = vmatprep.subr.bf16.mxu0 %v4883_v55  ;;  %v4947_v55 = vld [vmem:[%s5278_s9 + $0x7c] ss:$52 sps:$4 sm:$0xff]  }
  0x33   : > { %4175 = vmatpush3.bf16.msra.mxu1 %v4844_v37  ;;  %v4919_v37 = vld [vmem:[%s5278_s9 + $0x414] ss:$52 sps:$4 sm:$0xff]  }
  0x34   : > { %4176 = vmatprep.subr.bf16.mxu1 %v4851_v40  ;;  %v4924_v40 = vld [vmem:[%s5278_s9 + $0x278] ss:$52 sps:$4 sm:$0xff]  }
  0x35   : > { %4287 = vmatpush3.bf16.msra.mxu0 %v4884_v56  ;;  %v4959_v56 = vld [vmem:[%s6432_s1 + $0x248] sm:$0xff]  }
  0x36   : > { %2331 = vmatmul.mubr.bf16.gmra.mrb[8].mxu0 %v4849_v38  ;;  %2427 = vmatmul.mubr.bf16.gmra.mrb[8].mxu1 %v4850_v39  ;;  %v4921_v38 = vld [vmem:[%s5278_s9 + $0x27c] ss:$52 sps:$4 sm:$0xff]  }
  0x37   : > { %4177 = vmatpush3.bf16.msra.mxu1 %v4853_v41  ;;  %2338 = vmatprep.mubr.bf16.mxu0 %v4857_v44  ;;  %v4923_v39 = vld [vmem:[%s5278_s9 + $0x410] ss:$52 sps:$4 sm:$0xff]  }
  0x38   : > { %4178 = vmatprep.subr.bf16.mxu1 %v4855_v42  ;;  %2434 = vmatprep.mubr.bf16.mxu1 %v4859_v45  ;;  %v4927_v41 = vld [vmem:[%s5278_s9 + $0x47c] ss:$52 sps:$4 sm:$0xff]   ;;  %v4929_v42 = vld [vmem:[%s5278_s9 + $0x2e4] ss:$52 sps:$4 sm:$0xff]  }
  0x39   : > { %4288 = vmatprep.subr.bf16.mxu0 %v4893_v0  ;;  %v4974_v44 = vld [vmem:[%s6432_s1 + $0x1b0] sm:$0xff]   ;;  %v4931_v45 = vld [vmem:[%s5278_s9 + $0x478] ss:$52 sps:$4 sm:$0xff]  }
  0x3a   : > { %4289 = vmatpush3.bf16.msra.mxu0 %v4894_v2  ;;  %v4976_v0 = vld [vmem:[%s6432_s1 + $0x210] sm:$0xff]   ;;  %v4955_v2 = vld [vmem:[%s5278_s9 + $0x418] ss:$52 sps:$4 sm:$0xff]  }
  0x3b   : > { %4179 = vmatpush3.bf16.msra.mxu1 %v4856_v47  ;;  %4290 = vmatprep.subr.bf16.mxu0 %v4907_v8  ;;  %v4935_v47 = vld [vmem:[%s5278_s9 + $0x34c] ss:$52 sps:$4 sm:$0xff]  }
  0x3c   : > { %4180 = vmatprep.subr.bf16.mxu1 %v4863_v48  ;;  %v4939_v48 = vld [vmem:[%s5278_s9 + $0x14] ss:$52 sps:$4 sm:$0xff]   ;;  %v5008_v8 = vld [vmem:[%s6432_s1 + $0x220] sm:$0xff]  }
  0x3e   : > { %2339 = vmatmul.mubr.bf16.gmra.mrb[12].mxu0 %v4861_v49  ;;  %2435 = vmatmul.mubr.bf16.gmra.mrb[12].mxu1 %v4862_v50  ;;  %v4989_v49 = vld [vmem:[%s6432_s1 + $0x1f8] sm:$0xff]  }
  0x3f   : > { %4181 = vmatpush3.bf16.msra.mxu1 %v4864_v51  ;;  %2346 = vmatprep.mubr.bf16.mxu0 %v4869_v53  ;;  %v4990_v50 = vld [vmem:[%s6432_s1 + $0x1b8] sm:$0xff]   ;;  %v4937_v51 = vld [vmem:[%s5278_s9 + $0x10] ss:$52 sps:$4 sm:$0xff]  }
  0x40   : > { %4182 = vmatprep.subr.bf16.mxu1 %v4865_v52  ;;  %2475 = vmatprep.mubr.bf16.mxu1 %v4873_v54  ;;  %v4940_v52 = vld [vmem:[%s5278_s9 + $0x348] ss:$52 sps:$4 sm:$0xff]   ;;  %v4944_v53 = vld [vmem:[%s6432_s1 + $0x200] sm:$0xff]  }
  0x41   : > { %4291 = vmatpush3.bf16.msra.mxu0 %v4909_v10  ;;  %v4945_v54 = vld [vmem:[%s5278_s9 + $0x3b4] ss:$52 sps:$4 sm:$0xff]  }
  0x42   : > { %4292 = vmatprep.subr.bf16.mxu0 %v4917_v15  ;;  %v4965_v10 = vld [vmem:[%s5278_s9 + $0x480] ss:$52 sps:$4 sm:$0xff]  }
  0x43   : > { %4183 = vmatpush3.bf16.msra.mxu1 %v4867_v57  ;;  %v5005_v57 = vld [vmem:[%s6432_s1 + $0x2c0] sm:$0xff]   ;;  %v4969_v15 = vld [vmem:[%s5278_s9 + $0x1b4] ss:$52 sps:$4 sm:$0xff]  }
  0x44   : > { %4392 = vmatprep.subr.bf16.mxu1 %v4875_v60  ;;  %v4949_v60 = vld [vmem:[%s5278_s9 + $0x3b0] ss:$52 sps:$4 sm:$0xff]  }
  0x45   : > { %4293 = vmatpush3.bf16.msra.mxu0 %v4918_v16  ;;  %v5040_v16 = vld [vmem:[%s6432_s1 + $0x230] sm:$0xff]  }
  0x46   : > { %2347 = vmatmul.mubr.bf16.gmra.mrb[16].mxu0 %v4874_v59  ;;  %2476 = vmatmul.mubr.bf16.vlgmr.msra.gmra.mrb[16].mxu1 %v4871_v58  ;;  %v4960_v58 = vld [vmem:[%s6432_s1 + $0x208] sm:$0xff]   ;;  %v4975_v59 = vld [vmem:[%s6432_s1 + $0x250] sm:$0xff]  }
  0x47   : > { %4393 = vmatpush3.bf16.msra.mxu1 %v4876_v61  ;;  %2354 = vmatprep.mubr.bf16.mxu0 %v4877_v62  ;;  %v4950_v61 = vld [vmem:[%s5278_s9 + $0x78] ss:$52 sps:$4 sm:$0xff]   ;;  %v4951_v62 = vld [vmem:[%s5278_s9 + $0x41c] ss:$52 sps:$4 sm:$0xff]  }
  0x48   : > { %2483 = vmatprep.mubr.bf16.mxu1 %v4879_v63  ;;  %4394 = vmatprep.subr.bf16.mxu1 %v4891_v1  ;;  %v4953_v63 = vld [vmem:[%s5278_s9 + $0xe4] ss:$52 sps:$4 sm:$0xff]  }
  0x49   : > { %4294 = vmatprep.subr.bf16.mxu0 %v4933_v24  ;;  %v4991_v1 = vld [vmem:[%s6432_s1 + $0x258] sm:$0xff]  }
  0x4a   : > { %4295 = vmatpush3.bf16.msra.mxu0 %v4934_v25  ;;  %v4982_v24 = vld [vmem:[%s5278_s9 + $0x218] ss:$52 sps:$4 sm:$0xff]   ;;  %v4983_v25 = vld [vmem:[%s5278_s9 + $0x5bc] ss:$52 sps:$4 sm:$0xff]  }
  0x4b   : > { %4395 = vmatpush3.bf16.msra.mxu1 %v4892_v3  ;;  %4504 = vmatprep.subr.bf16.mxu0 %v4943_v30  ;;  %v4992_v3 = vld [vmem:[%s6432_s1 + $0x218] sm:$0xff]  }
  0x4c   : > { %4396 = vmatprep.subr.bf16.mxu1 %v4908_v9  ;;  %v5023_v9 = vld [vmem:[%s6432_s1 + $0x268] sm:$0xff]   ;;  %v4993_v30 = vld [vmem:[%s5278_s9 + $0x624] ss:$52 sps:$4 sm:$0xff]  }
  0x4e   : > { %2355 = vmatmul.mubr.bf16.gmra.mrb[20].mxu0 %v4881_v4  ;;  %2484 = vmatmul.mubr.bf16.gmra.mrb[20].mxu1 %v4882_v5  ;;  %v5007_v4 = vld [vmem:[%s6432_s1 + $0x260] sm:$0xff]  }
  0x4f   : > { %2362 = vmatprep.mubr.bf16.mxu0 %v4885_v6  ;;  %2491 = vmatprep.mubr.bf16.mxu1 %v4887_v7  ;;  %v4956_v5 = vld [vmem:[%s5278_s9 + $0xe0] ss:$52 sps:$4 sm:$0xff]   ;;  %v4961_v6 = vld [vmem:[%s5278_s9 + $0x484] ss:$52 sps:$4 sm:$0xff]  }
  0x50   : > { %4397 = vmatpush3.bf16.msra.mxu1 %v4910_v11  ;;  %v4963_v7 = vld [vmem:[%s5278_s9 + $0x14c] ss:$52 sps:$4 sm:$0xff]   ;;  %v4966_v11 = vld [vmem:[%s5278_s9 + $0x148] ss:$52 sps:$4 sm:$0xff]  }
  0x51   : > { %4398 = vmatprep.subr.bf16.mxu1 %v4925_v18  ;;  %v4972_v18 = vld [vmem:[%s5278_s9 + $0x1b0] ss:$52 sps:$4 sm:$0xff]  }
  0x54   : > { %4399 = vmatpush3.bf16.msra.mxu1 %v4926_v19  ;;  %v4977_v19 = vld [vmem:[%s5278_s9 + $0x554] ss:$52 sps:$4 sm:$0xff]  }
  0x55   : > { %4400 = vmatprep.subr.bf16.mxu1 %v4941_v26  ;;  %v4985_v26 = vld [vmem:[%s5278_s9 + $0x284] ss:$52 sps:$4 sm:$0xff]  }
  0x56   : > { %2363 = vmatmul.mubr.bf16.gmra.mrb[24].mxu0 %v4889_v12  ;;  %2492 = vmatmul.mubr.bf16.gmra.mrb[24].mxu1 %v4890_v13  ;;  %v5024_v12 = vld [vmem:[%s6432_s1 + $0x228] sm:$0xff]   ;;  %v5039_v13 = vld [vmem:[%s6432_s1 + $0x270] sm:$0xff]  }
  0x57   : > { %2370 = vmatprep.mubr.bf16.mxu0 %v4895_v14  ;;  %2499 = vmatprep.mubr.bf16.mxu1 %v4897_v17  ;;  %v4967_v14 = vld [vmem:[%s5278_s9 + $0x4ec] ss:$52 sps:$4 sm:$0xff]   ;;  %v4971_v17 = vld [vmem:[%s5278_s9 + $0x4e8] ss:$52 sps:$4 sm:$0xff]  }
  0x58   : > { %4401 = vmatpush3.bf16.msra.mxu1 %v4942_v29  ;;  %v4988_v29 = vld [vmem:[%s5278_s9 + $0x280] ss:$52 sps:$4 sm:$0xff]  }
  0x59   : > { %4402 = vmatprep.subr.bf16.mxu1 %v4957_v35  ;;  %v5003_v35 = vld [vmem:[%s5278_s9 + $0x1c] ss:$52 sps:$4 sm:$0xff]  }
  0x5c   : > { %4403 = vmatpush3.bf16.msra.mxu1 %v4958_v36  ;;  %v5001_v36 = vld [vmem:[%s5278_s9 + $0x18] ss:$52 sps:$4 sm:$0xff]  }
  0x5d   : > { %4404 = vmatprep.subr.bf16.mxu1 %v4973_v43  ;;  %v5037_v43 = vld [vmem:[%s6432_s1 + $0x2d0] sm:$0xff]  }
  0x5e   : > { %2371 = vmatmul.mubr.bf16.gmra.mrb[28].mxu0 %v4899_v20  ;;  %2500 = vmatmul.mubr.bf16.gmra.mrb[28].mxu1 %v4900_v21  ;;  %v4979_v20 = vld [vmem:[%s5278_s9 + $0x21c] ss:$52 sps:$4 sm:$0xff]  }
  0x5f   : > { %2378 = vmatprep.mubr.bf16.mxu0 %v4901_v22  ;;  %2507 = vmatprep.mubr.bf16.mxu1 %v4903_v23  ;;  %v5055_v21 = vld [vmem:[%s6432_s1 + $0x278] sm:$0xff]   ;;  %v4981_v23 = vld [vmem:[%s5278_s9 + $0x550] ss:$52 sps:$4 sm:$0xff]  }
  0x60   : > { %4405 = vmatpush3.bf16.msra.mxu1 %v4974_v44  ;;  %v5056_v22 = vld [vmem:[%s6432_s1 + $0x238] sm:$0xff]  }
  0x61   : > { %4406 = vmatprep.subr.bf16.mxu1 %v4989_v49  ;;  %v5013_v44 = vld [vmem:[%s5278_s9 + $0x3b8] ss:$52 sps:$4 sm:$0xff]  }
  0x62   : > { %v5053_v49 = vld [vmem:[%s6432_s1 + $0x2d8] sm:$0xff]  }
  0x64   : > { %4407 = vmatpush3.bf16.msra.mxu1 %v4990_v50  ;;  %v5054_v50 = vld [vmem:[%s6432_s1 + $0x298] sm:$0xff]  }
  0x65   : > { %4616 = vmatprep.subr.bf16.mxu1 %v5005_v57  ;;  %v5084_v57 = vld [vmem:[%s6432_s1 + $0x2e8] sm:$0xff]  }
  0x66   : > { %2379 = vmatmul.mubr.bf16.gmra.mrb[32].mxu0 %v4905_v27  ;;  %2508 = vmatmul.mubr.bf16.gmra.mrb[32].mxu1 %v4906_v28  ;;  %v5573_v27 = vld [vmem:[%s6432_s1 + $0x300] sm:$0xff]   ;;  %v4987_v28 = vld [vmem:[%s5278_s9 + $0x5b8] ss:$52 sps:$4 sm:$0xff]  }
  0x67   : > { %2386 = vmatprep.mubr.bf16.mxu0 %v4911_v31  ;;  %2515 = vmatprep.mubr.bf16.mxu1 %v4913_v32  ;;  %v4995_v31 = vld [vmem:[%s5278_s9 + $0x2ec] ss:$52 sps:$4 sm:$0xff]  }
  0x68   : > { %v4997_v32 = vld [vmem:[%s5278_s9 + $0x620] ss:$52 sps:$4 sm:$0xff]  }
  0x6e   : > { %2387 = vmatmul.mubr.bf16.gmra.mrb[36].mxu0 %v4915_v33  ;;  %2516 = vmatmul.mubr.bf16.gmra.mrb[36].mxu1 %v4916_v34  ;;  %v4998_v33 = vld [vmem:[%s5278_s9 + $0x2e8] ss:$52 sps:$4 sm:$0xff]  }
  0x6f   : > { %2394 = vmatprep.mubr.bf16.mxu0 %v4919_v37  ;;  %2523 = vmatprep.mubr.bf16.mxu1 %v4921_v38  ;;  %v4999_v34 = vld [vmem:[%s5278_s9 + $0x354] ss:$52 sps:$4 sm:$0xff]   ;;  %v5004_v37 = vld [vmem:[%s5278_s9 + $0x350] ss:$52 sps:$4 sm:$0xff]  }
  0x70   : > { %v5006_v38 = vld [vmem:[%s6432_s1 + $0x280] sm:$0xff]  }
  0x76   : > { %2395 = vmatmul.mubr.bf16.gmra.mrb[40].mxu0 %v4923_v39  ;;  %2524 = vmatmul.mubr.bf16.gmra.mrb[40].mxu1 %v4924_v40  ;;  %v5009_v39 = vld [vmem:[%s5278_s9 + $0x3bc] ss:$52 sps:$4 sm:$0xff]   ;;  %v5011_v40 = vld [vmem:[%s5278_s9 + $0x84] ss:$52 sps:$4 sm:$0xff]  }
  0x77   : > { %2402 = vmatprep.mubr.bf16.mxu0 %v4927_v41  ;;  %2531 = vmatprep.mubr.bf16.mxu1 %v4929_v42  ;;  %v5021_v41 = vld [vmem:[%s6432_s1 + $0x2c8] sm:$0xff]  }
  0x78   : > { %v5022_v42 = vld [vmem:[%s6432_s1 + $0x288] sm:$0xff]  }
  0x7e   : > { %2403 = vmatmul.mubr.bf16.gmra.mrb[44].mxu0 %v4931_v45  ;;  %2532 = vmatmul.mubr.bf16.gmra.mrb[44].mxu1 %v4932_v46  ;;  %v5014_v45 = vld [vmem:[%s5278_s9 + $0x80] ss:$52 sps:$4 sm:$0xff]   ;;  %v5015_v46 = vld [vmem:[%s5278_s9 + $0x424] ss:$52 sps:$4 sm:$0xff]  }
  0x7f   : > { %2539 = vmatprep.mubr.bf16.mxu1 %v4935_v47  ;;  %2636 = vmatprep.mubr.bf16.mxu0 %v4939_v48  ;;  %v5017_v47 = vld [vmem:[%s5278_s9 + $0xec] ss:$52 sps:$4 sm:$0xff]   ;;  %v5038_v48 = vld [vmem:[%s6432_s1 + $0x290] sm:$0xff]  }
  0x86   : > { %2540 = vmatmul.mubr.bf16.gmra.mrb[48].mxu1 %v4940_v52  ;;  %2637 = vmatmul.mubr.bf16.vlgmr.msra.gmra.mrb[48].mxu0 %v4937_v51  ;;  %v5069_v51 = vld [vmem:[%s6432_s1 + $0x2e0] sm:$0xff]  }
  0x87   : > { %4505 = vmatpush3.bf16.msra.mxu0 %v4944_v53  ;;  %2547 = vmatprep.mubr.bf16.mxu1 %v4945_v54  ;;  %v5019_v52 = vld [vmem:[%s5278_s9 + $0x420] ss:$52 sps:$4 sm:$0xff]   ;;  %v5020_v53 = vld [vmem:[%s5278_s9 + $0xe8] ss:$52 sps:$4 sm:$0xff]  }
  0x88   : > { %2644 = vmatprep.mubr.bf16.mxu0 %v4947_v55  ;;  %4506 = vmatprep.subr.bf16.mxu0 %v4959_v56  ;;  %v5025_v54 = vld [vmem:[%s5278_s9 + $0x48c] ss:$52 sps:$4 sm:$0xff]   ;;  %v5027_v55 = vld [vmem:[%s5278_s9 + $0x154] ss:$52 sps:$4 sm:$0xff]  }
  0x89   : > { %v5070_v56 = vld [vmem:[%s6432_s1 + $0x2a0] sm:$0xff]  }
  0x8b   : > { %4507 = vmatpush3.bf16.msra.mxu0 %v4960_v58  ;;  %v5085_v58 = vld [vmem:[%s6432_s1 + $0x2a8] sm:$0xff]  }
  0x8c   : > { %4508 = vmatprep.subr.bf16.mxu0 %v4975_v59  ;;  %v5098_v59 = vld [vmem:[%s6432_s1 + $0x2f0] sm:$0xff]  }
  0x8e   : > { %2548 = vmatmul.mubr.bf16.gmra.mrb[52].mxu1 %v4949_v60  ;;  %2645 = vmatmul.mubr.bf16.gmra.mrb[52].mxu0 %v4950_v61  ;;  %v5029_v60 = vld [vmem:[%s5278_s9 + $0x488] ss:$52 sps:$4 sm:$0xff]   ;;  %v5030_v61 = vld [vmem:[%s5278_s9 + $0x150] ss:$52 sps:$4 sm:$0xff]  }
  0x8f   : > { %2555 = vmatprep.mubr.bf16.mxu1 %v4951_v62  ;;  %2652 = vmatprep.mubr.bf16.mxu0 %v4953_v63  ;;  %v5031_v62 = vld [vmem:[%s5278_s9 + $0x4f4] ss:$52 sps:$4 sm:$0xff]   ;;  %v5033_v63 = vld [vmem:[%s5278_s9 + $0x1bc] ss:$52 sps:$4 sm:$0xff]  }
  0x90   : > { %4509 = vmatpush3.bf16.msra.mxu0 %v4976_v0  ;;  %v5099_v0 = vld [vmem:[%s6432_s1 + $0x2b0] sm:$0xff]  }
  0x91   : > { %4510 = vmatprep.subr.bf16.mxu0 %v4991_v1  ;;  %v5112_v1 = vld [vmem:[%s6432_s1 + $0x2f8] sm:$0xff]  }
  0x94   : > { %4511 = vmatpush3.bf16.msra.mxu0 %v4992_v3  ;;  %v5035_v3 = vld [vmem:[%s5278_s9 + $0x4f0] ss:$52 sps:$4 sm:$0xff]  }
  0x95   : > { %4512 = vmatprep.subr.bf16.mxu0 %v5007_v4  ;;  %v5036_v4 = vld [vmem:[%s5278_s9 + $0x1b8] ss:$52 sps:$4 sm:$0xff]  }
  0x96   : > { %2556 = vmatmul.mubr.bf16.gmra.mrb[56].mxu1 %v4955_v2  ;;  %2653 = vmatmul.mubr.bf16.gmra.mrb[56].mxu0 %v4956_v5  ;;  %v5113_v2 = vld [vmem:[%s6432_s1 + $0x2b8] sm:$0xff]  }
  0x97   : > { %2563 = vmatprep.mubr.bf16.mxu1 %v4961_v6  ;;  %2660 = vmatprep.mubr.bf16.mxu0 %v4963_v7  ;;  %v5041_v5 = vld [vmem:[%s5278_s9 + $0x55c] ss:$52 sps:$4 sm:$0xff]   ;;  %v5043_v6 = vld [vmem:[%s5278_s9 + $0x224] ss:$52 sps:$4 sm:$0xff]  }
  0x98   : > { %4513 = vmatpush3.bf16.msra.mxu0 %v5008_v8  ;;  %v5045_v7 = vld [vmem:[%s5278_s9 + $0x558] ss:$52 sps:$4 sm:$0xff]   ;;  %v5046_v8 = vld [vmem:[%s5278_s9 + $0x220] ss:$52 sps:$4 sm:$0xff]  }
  0x99   : > { %4514 = vmatprep.subr.bf16.mxu0 %v5023_v9  ;;  %v5047_v9 = vld [vmem:[%s5278_s9 + $0x5c4] ss:$52 sps:$4 sm:$0xff]  }
  0x9c   : > { %4515 = vmatpush3.bf16.msra.mxu0 %v5024_v12  ;;  %v5052_v12 = vld [vmem:[%s5278_s9 + $0x288] ss:$52 sps:$4 sm:$0xff]  }
  0x9d   : > { %4516 = vmatprep.subr.bf16.mxu0 %v5039_v13  ;;  %v5057_v13 = vld [vmem:[%s5278_s9 + $0x62c] ss:$52 sps:$4 sm:$0xff]  }
  0x9e   : > { %2564 = vmatmul.mubr.bf16.gmra.mrb[60].mxu1 %v4965_v10  ;;  %2661 = vmatmul.mubr.bf16.gmra.mrb[60].mxu0 %v4966_v11  ;;  %v5049_v10 = vld [vmem:[%s5278_s9 + $0x28c] ss:$52 sps:$4 sm:$0xff]  }
  0x9f   : > { %2571 = vmatprep.mubr.bf16.mxu1 %v4967_v14  ;;  %2668 = vmatprep.mubr.bf16.mxu0 %v4969_v15  ;;  %v5051_v11 = vld [vmem:[%s5278_s9 + $0x5c0] ss:$52 sps:$4 sm:$0xff]  }
  0xa0   : > { %4517 = vmatpush3.bf16.msra.mxu0 %v5040_v16  ;;  %v5059_v14 = vld [vmem:[%s5278_s9 + $0x2f4] ss:$52 sps:$4 sm:$0xff]  }
  0xa1   : > { %4518 = vmatprep.subr.bf16.mxu0 %v5055_v21 }
  0xa4   : > { %4519 = vmatpush3.bf16.msra.mxu0 %v5056_v22 }
  0xa5   : > { %4746 = vmatprep.subr.bf16.mxu0 %v5573_v27 }
  0xa6   : > { %2572 = vmatmul.mubr.bf16.gmra.mrb[64].mxu1 %v4971_v17  ;;  %2669 = vmatmul.mubr.bf16.gmra.mrb[64].mxu0 %v4972_v18 }
  0xa7   : > { %2579 = vmatprep.mubr.bf16.mxu1 %v4977_v19  ;;  %2676 = vmatprep.mubr.bf16.mxu0 %v4979_v20  ;;  %v5061_v19 = vld [vmem:[%s5278_s9 + $0x628] ss:$52 sps:$4 sm:$0xff]   ;;  %v5062_v20 = vld [vmem:[%s5278_s9 + $0x2f0] ss:$52 sps:$4 sm:$0xff]  }
  0xae   : > { %2580 = vmatmul.mubr.bf16.gmra.mrb[68].mxu1 %v4981_v23  ;;  %2677 = vmatmul.mubr.bf16.gmra.mrb[68].mxu0 %v4982_v24 }
  0xaf   : > { %2587 = vmatprep.mubr.bf16.mxu1 %v4983_v25  ;;  %2684 = vmatprep.mubr.bf16.mxu0 %v4985_v26  ;;  %v5063_v25 = vld [vmem:[%s5278_s9 + $0x35c] ss:$52 sps:$4 sm:$0xff]   ;;  %v5067_v26 = vld [vmem:[%s5278_s9 + $0x24] ss:$52 sps:$4 sm:$0xff]  }
  0xb6   : > { %2588 = vmatmul.mubr.bf16.gmra.mrb[72].mxu1 %v4987_v28  ;;  %2685 = vmatmul.mubr.bf16.gmra.mrb[72].mxu0 %v4988_v29 }
  0xb7   : > { %2595 = vmatprep.mubr.bf16.mxu1 %v4993_v30  ;;  %2692 = vmatprep.mubr.bf16.mxu0 %v4995_v31 }
  0xbe   : > { %2596 = vmatmul.mubr.bf16.gmra.mrb[76].mxu1 %v4997_v32  ;;  %2693 = vmatmul.mubr.bf16.gmra.mrb[76].mxu0 %v4998_v33 }
  0xbf   : > { %2700 = vmatprep.mubr.bf16.mxu0 %v4999_v34  ;;  %2797 = vmatprep.mubr.bf16.mxu1 %v5003_v35 }
  0xc6   : > { %2701 = vmatmul.mubr.bf16.gmra.mrb[80].mxu0 %v5004_v37  ;;  %2798 = vmatmul.mubr.bf16.vlgmr.msra.gmra.mrb[80].mxu1 %v5001_v36  ;;  %v5065_v36 = vld [vmem:[%s5278_s9 + $0x20] ss:$52 sps:$4 sm:$0xff]   ;;  %v5068_v37 = vld [vmem:[%s5278_s9 + $0x358] ss:$52 sps:$4 sm:$0xff]  }
  0xc7   : > { %4617 = vmatpush3.bf16.msra.mxu1 %v5006_v38  ;;  %2708 = vmatprep.mubr.bf16.mxu0 %v5009_v39 }
  0xc8   : > { %2805 = vmatprep.mubr.bf16.mxu1 %v5011_v40  ;;  %4618 = vmatprep.subr.bf16.mxu1 %v5021_v41 }
  0xcb   : > { %4619 = vmatpush3.bf16.msra.mxu1 %v5022_v42  ;;  %v5072_v42 = vld [vmem:[%s5278_s9 + $0x3c4] ss:$52 sps:$4 sm:$0xff]  }
  0xcc   : > { %4620 = vmatprep.subr.bf16.mxu1 %v5037_v43 }
  0xce   : > { %2709 = vmatmul.mubr.bf16.gmra.mrb[84].mxu0 %v5013_v44  ;;  %2806 = vmatmul.mubr.bf16.gmra.mrb[84].mxu1 %v5014_v45  ;;  %v5074_v45 = vld [vmem:[%s5278_s9 + $0x8c] ss:$52 sps:$4 sm:$0xff]  }
  0xcf   : > { %2716 = vmatprep.mubr.bf16.mxu0 %v5015_v46  ;;  %2813 = vmatprep.mubr.bf16.mxu1 %v5017_v47  ;;  %v5126_v46 = vld [vmem:[%s6432_s1 + $0x308] sm:$0xff]  }
  0xd0   : > { %4621 = vmatpush3.bf16.msra.mxu1 %v5038_v48 }
  0xd1   : > { %4622 = vmatprep.subr.bf16.mxu1 %v5053_v49 }
  0xd4   : > { %4623 = vmatpush3.bf16.msra.mxu1 %v5054_v50 }
  0xd5   : > { %4624 = vmatprep.subr.bf16.mxu1 %v5069_v51 }
  0xd6   : > { %2717 = vmatmul.mubr.bf16.gmra.mrb[88].mxu0 %v5019_v52  ;;  %2814 = vmatmul.mubr.bf16.gmra.mrb[88].mxu1 %v5020_v53  ;;  %v5076_v53 = vld [vmem:[%s5278_s9 + $0x3c0] ss:$52 sps:$4 sm:$0xff]  }
  0xd7   : > { %2724 = vmatprep.mubr.bf16.mxu0 %v5025_v54  ;;  %2821 = vmatprep.mubr.bf16.mxu1 %v5027_v55  ;;  %v5077_v54 = vld [vmem:[%s5278_s9 + $0x88] ss:$52 sps:$4 sm:$0xff]  }
  0xd8   : > { %4625 = vmatpush3.bf16.msra.mxu1 %v5070_v56 }
  0xd9   : > { %4626 = vmatprep.subr.bf16.mxu1 %v5084_v57 }
  0xdc   : > { %4627 = vmatpush3.bf16.msra.mxu1 %v5085_v58 }
  0xdd   : > { %4628 = vmatprep.subr.bf16.mxu1 %v5098_v59  ;;  %v5078_v59 = vld [vmem:[%s5278_s9 + $0x42c] ss:$52 sps:$4 sm:$0xff]  }
  0xde   : > { %2725 = vmatmul.mubr.bf16.gmra.mrb[92].mxu0 %v5029_v60  ;;  %2822 = vmatmul.mubr.bf16.gmra.mrb[92].mxu1 %v5030_v61  ;;  %v5080_v60 = vld [vmem:[%s5278_s9 + $0xf4] ss:$52 sps:$4 sm:$0xff]  }
  0xdf   : > { %2732 = vmatprep.mubr.bf16.mxu0 %v5031_v62  ;;  %2829 = vmatprep.mubr.bf16.mxu1 %v5033_v63 }
  0xe0   : > { %4629 = vmatpush3.bf16.msra.mxu1 %v5099_v0 }
  0xe1   : > { %4630 = vmatprep.subr.bf16.mxu1 %v5112_v1 }
  0xe4   : > { %4631 = vmatpush3.bf16.msra.mxu1 %v5113_v2 }
  0xe6   : > { %2733 = vmatmul.mubr.bf16.gmra.mrb[96].mxu0 %v5035_v3  ;;  %2830 = vmatmul.mubr.bf16.gmra.mrb[96].mxu1 %v5036_v4  ;;  %v5082_v4 = vld [vmem:[%s5278_s9 + $0x428] ss:$52 sps:$4 sm:$0xff]  }
  0xe7   : > { %2740 = vmatprep.mubr.bf16.mxu0 %v5041_v5  ;;  %2837 = vmatprep.mubr.bf16.mxu1 %v5043_v6  ;;  %v5083_v5 = vld [vmem:[%s5278_s9 + $0xf0] ss:$52 sps:$4 sm:$0xff]  }
  0xee   : > { %2741 = vmatmul.mubr.bf16.gmra.mrb[100].mxu0 %v5045_v7  ;;  %2838 = vmatmul.mubr.bf16.gmra.mrb[100].mxu1 %v5046_v8 }
  0xef   : > { %2748 = vmatprep.mubr.bf16.mxu0 %v5047_v9  ;;  %2845 = vmatprep.mubr.bf16.mxu1 %v5049_v10  ;;  %v5086_v10 = vld [vmem:[%s5278_s9 + $0x494] ss:$52 sps:$4 sm:$0xff]  }
  0xf6   : > { %2749 = vmatmul.mubr.bf16.gmra.mrb[104].mxu0 %v5051_v11  ;;  %2846 = vmatmul.mubr.bf16.gmra.mrb[104].mxu1 %v5052_v12  ;;  %v5088_v11 = vld [vmem:[%s5278_s9 + $0x15c] ss:$52 sps:$4 sm:$0xff]  }
  0xf7   : > { %2756 = vmatprep.mubr.bf16.mxu0 %v5057_v13  ;;  %2853 = vmatprep.mubr.bf16.mxu1 %v5059_v14 }
  0xf9   : > { %v4144_v15 = vpop.f32.mrb[0].mxu1  ;;  %v4072_v16 = vpop.f32.mrb[0].mxu0 }
  0xfa   : > { %v4145_v17 = vpop.f32.mrb[1].mxu1  ;;  %v4073_v18 = vpop.f32.mrb[1].mxu0 }
  0xfb   : > { %v5659_v21 = vadd.f32 %v4145_v17, %v4144_v15  ;;  %v4147_v22 = vpop.f32.mrb[2].mxu1  ;;  %v5661_v23 = vadd.f32 %v4073_v18, %v4072_v16  ;;  %v4075_v24 = vpop.f32.mrb[2].mxu0  ;;  %v5712_v16 = vld [vmem:[%s6433_s2] ss:$0 sm:$0xff] }
  0xfc   : > { %v4148_v28 = vpop.f32.mrb[3].mxu1  ;;  %v4076_v29 = vpop.f32.mrb[3].mxu0 }
  0xfd   : > { %v5665_v30 = vadd.f32 %v4148_v28, %v4147_v22  ;;  %v5667_v31 = vadd.f32 %v4076_v29, %v4075_v24  ;;  %v5090_v22 = vld [vmem:[%s5278_s9 + $0x490] ss:$52 sps:$4 sm:$0xff]   ;;  %v5091_v24 = vld [vmem:[%s5278_s9 + $0x158] ss:$52 sps:$4 sm:$0xff]  }
  0xfe   : > { %2757 = vmatmul.mubr.bf16.gmra.mrb[108].mxu0 %v5061_v19  ;;  %2854 = vmatmul.mubr.bf16.gmra.mrb[108].mxu1 %v5062_v20 }
  0xff   : > { %2861 = vmatprep.mubr.bf16.mxu1 %v5063_v25  ;;  %2958 = vmatprep.mubr.bf16.mxu0 %v5067_v26  ;;  %v2317_v25 = vadd.f32 %v5661_v23, %v5712_v16 }
 0x101   : > { %v4150_v32 = vpop.f32.mrb[4].mxu1  ;;  %v4078_v33 = vpop.f32.mrb[4].mxu0 }
 0x102   : > { %v4151_v34 = vpop.f32.mrb[5].mxu1  ;;  %v4079_v35 = vpop.f32.mrb[5].mxu0 }
 0x103   : > { %v5671_v38 = vadd.f32 %v4151_v34, %v4150_v32  ;;  %v4153_v39 = vpop.f32.mrb[6].mxu1  ;;  %v5673_v40 = vadd.f32 %v4079_v35, %v4078_v33  ;;  %v4081_v41 = vpop.f32.mrb[6].mxu0  ;;  %v5092_v33 = vld [vmem:[%s5278_s9 + $0x4fc] ss:$52 sps:$4 sm:$0xff]   ;;  %v5094_v34 = vld [vmem:[%s5278_s9 + $0x1c4] ss:$52 sps:$4 sm:$0xff]  }
 0x104   : > { %v4154_v43 = vpop.f32.mrb[7].mxu1  ;;  %v4082_v44 = vpop.f32.mrb[7].mxu0 }
 0x105   : > { %v5680_v47 = vadd.f32 %v4154_v43, %v4153_v39  ;;  %v5682_v48 = vadd.f32 %v4082_v44, %v4081_v41 }
 0x106   : > { %2862 = vmatmul.mubr.bf16.gmra.mrb[112].mxu1 %v5068_v37  ;;  %2959 = vmatmul.mubr.bf16.vlgmr.msra.gmra.mrb[112].mxu0 %v5065_v36  ;;  %v2320_v37 = vadd.f32 %v5667_v31, %v5712_v16  ;;  %v2325_v31 = vadd.f32 %v5673_v40, %v5712_v16 }
 0x107   : > { %4747 = vmatpush3.bf16.msra.mxu0 %v5573_v27  ;;  %2869 = vmatprep.mubr.bf16.mxu1 %v5072_v42 }
 0x108   : > { %2966 = vmatprep.mubr.bf16.mxu0 %v5074_v45  ;;  %4748 = vmatprep.subr.bf16.mxu0 %v5126_v46 }
 0x109   : > { %v4156_v49 = vpop.f32.mrb[8].mxu1  ;;  %v4084_v50 = vpop.f32.mrb[8].mxu0 }
 0x10a   : > { %v4157_v51 = vpop.f32.mrb[9].mxu1  ;;  %v4085_v52 = vpop.f32.mrb[9].mxu0 }
 0x10b   : > { %v5687_v55 = vadd.f32 %v4157_v51, %v4156_v49  ;;  %v4159_v56 = vpop.f32.mrb[10].mxu1  ;;  %v5689_v57 = vadd.f32 %v4085_v52, %v4084_v50  ;;  %v4087_v58 = vpop.f32.mrb[10].mxu0  ;;  %4749 = vmatpush3.bf16.msra.mxu0 %v5126_v46  ;;  %v5096_v49 = vld [vmem:[%s5278_s9 + $0x4f8] ss:$52 sps:$4 sm:$0xff]   ;;  %v5097_v50 = vld [vmem:[%s5278_s9 + $0x1c0] ss:$52 sps:$4 sm:$0xff]  }
 0x10c   : > { %v4160_v27 = vpop.f32.mrb[11].mxu1  ;;  %v4088_v61 = vpop.f32.mrb[11].mxu0 }
 0x10d   : > { %v5693_v62 = vadd.f32 %v4160_v27, %v4159_v56  ;;  %v5695_v63 = vadd.f32 %v4088_v61, %v4087_v58  ;;  %v5100_v56 = vld [vmem:[%s5278_s9 + $0x564] ss:$52 sps:$4 sm:$0xff]   ;;  %v5102_v58 = vld [vmem:[%s5278_s9 + $0x22c] ss:$52 sps:$4 sm:$0xff]   ;;  %v2328_v27 = vadd.f32 %v5682_v48, %v5712_v16  ;;  %v2333_v48 = vadd.f32 %v5689_v57, %v5712_v16 }
 0x10e   : > { %2870 = vmatmul.mubr.bf16.gmra.mrb[116].mxu1 %v5076_v53  ;;  %2967 = vmatmul.mubr.bf16.gmra.mrb[116].mxu0 %v5077_v54 }
 0x10f   : > { %2877 = vmatprep.mubr.bf16.mxu1 %v5078_v59  ;;  %2974 = vmatprep.mubr.bf16.mxu0 %v5080_v60 }
 0x111   : > { %v4162_v0 = vpop.f32.mrb[12].mxu1  ;;  %v4090_v1 = vpop.f32.mrb[12].mxu0 }
 0x112   : > { %v4163_v2 = vpop.f32.mrb[13].mxu1  ;;  %v4091_v3 = vpop.f32.mrb[13].mxu0 }
 0x113   : > { %v5699_v6 = vadd.f32 %v4163_v2, %v4162_v0  ;;  %v4165_v7 = vpop.f32.mrb[14].mxu1  ;;  %v5701_v8 = vadd.f32 %v4091_v3, %v4090_v1  ;;  %v4093_v9 = vpop.f32.mrb[14].mxu0 }
 0x114   : > { %v4166_v12 = vpop.f32.mrb[15].mxu1  ;;  %v4094_v13 = vpop.f32.mrb[15].mxu0 }
 0x115   : > { %v5705_v14 = vadd.f32 %v4166_v12, %v4165_v7  ;;  %v5707_v15 = vadd.f32 %v4094_v13, %v4093_v9  ;;  %v5104_v7 = vld [vmem:[%s5278_s9 + $0x560] ss:$52 sps:$4 sm:$0xff]   ;;  %v5105_v9 = vld [vmem:[%s5278_s9 + $0x228] ss:$52 sps:$4 sm:$0xff]  }
 0x116   : > { %2878 = vmatmul.mubr.bf16.gmra.mrb[120].mxu1 %v5082_v4  ;;  %2975 = vmatmul.mubr.bf16.gmra.mrb[120].mxu0 %v5083_v5 }
 0x117   : > { %2885 = vmatprep.mubr.bf16.mxu1 %v5086_v10  ;;  %2982 = vmatprep.mubr.bf16.mxu0 %v5088_v11 }
 0x119   : > { %v4184_v17 = vpop.f32.mrb[16].mxu1  ;;  %v4096_v18 = vpop.f32.mrb[16].mxu0 }
 0x11a   : > { %v4185_v19 = vpop.f32.mrb[17].mxu1  ;;  %v4097_v20 = vpop.f32.mrb[17].mxu0 }
 0x11b   : > { %v4186_v26 = vadd.f32 %v4185_v19, %v4184_v17  ;;  %v4187_v28 = vpop.f32.mrb[18].mxu1  ;;  %v5718_v29 = vadd.f32 %v4097_v20, %v4096_v18  ;;  %v4099_v32 = vpop.f32.mrb[18].mxu0  ;;  %v5106_v17 = vld [vmem:[%s5278_s9 + $0x5cc] ss:$52 sps:$4 sm:$0xff]   ;;  %v5108_v18 = vld [vmem:[%s5278_s9 + $0x294] ss:$52 sps:$4 sm:$0xff]  }
 0x11c   : > { %v4188_v35 = vpop.f32.mrb[19].mxu1  ;;  %v4100_v36 = vpop.f32.mrb[19].mxu0 }
 0x11d   : > { %v5724_v39 = vadd.f32 %v4186_v26, %v2317_v25  ;;  %v4189_v41 = vadd.f32 %v4188_v35, %v4187_v28  ;;  %v5726_v42 = vadd.f32 %v4100_v36, %v4099_v32  ;;  %v5110_v35 = vld [vmem:[%s5278_s9 + $0x5c8] ss:$52 sps:$4 sm:$0xff]   ;;  %v5111_v36 = vld [vmem:[%s5278_s9 + $0x290] ss:$52 sps:$4 sm:$0xff]  }
 0x11e   : > { %2886 = vmatmul.mubr.bf16.gmra.mrb[124].mxu1 %v5090_v22  ;;  %2983 = vmatmul.mubr.bf16.gmra.mrb[124].mxu0 %v5091_v24  ;;  %v2336_v22 = vadd.f32 %v5695_v63, %v5712_v16  ;;  %v2341_v63 = vadd.f32 %v5701_v8, %v5712_v16 }
 0x11f   : > { %v5728_v23 = vadd.f32 %v4189_v41, %v2320_v37  ;;  %2893 = vmatprep.mubr.bf16.mxu1 %v5092_v33  ;;  %2990 = vmatprep.mubr.bf16.mxu0 %v5094_v34 }
 0x121   : > { %v4190_v43 = vpop.f32.mrb[20].mxu1  ;;  %v4102_v44 = vpop.f32.mrb[20].mxu0 }
 0x122   : > { %v4191_v45 = vpop.f32.mrb[21].mxu1  ;;  %v4103_v46 = vpop.f32.mrb[21].mxu0 }
 0x123   : > { %v4192_v51 = vadd.f32 %v4191_v45, %v4190_v43  ;;  %v4193_v52 = vpop.f32.mrb[22].mxu1  ;;  %v5734_v53 = vadd.f32 %v4103_v46, %v4102_v44  ;;  %v4105_v54 = vpop.f32.mrb[22].mxu0  ;;  %v5114_v45 = vld [vmem:[%s5278_s9 + $0x634] ss:$52 sps:$4 sm:$0xff]   ;;  %v5116_v46 = vld [vmem:[%s5278_s9 + $0x2fc] ss:$52 sps:$4 sm:$0xff]  }
 0x124   : > { %v4194_v59 = vpop.f32.mrb[23].mxu1  ;;  %v4106_v60 = vpop.f32.mrb[23].mxu0 }
 0x125   : > { %v5740_v61 = vadd.f32 %v4192_v51, %v2325_v31  ;;  %v4195_v0 = vadd.f32 %v4194_v59, %v4193_v52  ;;  %v5742_v1 = vadd.f32 %v4106_v60, %v4105_v54  ;;  %v2344_v31 = vadd.f32 %v5707_v15, %v5712_v16 }
 0x126   : > { %2894 = vmatmul.mubr.bf16.gmra.mrb[128].mxu1 %v5096_v49  ;;  %2991 = vmatmul.mubr.bf16.gmra.mrb[128].mxu0 %v5097_v50  ;;  %v2349_v15 = vadd.f32 %v5718_v29, %v5712_v16 }
 0x127   : > { %v5744_v40 = vadd.f32 %v4195_v0, %v2328_v27  ;;  %2901 = vmatprep.mubr.bf16.mxu1 %v5100_v56  ;;  %2998 = vmatprep.mubr.bf16.mxu0 %v5102_v58  ;;  %v5118_v27 = vld [vmem:[%s5278_s9 + $0x630] ss:$52 sps:$4 sm:$0xff]   ;;  %v5119_v0 = vld [vmem:[%s5278_s9 + $0x2f8] ss:$52 sps:$4 sm:$0xff]  }
 0x129   : > { %v4196_v2 = vpop.f32.mrb[24].mxu1  ;;  %v4108_v3 = vpop.f32.mrb[24].mxu0 }
 0x12a   : > { %v4197_v4 = vpop.f32.mrb[25].mxu1  ;;  %v4109_v5 = vpop.f32.mrb[25].mxu0 }
 0x12b   : > { %v4198_v10 = vadd.f32 %v4197_v4, %v4196_v2  ;;  %v4199_v11 = vpop.f32.mrb[26].mxu1  ;;  %v5750_v12 = vadd.f32 %v4109_v5, %v4108_v3  ;;  %v4111_v13 = vpop.f32.mrb[26].mxu0 }
 0x12c   : > { %v4200_v19 = vpop.f32.mrb[27].mxu1  ;;  %v4112_v20 = vpop.f32.mrb[27].mxu0 }
 0x12d   : > { %v5756_v24 = vadd.f32 %v4198_v10, %v2333_v48  ;;  %v4201_v25 = vadd.f32 %v4200_v19, %v4199_v11  ;;  %v5758_v26 = vadd.f32 %v4112_v20, %v4111_v13  ;;  %v2352_v11 = vadd.f32 %v5726_v42, %v5712_v16 }
 0x12e   : > { %2902 = vmatmul.mubr.bf16.gmra.mrb[132].mxu1 %v5104_v7  ;;  %2999 = vmatmul.mubr.bf16.gmra.mrb[132].mxu0 %v5105_v9  ;;  %v5120_v7 = vld [vmem:[%s5278_s9 + $0x364] ss:$52 sps:$4 sm:$0xff]   ;;  %v5124_v9 = vld [vmem:[%s5278_s9 + $0x2c] ss:$52 sps:$4 sm:$0xff]   ;;  %v2357_v42 = vadd.f32 %v5734_v53, %v5712_v16 }
 0x12f   : > { %v5760_v57 = vadd.f32 %v4201_v25, %v2336_v22  ;;  %2909 = vmatprep.mubr.bf16.mxu1 %v5106_v17  ;;  %3006 = vmatprep.mubr.bf16.mxu0 %v5108_v18 }
 0x131   : > { %v4202_v28 = vpop.f32.mrb[28].mxu1  ;;  %v4114_v32 = vpop.f32.mrb[28].mxu0 }
 0x132   : > { %v4203_v33 = vpop.f32.mrb[29].mxu1  ;;  %v4115_v34 = vpop.f32.mrb[29].mxu0 }
 0x133   : > { %v4204_v37 = vadd.f32 %v4203_v33, %v4202_v28  ;;  %v4205_v41 = vpop.f32.mrb[30].mxu1  ;;  %v5766_v43 = vadd.f32 %v4115_v34, %v4114_v32  ;;  %v4117_v44 = vpop.f32.mrb[30].mxu0  ;;  %v5122_v28 = vld [vmem:[%s5278_s9 + $0x28] ss:$52 sps:$4 sm:$0xff]   ;;  %v5125_v32 = vld [vmem:[%s5278_s9 + $0x360] ss:$52 sps:$4 sm:$0xff]  }
 0x134   : > { %v4206_v49 = vpop.f32.mrb[31].mxu1  ;;  %v4118_v50 = vpop.f32.mrb[31].mxu0 }
 0x135   : > { %v5772_v51 = vadd.f32 %v4204_v37, %v2341_v63  ;;  %v4207_v52 = vadd.f32 %v4206_v49, %v4205_v41  ;;  %v5774_v54 = vadd.f32 %v4118_v50, %v4117_v44  ;;  %v5127_v63 = vld [vmem:[%s5278_s9 + $0x3cc] ss:$52 sps:$4 sm:$0xff]   ;;  %v5129_v37 = vld [vmem:[%s5278_s9 + $0x94] ss:$52 sps:$4 sm:$0xff]  }
 0x136   : > { %2910 = vmatmul.mubr.bf16.gmra.mrb[136].mxu1 %v5110_v35  ;;  %3007 = vmatmul.mubr.bf16.gmra.mrb[136].mxu0 %v5111_v36 }
 0x137   : > { %v5776_v8 = vadd.f32 %v4207_v52, %v2344_v31  ;;  %2917 = vmatprep.mubr.bf16.mxu1 %v5114_v45  ;;  %3014 = vmatprep.mubr.bf16.mxu0 %v5116_v46  ;;  %v2360_v45 = vadd.f32 %v5742_v1, %v5712_v16  ;;  %v2365_v1 = vadd.f32 %v5750_v12, %v5712_v16 }
 0x139   : > { %v4208_v56 = vpop.f32.mrb[32].mxu1  ;;  %v4120_v58 = vpop.f32.mrb[32].mxu0 }
 0x13a   : > { %v4209_v59 = vpop.f32.mrb[33].mxu1  ;;  %v4121_v60 = vpop.f32.mrb[33].mxu0 }
 0x13b   : > { %v4210_v2 = vadd.f32 %v4209_v59, %v4208_v56  ;;  %v4211_v3 = vpop.f32.mrb[34].mxu1  ;;  %v5782_v4 = vadd.f32 %v4121_v60, %v4120_v58  ;;  %v4123_v5 = vpop.f32.mrb[34].mxu0  ;;  %v5131_v59 = vld [vmem:[%s5278_s9 + $0x3c8] ss:$52 sps:$4 sm:$0xff]   ;;  %v5132_v60 = vld [vmem:[%s5278_s9 + $0x90] ss:$52 sps:$4 sm:$0xff]  }
 0x13c   : > { %v4212_v48 = vpop.f32.mrb[35].mxu1  ;;  %v4124_v10 = vpop.f32.mrb[35].mxu0 }
 0x13d   : > { %v5788_v13 = vadd.f32 %v4210_v2, %v2349_v15  ;;  %v4213_v17 = vadd.f32 %v4212_v48, %v4211_v3  ;;  %v5790_v18 = vadd.f32 %v4124_v10, %v4123_v5  ;;  %v5133_v3 = vld [vmem:[%s5278_s9 + $0x434] ss:$52 sps:$4 sm:$0xff]   ;;  %v5135_v5 = vld [vmem:[%s5278_s9 + $0xfc] ss:$52 sps:$4 sm:$0xff]   ;;  %v2368_v48 = vadd.f32 %v5758_v26, %v5712_v16 }
 0x13e   : > { %2918 = vmatmul.mubr.bf16.gmra.mrb[140].mxu1 %v5118_v27  ;;  %3015 = vmatmul.mubr.bf16.gmra.mrb[140].mxu0 %v5119_v0  ;;  %v2373_v26 = vadd.f32 %v5766_v43, %v5712_v16 }
 0x13f   : > { %v5792_v29 = vadd.f32 %v4213_v17, %v2352_v11  ;;  %3022 = vmatprep.mubr.bf16.mxu0 %v5120_v7  ;;  %3119 = vmatprep.mubr.bf16.mxu1 %v5124_v9 }
 0x141   : > { %v4214_v19 = vpop.f32.mrb[36].mxu1  ;;  %v4126_v20 = vpop.f32.mrb[36].mxu0 }
 0x142   : > { %v4215_v22 = vpop.f32.mrb[37].mxu1  ;;  %v4127_v25 = vpop.f32.mrb[37].mxu0 }
 0x143   : > { %v4216_v33 = vadd.f32 %v4215_v22, %v4214_v19  ;;  %v4217_v34 = vpop.f32.mrb[38].mxu1  ;;  %v5798_v35 = vadd.f32 %v4127_v25, %v4126_v20  ;;  %v4129_v36 = vpop.f32.mrb[38].mxu0 }
 0x144   : > { %v4218_v41 = vpop.f32.mrb[39].mxu1  ;;  %v4130_v44 = vpop.f32.mrb[39].mxu0 }
 0x145   : > { %v5804_v46 = vadd.f32 %v4216_v33, %v2357_v42  ;;  %v4219_v49 = vadd.f32 %v4218_v41, %v4217_v34  ;;  %v5806_v50 = vadd.f32 %v4130_v44, %v4129_v36 }
 0x146   : > { %3023 = vmatmul.mubr.bf16.gmra.mrb[144].mxu0 %v5125_v32  ;;  %3120 = vmatmul.mubr.bf16.vlgmr.msra.gmra.mrb[144].mxu1 %v5122_v28  ;;  %v5137_v28 = vld [vmem:[%s5278_s9 + $0x430] ss:$52 sps:$4 sm:$0xff]   ;;  %v5138_v32 = vld [vmem:[%s5278_s9 + $0xf8] ss:$52 sps:$4 sm:$0xff]  }
 0x147   : > { %v5808_v53 = vadd.f32 %v4219_v49, %v2360_v45  ;;  %3030 = vmatprep.mubr.bf16.mxu0 %v5127_v63  ;;  %3127 = vmatprep.mubr.bf16.mxu1 %v5129_v37  ;;  %v5139_v63 = vld [vmem:[%s5278_s9 + $0x49c] ss:$52 sps:$4 sm:$0xff]   ;;  %v5141_v37 = vld [vmem:[%s5278_s9 + $0x164] ss:$52 sps:$4 sm:$0xff]   ;;  %v2376_v45 = vadd.f32 %v5774_v54, %v5712_v16  ;;  %v2381_v54 = vadd.f32 %v5782_v4, %v5712_v16 }
 0x149   : > { %v4220_v31 = vpop.f32.mrb[40].mxu1  ;;  %v4132_v52 = vpop.f32.mrb[40].mxu0 }
 0x14a   : > { %v4221_v56 = vpop.f32.mrb[41].mxu1  ;;  %v4133_v58 = vpop.f32.mrb[41].mxu0 }
 0x14b   : > { %v4222_v27 = vadd.f32 %v4221_v56, %v4220_v31  ;;  %v4223_v0 = vpop.f32.mrb[42].mxu1  ;;  %v5814_v15 = vadd.f32 %v4133_v58, %v4132_v52  ;;  %v4135_v2 = vpop.f32.mrb[42].mxu0 }
 0x14c   : > { %v4224_v7 = vpop.f32.mrb[43].mxu1  ;;  %v4136_v9 = vpop.f32.mrb[43].mxu0 }
 0x14d   : > { %v5820_v10 = vadd.f32 %v4222_v27, %v2365_v1  ;;  %v4225_v11 = vadd.f32 %v4224_v7, %v4223_v0  ;;  %v5822_v17 = vadd.f32 %v4136_v9, %v4135_v2  ;;  %v5143_v1 = vld [vmem:[%s5278_s9 + $0x498] ss:$52 sps:$4 sm:$0xff]   ;;  %v5144_v27 = vld [vmem:[%s5278_s9 + $0x160] ss:$52 sps:$4 sm:$0xff]  }
 0x14e   : > { %3031 = vmatmul.mubr.bf16.gmra.mrb[148].mxu0 %v5131_v59  ;;  %3128 = vmatmul.mubr.bf16.gmra.mrb[148].mxu1 %v5132_v60  ;;  %v5145_v7 = vld [vmem:[%s5278_s9 + $0x504] ss:$52 sps:$4 sm:$0xff]   ;;  %v5147_v9 = vld [vmem:[%s5278_s9 + $0x1cc] ss:$52 sps:$4 sm:$0xff]  }
 0x14f   : > { %v5824_v12 = vadd.f32 %v4225_v11, %v2368_v48  ;;  %3038 = vmatprep.mubr.bf16.mxu0 %v5133_v3  ;;  %3135 = vmatprep.mubr.bf16.mxu1 %v5135_v5  ;;  %v2384_v48 = vadd.f32 %v5790_v18, %v5712_v16 }
 0x151   : > { %v4226_v19 = vpop.f32.mrb[44].mxu1  ;;  %v4138_v20 = vpop.f32.mrb[44].mxu0 }
 0x152   : > { %v4227_v22 = vpop.f32.mrb[45].mxu1  ;;  %v4139_v25 = vpop.f32.mrb[45].mxu0 }
 0x153   : > { %v4228_v42 = vadd.f32 %v4227_v22, %v4226_v19  ;;  %v4229_v33 = vpop.f32.mrb[46].mxu1  ;;  %v5830_v34 = vadd.f32 %v4139_v25, %v4138_v20  ;;  %v4141_v36 = vpop.f32.mrb[46].mxu0 }
 0x154   : > { %v4230_v41 = vpop.f32.mrb[47].mxu1  ;;  %v4142_v44 = vpop.f32.mrb[47].mxu0 }
 0x155   : > { %v5836_v49 = vadd.f32 %v4228_v42, %v2373_v26  ;;  %v4231_v31 = vadd.f32 %v4230_v41, %v4229_v33  ;;  %v5838_v52 = vadd.f32 %v4142_v44, %v4141_v36  ;;  %v5149_v36 = vld [vmem:[%s5278_s9 + $0x500] ss:$52 sps:$4 sm:$0xff]  }
 0x156   : > { %3039 = vmatmul.mubr.bf16.gmra.mrb[152].mxu0 %v5137_v28  ;;  %3136 = vmatmul.mubr.bf16.gmra.mrb[152].mxu1 %v5138_v32 }
 0x157   : > { %v5840_v43 = vadd.f32 %v4231_v31, %v2376_v45  ;;  %3046 = vmatprep.mubr.bf16.mxu0 %v5139_v63  ;;  %3143 = vmatprep.mubr.bf16.mxu1 %v5141_v37  ;;  %v2389_v63 = vadd.f32 %v5798_v35, %v5712_v16  ;;  %v5151_v31 = vld [vmem:[%s5278_s9 + $0x56c] ss:$52 sps:$4 sm:$0xff]  }
 0x159   : > { %v4232_v56 = vpop.f32.mrb[48].mxu1  ;;  %v4296_v58 = vpop.f32.mrb[48].mxu0 }
 0x15a   : > { %v4233_v59 = vpop.f32.mrb[49].mxu1  ;;  %v4297_v60 = vpop.f32.mrb[49].mxu0 }
 0x15b   : > { %v4234_v0 = vadd.f32 %v4233_v59, %v4232_v56  ;;  %v4298_v2 = vadd.f32 %v4297_v60, %v4296_v58  ;;  %v4235_v3 = vpop.f32.mrb[50].mxu1  ;;  %v4299_v5 = vpop.f32.mrb[50].mxu0  ;;  %v5153_v56 = vld [vmem:[%s5278_s9 + $0x234] ss:$52 sps:$4 sm:$0xff]  }
 0x15c   : > { %v4236_v11 = vpop.f32.mrb[51].mxu1  ;;  %v4300_v19 = vpop.f32.mrb[51].mxu0 }
 0x15d   : > { %v5850_v20 = vadd.f32 %v4234_v0, %v2381_v54  ;;  %v5853_v22 = vadd.f32 %v4298_v2, %v5724_v39  ;;  %v4237_v25 = vadd.f32 %v4236_v11, %v4235_v3  ;;  %v4301_v4 = vadd.f32 %v4300_v19, %v4299_v5  ;;  %v5150_v39 = vld [vmem:[%s5278_s9 + $0x1c8] ss:$52 sps:$4 sm:$0xff]  }
 0x15e   : > { %3047 = vmatmul.mubr.bf16.gmra.mrb[156].mxu0 %v5143_v1  ;;  %3144 = vmatmul.mubr.bf16.gmra.mrb[156].mxu1 %v5144_v27 }
 0x15f   : > { %v5855_v28 = vadd.f32 %v4237_v25, %v2384_v48  ;;  %v5858_v32 = vadd.f32 %v4301_v4, %v5728_v23  ;;  %3054 = vmatprep.mubr.bf16.mxu0 %v5145_v7  ;;  %3151 = vmatprep.mubr.bf16.mxu1 %v5147_v9  ;;  %v2392_v23 = vadd.f32 %v5806_v50, %v5712_v16  ;;  %v5155_v7 = vld [vmem:[%s5278_s9 + $0x568] ss:$52 sps:$4 sm:$0xff]  }
 0x160   : > { %v2397_v9 = vadd.f32 %v5814_v15, %v5712_v16  ;;  %v5157_v4 = vld [vmem:[%s5278_s9 + $0x5d4] ss:$52 sps:$4 sm:$0xff]  }
 0x161   : > { %v4238_v18 = vpop.f32.mrb[52].mxu1  ;;  %v4302_v26 = vpop.f32.mrb[52].mxu0 }
 0x162   : > { %v4239_v42 = vpop.f32.mrb[53].mxu1  ;;  %v4303_v33 = vpop.f32.mrb[53].mxu0 }
 0x163   : > { %v4240_v37 = vadd.f32 %v4239_v42, %v4238_v18  ;;  %v4304_v41 = vadd.f32 %v4303_v33, %v4302_v26  ;;  %v4241_v44 = vpop.f32.mrb[54].mxu1  ;;  %v4305_v45 = vpop.f32.mrb[54].mxu0  ;;  %v5159_v18 = vld [vmem:[%s5278_s9 + $0x29c] ss:$52 sps:$4 sm:$0xff]  }
 0x164   : > { %v4242_v58 = vpop.f32.mrb[55].mxu1  ;;  %v4306_v59 = vpop.f32.mrb[55].mxu0 }
 0x165   : > { %v5868_v60 = vadd.f32 %v4240_v37, %v2389_v63  ;;  %v5871_v1 = vadd.f32 %v4304_v41, %v5740_v61  ;;  %v4243_v27 = vadd.f32 %v4242_v58, %v4241_v44  ;;  %v4307_v35 = vadd.f32 %v4306_v59, %v4305_v45  ;;  %v5156_v61 = vld [vmem:[%s5278_s9 + $0x230] ss:$52 sps:$4 sm:$0xff]  }
 0x166   : > { %3055 = vmatmul.mubr.bf16.gmra.mrb[160].mxu0 %v5149_v36  ;;  %3152 = vmatmul.mubr.bf16.gmra.mrb[160].mxu1 %v5150_v39 }
 0x167   : > { %v5873_v54 = vadd.f32 %v4243_v27, %v2392_v23  ;;  %v5876_v0 = vadd.f32 %v4307_v35, %v5744_v40  ;;  %3062 = vmatprep.mubr.bf16.mxu0 %v5151_v31  ;;  %3159 = vmatprep.mubr.bf16.mxu1 %v5153_v56  ;;  %v2400_v40 = vadd.f32 %v5822_v17, %v5712_v16  ;;  %v5161_v31 = vld [vmem:[%s5278_s9 + $0x5d0] ss:$52 sps:$4 sm:$0xff]  }
 0x168   : > { %v2405_v56 = vadd.f32 %v5830_v34, %v5712_v16  ;;  %v5163_v35 = vld [vmem:[%s5278_s9 + $0x63c] ss:$52 sps:$4 sm:$0xff]  }
 0x169   : > { %v4244_v50 = vpop.f32.mrb[56].mxu1  ;;  %v4308_v2 = vpop.f32.mrb[56].mxu0 }
 0x16a   : > { %v4245_v3 = vpop.f32.mrb[57].mxu1  ;;  %v4309_v5 = vpop.f32.mrb[57].mxu0 }
 0x16b   : > { %v4246_v48 = vadd.f32 %v4245_v3, %v4244_v50  ;;  %v4310_v11 = vadd.f32 %v4309_v5, %v4308_v2  ;;  %v4247_v19 = vpop.f32.mrb[58].mxu1  ;;  %v4311_v25 = vpop.f32.mrb[58].mxu0  ;;  %v5165_v50 = vld [vmem:[%s5278_s9 + $0x304] ss:$52 sps:$4 sm:$0xff]  }
 0x16c   : > { %v4248_v26 = vpop.f32.mrb[59].mxu1  ;;  %v4312_v42 = vpop.f32.mrb[59].mxu0 }
 0x16d   : > { %v5886_v33 = vadd.f32 %v4246_v48, %v2397_v9  ;;  %v5889_v36 = vadd.f32 %v4310_v11, %v5756_v24  ;;  %v4249_v39 = vadd.f32 %v4248_v26, %v4247_v19  ;;  %v4313_v15 = vadd.f32 %v4312_v42, %v4311_v25  ;;  %v5162_v24 = vld [vmem:[%s5278_s9 + $0x298] ss:$52 sps:$4 sm:$0xff]  }
 0x16e   : > { %3063 = vmatmul.mubr.bf16.gmra.mrb[164].mxu0 %v5155_v7  ;;  %3160 = vmatmul.mubr.bf16.gmra.mrb[164].mxu1 %v5156_v61 }
 0x16f   : > { %v5891_v63 = vadd.f32 %v4249_v39, %v2400_v40  ;;  %v5894_v37 = vadd.f32 %v4313_v15, %v5760_v57  ;;  %3070 = vmatprep.mubr.bf16.mxu0 %v5157_v4  ;;  %3167 = vmatprep.mubr.bf16.mxu1 %v5159_v18  ;;  %v2408_v57 = vadd.f32 %v5838_v52, %v5712_v16  ;;  %v5167_v4 = vld [vmem:[%s5278_s9 + $0x638] ss:$52 sps:$4 sm:$0xff]  }
 0x170   : > { %v2413_v18 = vadd.f32 %v5659_v21, %v5712_v16  ;;  %v5169_v15 = vld [vmem:[%s5278_s9 + $0x36c] ss:$52 sps:$4 sm:$0xff]  }
 0x171   : > { %v4250_v17 = vpop.f32.mrb[60].mxu1  ;;  %v4314_v41 = vpop.f32.mrb[60].mxu0 }
 0x172   : > { %v4251_v44 = vpop.f32.mrb[61].mxu1  ;;  %v4315_v45 = vpop.f32.mrb[61].mxu0 }
 0x173   : > { %v4252_v23 = vadd.f32 %v4251_v44, %v4250_v17  ;;  %v4316_v58 = vadd.f32 %v4315_v45, %v4314_v41  ;;  %v4253_v59 = vpop.f32.mrb[62].mxu1  ;;  %v4317_v27 = vpop.f32.mrb[62].mxu0  ;;  %v5171_v17 = vld [vmem:[%s5278_s9 + $0x30] ss:$52 sps:$4 sm:$0xff]  }
 0x174   : > { %v4254_v2 = vpop.f32.mrb[63].mxu1  ;;  %v4318_v3 = vpop.f32.mrb[63].mxu0 }
 0x175   : > { %v5904_v5 = vadd.f32 %v4252_v23, %v2405_v56  ;;  %v5907_v7 = vadd.f32 %v4316_v58, %v5772_v51  ;;  %v4255_v61 = vadd.f32 %v4254_v2, %v4253_v59  ;;  %v4319_v34 = vadd.f32 %v4318_v3, %v4317_v27  ;;  %v5168_v51 = vld [vmem:[%s5278_s9 + $0x300] ss:$52 sps:$4 sm:$0xff]  }
 0x176   : > { %3071 = vmatmul.mubr.bf16.gmra.mrb[168].mxu0 %v5161_v31  ;;  %3168 = vmatmul.mubr.bf16.gmra.mrb[168].mxu1 %v5162_v24 }
 0x177   : > { %v5909_v9 = vadd.f32 %v4255_v61, %v2408_v57  ;;  %v5912_v48 = vadd.f32 %v4319_v34, %v5776_v8  ;;  %3078 = vmatprep.mubr.bf16.mxu0 %v5163_v35  ;;  %3175 = vmatprep.mubr.bf16.mxu1 %v5165_v50  ;;  %v2416_v8 = vadd.f32 %v5665_v30, %v5712_v16  ;;  %v5173_v35 = vld [vmem:[%s5278_s9 + $0x98] ss:$52 sps:$4 sm:$0xff]   ;;  %v5174_v34 = vld [vmem:[%s5278_s9 + $0x3d4] ss:$52 sps:$4 sm:$0xff]  }
 0x178   : > { %v2421_v50 = vadd.f32 %v5671_v38, %v5712_v16 }
 0x179   : > { %v4256_v52 = vpop.f32.mrb[64].mxu1  ;;  %v4320_v11 = vpop.f32.mrb[64].mxu0 }
 0x17a   : > { %v4257_v19 = vpop.f32.mrb[65].mxu1  ;;  %v4321_v25 = vpop.f32.mrb[65].mxu0 }
 0x17b   : > { %v4258_v40 = vadd.f32 %v4257_v19, %v4256_v52  ;;  %v4322_v26 = vadd.f32 %v4321_v25, %v4320_v11  ;;  %v4259_v42 = vpop.f32.mrb[66].mxu1  ;;  %v4323_v39 = vpop.f32.mrb[66].mxu0  ;;  %v5176_v52 = vld [vmem:[%s5278_s9 + $0x100] ss:$52 sps:$4 sm:$0xff]  }
 0x17c   : > { %v4260_v41 = vpop.f32.mrb[67].mxu1  ;;  %v4324_v44 = vpop.f32.mrb[67].mxu0 }
 0x17d   : > { %v5922_v45 = vadd.f32 %v4258_v40, %v2413_v18  ;;  %v5925_v31 = vadd.f32 %v4322_v26, %v5788_v13  ;;  %v4261_v21 = vadd.f32 %v4260_v41, %v4259_v42  ;;  %v4325_v24 = vadd.f32 %v4324_v44, %v4323_v39  ;;  %v5172_v13 = vld [vmem:[%s5278_s9 + $0x368] ss:$52 sps:$4 sm:$0xff]   ;;  %v5177_v39 = vld [vmem:[%s5278_s9 + $0x3d0] ss:$52 sps:$4 sm:$0xff]  }
 0x17e   : > { %3079 = vmatmul.mubr.bf16.gmra.mrb[172].mxu0 %v5167_v4  ;;  %3176 = vmatmul.mubr.bf16.gmra.mrb[172].mxu1 %v5168_v51 }
 0x17f   : > { %v5927_v56 = vadd.f32 %v4261_v21, %v2416_v8  ;;  %v5930_v30 = vadd.f32 %v4325_v24, %v5792_v29  ;;  %3183 = vmatprep.mubr.bf16.mxu1 %v5169_v15  ;;  %4750 = vmatprep.mubr.msk.bf16.mxu0 %vm2233_vm0, %v5171_v17  ;;  %v2424_v29 = vadd.f32 %v5680_v47, %v5712_v16  ;;  %v5178_v15 = vld [vmem:[%s5278_s9 + $0x168] ss:$52 sps:$4 sm:$0xff]  }
 0x180   : > { %v2429_v17 = vadd.f32 %v5687_v55, %v5712_v16  ;;  %v5179_v24 = vld [vmem:[%s5278_s9 + $0x43c] ss:$52 sps:$4 sm:$0xff]  }
 0x181   : > { %v4262_v23 = vpop.f32.mrb[68].mxu1  ;;  %v4326_v58 = vpop.f32.mrb[68].mxu0 }
 0x182   : > { %v4263_v59 = vpop.f32.mrb[69].mxu1  ;;  %v4327_v27 = vpop.f32.mrb[69].mxu0 }
 0x183   : > { %v4264_v57 = vadd.f32 %v4263_v59, %v4262_v23  ;;  %v4328_v2 = vadd.f32 %v4327_v27, %v4326_v58  ;;  %v4265_v3 = vpop.f32.mrb[70].mxu1  ;;  %v4329_v61 = vpop.f32.mrb[70].mxu0  ;;  %v5181_v23 = vld [vmem:[%s5278_s9 + $0x1d0] ss:$52 sps:$4 sm:$0xff]  }
 0x184   : > { %v4266_v11 = vpop.f32.mrb[71].mxu1  ;;  %v4330_v19 = vpop.f32.mrb[71].mxu0 }
 0x185   : > { %v5941_v25 = vadd.f32 %v4264_v57, %v2421_v50  ;;  %v5944_v4 = vadd.f32 %v4328_v2, %v5804_v46  ;;  %v4267_v51 = vadd.f32 %v4266_v11, %v4265_v3  ;;  %v4331_v38 = vadd.f32 %v4330_v19, %v4329_v61  ;;  %v5182_v61 = vld [vmem:[%s5278_s9 + $0x438] ss:$52 sps:$4 sm:$0xff]  }
 0x186   : > { %3184 = vmatmul.mubr.bf16.gmra.mrb[176].mxu1 %v5172_v13  ;;  %4751 = vmatmul.mubr.msk.bf16.vlgmr.msra.gmra.mrb[176].mxu0 %vm2233_vm0, %v5173_v35 }
 0x187   : > { %v5947_v18 = vadd.f32 %v4267_v51, %v2424_v29  ;;  %v5950_v47 = vadd.f32 %v4331_v38, %v5808_v53  ;;  %3191 = vmatprep.mubr.bf16.mxu1 %v5174_v34  ;;  %4754 = vmatprep.mubr.msk.bf16.mxu0 %vm2233_vm0, %v5176_v52  ;;  %v2432_v53 = vadd.f32 %v5693_v62, %v5712_v16  ;;  %v5183_v34 = vld [vmem:[%s5278_s9 + $0x238] ss:$52 sps:$4 sm:$0xff]  }
 0x188   : > { %v2437_v52 = vadd.f32 %v5699_v6, %v5712_v16  ;;  %v5184_v38 = vld [vmem:[%s5278_s9 + $0x4a4] ss:$52 sps:$4 sm:$0xff]  }
 0x189   : > { %v4268_v40 = vpop.f32.mrb[72].mxu1  ;;  %v4332_v26 = vpop.f32.mrb[72].mxu0 }
 0x18a   : > { %v4269_v42 = vpop.f32.mrb[73].mxu1  ;;  %v4333_v46 = vpop.f32.mrb[73].mxu0 }
 0x18b   : > { %v4270_v8 = vadd.f32 %v4269_v42, %v4268_v40  ;;  %v4334_v41 = vadd.f32 %v4333_v46, %v4332_v26  ;;  %v4271_v44 = vpop.f32.mrb[74].mxu1  ;;  %v4335_v21 = vpop.f32.mrb[74].mxu0  ;;  %v5186_v40 = vld [vmem:[%s5278_s9 + $0x2a0] ss:$52 sps:$4 sm:$0xff]  }
 0x18c   : > { %v4272_v58 = vpop.f32.mrb[75].mxu1  ;;  %v4336_v59 = vpop.f32.mrb[75].mxu0 }
 0x18d   : > { %v5961_v27 = vadd.f32 %v4270_v8, %v2429_v17  ;;  %v5964_v13 = vadd.f32 %v4334_v41, %v5820_v10  ;;  %v4273_v35 = vadd.f32 %v4272_v58, %v4271_v44  ;;  %v4337_v55 = vadd.f32 %v4336_v59, %v4335_v21  ;;  %v5187_v44 = vld [vmem:[%s5278_s9 + $0x4a0] ss:$52 sps:$4 sm:$0xff]   ;;  %v5188_v21 = vld [vmem:[%s5278_s9 + $0x308] ss:$52 sps:$4 sm:$0xff]  }
 0x18e   : > { %3192 = vmatmul.mubr.bf16.gmra.mrb[180].mxu1 %v5177_v39  ;;  %4755 = vmatmul.mubr.msk.bf16.gmra.mrb[180].mxu0 %vm2233_vm0, %v5178_v15  ;;  %v5189_v59 = vld [vmem:[%s5278_s9 + $0x50c] ss:$52 sps:$4 sm:$0xff]  }
 0x18f   : > { %v5967_v50 = vadd.f32 %v4273_v35, %v2432_v53  ;;  %v5970_v62 = vadd.f32 %v4337_v55, %v5824_v12  ;;  %3199 = vmatprep.mubr.bf16.mxu1 %v5179_v24  ;;  %4758 = vmatprep.mubr.msk.bf16.mxu0 %vm2233_vm0, %v5181_v23  ;;  %v2440_v12 = vadd.f32 %v5705_v14, %v5712_v16  ;;  %v5191_v35 = vld [vmem:[%s5278_s9 + $0x370] ss:$52 sps:$4 sm:$0xff]  }
 0x191   : > { %v4274_v57 = vpop.f32.mrb[76].mxu1  ;;  %v4338_v2 = vpop.f32.mrb[76].mxu0 }
 0x192   : > { %v4275_v3 = vpop.f32.mrb[77].mxu1  ;;  %v4339_v10 = vpop.f32.mrb[77].mxu0 }
 0x193   : > { %v4276_v29 = vadd.f32 %v4275_v3, %v4274_v57  ;;  %v4340_v11 = vadd.f32 %v4339_v10, %v4338_v2  ;;  %v4277_v19 = vpop.f32.mrb[78].mxu1  ;;  %v4341_v51 = vpop.f32.mrb[78].mxu0 }
 0x194   : > { %v4278_v26 = vpop.f32.mrb[79].mxu1  ;;  %v4342_v42 = vpop.f32.mrb[79].mxu0 }
 0x195   : > { %v5981_v46 = vadd.f32 %v4276_v29, %v2437_v52  ;;  %v5984_v39 = vadd.f32 %v4340_v11, %v5836_v49  ;;  %v4279_v15 = vadd.f32 %v4278_v26, %v4277_v19  ;;  %v4343_v6 = vadd.f32 %v4342_v42, %v4341_v51  ;;  %v5192_v11 = vld [vmem:[%s5278_s9 + $0x508] ss:$52 sps:$4 sm:$0xff]   ;;  %v5193_v19 = vld [vmem:[%s5278_s9 + $0x3d8] ss:$52 sps:$4 sm:$0xff]   ;;  %v5196_v42 = vld [vmem:[%s5278_s9 + $0x440] ss:$52 sps:$4 sm:$0xff]  }
 0x196   : > { %3200 = vmatmul.mubr.bf16.gmra.mrb[184].mxu1 %v5182_v61  ;;  %4759 = vmatmul.mubr.msk.bf16.gmra.mrb[184].mxu0 %vm2233_vm0, %v5183_v34  ;;  %v5194_v26 = vld [vmem:[%s5278_s9 + $0x574] ss:$52 sps:$4 sm:$0xff]  }
 0x197   : > { %v5987_v17 = vadd.f32 %v4279_v15, %v2440_v12  ;;  %v5990_v14 = vadd.f32 %v4343_v6, %v5840_v43  ;;  %3207 = vmatprep.mubr.bf16.mxu1 %v5184_v38  ;;  %4762 = vmatprep.mubr.msk.bf16.mxu0 %vm2233_vm0, %v5186_v40 }
 0x199   : > { %v4344_v16 = vpop.f32.mrb[80].mxu0  ;;  %v4408_v8 = vpop.f32.mrb[80].mxu1 }
 0x19a   : > { %v4345_v41 = vpop.f32.mrb[81].mxu0  ;;  %v4409_v49 = vpop.f32.mrb[81].mxu1 }
 0x19b   : > { %v4346_v24 = vadd.f32 %v4345_v41, %v4344_v16  ;;  %v4410_v23 = vadd.f32 %v4409_v49, %v4408_v8  ;;  %v4347_v53 = vpop.f32.mrb[82].mxu0  ;;  %v4411_v58 = vpop.f32.mrb[82].mxu1 }
 0x19c   : > { %v4348_v55 = vpop.f32.mrb[83].mxu0  ;;  %v4412_v57 = vpop.f32.mrb[83].mxu1 }
 0x19d   : > { %v5998_v43 = vadd.f32 %v4346_v24, %v5850_v20  ;;  %v6001_v2 = vadd.f32 %v4410_v23, %v5853_v22  ;;  %v4349_v3 = vadd.f32 %v4348_v55, %v4347_v53  ;;  %v4413_v10 = vadd.f32 %v4412_v57, %v4411_v58  ;;  %v5197_v24 = vld [vmem:[%s5278_s9 + $0x570] ss:$52 sps:$4 sm:$0xff]   ;;  %v5198_v23 = vld [vmem:[%s5278_s9 + $0x4a8] ss:$52 sps:$4 sm:$0xff]  }
 0x19e   : > { %3208 = vmatmul.mubr.bf16.gmra.mrb[188].mxu1 %v5187_v44  ;;  %4763 = vmatmul.mubr.msk.bf16.gmra.mrb[188].mxu0 %vm2233_vm0, %v5188_v21  ;;  %v5199_v55 = vld [vmem:[%s5278_s9 + $0x5dc] ss:$52 sps:$4 sm:$0xff]  }
 0x19f   : > { %v6005_v61 = vadd.f32 %v4349_v3, %v5855_v28  ;;  %v6008_v34 = vadd.f32 %v4413_v10, %v5858_v32  ;;  %3215 = vmatprep.mubr.bf16.mxu1 %v5189_v59  ;;  %4766 = vmatprep.mubr.msk.bf16.mxu0 %vm2233_vm0, %v5191_v35  ;;  %v5201_v57 = vld [vmem:[%s5278_s9 + $0x510] ss:$52 sps:$4 sm:$0xff]  }
 0x1a1   : > { %v4350_v20 = vpop.f32.mrb[84].mxu0  ;;  %v4414_v52 = vpop.f32.mrb[84].mxu1 }
 0x1a2   : > { %v4351_v22 = vpop.f32.mrb[85].mxu0  ;;  %v4415_v29 = vpop.f32.mrb[85].mxu1 }
 0x1a3   : > { %v4352_v51 = vadd.f32 %v4351_v22, %v4350_v20  ;;  %v4416_v38 = vadd.f32 %v4415_v29, %v4414_v52  ;;  %v4353_v40 = vpop.f32.mrb[86].mxu0  ;;  %v4417_v12 = vpop.f32.mrb[86].mxu1 }
 0x1a4   : > { %v4354_v28 = vpop.f32.mrb[87].mxu0  ;;  %v4418_v15 = vpop.f32.mrb[87].mxu1 }
 0x1a5   : > { %v6016_v32 = vadd.f32 %v4352_v51, %v5868_v60  ;;  %v6019_v6 = vadd.f32 %v4416_v38, %v5871_v1  ;;  %v4355_v16 = vadd.f32 %v4354_v28, %v4353_v40  ;;  %v4419_v8 = vadd.f32 %v4418_v15, %v4417_v12  ;;  %v5202_v51 = vld [vmem:[%s5278_s9 + $0x5d8] ss:$52 sps:$4 sm:$0xff]   ;;  %v5206_v15 = vld [vmem:[%s5278_s9 + $0x5e0] ss:$52 sps:$4 sm:$0xff]  }
 0x1a6   : > { %3216 = vmatmul.mubr.bf16.gmra.mrb[192].mxu1 %v5192_v11  ;;  %4767 = vmatmul.mubr.msk.bf16.gmra.mrb[192].mxu0 %vm2233_vm0, %v5193_v19  ;;  %v5203_v38 = vld [vmem:[%s5278_s9 + $0x578] ss:$52 sps:$4 sm:$0xff]  }
 0x1a7   : > { %v6023_v41 = vadd.f32 %v4355_v16, %v5873_v54  ;;  %v6026_v49 = vadd.f32 %v4419_v8, %v5876_v0  ;;  %3223 = vmatprep.mubr.bf16.mxu1 %v5194_v26  ;;  %4770 = vmatprep.mubr.msk.bf16.mxu0 %vm2233_vm0, %v5196_v42  ;;  %v5204_v28 = vld [vmem:[%s5278_s9 + $0x644] ss:$52 sps:$4 sm:$0xff]  }
 0x1a9   : > { %v4356_v60 = vpop.f32.mrb[88].mxu0  ;;  %v4420_v44 = vpop.f32.mrb[88].mxu1 }
 0x1aa   : > { %v4357_v1 = vpop.f32.mrb[89].mxu0  ;;  %v4421_v21 = vpop.f32.mrb[89].mxu1 }
 0x1ab   : > { %v4358_v53 = vadd.f32 %v4357_v1, %v4356_v60  ;;  %v4422_v58 = vadd.f32 %v4421_v21, %v4420_v44  ;;  %v4359_v59 = vpop.f32.mrb[90].mxu0  ;;  %v4423_v35 = vpop.f32.mrb[90].mxu1 }
 0x1ac   : > { %v4360_v54 = vpop.f32.mrb[91].mxu0  ;;  %v4424_v3 = vpop.f32.mrb[91].mxu1 }
 0x1ad   : > { %v6034_v0 = vadd.f32 %v4358_v53, %v5886_v33  ;;  %v6037_v10 = vadd.f32 %v4422_v58, %v5889_v36  ;;  %v4361_v20 = vadd.f32 %v4360_v54, %v4359_v59  ;;  %v4425_v52 = vadd.f32 %v4424_v3, %v4423_v35  ;;  %v5208_v58 = vld [vmem:[%s5278_s9 + $0x648] ss:$52 sps:$4 sm:$0xff]  }
 0x1ae   : > { %3224 = vmatmul.mubr.bf16.gmra.mrb[196].mxu1 %v5197_v24  ;;  %4771 = vmatmul.mubr.msk.bf16.gmra.mrb[196].mxu0 %vm2233_vm0, %v5198_v23 }
 0x1af   : > { %v6041_v22 = vadd.f32 %v4361_v20, %v5891_v63  ;;  %v6044_v29 = vadd.f32 %v4425_v52, %v5894_v37  ;;  %3231 = vmatprep.mubr.bf16.mxu1 %v5199_v55  ;;  %4774 = vmatprep.mubr.msk.bf16.mxu0 %vm2233_vm0, %v5201_v57 }
 0x1b1   : > { %v4362_v33 = vpop.f32.mrb[92].mxu0  ;;  %v4426_v11 = vpop.f32.mrb[92].mxu1 }
 0x1b2   : > { %v4363_v36 = vpop.f32.mrb[93].mxu0  ;;  %v4427_v19 = vpop.f32.mrb[93].mxu1 }
 0x1b3   : > { %v4364_v40 = vadd.f32 %v4363_v36, %v4362_v33  ;;  %v4428_v12 = vadd.f32 %v4427_v19, %v4426_v11  ;;  %v4365_v26 = vpop.f32.mrb[94].mxu0  ;;  %v4429_v42 = vpop.f32.mrb[94].mxu1 }
 0x1b4   : > { %v4366_v63 = vpop.f32.mrb[95].mxu0  ;;  %v4430_v16 = vpop.f32.mrb[95].mxu1 }
 0x1b5   : > { %v6052_v37 = vadd.f32 %v4364_v40, %v5904_v5  ;;  %v6055_v8 = vadd.f32 %v4428_v12, %v5907_v7  ;;  %v4367_v60 = vadd.f32 %v4366_v63, %v4365_v26  ;;  %v4431_v44 = vadd.f32 %v4430_v16, %v4429_v42  ;;  %v5207_v7 = vld [vmem:[%s5278_s9 + $0x640] ss:$52 sps:$4 sm:$0xff]   ;;  %s3666_s9 = sshll.u32 %s6436_s16, 2 }
 0x1b6   : > { %3232 = vmatmul.mubr.bf16.gmra.mrb[200].mxu1 %v5202_v51  ;;  %4775 = vmatmul.mubr.msk.bf16.gmra.mrb[200].mxu0 %vm2233_vm0, %v5203_v38  ;;  %s6315_s26 = scalar_lea.vmem %s6434_s3, %s3666_s9 }
 0x1b7   : > { %v6059_v1 = vadd.f32 %v4367_v60, %v5909_v9  ;;  %v6062_v21 = vadd.f32 %v4431_v44, %v5912_v48  ;;  %3239 = vmatprep.mubr.bf16.mxu1 %v5204_v28  ;;  %4778 = vmatprep.mubr.msk.bf16.mxu0 %vm2233_vm0, %v5206_v15 }
 0x1b9   : > { %v4368_v24 = vpop.f32.mrb[96].mxu0  ;;  %v4432_v5 = vpop.f32.mrb[96].mxu1 }
 0x1ba   : > { %v4369_v23 = vpop.f32.mrb[97].mxu0  ;;  %v4433_v53 = vpop.f32.mrb[97].mxu1 }
 0x1bb   : > { %v4370_v59 = vadd.f32 %v4369_v23, %v4368_v24  ;;  %v4434_v35 = vadd.f32 %v4433_v53, %v4432_v5  ;;  %v4371_v55 = vpop.f32.mrb[98].mxu0  ;;  %v4435_v57 = vpop.f32.mrb[98].mxu1 }
 0x1bc   : > { %v4372_v54 = vpop.f32.mrb[99].mxu0  ;;  %v4436_v3 = vpop.f32.mrb[99].mxu1 }
 0x1bd   : > { %v6068_v9 = vadd.f32 %v4370_v59, %v5922_v45  ;;  %v6071_v48 = vadd.f32 %v4434_v35, %v5925_v31  ;;  %v4373_v20 = vadd.f32 %v4372_v54, %v4371_v55  ;;  %v4437_v52 = vadd.f32 %v4436_v3, %v4435_v57 }
 0x1be   : > { %3240 = vmatmul.mubr.bf16.gmra.mrb[204].mxu1 %v5207_v7  ;;  %4779 = vmatmul.mubr.msk.bf16.gmra.mrb[204].mxu0 %vm2233_vm0, %v5208_v58 }
 0x1bf   : > { %v6075_v33 = vadd.f32 %v4373_v20, %v5927_v56  ;;  %v6078_v11 = vadd.f32 %v4437_v52, %v5930_v30 }
 0x1c1   : > { %v4374_v36 = vpop.f32.mrb[100].mxu0  ;;  %v4438_v19 = vpop.f32.mrb[100].mxu1 }
 0x1c2   : > { %v4375_v51 = vpop.f32.mrb[101].mxu0  ;;  %v4439_v38 = vpop.f32.mrb[101].mxu1 }
 0x1c3   : > { %v4376_v45 = vadd.f32 %v4375_v51, %v4374_v36  ;;  %v4440_v40 = vadd.f32 %v4439_v38, %v4438_v19  ;;  %v4377_v12 = vpop.f32.mrb[102].mxu0  ;;  %v4441_v31 = vpop.f32.mrb[102].mxu1 }
 0x1c4   : > { %v4378_v26 = vpop.f32.mrb[103].mxu0  ;;  %v4442_v42 = vpop.f32.mrb[103].mxu1 }
 0x1c5   : > { %v6081_v28 = vadd.f32 %v4376_v45, %v5941_v25  ;;  %v6084_v15 = vadd.f32 %v4440_v40, %v5944_v4  ;;  %v4379_v56 = vadd.f32 %v4378_v26, %v4377_v12  ;;  %v4443_v63 = vadd.f32 %v4442_v42, %v4441_v31 }
 0x1c7   : > { %v6087_v30 = vadd.f32 %v4379_v56, %v5947_v18  ;;  %v6090_v16 = vadd.f32 %v4443_v63, %v5950_v47 }
 0x1c9   : > { %v4380_v60 = vpop.f32.mrb[104].mxu0  ;;  %v4444_v44 = vpop.f32.mrb[104].mxu1 }
 0x1ca   : > { %v4381_v24 = vpop.f32.mrb[105].mxu0  ;;  %v4445_v5 = vpop.f32.mrb[105].mxu1 }
 0x1cb   : > { %v4382_v23 = vadd.f32 %v4381_v24, %v4380_v60  ;;  %v4446_v53 = vadd.f32 %v4445_v5, %v4444_v44  ;;  %v4383_v7 = vpop.f32.mrb[106].mxu0  ;;  %v4447_v25 = vpop.f32.mrb[106].mxu1 }
 0x1cc   : > { %v4384_v58 = vpop.f32.mrb[107].mxu0  ;;  %v4448_v59 = vpop.f32.mrb[107].mxu1 }
 0x1cd   : > { %v6093_v4 = vadd.f32 %v4382_v23, %v5961_v27  ;;  %v6096_v35 = vadd.f32 %v4446_v53, %v5964_v13  ;;  %v4385_v18 = vadd.f32 %v4384_v58, %v4383_v7  ;;  %v4449_v55 = vadd.f32 %v4448_v59, %v4447_v25 }
 0x1cf   : > { %v6099_v47 = vadd.f32 %v4385_v18, %v5967_v50  ;;  %v6102_v57 = vadd.f32 %v4449_v55, %v5970_v62 }
 0x1d1   : > { %v4386_v54 = vpop.f32.mrb[108].mxu0  ;;  %v4450_v3 = vpop.f32.mrb[108].mxu1 }
 0x1d2   : > { %v4387_v20 = vpop.f32.mrb[109].mxu0  ;;  %v4451_v52 = vpop.f32.mrb[109].mxu1 }
 0x1d3   : > { %v4388_v36 = vadd.f32 %v4387_v20, %v4386_v54  ;;  %v4452_v19 = vadd.f32 %v4451_v52, %v4450_v3  ;;  %v4389_v51 = vpop.f32.mrb[110].mxu0  ;;  %v4453_v27 = vpop.f32.mrb[110].mxu1 }
 0x1d4   : > { %v4390_v38 = vpop.f32.mrb[111].mxu0  ;;  %v4454_v45 = vpop.f32.mrb[111].mxu1 }
 0x1d5   : > { %v6105_v13 = vadd.f32 %v4388_v36, %v5981_v46  ;;  %v6108_v40 = vadd.f32 %v4452_v19, %v5984_v39  ;;  %v4391_v50 = vadd.f32 %v4390_v38, %v4389_v51  ;;  %v4455_v12 = vadd.f32 %v4454_v45, %v4453_v27 }
 0x1d7   : > { %v6111_v62 = vadd.f32 %v4391_v50, %v5987_v17  ;;  %v6114_v31 = vadd.f32 %v4455_v12, %v5990_v14 }
 0x1d9   : > { %v4456_v26 = vpop.f32.mrb[112].mxu1  ;;  %v4520_v42 = vpop.f32.mrb[112].mxu0 }
 0x1da   : > { %v4457_v56 = vpop.f32.mrb[113].mxu1  ;;  %v4521_v63 = vpop.f32.mrb[113].mxu0 }
 0x1db   : > { %v4458_v60 = vadd.f32 %v4457_v56, %v4456_v26  ;;  %v4522_v44 = vadd.f32 %v4521_v63, %v4520_v42  ;;  %v4459_v24 = vpop.f32.mrb[114].mxu1  ;;  %v4523_v46 = vpop.f32.mrb[114].mxu0 }
 0x1dc   : > { %v4460_v5 = vpop.f32.mrb[115].mxu1  ;;  %v4524_v23 = vpop.f32.mrb[115].mxu0 }
 0x1dd   : > { %v6117_v39 = vadd.f32 %v4458_v60, %v5998_v43  ;;  %v6120_v53 = vadd.f32 %v4522_v44, %v6001_v2  ;;  %v4461_v17 = vadd.f32 %v4460_v5, %v4459_v24  ;;  %v4525_v7 = vadd.f32 %v4524_v23, %v4523_v46 }
 0x1df   : > { %v6123_v14 = vadd.f32 %v4461_v17, %v6005_v61  ;;  %v6126_v25 = vadd.f32 %v4525_v7, %v6008_v34 }
 0x1e1   : > { %v4462_v58 = vpop.f32.mrb[116].mxu1  ;;  %v4526_v59 = vpop.f32.mrb[116].mxu0 }
 0x1e2   : > { %v4463_v18 = vpop.f32.mrb[117].mxu1  ;;  %v4527_v55 = vpop.f32.mrb[117].mxu0 }
 0x1e3   : > { %v4464_v54 = vadd.f32 %v4463_v18, %v4462_v58  ;;  %v4528_v3 = vadd.f32 %v4527_v55, %v4526_v59  ;;  %v4465_v20 = vpop.f32.mrb[118].mxu1  ;;  %v4529_v43 = vpop.f32.mrb[118].mxu0 }
 0x1e4   : > { %v4466_v52 = vpop.f32.mrb[119].mxu1  ;;  %v4530_v36 = vpop.f32.mrb[119].mxu0 }
 0x1e5   : > { %v6129_v2 = vadd.f32 %v4464_v54, %v6016_v32  ;;  %v6132_v19 = vadd.f32 %v4528_v3, %v6019_v6  ;;  %v4467_v61 = vadd.f32 %v4466_v52, %v4465_v20  ;;  %v4531_v51 = vadd.f32 %v4530_v36, %v4529_v43 }
 0x1e7   : > { %v6135_v34 = vadd.f32 %v4467_v61, %v6023_v41  ;;  %v6138_v27 = vadd.f32 %v4531_v51, %v6026_v49 }
 0x1e9   : > { %v4468_v38 = vpop.f32.mrb[120].mxu1  ;;  %v4532_v45 = vpop.f32.mrb[120].mxu0 }
 0x1ea   : > { %v4469_v50 = vpop.f32.mrb[121].mxu1  ;;  %v4533_v12 = vpop.f32.mrb[121].mxu0 }
 0x1eb   : > { %v4470_v26 = vadd.f32 %v4469_v50, %v4468_v38  ;;  %v4534_v42 = vadd.f32 %v4533_v12, %v4532_v45  ;;  %v4471_v56 = vpop.f32.mrb[122].mxu1  ;;  %v4535_v32 = vpop.f32.mrb[122].mxu0 }
 0x1ec   : > { %v4472_v63 = vpop.f32.mrb[123].mxu1  ;;  %v4536_v60 = vpop.f32.mrb[123].mxu0 }
 0x1ed   : > { %v6141_v6 = vadd.f32 %v4470_v26, %v6034_v0  ;;  %v6144_v44 = vadd.f32 %v4534_v42, %v6037_v10  ;;  %v4473_v41 = vadd.f32 %v4472_v63, %v4471_v56  ;;  %v4537_v24 = vadd.f32 %v4536_v60, %v4535_v32 }
 0x1ef   : > { %v6147_v49 = vadd.f32 %v4473_v41, %v6041_v22  ;;  %v6150_v46 = vadd.f32 %v4537_v24, %v6044_v29 }
 0x1f1   : > { %v4474_v5 = vpop.f32.mrb[124].mxu1  ;;  %v4538_v23 = vpop.f32.mrb[124].mxu0 }
 0x1f2   : > { %v4475_v17 = vpop.f32.mrb[125].mxu1  ;;  %v4539_v7 = vpop.f32.mrb[125].mxu0 }
 0x1f3   : > { %v4476_v58 = vadd.f32 %v4475_v17, %v4474_v5  ;;  %v4540_v59 = vadd.f32 %v4539_v7, %v4538_v23  ;;  %v4477_v18 = vpop.f32.mrb[126].mxu1  ;;  %v4541_v0 = vpop.f32.mrb[126].mxu0 }
 0x1f4   : > { %v4478_v55 = vpop.f32.mrb[127].mxu1  ;;  %v4542_v54 = vpop.f32.mrb[127].mxu0 }
 0x1f5   : > { %v6153_v10 = vadd.f32 %v4476_v58, %v6052_v37  ;;  %v6156_v3 = vadd.f32 %v4540_v59, %v6055_v8  ;;  %v4479_v22 = vadd.f32 %v4478_v55, %v4477_v18  ;;  %v4543_v20 = vadd.f32 %v4542_v54, %v4541_v0 }
 0x1f7   : > { %v6159_v29 = vadd.f32 %v4479_v22, %v6059_v1  ;;  %v6162_v43 = vadd.f32 %v4543_v20, %v6062_v21 }
 0x1f9   : > { %v4480_v52 = vpop.f32.mrb[128].mxu1  ;;  %v4544_v36 = vpop.f32.mrb[128].mxu0 }
 0x1fa   : > { %v4481_v61 = vpop.f32.mrb[129].mxu1  ;;  %v4545_v51 = vpop.f32.mrb[129].mxu0 }
 0x1fb   : > { %v4482_v38 = vadd.f32 %v4481_v61, %v4480_v52  ;;  %v4546_v45 = vadd.f32 %v4545_v51, %v4544_v36  ;;  %v4483_v50 = vpop.f32.mrb[130].mxu1  ;;  %v4547_v37 = vpop.f32.mrb[130].mxu0 }
 0x1fc   : > { %v4484_v12 = vpop.f32.mrb[131].mxu1  ;;  %v4548_v26 = vpop.f32.mrb[131].mxu0 }
 0x1fd   : > { %v6165_v8 = vadd.f32 %v4482_v38, %v6068_v9  ;;  %v6168_v42 = vadd.f32 %v4546_v45, %v6071_v48  ;;  %v4485_v1 = vadd.f32 %v4484_v12, %v4483_v50  ;;  %v4549_v56 = vadd.f32 %v4548_v26, %v4547_v37 }
 0x1ff   : > { %v6171_v21 = vadd.f32 %v4485_v1, %v6075_v33  ;;  %v6174_v32 = vadd.f32 %v4549_v56, %v6078_v11 }
 0x201   : > { %v4486_v63 = vpop.f32.mrb[132].mxu1  ;;  %v4550_v60 = vpop.f32.mrb[132].mxu0 }
 0x202   : > { %v4487_v41 = vpop.f32.mrb[133].mxu1  ;;  %v4551_v24 = vpop.f32.mrb[133].mxu0 }
 0x203   : > { %v4488_v5 = vadd.f32 %v4487_v41, %v4486_v63  ;;  %v4552_v23 = vadd.f32 %v4551_v24, %v4550_v60  ;;  %v4489_v17 = vpop.f32.mrb[134].mxu1  ;;  %v4553_v9 = vpop.f32.mrb[134].mxu0 }
 0x204   : > { %v4490_v7 = vpop.f32.mrb[135].mxu1  ;;  %v4554_v58 = vpop.f32.mrb[135].mxu0 }
 0x205   : > { %v6177_v48 = vadd.f32 %v4488_v5, %v6081_v28  ;;  %v6180_v59 = vadd.f32 %v4552_v23, %v6084_v15  ;;  %v4491_v33 = vadd.f32 %v4490_v7, %v4489_v17  ;;  %v4555_v18 = vadd.f32 %v4554_v58, %v4553_v9 }
 0x207   : > { %v6183_v11 = vadd.f32 %v4491_v33, %v6087_v30  ;;  %v6186_v0 = vadd.f32 %v4555_v18, %v6090_v16 }
 0x209   : > { %v4492_v55 = vpop.f32.mrb[136].mxu1  ;;  %v4556_v54 = vpop.f32.mrb[136].mxu0 }
 0x20a   : > { %v4493_v22 = vpop.f32.mrb[137].mxu1  ;;  %v4557_v20 = vpop.f32.mrb[137].mxu0 }
 0x20b   : > { %v4494_v52 = vadd.f32 %v4493_v22, %v4492_v55  ;;  %v4558_v36 = vadd.f32 %v4557_v20, %v4556_v54  ;;  %v4495_v61 = vpop.f32.mrb[138].mxu1  ;;  %v4559_v28 = vpop.f32.mrb[138].mxu0 }
 0x20c   : > { %v4496_v51 = vpop.f32.mrb[139].mxu1  ;;  %v4560_v38 = vpop.f32.mrb[139].mxu0 }
 0x20d   : > { %v6189_v15 = vadd.f32 %v4494_v52, %v6093_v4  ;;  %v6192_v45 = vadd.f32 %v4558_v36, %v6096_v35  ;;  %v4497_v30 = vadd.f32 %v4496_v51, %v4495_v61  ;;  %v4561_v50 = vadd.f32 %v4560_v38, %v4559_v28 }
 0x20f   : > { %v6195_v16 = vadd.f32 %v4497_v30, %v6099_v47  ;;  %v6198_v37 = vadd.f32 %v4561_v50, %v6102_v57 }
 0x211   : > { %v4498_v12 = vpop.f32.mrb[140].mxu1  ;;  %v4562_v26 = vpop.f32.mrb[140].mxu0 }
 0x212   : > { %v4499_v1 = vpop.f32.mrb[141].mxu1  ;;  %v4563_v56 = vpop.f32.mrb[141].mxu0 }
 0x213   : > { %v4500_v63 = vadd.f32 %v4499_v1, %v4498_v12  ;;  %v4564_v60 = vadd.f32 %v4563_v56, %v4562_v26  ;;  %v4501_v41 = vpop.f32.mrb[142].mxu1  ;;  %v4565_v4 = vpop.f32.mrb[142].mxu0 }
 0x214   : > { %v4502_v24 = vpop.f32.mrb[143].mxu1  ;;  %v4566_v5 = vpop.f32.mrb[143].mxu0 }
 0x215   : > { %v6201_v35 = vadd.f32 %v4500_v63, %v6105_v13  ;;  %v6204_v23 = vadd.f32 %v4564_v60, %v6108_v40  ;;  %v4503_v47 = vadd.f32 %v4502_v24, %v4501_v41  ;;  %v4567_v17 = vadd.f32 %v4566_v5, %v4565_v4 }
 0x217   : > { %v6207_v57 = vadd.f32 %v4503_v47, %v6111_v62  ;;  %v6210_v9 = vadd.f32 %v4567_v17, %v6114_v31 }
 0x219   : > { %v4568_v7 = vpop.f32.mrb[144].mxu0  ;;  %v4632_v58 = vpop.f32.mrb[144].mxu1 }
 0x21a   : > { %v4569_v33 = vpop.f32.mrb[145].mxu0  ;;  %v4633_v18 = vpop.f32.mrb[145].mxu1 }
 0x21b   : > { %v4570_v55 = vadd.f32 %v4569_v33, %v4568_v7  ;;  %v4634_v54 = vadd.f32 %v4633_v18, %v4632_v58  ;;  %v4571_v22 = vpop.f32.mrb[146].mxu0  ;;  %v4635_v13 = vpop.f32.mrb[146].mxu1 }
 0x21c   : > { %v4572_v20 = vpop.f32.mrb[147].mxu0  ;;  %v4636_v52 = vpop.f32.mrb[147].mxu1 }
 0x21d   : > { %v6213_v40 = vadd.f32 %v4570_v55, %v6117_v39  ;;  %v4573_v36 = vadd.f32 %v4572_v20, %v4571_v22  ;;  %v4637_v61 = vadd.f32 %v4636_v52, %v4635_v13  ;;  %v6216_v62 = vadd.f32 %v4634_v54, %v6120_v53 }
 0x21f   : > { %v6219_v31 = vadd.f32 %v4573_v36, %v6123_v14  ;;  %v6222_v28 = vadd.f32 %v4637_v61, %v6126_v25 }
 0x221   : > { %v4574_v51 = vpop.f32.mrb[148].mxu0  ;;  %v4638_v38 = vpop.f32.mrb[148].mxu1 }
 0x222   : > { %v4575_v30 = vpop.f32.mrb[149].mxu0  ;;  %v4639_v50 = vpop.f32.mrb[149].mxu1 }
 0x223   : > { %v4576_v12 = vadd.f32 %v4575_v30, %v4574_v51  ;;  %v4640_v26 = vadd.f32 %v4639_v50, %v4638_v38  ;;  %v4577_v1 = vpop.f32.mrb[150].mxu0  ;;  %v4641_v39 = vpop.f32.mrb[150].mxu1 }
 0x224   : > { %v4578_v56 = vpop.f32.mrb[151].mxu0  ;;  %v4642_v63 = vpop.f32.mrb[151].mxu1 }
 0x225   : > { %v6225_v60 = vadd.f32 %v4576_v12, %v6129_v2  ;;  %v4579_v53 = vadd.f32 %v4578_v56, %v4577_v1  ;;  %v4643_v41 = vadd.f32 %v4642_v63, %v4641_v39  ;;  %v6228_v14 = vadd.f32 %v4640_v26, %v6132_v19 }
 0x227   : > { %v6231_v25 = vadd.f32 %v4579_v53, %v6135_v34  ;;  %v6234_v4 = vadd.f32 %v4643_v41, %v6138_v27 }
 0x229   : > { %v4580_v24 = vpop.f32.mrb[152].mxu0  ;;  %v4644_v5 = vpop.f32.mrb[152].mxu1 }
 0x22a   : > { %v4581_v47 = vpop.f32.mrb[153].mxu0  ;;  %v4645_v17 = vpop.f32.mrb[153].mxu1 }
 0x22b   : > { %v4582_v7 = vadd.f32 %v4581_v47, %v4580_v24  ;;  %v4646_v58 = vadd.f32 %v4645_v17, %v4644_v5  ;;  %v4583_v33 = vpop.f32.mrb[154].mxu0  ;;  %v4647_v2 = vpop.f32.mrb[154].mxu1 }
 0x22c   : > { %v4584_v18 = vpop.f32.mrb[155].mxu0  ;;  %v4648_v55 = vpop.f32.mrb[155].mxu1 }
 0x22d   : > { %v6237_v54 = vadd.f32 %v4582_v7, %v6141_v6  ;;  %v4585_v19 = vadd.f32 %v4584_v18, %v4583_v33  ;;  %v4649_v22 = vadd.f32 %v4648_v55, %v4647_v2  ;;  %v6240_v34 = vadd.f32 %v4646_v58, %v6144_v44 }
 0x22f   : > { %v6243_v27 = vadd.f32 %v4585_v19, %v6147_v49  ;;  %v6246_v13 = vadd.f32 %v4649_v22, %v6150_v46 }
 0x231   : > { %v4586_v20 = vpop.f32.mrb[156].mxu0  ;;  %v4650_v52 = vpop.f32.mrb[156].mxu1 }
 0x232   : > { %v4587_v36 = vpop.f32.mrb[157].mxu0  ;;  %v4651_v61 = vpop.f32.mrb[157].mxu1 }
 0x233   : > { %v4588_v51 = vadd.f32 %v4587_v36, %v4586_v20  ;;  %v4652_v38 = vadd.f32 %v4651_v61, %v4650_v52  ;;  %v4589_v30 = vpop.f32.mrb[158].mxu0  ;;  %v4653_v6 = vpop.f32.mrb[158].mxu1 }
 0x234   : > { %v4590_v50 = vpop.f32.mrb[159].mxu0  ;;  %v4654_v12 = vpop.f32.mrb[159].mxu1 }
 0x235   : > { %v6249_v26 = vadd.f32 %v4588_v51, %v6153_v10  ;;  %v4591_v44 = vadd.f32 %v4590_v50, %v4589_v30  ;;  %v4655_v1 = vadd.f32 %v4654_v12, %v4653_v6  ;;  %v6252_v49 = vadd.f32 %v4652_v38, %v6156_v3 }
 0x237   : > { %v6255_v46 = vadd.f32 %v4591_v44, %v6159_v29  ;;  %v6258_v39 = vadd.f32 %v4655_v1, %v6162_v43 }
 0x239   : > { %v4592_v56 = vpop.f32.mrb[160].mxu0  ;;  %v4656_v63 = vpop.f32.mrb[160].mxu1 }
 0x23a   : > { %v4593_v53 = vpop.f32.mrb[161].mxu0  ;;  %v4657_v41 = vpop.f32.mrb[161].mxu1 }
 0x23b   : > { %v4594_v24 = vadd.f32 %v4593_v53, %v4592_v56  ;;  %v4658_v5 = vadd.f32 %v4657_v41, %v4656_v63  ;;  %v4595_v47 = vpop.f32.mrb[162].mxu0  ;;  %v4659_v10 = vpop.f32.mrb[162].mxu1 }
 0x23c   : > { %v4596_v17 = vpop.f32.mrb[163].mxu0  ;;  %v4660_v7 = vpop.f32.mrb[163].mxu1 }
 0x23d   : > { %v6261_v58 = vadd.f32 %v4594_v24, %v6165_v8  ;;  %v4597_v3 = vadd.f32 %v4596_v17, %v4595_v47  ;;  %v4661_v33 = vadd.f32 %v4660_v7, %v4659_v10  ;;  %v6264_v29 = vadd.f32 %v4658_v5, %v6168_v42 }
 0x23f   : > { %v6267_v43 = vadd.f32 %v4597_v3, %v6171_v21  ;;  %v6270_v2 = vadd.f32 %v4661_v33, %v6174_v32 }
 0x241   : > { %v4598_v18 = vpop.f32.mrb[164].mxu0  ;;  %v4662_v55 = vpop.f32.mrb[164].mxu1 }
 0x242   : > { %v4599_v19 = vpop.f32.mrb[165].mxu0  ;;  %v4663_v22 = vpop.f32.mrb[165].mxu1 }
 0x243   : > { %v4600_v20 = vadd.f32 %v4599_v19, %v4598_v18  ;;  %v4664_v52 = vadd.f32 %v4663_v22, %v4662_v55  ;;  %v4601_v36 = vpop.f32.mrb[166].mxu0  ;;  %v4665_v8 = vpop.f32.mrb[166].mxu1 }
 0x244   : > { %v4602_v61 = vpop.f32.mrb[167].mxu0  ;;  %v4666_v51 = vpop.f32.mrb[167].mxu1 }
 0x245   : > { %v6273_v38 = vadd.f32 %v4600_v20, %v6177_v48  ;;  %v4603_v42 = vadd.f32 %v4602_v61, %v4601_v36  ;;  %v4667_v30 = vadd.f32 %v4666_v51, %v4665_v8  ;;  %v6276_v21 = vadd.f32 %v4664_v52, %v6180_v59 }
 0x247   : > { %v6279_v32 = vadd.f32 %v4603_v42, %v6183_v11  ;;  %v6282_v6 = vadd.f32 %v4667_v30, %v6186_v0 }
 0x249   : > { %v4604_v50 = vpop.f32.mrb[168].mxu0  ;;  %v4668_v12 = vpop.f32.mrb[168].mxu1 }
 0x24a   : > { %v4605_v44 = vpop.f32.mrb[169].mxu0  ;;  %v4669_v1 = vpop.f32.mrb[169].mxu1 }
 0x24b   : > { %v4606_v56 = vadd.f32 %v4605_v44, %v4604_v50  ;;  %v4670_v63 = vadd.f32 %v4669_v1, %v4668_v12  ;;  %v4607_v53 = vpop.f32.mrb[170].mxu0  ;;  %v4671_v48 = vpop.f32.mrb[170].mxu1 }
 0x24c   : > { %v4608_v41 = vpop.f32.mrb[171].mxu0  ;;  %v4672_v24 = vpop.f32.mrb[171].mxu1 }
 0x24d   : > { %v6285_v5 = vadd.f32 %v4606_v56, %v6189_v15  ;;  %v4609_v59 = vadd.f32 %v4608_v41, %v4607_v53  ;;  %v4673_v47 = vadd.f32 %v4672_v24, %v4671_v48  ;;  %v6288_v11 = vadd.f32 %v4670_v63, %v6192_v45 }
 0x24f   : > { %v6291_v0 = vadd.f32 %v4609_v59, %v6195_v16  ;;  %v6294_v10 = vadd.f32 %v4673_v47, %v6198_v37 }
 0x251   : > { %v4610_v17 = vpop.f32.mrb[172].mxu0  ;;  %v4674_v7 = vpop.f32.mrb[172].mxu1 }
 0x252   : > { %v4611_v3 = vpop.f32.mrb[173].mxu0  ;;  %v4675_v33 = vpop.f32.mrb[173].mxu1 }
 0x253   : > { %v4612_v18 = vadd.f32 %v4611_v3, %v4610_v17  ;;  %v4676_v55 = vadd.f32 %v4675_v33, %v4674_v7  ;;  %v4613_v15 = vpop.f32.mrb[174].mxu0  ;;  %v4677_v19 = vpop.f32.mrb[174].mxu1 }
 0x254   : > { %v4614_v22 = vpop.f32.mrb[175].mxu0  ;;  %v4678_v20 = vpop.f32.mrb[175].mxu1 }
 0x255   : > { %v6297_v45 = vadd.f32 %v4612_v18, %v6201_v35  ;;  %v4615_v52 = vadd.f32 %v4614_v22, %v4613_v15  ;;  %v4679_v16 = vadd.f32 %v4678_v20, %v4677_v19  ;;  %v6300_v36 = vadd.f32 %v4676_v55, %v6204_v23 }
 0x257   : > { %v6303_v37 = vadd.f32 %v4615_v52, %v6207_v57  ;;  %v6306_v8 = vadd.f32 %v4679_v16, %v6210_v9 }
 0x259   : > { %v4680_v61 = vpop.f32.mrb[176].mxu1  ;;  %v4752_v51 = vpop.f32.mrb[176].mxu0 }
 0x25a   : > { %v3291_v42 = vadd.f32 %v4752_v51, %v6228_v14  ;;  %v4681_v30 = vpop.f32.mrb[177].mxu1  ;;  %v3282_v50 = vpop.f32.mrb[177].mxu0 }
 0x25b   : > { %v4682_v35 = vadd.f32 %v4681_v30, %v4680_v61  ;;  %v3283_v12 = vadd.f32 %v3282_v50, %v6216_v62  ;;  %v4683_v44 = vpop.f32.mrb[178].mxu1  ;;  %v4753_v1 = vpop.f32.mrb[178].mxu0 }
 0x25c   : > { %v3411_v23 = vmax.f32 %v3291_v42, 0.0  ;;  %v3294_v57 = vadd.f32 %v4753_v1, %v6234_v4  ;;  %v4684_v56 = vpop.f32.mrb[179].mxu1  ;;  %v3285_v63 = vpop.f32.mrb[179].mxu0 }
 0x25d   : > { %v3409_v9 = vmax.f32 %v3283_v12, 0.0  ;;  %v4685_v14 = vadd.f32 %v4684_v56, %v4683_v44  ;;  %v3286_v62 = vadd.f32 %v3285_v63, %v6222_v28  ;;  %v6319_v53 = vadd.f32 %v4682_v35, %v6213_v40 }
 0x25e   : > { %v4026_v48 = vpack.c.bf16 %v3411_v23, %v3411_v23  ;;  %v3412_v4 = vmax.f32 %v3294_v57, 0.0 }
 0x25f   : > { %v4024_v41 = vpack.c.bf16 %v3409_v9, %v3409_v9  ;;  %v3410_v24 = vmax.f32 %v3286_v62, 0.0  ;;  %v6322_v59 = vadd.f32 %v4685_v14, %v6219_v31 }
 0x260   : > { %3572 = vst.msk [vmem:[%s6315_s26 + $0x8] sm:$0xf] %vm3569_vm1, %v4026_v48  ;;  %v4027_v47 = vpack.c.bf16 %v3412_v4, %v3412_v4 }
 0x261   : > { %3570 = vst.msk [vmem:[%s6315_s26] sm:$0xf] %vm3569_vm1, %v4024_v41  ;;  %v4025_v17 = vpack.c.bf16 %v3410_v24, %v3410_v24  ;;  %v4686_v7 = vpop.f32.mrb[180].mxu1  ;;  %v4756_v3 = vpop.f32.mrb[180].mxu0 }
 0x262   : > { %3573 = vst.msk [vmem:[%s6315_s26 + $0xc] sm:$0xf] %vm3569_vm1, %v4027_v47  ;;  %v3307_v40 = vadd.f32 %v4756_v3, %v6252_v49  ;;  %v4687_v28 = vpop.f32.mrb[181].mxu1  ;;  %v3298_v33 = vpop.f32.mrb[181].mxu0 }
 0x263   : > { %3571 = vst.msk [vmem:[%s6315_s26 + $0x4] sm:$0xf] %vm3569_vm1, %v4025_v17  ;;  %v4688_v18 = vadd.f32 %v4687_v28, %v4686_v7  ;;  %v3299_v31 = vadd.f32 %v3298_v33, %v6240_v34  ;;  %v4689_v55 = vpop.f32.mrb[182].mxu1  ;;  %v4757_v15 = vpop.f32.mrb[182].mxu0 }
 0x264   : > { %v3415_v19 = vmax.f32 %v3307_v40, 0.0  ;;  %v3310_v22 = vadd.f32 %v4757_v15, %v6258_v39  ;;  %v4690_v20 = vpop.f32.mrb[183].mxu1  ;;  %v3301_v52 = vpop.f32.mrb[183].mxu0 }
 0x265   : > { %v3413_v16 = vmax.f32 %v3299_v31, 0.0  ;;  %v4691_v61 = vadd.f32 %v4690_v20, %v4689_v55  ;;  %v3302_v49 = vadd.f32 %v3301_v52, %v6246_v13  ;;  %v6337_v51 = vadd.f32 %v4688_v18, %v6225_v60 }
 0x266   : > { %v4030_v42 = vpack.c.bf16 %v3415_v19, %v3415_v19  ;;  %v3416_v34 = vmax.f32 %v3310_v22, 0.0 }
 0x267   : > { %v4028_v30 = vpack.c.bf16 %v3413_v16, %v3413_v16  ;;  %v3414_v50 = vmax.f32 %v3302_v49, 0.0  ;;  %v6340_v35 = vadd.f32 %v4691_v61, %v6231_v25 }
 0x268   : > { %3576 = vst.msk [vmem:[%s6315_s26 + $0x18] sm:$0xf] %vm3569_vm1, %v4030_v42  ;;  %v4031_v39 = vpack.c.bf16 %v3416_v34, %v3416_v34 }
 0x269   : > { %3574 = vst.msk [vmem:[%s6315_s26 + $0x10] sm:$0xf] %vm3569_vm1, %v4028_v30  ;;  %v4029_v12 = vpack.c.bf16 %v3414_v50, %v3414_v50  ;;  %v4692_v44 = vpop.f32.mrb[184].mxu1  ;;  %v4760_v1 = vpop.f32.mrb[184].mxu0 }
 0x26a   : > { %3577 = vst.msk [vmem:[%s6315_s26 + $0x1c] sm:$0xf] %vm3569_vm1, %v4031_v39  ;;  %v3323_v60 = vadd.f32 %v4760_v1, %v6276_v21  ;;  %v4693_v13 = vpop.f32.mrb[185].mxu1  ;;  %v3314_v23 = vpop.f32.mrb[185].mxu0 }
 0x26b   : > { %3575 = vst.msk [vmem:[%s6315_s26 + $0x14] sm:$0xf] %vm3569_vm1, %v4029_v12  ;;  %v4694_v57 = vadd.f32 %v4693_v13, %v4692_v44  ;;  %v3315_v25 = vadd.f32 %v3314_v23, %v6264_v29  ;;  %v4695_v56 = vpop.f32.mrb[186].mxu1  ;;  %v4761_v63 = vpop.f32.mrb[186].mxu0 }
 0x26c   : > { %v3419_v9 = vmax.f32 %v3323_v60, 0.0  ;;  %v3326_v14 = vadd.f32 %v4761_v63, %v6282_v6  ;;  %v4696_v62 = vpop.f32.mrb[187].mxu1  ;;  %v3317_v48 = vpop.f32.mrb[187].mxu0 }
 0x26d   : > { %v3417_v4 = vmax.f32 %v3315_v25, 0.0  ;;  %v4697_v41 = vadd.f32 %v4696_v62, %v4695_v56  ;;  %v3318_v21 = vadd.f32 %v3317_v48, %v6270_v2  ;;  %v6355_v24 = vadd.f32 %v4694_v57, %v6237_v54 }
 0x26e   : > { %v4034_v47 = vpack.c.bf16 %v3419_v9, %v3419_v9  ;;  %v3420_v29 = vmax.f32 %v3326_v14, 0.0 }
 0x26f   : > { %v4032_v17 = vpack.c.bf16 %v3417_v4, %v3417_v4  ;;  %v3418_v7 = vmax.f32 %v3318_v21, 0.0  ;;  %v6358_v3 = vadd.f32 %v4697_v41, %v6243_v27 }
 0x270   : > { %3580 = vst.msk [vmem:[%s6315_s26 + $0x28] sm:$0xf] %vm3569_vm1, %v4034_v47  ;;  %v4035_v6 = vpack.c.bf16 %v3420_v29, %v3420_v29 }
 0x271   : > { %3578 = vst.msk [vmem:[%s6315_s26 + $0x20] sm:$0xf] %vm3569_vm1, %v4032_v17  ;;  %v4033_v40 = vpack.c.bf16 %v3418_v7, %v3418_v7  ;;  %v4698_v28 = vpop.f32.mrb[188].mxu1  ;;  %v4764_v33 = vpop.f32.mrb[188].mxu0 }
 0x272   : > { %3581 = vst.msk [vmem:[%s6315_s26 + $0x2c] sm:$0xf] %vm3569_vm1, %v4035_v6  ;;  %v3339_v54 = vadd.f32 %v4764_v33, %v6300_v36  ;;  %v4699_v2 = vpop.f32.mrb[189].mxu1  ;;  %v3330_v18 = vpop.f32.mrb[189].mxu0 }
 0x273   : > { %3579 = vst.msk [vmem:[%s6315_s26 + $0x24] sm:$0xf] %vm3569_vm1, %v4033_v40  ;;  %v4700_v31 = vadd.f32 %v4699_v2, %v4698_v28  ;;  %v3331_v27 = vadd.f32 %v3330_v18, %v6288_v11  ;;  %v4701_v55 = vpop.f32.mrb[190].mxu1  ;;  %v4765_v15 = vpop.f32.mrb[190].mxu0 }
 0x274   : > { %v3423_v19 = vmax.f32 %v3339_v54, 0.0  ;;  %v3342_v22 = vadd.f32 %v4765_v15, %v6306_v8  ;;  %v4702_v20 = vpop.f32.mrb[191].mxu1  ;;  %v3333_v52 = vpop.f32.mrb[191].mxu0 }
 0x275   : > { %v3421_v16 = vmax.f32 %v3331_v27, 0.0  ;;  %v4703_v61 = vadd.f32 %v4702_v20, %v4701_v55  ;;  %v3334_v36 = vadd.f32 %v3333_v52, %v6294_v10  ;;  %v3210_v49 = vadd.f32 %v4700_v31, %v6249_v26 }
 0x276   : > { %v4038_v42 = vpack.c.bf16 %v3423_v19, %v3423_v19  ;;  %v3424_v34 = vmax.f32 %v3342_v22, 0.0 }
 0x277   : > { %v4036_v11 = vpack.c.bf16 %v3421_v16, %v3421_v16  ;;  %v3422_v30 = vmax.f32 %v3334_v36, 0.0  ;;  %v3213_v50 = vadd.f32 %v4703_v61, %v6255_v46 }
 0x278   : > { %3584 = vst.msk [vmem:[%s6315_s26 + $0x38] sm:$0xf] %vm3569_vm1, %v4038_v42  ;;  %v4039_v39 = vpack.c.bf16 %v3424_v34, %v3424_v34 }
 0x279   : > { %3582 = vst.msk [vmem:[%s6315_s26 + $0x30] sm:$0xf] %vm3569_vm1, %v4036_v11  ;;  %v4037_v8 = vpack.c.bf16 %v3422_v30, %v3422_v30  ;;  %v4704_v12 = vpop.f32.mrb[192].mxu1  ;;  %v4768_v44 = vpop.f32.mrb[192].mxu0 }
 0x27a   : > { %3585 = vst.msk [vmem:[%s6315_s26 + $0x3c] sm:$0xf] %vm3569_vm1, %v4039_v39  ;;  %v3355_v10 = vadd.f32 %v4768_v44, %v6337_v51  ;;  %v4705_v26 = vpop.f32.mrb[193].mxu1  ;;  %v3346_v1 = vpop.f32.mrb[193].mxu0 }
 0x27b   : > { %3583 = vst.msk [vmem:[%s6315_s26 + $0x34] sm:$0xf] %vm3569_vm1, %v4037_v8  ;;  %v4706_v60 = vadd.f32 %v4705_v26, %v4704_v12  ;;  %v3347_v13 = vadd.f32 %v3346_v1, %v6319_v53  ;;  %v4707_v46 = vpop.f32.mrb[194].mxu1  ;;  %v4769_v23 = vpop.f32.mrb[194].mxu0 }
 0x27c   : > { %v3427_v57 = vmax.f32 %v3355_v10, 0.0  ;;  %v3358_v25 = vadd.f32 %v4769_v23, %v6340_v35  ;;  %v4708_v56 = vpop.f32.mrb[195].mxu1  ;;  %v3349_v63 = vpop.f32.mrb[195].mxu0 }
 0x27d   : > { %v3425_v9 = vmax.f32 %v3347_v13, 0.0  ;;  %v4709_v14 = vadd.f32 %v4708_v56, %v4707_v46  ;;  %v3350_v51 = vadd.f32 %v3349_v63, %v6322_v59  ;;  %v3218_v62 = vadd.f32 %v4706_v60, %v6261_v58 }
 0x27e   : > { %v4042_v48 = vpack.c.bf16 %v3427_v57, %v3427_v57  ;;  %v3428_v4 = vmax.f32 %v3358_v25, 0.0 }
 0x27f   : > { %v4040_v53 = vpack.c.bf16 %v3425_v9, %v3425_v9  ;;  %v3426_v41 = vmax.f32 %v3350_v51, 0.0  ;;  %v3221_v21 = vadd.f32 %v4709_v14, %v6267_v43 }
 0x280   : > { %3588 = vst.msk [vmem:[%s6315_s26 + $0x48] sm:$0xf] %vm3569_vm1, %v4042_v48  ;;  %v4043_v47 = vpack.c.bf16 %v3428_v4, %v3428_v4 }
 0x281   : > { %3586 = vst.msk [vmem:[%s6315_s26 + $0x40] sm:$0xf] %vm3569_vm1, %v4040_v53  ;;  %v4041_v35 = vpack.c.bf16 %v3426_v41, %v3426_v41  ;;  %v4710_v29 = vpop.f32.mrb[196].mxu1  ;;  %v4772_v17 = vpop.f32.mrb[196].mxu0 }
 0x282   : > { %3589 = vst.msk [vmem:[%s6315_s26 + $0x4c] sm:$0xf] %vm3569_vm1, %v4043_v47  ;;  %v3371_v59 = vadd.f32 %v4772_v17, %v3210_v49  ;;  %v4711_v7 = vpop.f32.mrb[197].mxu1  ;;  %v3362_v58 = vpop.f32.mrb[197].mxu0 }
 0x283   : > { %3587 = vst.msk [vmem:[%s6315_s26 + $0x44] sm:$0xf] %vm3569_vm1, %v4041_v35  ;;  %v4712_v6 = vadd.f32 %v4711_v7, %v4710_v29  ;;  %v3363_v40 = vadd.f32 %v3362_v58, %v6355_v24  ;;  %v4713_v43 = vpop.f32.mrb[198].mxu1  ;;  %v4773_v28 = vpop.f32.mrb[198].mxu0 }
 0x284   : > { %v3431_v33 = vmax.f32 %v3371_v59, 0.0  ;;  %v3374_v54 = vadd.f32 %v4773_v28, %v3213_v50  ;;  %v4714_v2 = vpop.f32.mrb[199].mxu1  ;;  %v3365_v18 = vpop.f32.mrb[199].mxu0 }
 0x285   : > { %v3429_v31 = vmax.f32 %v3363_v40, 0.0  ;;  %v4715_v27 = vadd.f32 %v4714_v2, %v4713_v43  ;;  %v3366_v55 = vadd.f32 %v3365_v18, %v6358_v3  ;;  %v3226_v15 = vadd.f32 %v4712_v6, %v6273_v38 }
 0x286   : > { %v4046_v19 = vpack.c.bf16 %v3431_v33, %v3431_v33  ;;  %v3432_v22 = vmax.f32 %v3374_v54, 0.0 }
 0x287   : > { %v4044_v20 = vpack.c.bf16 %v3429_v31, %v3429_v31  ;;  %v3430_v24 = vmax.f32 %v3366_v55, 0.0  ;;  %v3229_v52 = vadd.f32 %v4715_v27, %v6279_v32 }
 0x288   : > { %3592 = vst.msk [vmem:[%s6315_s26 + $0x58] sm:$0xf] %vm3569_vm1, %v4046_v19  ;;  %v4047_v16 = vpack.c.bf16 %v3432_v22, %v3432_v22 }
 0x289   : > { %3590 = vst.msk [vmem:[%s6315_s26 + $0x50] sm:$0xf] %vm3569_vm1, %v4044_v20  ;;  %v4045_v61 = vpack.c.bf16 %v3430_v24, %v3430_v24  ;;  %v4716_v36 = vpop.f32.mrb[200].mxu1  ;;  %v4776_v49 = vpop.f32.mrb[200].mxu0 }
 0x28a   : > { %3593 = vst.msk [vmem:[%s6315_s26 + $0x5c] sm:$0xf] %vm3569_vm1, %v4047_v16  ;;  %v3387_v3 = vadd.f32 %v4776_v49, %v3226_v15  ;;  %v4717_v42 = vpop.f32.mrb[201].mxu1  ;;  %v3378_v38 = vpop.f32.mrb[201].mxu0 }
 0x28b   : > { %3591 = vst.msk [vmem:[%s6315_s26 + $0x54] sm:$0xf] %vm3569_vm1, %v4045_v61  ;;  %v4718_v34 = vadd.f32 %v4717_v42, %v4716_v36  ;;  %v3379_v11 = vadd.f32 %v3378_v38, %v3218_v62  ;;  %v4719_v30 = vpop.f32.mrb[202].mxu1  ;;  %v4777_v32 = vpop.f32.mrb[202].mxu0 }
 0x28c   : > { %v3435_v50 = vmax.f32 %v3387_v3, 0.0  ;;  %v3390_v39 = vadd.f32 %v4777_v32, %v3229_v52  ;;  %v4720_v8 = vpop.f32.mrb[203].mxu1  ;;  %v3381_v12 = vpop.f32.mrb[203].mxu0 }
 0x28d   : > { %v3433_v44 = vmax.f32 %v3379_v11, 0.0  ;;  %v4721_v10 = vadd.f32 %v4720_v8, %v4719_v30  ;;  %v3382_v26 = vadd.f32 %v3381_v12, %v3221_v21  ;;  %v3234_v1 = vadd.f32 %v4718_v34, %v6285_v5 }
 0x28e   : > { %v4050_v60 = vpack.c.bf16 %v3435_v50, %v3435_v50  ;;  %v3436_v13 = vmax.f32 %v3390_v39, 0.0 }
 0x28f   : > { %v4048_v46 = vpack.c.bf16 %v3433_v44, %v3433_v44  ;;  %v3434_v23 = vmax.f32 %v3382_v26, 0.0  ;;  %v3237_v57 = vadd.f32 %v4721_v10, %v6291_v0 }
 0x290   : > { %3596 = vst.msk [vmem:[%s6315_s26 + $0x68] sm:$0xf] %vm3569_vm1, %v4050_v60  ;;  %v4051_v25 = vpack.c.bf16 %v3436_v13, %v3436_v13 }
 0x291   : > { %3594 = vst.msk [vmem:[%s6315_s26 + $0x60] sm:$0xf] %vm3569_vm1, %v4048_v46  ;;  %v4049_v56 = vpack.c.bf16 %v3434_v23, %v3434_v23  ;;  %v4722_v63 = vpop.f32.mrb[204].mxu1  ;;  %v4780_v9 = vpop.f32.mrb[204].mxu0 }
 0x292   : > { %3597 = vst.msk [vmem:[%s6315_s26 + $0x6c] sm:$0xf] %vm3569_vm1, %v4051_v25  ;;  %v4723_v14 = vpop.f32.mrb[205].mxu1  ;;  %v3394_v51 = vpop.f32.mrb[205].mxu0 }
 0x293   : > { %3595 = vst.msk [vmem:[%s6315_s26 + $0x64] sm:$0xf] %vm3569_vm1, %v4049_v56  ;;  %v4724_v5 = vadd.f32 %v4723_v14, %v4722_v63  ;;  %v3395_v62 = vadd.f32 %v3394_v51, %v3234_v1  ;;  %v4725_v48 = vpop.f32.mrb[206].mxu1  ;;  %v4781_v4 = vpop.f32.mrb[206].mxu0 }
 0x294   : > { %v4726_v0 = vpop.f32.mrb[207].mxu1  ;;  %v3397_v53 = vpop.f32.mrb[207].mxu0 }
 0x295   : > { %v3242_v41 = vadd.f32 %v4724_v5, %v6297_v45  ;;  %v3437_v21 = vmax.f32 %v3395_v62, 0.0  ;;  %v4727_v47 = vadd.f32 %v4726_v0, %v4725_v48  ;;  %v3398_v35 = vadd.f32 %v3397_v53, %v3237_v57 }
 0x297   : > { %v3403_v29 = vadd.f32 %v4780_v9, %v3242_v41  ;;  %v4052_v17 = vpack.c.bf16 %v3437_v21, %v3437_v21  ;;  %v3245_v59 = vadd.f32 %v4727_v47, %v6303_v37  ;;  %v3438_v7 = vmax.f32 %v3398_v35, 0.0 }
 0x299   : > { %v3439_v58 = vmax.f32 %v3403_v29, 0.0  ;;  %3598 = vst.msk [vmem:[%s6315_s26 + $0x70] sm:$0xf] %vm3569_vm1, %v4052_v17  ;;  %v3406_v6 = vadd.f32 %v4781_v4, %v3245_v59  ;;  %v4053_v40 = vpack.c.bf16 %v3438_v7, %v3438_v7 }
 0x29b   : > { %v4054_v43 = vpack.c.bf16 %v3439_v58, %v3439_v58  ;;  %v3440_v28 = vmax.f32 %v3406_v6, 0.0  ;;  %3599 = vst.msk [vmem:[%s6315_s26 + $0x74] sm:$0xf] %vm3569_vm1, %v4053_v40 }
 0x29d   : > { %3600 = vst.msk [vmem:[%s6315_s26 + $0x78] sm:$0xf] %vm3569_vm1, %v4054_v43  ;;  %v4055_v45 = vpack.c.bf16 %v3440_v28, %v3440_v28 }
 0x29f   : > { %3601 = vst.msk [vmem:[%s6315_s26 + $0x7c] sm:$0xf] %vm3569_vm1, %v4055_v45 }
 0x2a0 PF: > { %s13_s12 = sadd.s32 1, %s5215_s12  }
 0x2a1   : > { %p10_p4 = scmp.ge.s32.totalorder %s13_s12, 4  }
 0x2a3   :  { %12 = sbr.rel (!%p10_p4) target bundleno = 1 (0x1), region = 62 }

// kernel: model_cnn_forward.39
= control target key start
LH: loop header
LB: loop body
LE: loop exit
PB: predicated region body
PF: predicated region fallthrough
CT: control target
= control target key end

     0   :  { %s6043_s24 = smov 0   ;;  %s7346_s0 = inlined_call_operand.vmem [shape: bf16[512,1568], index: 0, kind: input, shape index: {}]   ;;  %s7347_s1 = inlined_call_operand.vmem [shape: bf16[1568,32], index: 1, kind: input, shape index: {}]   ;;  %s7348_s2 = inlined_call_operand.vmem [shape: f32[1,32], index: 2, kind: input, shape index: {}]   ;;  %s7349_s3 = inlined_call_operand.vmem [shape: bf16[32,32], index: 3, kind: input, shape index: {}]   ;;  %s7350_s4 = inlined_call_operand.vmem [shape: f32[1,32], index: 4, kind: input, shape index: {}]   ;;  %s7351_s5 = inlined_call_operand.vmem [shape: bf16[32,12], index: 5, kind: input, shape index: {}]   ;;  %s7352_s6 = inlined_call_operand.vmem [shape: f32[1,12], index: 6, kind: input, shape index: {}]   ;;  %s7353_s7 = inlined_call_operand.vmem [shape: bf16[512,12], index: 7, kind: output, shape index: {}]  }
   0x1 LB: > { %s4294_s25 = sadd.s32 4294967295, %s6001_s24   ;;  %p4298_p0 = scmp.ge.s32.totalorder %s6001_s24, 1  ;;  %s6001_s24 = sphi %s6043_s24, %s17_s24  }
   0x2   : > { %p239_p1 = scmp.lt.s32.totalorder %s6001_s24, 3 }
   0x4   : > { %p240_p2 = pnand %p4298_p0, %p239_p1 }
   0x5   : > { %v5589_v0 = vld [vmem:[%s7347_s1 + $0x40] sm:$0xff] (!%p240_p2)   ;;  %s4299_s28 = sshll.u32 (!%p240_p2), %s4294_s25, 5  ;;  %v5591_v2 = vld [vmem:[%s7347_s1 + $0x48] sm:$0xff] (!%p240_p2)   ;;  %v5593_v4 = vld [vmem:[%s7347_s1 + $0x50] sm:$0xff] (!%p240_p2)   ;;  %vm2341_vm0 = vcmask (!%p240_p2), 261120   ;;  %vm4205_vm1 = vcmask (!%p240_p2), 93184  }
   0x6   : > { %243 = sbr.rel (%p240_p2) target bundleno = 1113 (0x459), region = 48  ;;  %v5590_v1 = vld [vmem:[%s7347_s1] sm:$0xff] (!%p240_p2)   ;;  %4730 = vmatprep.subr.bf16.mxu0 (!%p240_p2), %v5589_v0  ;;  %5564 = vmatprep.subr.bf16.mxu1 (!%p240_p2), %v5589_v0  ;;  %p273_p3 = scmp.lt.s32.totalorder (!%p240_p2), %s4299_s28, 63  ;;  %v5592_v3 = vld [vmem:[%s7347_s1 + $0x8] sm:$0xff] (!%p240_p2)   ;;  %v5594_v5 = vld [vmem:[%s7347_s1 + $0x10] sm:$0xff] (!%p240_p2)  }
   0x7   : > { %4731 = vmatpush3.bf16.msra.mxu0 (!%p240_p2), %v5590_v1  ;;  %5572 = vmatpush3.bf16.msra.mxu1 (!%p240_p2), %v5590_v1  ;;  %v5595_v6 = vld [vmem:[%s7347_s1 + $0x58] sm:$0xff] (!%p240_p2)   ;;  %v5597_v8 = vld [vmem:[%s7347_s1 + $0x60] sm:$0xff] (!%p240_p2)   ;;  %v5599_v10 = vld [vmem:[%s7347_s1 + $0x68] sm:$0xff] (!%p240_p2)  }
   0x8   : > { %4732 = vmatprep.subr.bf16.mxu0 (!%p240_p2), %v5591_v2  ;;  %5565 = vmatprep.subr.bf16.mxu1 (!%p240_p2), %v5591_v2  ;;  %v5596_v7 = vld [vmem:[%s7347_s1 + $0x18] sm:$0xff] (!%p240_p2)   ;;  %v5598_v9 = vld [vmem:[%s7347_s1 + $0x20] sm:$0xff] (!%p240_p2)   ;;  %v5600_v13 = vld [vmem:[%s7347_s1 + $0x28] sm:$0xff] (!%p240_p2)  }
   0x9   : > { %v5601_v14 = vld [vmem:[%s7347_s1 + $0x70] sm:$0xff] (!%p240_p2)   ;;  %v5603_v16 = vld [vmem:[%s7347_s1 + $0x78] sm:$0xff] (!%p240_p2)   ;;  %v5611_v18 = vld [vmem:[%s7347_s1 + $0xc0] sm:$0xff] (!%p240_p2)  }
   0xa   : > { %v5602_v15 = vld [vmem:[%s7347_s1 + $0x30] sm:$0xff] (!%p240_p2)   ;;  %v5604_v17 = vld [vmem:[%s7347_s1 + $0x38] sm:$0xff] (!%p240_p2)   ;;  %v5613_v21 = vld [vmem:[%s7347_s1 + $0x140] sm:$0xff] (!%p240_p2)  }
   0xb   : > { %4733 = vmatpush3.bf16.msra.mxu0 (!%p240_p2), %v5592_v3  ;;  %5573 = vmatpush3.bf16.msra.mxu1 (!%p240_p2), %v5592_v3  ;;  %v5612_v22 = vld [vmem:[%s7347_s1 + $0x80] sm:$0xff] (!%p240_p2)   ;;  %v5614_v23 = vld [vmem:[%s7347_s1 + $0xc8] sm:$0xff] (!%p240_p2)   ;;  %v5623_v29 = vld [vmem:[%s7347_s1 + $0xd0] sm:$0xff] (!%p240_p2)  }
   0xc   : > { %4734 = vmatprep.subr.bf16.mxu0 (!%p240_p2), %v5593_v4  ;;  %5566 = vmatprep.subr.bf16.mxu1 (!%p240_p2), %v5593_v4  ;;  %v5615_v24 = vld [vmem:[%s7347_s1 + $0x100] sm:$0xff] (!%p240_p2)   ;;  %v5616_v27 = vld [vmem:[%s7347_s1 + $0x88] sm:$0xff] (!%p240_p2)   ;;  %v5624_v33 = vld [vmem:[%s7347_s1 + $0x90] sm:$0xff] (!%p240_p2)  }
   0xd   : > { %s7355_s28 = smov (!%p273_p3, %s4299_s28), 63  ;;  %v5631_v28 = vld [vmem:[%s7347_s1 + $0x148] sm:$0xff]   ;;  %v5625_v34 = vld [vmem:[%s7347_s1 + $0xd8] sm:$0xff]   ;;  %v5634_v40 = vld [vmem:[%s7347_s1 + $0xe0] sm:$0xff]  }
   0xe   : > { %s5580_s18 = smul.u32 52, %s7355_s28  ;;  %v5635_v32 = vld [vmem:[%s7347_s1 + $0x108] sm:$0xff]   ;;  %v5626_v37 = vld [vmem:[%s7347_s1 + $0x98] sm:$0xff]   ;;  %v5636_v41 = vld [vmem:[%s7347_s1 + $0xa0] sm:$0xff]   ;;  %s4302_s16 = sshll.u32 %s7355_s28, 2 }
   0xf   : > { %4735 = vmatpush3.bf16.msra.mxu0 %v5594_v5  ;;  %5574 = vmatpush3.bf16.msra.mxu1 %v5594_v5  ;;  %v5647_v42 = vld [vmem:[%s7347_s1 + $0x150] sm:$0xff]   ;;  %v5637_v43 = vld [vmem:[%s7347_s1 + $0xe8] sm:$0xff]   ;;  %v5648_v53 = vld [vmem:[%s7347_s1 + $0xf8] sm:$0xff]   ;;  %s7246_s19 = scalar_lea.vmem %s7353_s7, %s4302_s16 }
  0x10   : > { %4736 = vmatprep.subr.bf16.mxu0 %v5595_v6  ;;  %5567 = vmatprep.subr.bf16.mxu1 %v5595_v6  ;;  %s6084_s26 = scalar_lea.vmem %s7346_s0, %s5580_s18  ;;  %v5649_v45 = vld [vmem:[%s7347_s1 + $0x110] sm:$0xff]   ;;  %v5638_v47 = vld [vmem:[%s7347_s1 + $0xa8] sm:$0xff]   ;;  %v5663_v55 = vld [vmem:[%s7347_s1 + $0x158] sm:$0xff]  }
  0x11   : > { %v5607_v11 = vld [vmem:[%s6084_s26 + $0x4] ss:$52 sps:$4 sm:$0xff]   ;;  %v5605_v19 = vld [vmem:[%s6084_s26] ss:$52 sps:$4 sm:$0xff]   ;;  %v5621_v30 = vld [vmem:[%s6084_s26 + $0x68] ss:$52 sps:$4 sm:$0xff]  }
  0x12   : > { %v5610_v12 = vld [vmem:[%s6084_s26 + $0x4e4] ss:$52 sps:$4 sm:$0xff]   ;;  %2422 = vmatprep.mubr.bf16.mxu0 %v5607_v11  ;;  %v5608_v20 = vld [vmem:[%s6084_s26 + $0x4e0] ss:$52 sps:$4 sm:$0xff]   ;;  %v5622_v31 = vld [vmem:[%s6084_s26 + $0x548] ss:$52 sps:$4 sm:$0xff]  }
  0x13   : > { %4737 = vmatpush3.bf16.msra.mxu0 %v5596_v7  ;;  %5575 = vmatpush3.bf16.msra.mxu1 %v5596_v7  ;;  %v5617_v25 = vld [vmem:[%s6084_s26 + $0x6c] ss:$52 sps:$4 sm:$0xff]   ;;  %v5627_v35 = vld [vmem:[%s6084_s26 + $0xd4] ss:$52 sps:$4 sm:$0xff]   ;;  %v5632_v38 = vld [vmem:[%s6084_s26 + $0xd0] ss:$52 sps:$4 sm:$0xff]  }
  0x14   : > { %4738 = vmatprep.subr.bf16.mxu0 %v5597_v8  ;;  %5568 = vmatprep.subr.bf16.mxu1 %v5597_v8  ;;  %v5619_v26 = vld [vmem:[%s6084_s26 + $0x54c] ss:$52 sps:$4 sm:$0xff]   ;;  %v5629_v36 = vld [vmem:[%s6084_s26 + $0x5b4] ss:$52 sps:$4 sm:$0xff]   ;;  %v5633_v39 = vld [vmem:[%s6084_s26 + $0x5b0] ss:$52 sps:$4 sm:$0xff]  }
  0x15   : > { %2518 = vmatprep.mubr.bf16.mxu1 %v5610_v12  ;;  %v5639_v44 = vld [vmem:[%s6084_s26 + $0x13c] ss:$52 sps:$4 sm:$0xff]   ;;  %v5643_v48 = vld [vmem:[%s6084_s26 + $0x138] ss:$52 sps:$4 sm:$0xff]   ;;  %v5656_v59 = vld [vmem:[%s6084_s26 + $0x1a0] ss:$52 sps:$4 sm:$0xff]  }
  0x16   : > { %v5641_v46 = vld [vmem:[%s6084_s26 + $0x61c] ss:$52 sps:$4 sm:$0xff]   ;;  %v5644_v50 = vld [vmem:[%s6084_s26 + $0x618] ss:$52 sps:$4 sm:$0xff]   ;;  %v5657_v60 = vld [vmem:[%s7347_s1 + $0x1c0] sm:$0xff]  }
  0x17   : > { %4739 = vmatpush3.bf16.msra.mxu0 %v5598_v9  ;;  %5576 = vmatpush3.bf16.msra.mxu1 %v5598_v9  ;;  %v5645_v49 = vld [vmem:[%s7347_s1 + $0xf0] sm:$0xff]   ;;  %v5651_v52 = vld [vmem:[%s6084_s26 + $0x1a4] ss:$52 sps:$4 sm:$0xff]   ;;  %v5655_v54 = vld [vmem:[%s6084_s26 + $0xc] ss:$52 sps:$4 sm:$0xff]  }
  0x18   : > { %4740 = vmatprep.subr.bf16.mxu0 %v5599_v10  ;;  %5569 = vmatprep.subr.bf16.mxu1 %v5599_v10  ;;  %v5646_v51 = vld [vmem:[%s7347_s1 + $0xb0] sm:$0xff]   ;;  %v5666_v56 = vld [vmem:[%s7347_s1 + $0x118] sm:$0xff]   ;;  %v5658_v61 = vld [vmem:[%s7347_s1 + $0x180] sm:$0xff]  }
  0x19   : > { %v5650_v57 = vld [vmem:[%s7347_s1 + $0xb8] sm:$0xff]   ;;  %v5659_v62 = vld [vmem:[%s6084_s26 + $0x20c] ss:$52 sps:$4 sm:$0xff]   ;;  %v5661_v63 = vld [vmem:[%s6084_s26 + $0x74] ss:$52 sps:$4 sm:$0xff]  }
  0x1a   : > { %v5653_v58 = vld [vmem:[%s6084_s26 + $0x8] ss:$52 sps:$4 sm:$0xff]   ;;  %v5675_v0 = vld [vmem:[%s7347_s1 + $0x160] sm:$0xff]   ;;  %v5691_v10 = vld [vmem:[%s7347_s1 + $0x1d0] sm:$0xff]  }
  0x1b   : > { %4741 = vmatpush3.bf16.msra.mxu0 %v5600_v13  ;;  %5577 = vmatpush3.bf16.msra.mxu1 %v5600_v13  ;;  %v5673_v1 = vld [vmem:[%s7347_s1 + $0x1c8] sm:$0xff]   ;;  %v5676_v2 = vld [vmem:[%s7347_s1 + $0x120] sm:$0xff]   ;;  %v5669_v7 = vld [vmem:[%s6084_s26 + $0xdc] ss:$52 sps:$4 sm:$0xff]  }
  0x1c   : > { %4742 = vmatprep.subr.bf16.mxu0 %v5601_v14  ;;  %5570 = vmatprep.subr.bf16.mxu1 %v5601_v14  ;;  %v5674_v3 = vld [vmem:[%s7347_s1 + $0x188] sm:$0xff]   ;;  %v5665_v5 = vld [vmem:[%s6084_s26 + $0x70] ss:$52 sps:$4 sm:$0xff]  }
  0x1d   : > { %v5664_v4 = vld [vmem:[%s6084_s26 + $0x208] ss:$52 sps:$4 sm:$0xff]   ;;  %v5692_v11 = vld [vmem:[%s7347_s1 + $0x190] sm:$0xff]   ;;  %v5672_v13 = vld [vmem:[%s6084_s26 + $0xd8] ss:$52 sps:$4 sm:$0xff]  }
  0x1e   : > { %v5667_v6 = vld [vmem:[%s6084_s26 + $0x274] ss:$52 sps:$4 sm:$0xff]   ;;  %v5671_v12 = vld [vmem:[%s6084_s26 + $0x270] ss:$52 sps:$4 sm:$0xff]  }
  0x1f   : > { %4743 = vmatpush3.bf16.msra.mxu0 %v5602_v15  ;;  %5578 = vmatpush3.bf16.msra.mxu1 %v5602_v15  ;;  %v5687_v8 = vld [vmem:[%s7347_s1 + $0x168] sm:$0xff]   ;;  %v5677_v14 = vld [vmem:[%s6084_s26 + $0x2dc] ss:$52 sps:$4 sm:$0xff]  }
  0x20   : > { %4744 = vmatprep.subr.bf16.mxu0 %v5603_v16  ;;  %5571 = vmatprep.subr.bf16.mxu1 %v5603_v16  ;;  %v5690_v9 = vld [vmem:[%s7347_s1 + $0x128] sm:$0xff]   ;;  %v5699_v15 = vld [vmem:[%s7347_s1 + $0x170] sm:$0xff]  }
  0x21   : > { %v5700_v16 = vld [vmem:[%s7347_s1 + $0x130] sm:$0xff]  }
  0x23   : > { %4745 = vmatpush3.bf16.msra.mxu0 %v5604_v17  ;;  %5579 = vmatpush3.bf16.msra.mxu1 %v5604_v17  ;;  %v5679_v17 = vld [vmem:[%s6084_s26 + $0x144] ss:$52 sps:$4 sm:$0xff]  }
  0x24   : > { %4842 = vmatprep.subr.bf16.mxu1 %v5611_v18  ;;  %4954 = vmatprep.subr.bf16.mxu0 %v5613_v21  ;;  %v5707_v18 = vld [vmem:[%s7347_s1 + $0x1d8] sm:$0xff]   ;;  %v5682_v21 = vld [vmem:[%s6084_s26 + $0x140] ss:$52 sps:$4 sm:$0xff]  }
  0x26   : > { %2423 = vmatmul.mubr.bf16.vlgmr.msra.gmra.mrb[0].mxu0 %v5605_v19  ;;  %2519 = vmatmul.mubr.bf16.vlgmr.msra.gmra.mrb[0].mxu1 %v5608_v20  ;;  %v5708_v19 = vld [vmem:[%s7347_s1 + $0x198] sm:$0xff]  }
  0x27   : > { %4843 = vmatpush3.bf16.msra.mxu1 %v5612_v22  ;;  %4955 = vmatpush3.bf16.msra.mxu0 %v5615_v24  ;;  %v5681_v20 = vld [vmem:[%s6084_s26 + $0x2d8] ss:$52 sps:$4 sm:$0xff]  }
  0x28   : > { %4844 = vmatprep.subr.bf16.mxu1 %v5614_v23  ;;  %2430 = vmatprep.mubr.bf16.mxu0 %v5617_v25  ;;  %v5683_v22 = vld [vmem:[%s6084_s26 + $0x344] ss:$52 sps:$4 sm:$0xff]   ;;  %v5685_v23 = vld [vmem:[%s6084_s26 + $0x1ac] ss:$52 sps:$4 sm:$0xff]  }
  0x29   : > { %2526 = vmatprep.mubr.bf16.mxu1 %v5619_v26  ;;  %4956 = vmatprep.subr.bf16.mxu0 %v5631_v28  ;;  %v5713_v24 = vld [vmem:[%s7347_s1 + $0x178] sm:$0xff]   ;;  %v5723_v26 = vld [vmem:[%s7347_s1 + $0x1e0] sm:$0xff]  }
  0x2a   : > { %v5716_v25 = vld [vmem:[%s7347_s1 + $0x138] sm:$0xff]  }
  0x2b   : > { %4845 = vmatpush3.bf16.msra.mxu1 %v5616_v27  ;;  %4957 = vmatpush3.bf16.msra.mxu0 %v5635_v32  ;;  %v5688_v27 = vld [vmem:[%s6084_s26 + $0x340] ss:$52 sps:$4 sm:$0xff]   ;;  %v5689_v28 = vld [vmem:[%s6084_s26 + $0x1a8] ss:$52 sps:$4 sm:$0xff]  }
  0x2c   : > { %4846 = vmatprep.subr.bf16.mxu1 %v5623_v29  ;;  %4958 = vmatprep.subr.bf16.mxu0 %v5647_v42  ;;  %v5724_v29 = vld [vmem:[%s7347_s1 + $0x1a0] sm:$0xff]   ;;  %v5695_v32 = vld [vmem:[%s6084_s26 + $0x214] ss:$52 sps:$4 sm:$0xff]  }
  0x2d   : > { %v5711_v42 = vld [vmem:[%s6084_s26 + $0x2e4] ss:$52 sps:$4 sm:$0xff]  }
  0x2e   : > { %2431 = vmatmul.mubr.bf16.gmra.mrb[4].mxu0 %v5621_v30  ;;  %2527 = vmatmul.mubr.bf16.gmra.mrb[4].mxu1 %v5622_v31  ;;  %v5725_v30 = vld [vmem:[%s7347_s1 + $0x240] sm:$0xff]  }
  0x2f   : > { %4847 = vmatpush3.bf16.msra.mxu1 %v5624_v33  ;;  %2438 = vmatprep.mubr.bf16.mxu0 %v5627_v35  ;;  %v5693_v31 = vld [vmem:[%s6084_s26 + $0x3ac] ss:$52 sps:$4 sm:$0xff]   ;;  %v5697_v33 = vld [vmem:[%s6084_s26 + $0x3a8] ss:$52 sps:$4 sm:$0xff]  }
  0x30   : > { %4848 = vmatprep.subr.bf16.mxu1 %v5625_v34  ;;  %2534 = vmatprep.mubr.bf16.mxu1 %v5629_v36  ;;  %v5698_v34 = vld [vmem:[%s6084_s26 + $0x210] ss:$52 sps:$4 sm:$0xff]   ;;  %v5739_v35 = vld [vmem:[%s7347_s1 + $0x1e8] sm:$0xff]  }
  0x31   : > { %4959 = vmatpush3.bf16.msra.mxu0 %v5649_v45  ;;  %v5740_v36 = vld [vmem:[%s7347_s1 + $0x1a8] sm:$0xff]  }
  0x32   : > { %4960 = vmatprep.subr.bf16.mxu0 %v5663_v55  ;;  %v5714_v45 = vld [vmem:[%s6084_s26 + $0x478] ss:$52 sps:$4 sm:$0xff]   ;;  %v5729_v55 = vld [vmem:[%s6084_s26 + $0x7c] ss:$52 sps:$4 sm:$0xff]  }
  0x33   : > { %4849 = vmatpush3.bf16.msra.mxu1 %v5626_v37  ;;  %v5701_v37 = vld [vmem:[%s6084_s26 + $0x414] ss:$52 sps:$4 sm:$0xff]  }
  0x34   : > { %4850 = vmatprep.subr.bf16.mxu1 %v5634_v40  ;;  %v5706_v40 = vld [vmem:[%s6084_s26 + $0x278] ss:$52 sps:$4 sm:$0xff]  }
  0x35   : > { %4961 = vmatpush3.bf16.msra.mxu0 %v5666_v56  ;;  %v5741_v56 = vld [vmem:[%s7347_s1 + $0x248] sm:$0xff]  }
  0x36   : > { %2439 = vmatmul.mubr.bf16.gmra.mrb[8].mxu0 %v5632_v38  ;;  %2535 = vmatmul.mubr.bf16.gmra.mrb[8].mxu1 %v5633_v39  ;;  %v5703_v38 = vld [vmem:[%s6084_s26 + $0x27c] ss:$52 sps:$4 sm:$0xff]  }
  0x37   : > { %4851 = vmatpush3.bf16.msra.mxu1 %v5636_v41  ;;  %2446 = vmatprep.mubr.bf16.mxu0 %v5639_v44  ;;  %v5705_v39 = vld [vmem:[%s6084_s26 + $0x410] ss:$52 sps:$4 sm:$0xff]  }
  0x38   : > { %4852 = vmatprep.subr.bf16.mxu1 %v5637_v43  ;;  %2542 = vmatprep.mubr.bf16.mxu1 %v5641_v46  ;;  %v5709_v41 = vld [vmem:[%s6084_s26 + $0x47c] ss:$52 sps:$4 sm:$0xff]   ;;  %v5715_v46 = vld [vmem:[%s6084_s26 + $0x2e0] ss:$52 sps:$4 sm:$0xff]  }
  0x39   : > { %4962 = vmatprep.subr.bf16.mxu0 %v5675_v0  ;;  %v5755_v43 = vld [vmem:[%s7347_s1 + $0x1f0] sm:$0xff]  }
  0x3a   : > { %4963 = vmatpush3.bf16.msra.mxu0 %v5676_v2  ;;  %v5756_v44 = vld [vmem:[%s7347_s1 + $0x1b0] sm:$0xff]   ;;  %v5737_v2 = vld [vmem:[%s6084_s26 + $0x418] ss:$52 sps:$4 sm:$0xff]  }
  0x3b   : > { %4853 = vmatpush3.bf16.msra.mxu1 %v5638_v47  ;;  %4964 = vmatprep.subr.bf16.mxu0 %v5687_v8  ;;  %v5717_v47 = vld [vmem:[%s6084_s26 + $0x34c] ss:$52 sps:$4 sm:$0xff]   ;;  %v5758_v0 = vld [vmem:[%s7347_s1 + $0x210] sm:$0xff]  }
  0x3c   : > { %4854 = vmatprep.subr.bf16.mxu1 %v5645_v49  ;;  %v5771_v49 = vld [vmem:[%s7347_s1 + $0x1f8] sm:$0xff]   ;;  %v5790_v8 = vld [vmem:[%s7347_s1 + $0x220] sm:$0xff]  }
  0x3e   : > { %2447 = vmatmul.mubr.bf16.gmra.mrb[12].mxu0 %v5643_v48  ;;  %2543 = vmatmul.mubr.bf16.gmra.mrb[12].mxu1 %v5644_v50  ;;  %v5721_v48 = vld [vmem:[%s6084_s26 + $0x14] ss:$52 sps:$4 sm:$0xff]   ;;  %v5772_v50 = vld [vmem:[%s7347_s1 + $0x1b8] sm:$0xff]  }
  0x3f   : > { %4855 = vmatpush3.bf16.msra.mxu1 %v5646_v51  ;;  %2454 = vmatprep.mubr.bf16.mxu0 %v5651_v52  ;;  %v5719_v51 = vld [vmem:[%s6084_s26 + $0x10] ss:$52 sps:$4 sm:$0xff]   ;;  %v5722_v52 = vld [vmem:[%s6084_s26 + $0x348] ss:$52 sps:$4 sm:$0xff]  }
  0x40   : > { %4856 = vmatprep.subr.bf16.mxu1 %v5648_v53  ;;  %2583 = vmatprep.mubr.bf16.mxu1 %v5655_v54  ;;  %v5726_v53 = vld [vmem:[%s7347_s1 + $0x200] sm:$0xff]   ;;  %v5727_v54 = vld [vmem:[%s6084_s26 + $0x3b4] ss:$52 sps:$4 sm:$0xff]  }
  0x41   : > { %4965 = vmatpush3.bf16.msra.mxu0 %v5690_v9  ;;  %v5805_v9 = vld [vmem:[%s7347_s1 + $0x268] sm:$0xff]  }
  0x42   : > { %4966 = vmatprep.subr.bf16.mxu0 %v5699_v15  ;;  %v5751_v15 = vld [vmem:[%s6084_s26 + $0x1b4] ss:$52 sps:$4 sm:$0xff]  }
  0x43   : > { %4857 = vmatpush3.bf16.msra.mxu1 %v5650_v57  ;;  %v5787_v57 = vld [vmem:[%s7347_s1 + $0x2c0] sm:$0xff]  }
  0x44   : > { %5066 = vmatprep.subr.bf16.mxu1 %v5657_v60  ;;  %v5731_v60 = vld [vmem:[%s6084_s26 + $0x3b0] ss:$52 sps:$4 sm:$0xff]  }
  0x45   : > { %4967 = vmatpush3.bf16.msra.mxu0 %v5700_v16  ;;  %v5822_v16 = vld [vmem:[%s7347_s1 + $0x230] sm:$0xff]  }
  0x46   : > { %2455 = vmatmul.mubr.bf16.gmra.mrb[16].mxu0 %v5656_v59  ;;  %2584 = vmatmul.mubr.bf16.vlgmr.msra.gmra.mrb[16].mxu1 %v5653_v58  ;;  %v5742_v58 = vld [vmem:[%s7347_s1 + $0x208] sm:$0xff]   ;;  %v5757_v59 = vld [vmem:[%s7347_s1 + $0x250] sm:$0xff]  }
  0x47   : > { %5067 = vmatpush3.bf16.msra.mxu1 %v5658_v61  ;;  %2462 = vmatprep.mubr.bf16.mxu0 %v5659_v62  ;;  %v5732_v61 = vld [vmem:[%s6084_s26 + $0x78] ss:$52 sps:$4 sm:$0xff]   ;;  %v5733_v62 = vld [vmem:[%s6084_s26 + $0x41c] ss:$52 sps:$4 sm:$0xff]  }
  0x48   : > { %2591 = vmatprep.mubr.bf16.mxu1 %v5661_v63  ;;  %5068 = vmatprep.subr.bf16.mxu1 %v5673_v1  ;;  %v5735_v63 = vld [vmem:[%s6084_s26 + $0xe4] ss:$52 sps:$4 sm:$0xff]  }
  0x49   : > { %4968 = vmatprep.subr.bf16.mxu0 %v5713_v24  ;;  %v5773_v1 = vld [vmem:[%s7347_s1 + $0x258] sm:$0xff]  }
  0x4a   : > { %4969 = vmatpush3.bf16.msra.mxu0 %v5716_v25  ;;  %v5764_v24 = vld [vmem:[%s6084_s26 + $0x218] ss:$52 sps:$4 sm:$0xff]   ;;  %v5765_v25 = vld [vmem:[%s6084_s26 + $0x5bc] ss:$52 sps:$4 sm:$0xff]  }
  0x4b   : > { %5069 = vmatpush3.bf16.msra.mxu1 %v5674_v3  ;;  %5178 = vmatprep.subr.bf16.mxu0 %v5725_v30  ;;  %v5774_v3 = vld [vmem:[%s7347_s1 + $0x218] sm:$0xff]  }
  0x4c   : > { %5070 = vmatprep.subr.bf16.mxu1 %v5691_v10  ;;  %v5747_v10 = vld [vmem:[%s6084_s26 + $0x480] ss:$52 sps:$4 sm:$0xff]   ;;  %v5775_v30 = vld [vmem:[%s6084_s26 + $0x624] ss:$52 sps:$4 sm:$0xff]  }
  0x4e   : > { %2463 = vmatmul.mubr.bf16.gmra.mrb[20].mxu0 %v5664_v4  ;;  %2592 = vmatmul.mubr.bf16.gmra.mrb[20].mxu1 %v5665_v5  ;;  %v5789_v4 = vld [vmem:[%s7347_s1 + $0x260] sm:$0xff]  }
  0x4f   : > { %2470 = vmatprep.mubr.bf16.mxu0 %v5667_v6  ;;  %2599 = vmatprep.mubr.bf16.mxu1 %v5669_v7  ;;  %v5738_v5 = vld [vmem:[%s6084_s26 + $0xe0] ss:$52 sps:$4 sm:$0xff]   ;;  %v5743_v6 = vld [vmem:[%s6084_s26 + $0x484] ss:$52 sps:$4 sm:$0xff]  }
  0x50   : > { %5071 = vmatpush3.bf16.msra.mxu1 %v5692_v11  ;;  %v5745_v7 = vld [vmem:[%s6084_s26 + $0x14c] ss:$52 sps:$4 sm:$0xff]   ;;  %v5748_v11 = vld [vmem:[%s6084_s26 + $0x148] ss:$52 sps:$4 sm:$0xff]  }
  0x51   : > { %5072 = vmatprep.subr.bf16.mxu1 %v5707_v18  ;;  %v5754_v18 = vld [vmem:[%s6084_s26 + $0x1b0] ss:$52 sps:$4 sm:$0xff]  }
  0x54   : > { %5073 = vmatpush3.bf16.msra.mxu1 %v5708_v19  ;;  %v5759_v19 = vld [vmem:[%s6084_s26 + $0x554] ss:$52 sps:$4 sm:$0xff]  }
  0x55   : > { %5074 = vmatprep.subr.bf16.mxu1 %v5723_v26  ;;  %v5767_v26 = vld [vmem:[%s6084_s26 + $0x284] ss:$52 sps:$4 sm:$0xff]  }
  0x56   : > { %2471 = vmatmul.mubr.bf16.gmra.mrb[24].mxu0 %v5671_v12  ;;  %2600 = vmatmul.mubr.bf16.gmra.mrb[24].mxu1 %v5672_v13  ;;  %v5806_v12 = vld [vmem:[%s7347_s1 + $0x228] sm:$0xff]   ;;  %v5821_v13 = vld [vmem:[%s7347_s1 + $0x270] sm:$0xff]  }
  0x57   : > { %2478 = vmatprep.mubr.bf16.mxu0 %v5677_v14  ;;  %2607 = vmatprep.mubr.bf16.mxu1 %v5679_v17  ;;  %v5749_v14 = vld [vmem:[%s6084_s26 + $0x4ec] ss:$52 sps:$4 sm:$0xff]   ;;  %v5753_v17 = vld [vmem:[%s6084_s26 + $0x4e8] ss:$52 sps:$4 sm:$0xff]  }
  0x58   : > { %5075 = vmatpush3.bf16.msra.mxu1 %v5724_v29  ;;  %v5770_v29 = vld [vmem:[%s6084_s26 + $0x280] ss:$52 sps:$4 sm:$0xff]  }
  0x59   : > { %5076 = vmatprep.subr.bf16.mxu1 %v5739_v35  ;;  %v5785_v35 = vld [vmem:[%s6084_s26 + $0x1c] ss:$52 sps:$4 sm:$0xff]  }
  0x5c   : > { %5077 = vmatpush3.bf16.msra.mxu1 %v5740_v36  ;;  %v5783_v36 = vld [vmem:[%s6084_s26 + $0x18] ss:$52 sps:$4 sm:$0xff]  }
  0x5d   : > { %5078 = vmatprep.subr.bf16.mxu1 %v5755_v43  ;;  %v5819_v43 = vld [vmem:[%s7347_s1 + $0x2d0] sm:$0xff]  }
  0x5e   : > { %2479 = vmatmul.mubr.bf16.gmra.mrb[28].mxu0 %v5681_v20  ;;  %2608 = vmatmul.mubr.bf16.gmra.mrb[28].mxu1 %v5682_v21  ;;  %v5837_v20 = vld [vmem:[%s7347_s1 + $0x278] sm:$0xff]  }
  0x5f   : > { %2486 = vmatprep.mubr.bf16.mxu0 %v5683_v22  ;;  %2615 = vmatprep.mubr.bf16.mxu1 %v5685_v23  ;;  %v5761_v21 = vld [vmem:[%s6084_s26 + $0x21c] ss:$52 sps:$4 sm:$0xff]  }
  0x60   : > { %5079 = vmatpush3.bf16.msra.mxu1 %v5756_v44  ;;  %v5838_v22 = vld [vmem:[%s7347_s1 + $0x238] sm:$0xff]   ;;  %v5763_v23 = vld [vmem:[%s6084_s26 + $0x550] ss:$52 sps:$4 sm:$0xff]  }
  0x61   : > { %5080 = vmatprep.subr.bf16.mxu1 %v5771_v49  ;;  %v5795_v44 = vld [vmem:[%s6084_s26 + $0x3b8] ss:$52 sps:$4 sm:$0xff]  }
  0x62   : > { %v5835_v49 = vld [vmem:[%s7347_s1 + $0x2d8] sm:$0xff]  }
  0x64   : > { %5081 = vmatpush3.bf16.msra.mxu1 %v5772_v50  ;;  %v5836_v50 = vld [vmem:[%s7347_s1 + $0x298] sm:$0xff]  }
  0x65   : > { %5290 = vmatprep.subr.bf16.mxu1 %v5787_v57  ;;  %v5866_v57 = vld [vmem:[%s7347_s1 + $0x2e8] sm:$0xff]  }
  0x66   : > { %2487 = vmatmul.mubr.bf16.gmra.mrb[32].mxu0 %v5688_v27  ;;  %2616 = vmatmul.mubr.bf16.gmra.mrb[32].mxu1 %v5689_v28  ;;  %v6379_v27 = vld [vmem:[%s7347_s1 + $0x300] sm:$0xff]   ;;  %v5769_v28 = vld [vmem:[%s6084_s26 + $0x5b8] ss:$52 sps:$4 sm:$0xff]  }
  0x67   : > { %2494 = vmatprep.mubr.bf16.mxu0 %v5693_v31  ;;  %2623 = vmatprep.mubr.bf16.mxu1 %v5695_v32  ;;  %v5777_v31 = vld [vmem:[%s6084_s26 + $0x2ec] ss:$52 sps:$4 sm:$0xff]  }
  0x68   : > { %v5779_v32 = vld [vmem:[%s6084_s26 + $0x620] ss:$52 sps:$4 sm:$0xff]  }
  0x6e   : > { %2495 = vmatmul.mubr.bf16.gmra.mrb[36].mxu0 %v5697_v33  ;;  %2624 = vmatmul.mubr.bf16.gmra.mrb[36].mxu1 %v5698_v34  ;;  %v5780_v33 = vld [vmem:[%s6084_s26 + $0x2e8] ss:$52 sps:$4 sm:$0xff]  }
  0x6f   : > { %2502 = vmatprep.mubr.bf16.mxu0 %v5701_v37  ;;  %2631 = vmatprep.mubr.bf16.mxu1 %v5703_v38  ;;  %v5781_v34 = vld [vmem:[%s6084_s26 + $0x354] ss:$52 sps:$4 sm:$0xff]   ;;  %v5786_v37 = vld [vmem:[%s6084_s26 + $0x350] ss:$52 sps:$4 sm:$0xff]  }
  0x70   : > { %v5788_v38 = vld [vmem:[%s7347_s1 + $0x280] sm:$0xff]  }
  0x76   : > { %2503 = vmatmul.mubr.bf16.gmra.mrb[40].mxu0 %v5705_v39  ;;  %2632 = vmatmul.mubr.bf16.gmra.mrb[40].mxu1 %v5706_v40  ;;  %v5791_v39 = vld [vmem:[%s6084_s26 + $0x3bc] ss:$52 sps:$4 sm:$0xff]   ;;  %v5793_v40 = vld [vmem:[%s6084_s26 + $0x84] ss:$52 sps:$4 sm:$0xff]  }
  0x77   : > { %2510 = vmatprep.mubr.bf16.mxu0 %v5709_v41  ;;  %2639 = vmatprep.mubr.bf16.mxu1 %v5711_v42  ;;  %v5803_v41 = vld [vmem:[%s7347_s1 + $0x2c8] sm:$0xff]  }
  0x78   : > { %v5804_v42 = vld [vmem:[%s7347_s1 + $0x288] sm:$0xff]  }
  0x7e   : > { %2511 = vmatmul.mubr.bf16.gmra.mrb[44].mxu0 %v5714_v45  ;;  %2640 = vmatmul.mubr.bf16.gmra.mrb[44].mxu1 %v5715_v46  ;;  %v5796_v45 = vld [vmem:[%s6084_s26 + $0x80] ss:$52 sps:$4 sm:$0xff]   ;;  %v5797_v46 = vld [vmem:[%s6084_s26 + $0x424] ss:$52 sps:$4 sm:$0xff]  }
  0x7f   : > { %2647 = vmatprep.mubr.bf16.mxu1 %v5717_v47  ;;  %2744 = vmatprep.mubr.bf16.mxu0 %v5721_v48  ;;  %v5799_v47 = vld [vmem:[%s6084_s26 + $0xec] ss:$52 sps:$4 sm:$0xff]   ;;  %v5820_v48 = vld [vmem:[%s7347_s1 + $0x290] sm:$0xff]  }
  0x86   : > { %2648 = vmatmul.mubr.bf16.gmra.mrb[48].mxu1 %v5722_v52  ;;  %2745 = vmatmul.mubr.bf16.vlgmr.msra.gmra.mrb[48].mxu0 %v5719_v51  ;;  %v5851_v51 = vld [vmem:[%s7347_s1 + $0x2e0] sm:$0xff]  }
  0x87   : > { %5179 = vmatpush3.bf16.msra.mxu0 %v5726_v53  ;;  %2655 = vmatprep.mubr.bf16.mxu1 %v5727_v54  ;;  %v5801_v52 = vld [vmem:[%s6084_s26 + $0x420] ss:$52 sps:$4 sm:$0xff]   ;;  %v5802_v53 = vld [vmem:[%s6084_s26 + $0xe8] ss:$52 sps:$4 sm:$0xff]  }
  0x88   : > { %2752 = vmatprep.mubr.bf16.mxu0 %v5729_v55  ;;  %5180 = vmatprep.subr.bf16.mxu0 %v5741_v56  ;;  %v5807_v54 = vld [vmem:[%s6084_s26 + $0x48c] ss:$52 sps:$4 sm:$0xff]   ;;  %v5809_v55 = vld [vmem:[%s6084_s26 + $0x154] ss:$52 sps:$4 sm:$0xff]  }
  0x89   : > { %v5852_v56 = vld [vmem:[%s7347_s1 + $0x2a0] sm:$0xff]  }
  0x8b   : > { %5181 = vmatpush3.bf16.msra.mxu0 %v5742_v58  ;;  %v5867_v58 = vld [vmem:[%s7347_s1 + $0x2a8] sm:$0xff]  }
  0x8c   : > { %5182 = vmatprep.subr.bf16.mxu0 %v5757_v59  ;;  %v5880_v59 = vld [vmem:[%s7347_s1 + $0x2f0] sm:$0xff]  }
  0x8e   : > { %2656 = vmatmul.mubr.bf16.gmra.mrb[52].mxu1 %v5731_v60  ;;  %2753 = vmatmul.mubr.bf16.gmra.mrb[52].mxu0 %v5732_v61  ;;  %v5811_v60 = vld [vmem:[%s6084_s26 + $0x488] ss:$52 sps:$4 sm:$0xff]   ;;  %v5812_v61 = vld [vmem:[%s6084_s26 + $0x150] ss:$52 sps:$4 sm:$0xff]  }
  0x8f   : > { %2663 = vmatprep.mubr.bf16.mxu1 %v5733_v62  ;;  %2760 = vmatprep.mubr.bf16.mxu0 %v5735_v63  ;;  %v5813_v62 = vld [vmem:[%s6084_s26 + $0x4f4] ss:$52 sps:$4 sm:$0xff]   ;;  %v5815_v63 = vld [vmem:[%s6084_s26 + $0x1bc] ss:$52 sps:$4 sm:$0xff]  }
  0x90   : > { %5183 = vmatpush3.bf16.msra.mxu0 %v5758_v0  ;;  %v5881_v0 = vld [vmem:[%s7347_s1 + $0x2b0] sm:$0xff]  }
  0x91   : > { %5184 = vmatprep.subr.bf16.mxu0 %v5773_v1  ;;  %v5894_v1 = vld [vmem:[%s7347_s1 + $0x2f8] sm:$0xff]  }
  0x94   : > { %5185 = vmatpush3.bf16.msra.mxu0 %v5774_v3  ;;  %v5817_v3 = vld [vmem:[%s6084_s26 + $0x4f0] ss:$52 sps:$4 sm:$0xff]  }
  0x95   : > { %5186 = vmatprep.subr.bf16.mxu0 %v5789_v4  ;;  %v5818_v4 = vld [vmem:[%s6084_s26 + $0x1b8] ss:$52 sps:$4 sm:$0xff]  }
  0x96   : > { %2664 = vmatmul.mubr.bf16.gmra.mrb[56].mxu1 %v5737_v2  ;;  %2761 = vmatmul.mubr.bf16.gmra.mrb[56].mxu0 %v5738_v5  ;;  %v5895_v2 = vld [vmem:[%s7347_s1 + $0x2b8] sm:$0xff]  }
  0x97   : > { %2671 = vmatprep.mubr.bf16.mxu1 %v5743_v6  ;;  %2768 = vmatprep.mubr.bf16.mxu0 %v5745_v7  ;;  %v5823_v5 = vld [vmem:[%s6084_s26 + $0x55c] ss:$52 sps:$4 sm:$0xff]   ;;  %v5825_v6 = vld [vmem:[%s6084_s26 + $0x224] ss:$52 sps:$4 sm:$0xff]  }
  0x98   : > { %5187 = vmatpush3.bf16.msra.mxu0 %v5790_v8  ;;  %v5827_v7 = vld [vmem:[%s6084_s26 + $0x558] ss:$52 sps:$4 sm:$0xff]   ;;  %v5828_v8 = vld [vmem:[%s6084_s26 + $0x220] ss:$52 sps:$4 sm:$0xff]  }
  0x99   : > { %5188 = vmatprep.subr.bf16.mxu0 %v5805_v9  ;;  %v5829_v9 = vld [vmem:[%s6084_s26 + $0x5c4] ss:$52 sps:$4 sm:$0xff]  }
  0x9c   : > { %5189 = vmatpush3.bf16.msra.mxu0 %v5806_v12  ;;  %v5834_v12 = vld [vmem:[%s6084_s26 + $0x288] ss:$52 sps:$4 sm:$0xff]  }
  0x9d   : > { %5190 = vmatprep.subr.bf16.mxu0 %v5821_v13  ;;  %v5839_v13 = vld [vmem:[%s6084_s26 + $0x62c] ss:$52 sps:$4 sm:$0xff]  }
  0x9e   : > { %2672 = vmatmul.mubr.bf16.gmra.mrb[60].mxu1 %v5747_v10  ;;  %2769 = vmatmul.mubr.bf16.gmra.mrb[60].mxu0 %v5748_v11  ;;  %v5831_v10 = vld [vmem:[%s6084_s26 + $0x28c] ss:$52 sps:$4 sm:$0xff]  }
  0x9f   : > { %2679 = vmatprep.mubr.bf16.mxu1 %v5749_v14  ;;  %2776 = vmatprep.mubr.bf16.mxu0 %v5751_v15  ;;  %v5833_v11 = vld [vmem:[%s6084_s26 + $0x5c0] ss:$52 sps:$4 sm:$0xff]  }
  0xa0   : > { %5191 = vmatpush3.bf16.msra.mxu0 %v5822_v16  ;;  %v5841_v14 = vld [vmem:[%s6084_s26 + $0x2f4] ss:$52 sps:$4 sm:$0xff]  }
  0xa1   : > { %5192 = vmatprep.subr.bf16.mxu0 %v5837_v20  ;;  %v5844_v20 = vld [vmem:[%s6084_s26 + $0x2f0] ss:$52 sps:$4 sm:$0xff]  }
  0xa4   : > { %5193 = vmatpush3.bf16.msra.mxu0 %v5838_v22 }
  0xa5   : > { %5456 = vmatprep.subr.bf16.mxu0 %v6379_v27 }
  0xa6   : > { %2680 = vmatmul.mubr.bf16.gmra.mrb[64].mxu1 %v5753_v17  ;;  %2777 = vmatmul.mubr.bf16.gmra.mrb[64].mxu0 %v5754_v18 }
  0xa7   : > { %2687 = vmatprep.mubr.bf16.mxu1 %v5759_v19  ;;  %2784 = vmatprep.mubr.bf16.mxu0 %v5761_v21  ;;  %v5843_v19 = vld [vmem:[%s6084_s26 + $0x628] ss:$52 sps:$4 sm:$0xff]  }
  0xae   : > { %2688 = vmatmul.mubr.bf16.gmra.mrb[68].mxu1 %v5763_v23  ;;  %2785 = vmatmul.mubr.bf16.gmra.mrb[68].mxu0 %v5764_v24 }
  0xaf   : > { %2695 = vmatprep.mubr.bf16.mxu1 %v5765_v25  ;;  %2792 = vmatprep.mubr.bf16.mxu0 %v5767_v26  ;;  %v5845_v25 = vld [vmem:[%s6084_s26 + $0x35c] ss:$52 sps:$4 sm:$0xff]   ;;  %v5849_v26 = vld [vmem:[%s6084_s26 + $0x24] ss:$52 sps:$4 sm:$0xff]  }
  0xb6   : > { %2696 = vmatmul.mubr.bf16.gmra.mrb[72].mxu1 %v5769_v28  ;;  %2793 = vmatmul.mubr.bf16.gmra.mrb[72].mxu0 %v5770_v29 }
  0xb7   : > { %2703 = vmatprep.mubr.bf16.mxu1 %v5775_v30  ;;  %2800 = vmatprep.mubr.bf16.mxu0 %v5777_v31 }
  0xbe   : > { %2704 = vmatmul.mubr.bf16.gmra.mrb[76].mxu1 %v5779_v32  ;;  %2801 = vmatmul.mubr.bf16.gmra.mrb[76].mxu0 %v5780_v33 }
  0xbf   : > { %2808 = vmatprep.mubr.bf16.mxu0 %v5781_v34  ;;  %2905 = vmatprep.mubr.bf16.mxu1 %v5785_v35 }
  0xc6   : > { %2809 = vmatmul.mubr.bf16.gmra.mrb[80].mxu0 %v5786_v37  ;;  %2906 = vmatmul.mubr.bf16.vlgmr.msra.gmra.mrb[80].mxu1 %v5783_v36  ;;  %v5847_v36 = vld [vmem:[%s6084_s26 + $0x20] ss:$52 sps:$4 sm:$0xff]   ;;  %v5850_v37 = vld [vmem:[%s6084_s26 + $0x358] ss:$52 sps:$4 sm:$0xff]  }
  0xc7   : > { %5291 = vmatpush3.bf16.msra.mxu1 %v5788_v38  ;;  %2816 = vmatprep.mubr.bf16.mxu0 %v5791_v39 }
  0xc8   : > { %2913 = vmatprep.mubr.bf16.mxu1 %v5793_v40  ;;  %5292 = vmatprep.subr.bf16.mxu1 %v5803_v41 }
  0xcb   : > { %5293 = vmatpush3.bf16.msra.mxu1 %v5804_v42  ;;  %v5854_v42 = vld [vmem:[%s6084_s26 + $0x3c4] ss:$52 sps:$4 sm:$0xff]  }
  0xcc   : > { %5294 = vmatprep.subr.bf16.mxu1 %v5819_v43 }
  0xce   : > { %2817 = vmatmul.mubr.bf16.gmra.mrb[84].mxu0 %v5795_v44  ;;  %2914 = vmatmul.mubr.bf16.gmra.mrb[84].mxu1 %v5796_v45  ;;  %v5856_v45 = vld [vmem:[%s6084_s26 + $0x8c] ss:$52 sps:$4 sm:$0xff]  }
  0xcf   : > { %2824 = vmatprep.mubr.bf16.mxu0 %v5797_v46  ;;  %2921 = vmatprep.mubr.bf16.mxu1 %v5799_v47  ;;  %v5908_v46 = vld [vmem:[%s7347_s1 + $0x308] sm:$0xff]  }
  0xd0   : > { %5295 = vmatpush3.bf16.msra.mxu1 %v5820_v48 }
  0xd1   : > { %5296 = vmatprep.subr.bf16.mxu1 %v5835_v49 }
  0xd4   : > { %5297 = vmatpush3.bf16.msra.mxu1 %v5836_v50 }
  0xd5   : > { %5298 = vmatprep.subr.bf16.mxu1 %v5851_v51 }
  0xd6   : > { %2825 = vmatmul.mubr.bf16.gmra.mrb[88].mxu0 %v5801_v52  ;;  %2922 = vmatmul.mubr.bf16.gmra.mrb[88].mxu1 %v5802_v53  ;;  %v5858_v53 = vld [vmem:[%s6084_s26 + $0x3c0] ss:$52 sps:$4 sm:$0xff]  }
  0xd7   : > { %2832 = vmatprep.mubr.bf16.mxu0 %v5807_v54  ;;  %2929 = vmatprep.mubr.bf16.mxu1 %v5809_v55  ;;  %v5859_v54 = vld [vmem:[%s6084_s26 + $0x88] ss:$52 sps:$4 sm:$0xff]  }
  0xd8   : > { %5299 = vmatpush3.bf16.msra.mxu1 %v5852_v56 }
  0xd9   : > { %5300 = vmatprep.subr.bf16.mxu1 %v5866_v57 }
  0xdc   : > { %5301 = vmatpush3.bf16.msra.mxu1 %v5867_v58 }
  0xdd   : > { %5302 = vmatprep.subr.bf16.mxu1 %v5880_v59  ;;  %v5860_v59 = vld [vmem:[%s6084_s26 + $0x42c] ss:$52 sps:$4 sm:$0xff]  }
  0xde   : > { %2833 = vmatmul.mubr.bf16.gmra.mrb[92].mxu0 %v5811_v60  ;;  %2930 = vmatmul.mubr.bf16.gmra.mrb[92].mxu1 %v5812_v61  ;;  %v5862_v60 = vld [vmem:[%s6084_s26 + $0xf4] ss:$52 sps:$4 sm:$0xff]  }
  0xdf   : > { %2840 = vmatprep.mubr.bf16.mxu0 %v5813_v62  ;;  %2937 = vmatprep.mubr.bf16.mxu1 %v5815_v63 }
  0xe0   : > { %5303 = vmatpush3.bf16.msra.mxu1 %v5881_v0 }
  0xe1   : > { %5304 = vmatprep.subr.bf16.mxu1 %v5894_v1 }
  0xe4   : > { %5305 = vmatpush3.bf16.msra.mxu1 %v5895_v2 }
  0xe6   : > { %2841 = vmatmul.mubr.bf16.gmra.mrb[96].mxu0 %v5817_v3  ;;  %2938 = vmatmul.mubr.bf16.gmra.mrb[96].mxu1 %v5818_v4  ;;  %v5864_v4 = vld [vmem:[%s6084_s26 + $0x428] ss:$52 sps:$4 sm:$0xff]  }
  0xe7   : > { %2848 = vmatprep.mubr.bf16.mxu0 %v5823_v5  ;;  %2945 = vmatprep.mubr.bf16.mxu1 %v5825_v6  ;;  %v5865_v5 = vld [vmem:[%s6084_s26 + $0xf0] ss:$52 sps:$4 sm:$0xff]  }
  0xee   : > { %2849 = vmatmul.mubr.bf16.gmra.mrb[100].mxu0 %v5827_v7  ;;  %2946 = vmatmul.mubr.bf16.gmra.mrb[100].mxu1 %v5828_v8 }
  0xef   : > { %2856 = vmatprep.mubr.bf16.mxu0 %v5829_v9  ;;  %2953 = vmatprep.mubr.bf16.mxu1 %v5831_v10  ;;  %v5868_v10 = vld [vmem:[%s6084_s26 + $0x494] ss:$52 sps:$4 sm:$0xff]  }
  0xf6   : > { %2857 = vmatmul.mubr.bf16.gmra.mrb[104].mxu0 %v5833_v11  ;;  %2954 = vmatmul.mubr.bf16.gmra.mrb[104].mxu1 %v5834_v12  ;;  %v5870_v11 = vld [vmem:[%s6084_s26 + $0x15c] ss:$52 sps:$4 sm:$0xff]  }
  0xf7   : > { %2864 = vmatprep.mubr.bf16.mxu0 %v5839_v13  ;;  %2961 = vmatprep.mubr.bf16.mxu1 %v5841_v14 }
  0xf9   : > { %v4818_v15 = vpop.f32.mrb[0].mxu1  ;;  %v4746_v16 = vpop.f32.mrb[0].mxu0 }
  0xfa   : > { %v4819_v17 = vpop.f32.mrb[1].mxu1  ;;  %v4747_v18 = vpop.f32.mrb[1].mxu0 }
  0xfb   : > { %v6465_v21 = vadd.f32 %v4819_v17, %v4818_v15  ;;  %v6467_v22 = vadd.f32 %v4747_v18, %v4746_v16  ;;  %v4821_v23 = vpop.f32.mrb[2].mxu1  ;;  %v4749_v24 = vpop.f32.mrb[2].mxu0  ;;  %v6518_v16 = vld [vmem:[%s7348_s2] ss:$0 sm:$0xff] }
  0xfc   : > { %v4822_v28 = vpop.f32.mrb[3].mxu1  ;;  %v4750_v29 = vpop.f32.mrb[3].mxu0 }
  0xfd   : > { %v6471_v30 = vadd.f32 %v4822_v28, %v4821_v23  ;;  %v6473_v31 = vadd.f32 %v4750_v29, %v4749_v24  ;;  %v5872_v23 = vld [vmem:[%s6084_s26 + $0x490] ss:$52 sps:$4 sm:$0xff]   ;;  %v5873_v24 = vld [vmem:[%s6084_s26 + $0x158] ss:$52 sps:$4 sm:$0xff]  }
  0xfe   : > { %2865 = vmatmul.mubr.bf16.gmra.mrb[108].mxu0 %v5843_v19  ;;  %2962 = vmatmul.mubr.bf16.gmra.mrb[108].mxu1 %v5844_v20 }
  0xff   : > { %2969 = vmatprep.mubr.bf16.mxu1 %v5845_v25  ;;  %3066 = vmatprep.mubr.bf16.mxu0 %v5849_v26  ;;  %v2425_v25 = vadd.f32 %v6467_v22, %v6518_v16 }
 0x101   : > { %v4824_v32 = vpop.f32.mrb[4].mxu1  ;;  %v4752_v33 = vpop.f32.mrb[4].mxu0 }
 0x102   : > { %v4825_v34 = vpop.f32.mrb[5].mxu1  ;;  %v4753_v35 = vpop.f32.mrb[5].mxu0 }
 0x103   : > { %v6477_v38 = vadd.f32 %v4825_v34, %v4824_v32  ;;  %v6479_v39 = vadd.f32 %v4753_v35, %v4752_v33  ;;  %v4827_v40 = vpop.f32.mrb[6].mxu1  ;;  %v4755_v41 = vpop.f32.mrb[6].mxu0  ;;  %v5874_v33 = vld [vmem:[%s6084_s26 + $0x4fc] ss:$52 sps:$4 sm:$0xff]   ;;  %v5876_v34 = vld [vmem:[%s6084_s26 + $0x1c4] ss:$52 sps:$4 sm:$0xff]  }
 0x104   : > { %v4828_v43 = vpop.f32.mrb[7].mxu1  ;;  %v4756_v44 = vpop.f32.mrb[7].mxu0 }
 0x105   : > { %v6486_v47 = vadd.f32 %v4828_v43, %v4827_v40  ;;  %v6488_v48 = vadd.f32 %v4756_v44, %v4755_v41 }
 0x106   : > { %2970 = vmatmul.mubr.bf16.gmra.mrb[112].mxu1 %v5850_v37  ;;  %3067 = vmatmul.mubr.bf16.vlgmr.msra.gmra.mrb[112].mxu0 %v5847_v36  ;;  %v2428_v37 = vadd.f32 %v6473_v31, %v6518_v16  ;;  %v2433_v31 = vadd.f32 %v6479_v39, %v6518_v16 }
 0x107   : > { %5457 = vmatpush3.bf16.msra.mxu0 %v6379_v27  ;;  %2977 = vmatprep.mubr.bf16.mxu1 %v5854_v42 }
 0x108   : > { %3074 = vmatprep.mubr.bf16.mxu0 %v5856_v45  ;;  %5458 = vmatprep.subr.bf16.mxu0 %v5908_v46 }
 0x109   : > { %v4830_v49 = vpop.f32.mrb[8].mxu1  ;;  %v4758_v50 = vpop.f32.mrb[8].mxu0 }
 0x10a   : > { %v4831_v51 = vpop.f32.mrb[9].mxu1  ;;  %v4759_v52 = vpop.f32.mrb[9].mxu0 }
 0x10b   : > { %v6493_v55 = vadd.f32 %v4831_v51, %v4830_v49  ;;  %v6495_v56 = vadd.f32 %v4759_v52, %v4758_v50  ;;  %v4833_v57 = vpop.f32.mrb[10].mxu1  ;;  %v4761_v58 = vpop.f32.mrb[10].mxu0  ;;  %5459 = vmatpush3.bf16.msra.mxu0 %v5908_v46  ;;  %v5878_v49 = vld [vmem:[%s6084_s26 + $0x4f8] ss:$52 sps:$4 sm:$0xff]   ;;  %v5879_v50 = vld [vmem:[%s6084_s26 + $0x1c0] ss:$52 sps:$4 sm:$0xff]  }
 0x10c   : > { %v4834_v27 = vpop.f32.mrb[11].mxu1  ;;  %v4762_v61 = vpop.f32.mrb[11].mxu0 }
 0x10d   : > { %v6499_v62 = vadd.f32 %v4834_v27, %v4833_v57  ;;  %v6501_v63 = vadd.f32 %v4762_v61, %v4761_v58  ;;  %v5882_v57 = vld [vmem:[%s6084_s26 + $0x564] ss:$52 sps:$4 sm:$0xff]   ;;  %v5884_v58 = vld [vmem:[%s6084_s26 + $0x22c] ss:$52 sps:$4 sm:$0xff]   ;;  %v2436_v27 = vadd.f32 %v6488_v48, %v6518_v16  ;;  %v2441_v48 = vadd.f32 %v6495_v56, %v6518_v16 }
 0x10e   : > { %2978 = vmatmul.mubr.bf16.gmra.mrb[116].mxu1 %v5858_v53  ;;  %3075 = vmatmul.mubr.bf16.gmra.mrb[116].mxu0 %v5859_v54 }
 0x10f   : > { %2985 = vmatprep.mubr.bf16.mxu1 %v5860_v59  ;;  %3082 = vmatprep.mubr.bf16.mxu0 %v5862_v60 }
 0x111   : > { %v4836_v0 = vpop.f32.mrb[12].mxu1  ;;  %v4764_v1 = vpop.f32.mrb[12].mxu0 }
 0x112   : > { %v4837_v2 = vpop.f32.mrb[13].mxu1  ;;  %v4765_v3 = vpop.f32.mrb[13].mxu0 }
 0x113   : > { %v6505_v6 = vadd.f32 %v4837_v2, %v4836_v0  ;;  %v6507_v7 = vadd.f32 %v4765_v3, %v4764_v1  ;;  %v4839_v8 = vpop.f32.mrb[14].mxu1  ;;  %v4767_v9 = vpop.f32.mrb[14].mxu0 }
 0x114   : > { %v4840_v12 = vpop.f32.mrb[15].mxu1  ;;  %v4768_v13 = vpop.f32.mrb[15].mxu0 }
 0x115   : > { %v6511_v14 = vadd.f32 %v4840_v12, %v4839_v8  ;;  %v6513_v15 = vadd.f32 %v4768_v13, %v4767_v9  ;;  %v5886_v8 = vld [vmem:[%s6084_s26 + $0x560] ss:$52 sps:$4 sm:$0xff]   ;;  %v5887_v9 = vld [vmem:[%s6084_s26 + $0x228] ss:$52 sps:$4 sm:$0xff]  }
 0x116   : > { %2986 = vmatmul.mubr.bf16.gmra.mrb[120].mxu1 %v5864_v4  ;;  %3083 = vmatmul.mubr.bf16.gmra.mrb[120].mxu0 %v5865_v5 }
 0x117   : > { %2993 = vmatprep.mubr.bf16.mxu1 %v5868_v10  ;;  %3090 = vmatprep.mubr.bf16.mxu0 %v5870_v11 }
 0x119   : > { %v4858_v17 = vpop.f32.mrb[16].mxu1  ;;  %v4770_v18 = vpop.f32.mrb[16].mxu0 }
 0x11a   : > { %v4859_v19 = vpop.f32.mrb[17].mxu1  ;;  %v4771_v20 = vpop.f32.mrb[17].mxu0 }
 0x11b   : > { %v4860_v26 = vadd.f32 %v4859_v19, %v4858_v17  ;;  %v6524_v28 = vadd.f32 %v4771_v20, %v4770_v18  ;;  %v4861_v29 = vpop.f32.mrb[18].mxu1  ;;  %v4773_v32 = vpop.f32.mrb[18].mxu0  ;;  %v5888_v17 = vld [vmem:[%s6084_s26 + $0x5cc] ss:$52 sps:$4 sm:$0xff]   ;;  %v5890_v18 = vld [vmem:[%s6084_s26 + $0x294] ss:$52 sps:$4 sm:$0xff]  }
 0x11c   : > { %v4862_v35 = vpop.f32.mrb[19].mxu1  ;;  %v4774_v36 = vpop.f32.mrb[19].mxu0 }
 0x11d   : > { %v6530_v40 = vadd.f32 %v4860_v26, %v2425_v25  ;;  %v4863_v41 = vadd.f32 %v4862_v35, %v4861_v29  ;;  %v6532_v42 = vadd.f32 %v4774_v36, %v4773_v32  ;;  %v5892_v35 = vld [vmem:[%s6084_s26 + $0x5c8] ss:$52 sps:$4 sm:$0xff]   ;;  %v5893_v36 = vld [vmem:[%s6084_s26 + $0x290] ss:$52 sps:$4 sm:$0xff]  }
 0x11e   : > { %2994 = vmatmul.mubr.bf16.gmra.mrb[124].mxu1 %v5872_v23  ;;  %3091 = vmatmul.mubr.bf16.gmra.mrb[124].mxu0 %v5873_v24  ;;  %v2444_v23 = vadd.f32 %v6501_v63, %v6518_v16  ;;  %v2449_v63 = vadd.f32 %v6507_v7, %v6518_v16 }
 0x11f   : > { %v6534_v22 = vadd.f32 %v4863_v41, %v2428_v37  ;;  %3001 = vmatprep.mubr.bf16.mxu1 %v5874_v33  ;;  %3098 = vmatprep.mubr.bf16.mxu0 %v5876_v34 }
 0x121   : > { %v4864_v43 = vpop.f32.mrb[20].mxu1  ;;  %v4776_v44 = vpop.f32.mrb[20].mxu0 }
 0x122   : > { %v4865_v45 = vpop.f32.mrb[21].mxu1  ;;  %v4777_v46 = vpop.f32.mrb[21].mxu0 }
 0x123   : > { %v4866_v51 = vadd.f32 %v4865_v45, %v4864_v43  ;;  %v6540_v52 = vadd.f32 %v4777_v46, %v4776_v44  ;;  %v4867_v53 = vpop.f32.mrb[22].mxu1  ;;  %v4779_v54 = vpop.f32.mrb[22].mxu0  ;;  %v5896_v45 = vld [vmem:[%s6084_s26 + $0x634] ss:$52 sps:$4 sm:$0xff]   ;;  %v5898_v46 = vld [vmem:[%s6084_s26 + $0x2fc] ss:$52 sps:$4 sm:$0xff]  }
 0x124   : > { %v4868_v59 = vpop.f32.mrb[23].mxu1  ;;  %v4780_v60 = vpop.f32.mrb[23].mxu0 }
 0x125   : > { %v6546_v61 = vadd.f32 %v4866_v51, %v2433_v31  ;;  %v4869_v0 = vadd.f32 %v4868_v59, %v4867_v53  ;;  %v6548_v1 = vadd.f32 %v4780_v60, %v4779_v54  ;;  %v2452_v31 = vadd.f32 %v6513_v15, %v6518_v16 }
 0x126   : > { %3002 = vmatmul.mubr.bf16.gmra.mrb[128].mxu1 %v5878_v49  ;;  %3099 = vmatmul.mubr.bf16.gmra.mrb[128].mxu0 %v5879_v50  ;;  %v2457_v15 = vadd.f32 %v6524_v28, %v6518_v16 }
 0x127   : > { %v6550_v39 = vadd.f32 %v4869_v0, %v2436_v27  ;;  %3009 = vmatprep.mubr.bf16.mxu1 %v5882_v57  ;;  %3106 = vmatprep.mubr.bf16.mxu0 %v5884_v58  ;;  %v5900_v27 = vld [vmem:[%s6084_s26 + $0x630] ss:$52 sps:$4 sm:$0xff]   ;;  %v5901_v0 = vld [vmem:[%s6084_s26 + $0x2f8] ss:$52 sps:$4 sm:$0xff]  }
 0x129   : > { %v4870_v2 = vpop.f32.mrb[24].mxu1  ;;  %v4782_v3 = vpop.f32.mrb[24].mxu0 }
 0x12a   : > { %v4871_v4 = vpop.f32.mrb[25].mxu1  ;;  %v4783_v5 = vpop.f32.mrb[25].mxu0 }
 0x12b   : > { %v4872_v10 = vadd.f32 %v4871_v4, %v4870_v2  ;;  %v6556_v11 = vadd.f32 %v4783_v5, %v4782_v3  ;;  %v4873_v12 = vpop.f32.mrb[26].mxu1  ;;  %v4785_v13 = vpop.f32.mrb[26].mxu0 }
 0x12c   : > { %v4874_v19 = vpop.f32.mrb[27].mxu1  ;;  %v4786_v20 = vpop.f32.mrb[27].mxu0 }
 0x12d   : > { %v6562_v24 = vadd.f32 %v4872_v10, %v2441_v48  ;;  %v4875_v25 = vadd.f32 %v4874_v19, %v4873_v12  ;;  %v6564_v26 = vadd.f32 %v4786_v20, %v4785_v13  ;;  %v2460_v12 = vadd.f32 %v6532_v42, %v6518_v16 }
 0x12e   : > { %3010 = vmatmul.mubr.bf16.gmra.mrb[132].mxu1 %v5886_v8  ;;  %3107 = vmatmul.mubr.bf16.gmra.mrb[132].mxu0 %v5887_v9  ;;  %v5902_v8 = vld [vmem:[%s6084_s26 + $0x364] ss:$52 sps:$4 sm:$0xff]   ;;  %v5906_v9 = vld [vmem:[%s6084_s26 + $0x2c] ss:$52 sps:$4 sm:$0xff]   ;;  %v2465_v42 = vadd.f32 %v6540_v52, %v6518_v16 }
 0x12f   : > { %v6566_v56 = vadd.f32 %v4875_v25, %v2444_v23  ;;  %3017 = vmatprep.mubr.bf16.mxu1 %v5888_v17  ;;  %3114 = vmatprep.mubr.bf16.mxu0 %v5890_v18 }
 0x131   : > { %v4876_v29 = vpop.f32.mrb[28].mxu1  ;;  %v4788_v32 = vpop.f32.mrb[28].mxu0 }
 0x132   : > { %v4877_v33 = vpop.f32.mrb[29].mxu1  ;;  %v4789_v34 = vpop.f32.mrb[29].mxu0 }
 0x133   : > { %v4878_v37 = vadd.f32 %v4877_v33, %v4876_v29  ;;  %v6572_v41 = vadd.f32 %v4789_v34, %v4788_v32  ;;  %v4879_v43 = vpop.f32.mrb[30].mxu1  ;;  %v4791_v44 = vpop.f32.mrb[30].mxu0  ;;  %v5904_v29 = vld [vmem:[%s6084_s26 + $0x28] ss:$52 sps:$4 sm:$0xff]   ;;  %v5907_v32 = vld [vmem:[%s6084_s26 + $0x360] ss:$52 sps:$4 sm:$0xff]  }
 0x134   : > { %v4880_v49 = vpop.f32.mrb[31].mxu1  ;;  %v4792_v50 = vpop.f32.mrb[31].mxu0 }
 0x135   : > { %v6578_v51 = vadd.f32 %v4878_v37, %v2449_v63  ;;  %v4881_v53 = vadd.f32 %v4880_v49, %v4879_v43  ;;  %v6580_v54 = vadd.f32 %v4792_v50, %v4791_v44  ;;  %v5909_v63 = vld [vmem:[%s6084_s26 + $0x3cc] ss:$52 sps:$4 sm:$0xff]   ;;  %v5911_v37 = vld [vmem:[%s6084_s26 + $0x94] ss:$52 sps:$4 sm:$0xff]  }
 0x136   : > { %3018 = vmatmul.mubr.bf16.gmra.mrb[136].mxu1 %v5892_v35  ;;  %3115 = vmatmul.mubr.bf16.gmra.mrb[136].mxu0 %v5893_v36 }
 0x137   : > { %v6582_v7 = vadd.f32 %v4881_v53, %v2452_v31  ;;  %3025 = vmatprep.mubr.bf16.mxu1 %v5896_v45  ;;  %3122 = vmatprep.mubr.bf16.mxu0 %v5898_v46  ;;  %v2468_v45 = vadd.f32 %v6548_v1, %v6518_v16  ;;  %v2473_v1 = vadd.f32 %v6556_v11, %v6518_v16 }
 0x139   : > { %v4882_v57 = vpop.f32.mrb[32].mxu1  ;;  %v4794_v58 = vpop.f32.mrb[32].mxu0 }
 0x13a   : > { %v4883_v59 = vpop.f32.mrb[33].mxu1  ;;  %v4795_v60 = vpop.f32.mrb[33].mxu0 }
 0x13b   : > { %v4884_v2 = vadd.f32 %v4883_v59, %v4882_v57  ;;  %v6588_v3 = vadd.f32 %v4795_v60, %v4794_v58  ;;  %v4885_v4 = vpop.f32.mrb[34].mxu1  ;;  %v4797_v5 = vpop.f32.mrb[34].mxu0  ;;  %v5913_v59 = vld [vmem:[%s6084_s26 + $0x3c8] ss:$52 sps:$4 sm:$0xff]   ;;  %v5914_v60 = vld [vmem:[%s6084_s26 + $0x90] ss:$52 sps:$4 sm:$0xff]  }
 0x13c   : > { %v4886_v48 = vpop.f32.mrb[35].mxu1  ;;  %v4798_v10 = vpop.f32.mrb[35].mxu0 }
 0x13d   : > { %v6594_v13 = vadd.f32 %v4884_v2, %v2457_v15  ;;  %v4887_v17 = vadd.f32 %v4886_v48, %v4885_v4  ;;  %v6596_v18 = vadd.f32 %v4798_v10, %v4797_v5  ;;  %v5915_v4 = vld [vmem:[%s6084_s26 + $0x434] ss:$52 sps:$4 sm:$0xff]   ;;  %v5917_v5 = vld [vmem:[%s6084_s26 + $0xfc] ss:$52 sps:$4 sm:$0xff]   ;;  %v2476_v48 = vadd.f32 %v6564_v26, %v6518_v16 }
 0x13e   : > { %3026 = vmatmul.mubr.bf16.gmra.mrb[140].mxu1 %v5900_v27  ;;  %3123 = vmatmul.mubr.bf16.gmra.mrb[140].mxu0 %v5901_v0  ;;  %v2481_v26 = vadd.f32 %v6572_v41, %v6518_v16 }
 0x13f   : > { %v6598_v28 = vadd.f32 %v4887_v17, %v2460_v12  ;;  %3130 = vmatprep.mubr.bf16.mxu0 %v5902_v8  ;;  %3227 = vmatprep.mubr.bf16.mxu1 %v5906_v9 }
 0x141   : > { %v4888_v19 = vpop.f32.mrb[36].mxu1  ;;  %v4800_v20 = vpop.f32.mrb[36].mxu0 }
 0x142   : > { %v4889_v23 = vpop.f32.mrb[37].mxu1  ;;  %v4801_v25 = vpop.f32.mrb[37].mxu0 }
 0x143   : > { %v4890_v33 = vadd.f32 %v4889_v23, %v4888_v19  ;;  %v6604_v34 = vadd.f32 %v4801_v25, %v4800_v20  ;;  %v4891_v35 = vpop.f32.mrb[38].mxu1  ;;  %v4803_v36 = vpop.f32.mrb[38].mxu0 }
 0x144   : > { %v4892_v43 = vpop.f32.mrb[39].mxu1  ;;  %v4804_v44 = vpop.f32.mrb[39].mxu0 }
 0x145   : > { %v6610_v46 = vadd.f32 %v4890_v33, %v2465_v42  ;;  %v4893_v49 = vadd.f32 %v4892_v43, %v4891_v35  ;;  %v6612_v50 = vadd.f32 %v4804_v44, %v4803_v36 }
 0x146   : > { %3131 = vmatmul.mubr.bf16.gmra.mrb[144].mxu0 %v5907_v32  ;;  %3228 = vmatmul.mubr.bf16.vlgmr.msra.gmra.mrb[144].mxu1 %v5904_v29  ;;  %v5919_v29 = vld [vmem:[%s6084_s26 + $0x430] ss:$52 sps:$4 sm:$0xff]   ;;  %v5920_v32 = vld [vmem:[%s6084_s26 + $0xf8] ss:$52 sps:$4 sm:$0xff]  }
 0x147   : > { %v6614_v52 = vadd.f32 %v4893_v49, %v2468_v45  ;;  %3138 = vmatprep.mubr.bf16.mxu0 %v5909_v63  ;;  %3235 = vmatprep.mubr.bf16.mxu1 %v5911_v37  ;;  %v5921_v63 = vld [vmem:[%s6084_s26 + $0x49c] ss:$52 sps:$4 sm:$0xff]   ;;  %v5923_v37 = vld [vmem:[%s6084_s26 + $0x164] ss:$52 sps:$4 sm:$0xff]   ;;  %v2484_v45 = vadd.f32 %v6580_v54, %v6518_v16  ;;  %v2489_v54 = vadd.f32 %v6588_v3, %v6518_v16 }
 0x149   : > { %v4894_v31 = vpop.f32.mrb[40].mxu1  ;;  %v4806_v53 = vpop.f32.mrb[40].mxu0 }
 0x14a   : > { %v4895_v57 = vpop.f32.mrb[41].mxu1  ;;  %v4807_v58 = vpop.f32.mrb[41].mxu0 }
 0x14b   : > { %v4896_v27 = vadd.f32 %v4895_v57, %v4894_v31  ;;  %v6620_v0 = vadd.f32 %v4807_v58, %v4806_v53  ;;  %v4897_v15 = vpop.f32.mrb[42].mxu1  ;;  %v4809_v2 = vpop.f32.mrb[42].mxu0 }
 0x14c   : > { %v4898_v8 = vpop.f32.mrb[43].mxu1  ;;  %v4810_v9 = vpop.f32.mrb[43].mxu0 }
 0x14d   : > { %v6626_v10 = vadd.f32 %v4896_v27, %v2473_v1  ;;  %v4899_v12 = vadd.f32 %v4898_v8, %v4897_v15  ;;  %v6628_v17 = vadd.f32 %v4810_v9, %v4809_v2  ;;  %v5925_v1 = vld [vmem:[%s6084_s26 + $0x498] ss:$52 sps:$4 sm:$0xff]   ;;  %v5926_v27 = vld [vmem:[%s6084_s26 + $0x160] ss:$52 sps:$4 sm:$0xff]  }
 0x14e   : > { %3139 = vmatmul.mubr.bf16.gmra.mrb[148].mxu0 %v5913_v59  ;;  %3236 = vmatmul.mubr.bf16.gmra.mrb[148].mxu1 %v5914_v60  ;;  %v5927_v8 = vld [vmem:[%s6084_s26 + $0x504] ss:$52 sps:$4 sm:$0xff]   ;;  %v5929_v9 = vld [vmem:[%s6084_s26 + $0x1cc] ss:$52 sps:$4 sm:$0xff]  }
 0x14f   : > { %v6630_v11 = vadd.f32 %v4899_v12, %v2476_v48  ;;  %3146 = vmatprep.mubr.bf16.mxu0 %v5915_v4  ;;  %3243 = vmatprep.mubr.bf16.mxu1 %v5917_v5  ;;  %v2492_v48 = vadd.f32 %v6596_v18, %v6518_v16 }
 0x151   : > { %v4900_v19 = vpop.f32.mrb[44].mxu1  ;;  %v4812_v20 = vpop.f32.mrb[44].mxu0 }
 0x152   : > { %v4901_v23 = vpop.f32.mrb[45].mxu1  ;;  %v4813_v25 = vpop.f32.mrb[45].mxu0 }
 0x153   : > { %v4902_v42 = vadd.f32 %v4901_v23, %v4900_v19  ;;  %v6636_v33 = vadd.f32 %v4813_v25, %v4812_v20  ;;  %v4903_v35 = vpop.f32.mrb[46].mxu1  ;;  %v4815_v36 = vpop.f32.mrb[46].mxu0 }
 0x154   : > { %v4904_v43 = vpop.f32.mrb[47].mxu1  ;;  %v4816_v44 = vpop.f32.mrb[47].mxu0 }
 0x155   : > { %v6642_v49 = vadd.f32 %v4902_v42, %v2481_v26  ;;  %v4905_v31 = vadd.f32 %v4904_v43, %v4903_v35  ;;  %v6644_v53 = vadd.f32 %v4816_v44, %v4815_v36  ;;  %v5931_v36 = vld [vmem:[%s6084_s26 + $0x500] ss:$52 sps:$4 sm:$0xff]  }
 0x156   : > { %3147 = vmatmul.mubr.bf16.gmra.mrb[152].mxu0 %v5919_v29  ;;  %3244 = vmatmul.mubr.bf16.gmra.mrb[152].mxu1 %v5920_v32 }
 0x157   : > { %v6646_v41 = vadd.f32 %v4905_v31, %v2484_v45  ;;  %3154 = vmatprep.mubr.bf16.mxu0 %v5921_v63  ;;  %3251 = vmatprep.mubr.bf16.mxu1 %v5923_v37  ;;  %v2497_v63 = vadd.f32 %v6604_v34, %v6518_v16  ;;  %v5933_v31 = vld [vmem:[%s6084_s26 + $0x56c] ss:$52 sps:$4 sm:$0xff]  }
 0x159   : > { %v4906_v57 = vpop.f32.mrb[48].mxu1  ;;  %v4970_v58 = vpop.f32.mrb[48].mxu0 }
 0x15a   : > { %v4907_v59 = vpop.f32.mrb[49].mxu1  ;;  %v4971_v60 = vpop.f32.mrb[49].mxu0 }
 0x15b   : > { %v4908_v15 = vadd.f32 %v4907_v59, %v4906_v57  ;;  %v4972_v2 = vadd.f32 %v4971_v60, %v4970_v58  ;;  %v4909_v4 = vpop.f32.mrb[50].mxu1  ;;  %v4973_v5 = vpop.f32.mrb[50].mxu0  ;;  %v5935_v57 = vld [vmem:[%s6084_s26 + $0x234] ss:$52 sps:$4 sm:$0xff]  }
 0x15c   : > { %v4910_v12 = vpop.f32.mrb[51].mxu1  ;;  %v4974_v19 = vpop.f32.mrb[51].mxu0 }
 0x15d   : > { %v6656_v20 = vadd.f32 %v4908_v15, %v2489_v54  ;;  %v6659_v23 = vadd.f32 %v4972_v2, %v6530_v40  ;;  %v4911_v25 = vadd.f32 %v4910_v12, %v4909_v4  ;;  %v4975_v3 = vadd.f32 %v4974_v19, %v4973_v5  ;;  %v5932_v40 = vld [vmem:[%s6084_s26 + $0x1c8] ss:$52 sps:$4 sm:$0xff]  }
 0x15e   : > { %3155 = vmatmul.mubr.bf16.gmra.mrb[156].mxu0 %v5925_v1  ;;  %3252 = vmatmul.mubr.bf16.gmra.mrb[156].mxu1 %v5926_v27 }
 0x15f   : > { %v6661_v29 = vadd.f32 %v4911_v25, %v2492_v48  ;;  %v6664_v32 = vadd.f32 %v4975_v3, %v6534_v22  ;;  %3162 = vmatprep.mubr.bf16.mxu0 %v5927_v8  ;;  %3259 = vmatprep.mubr.bf16.mxu1 %v5929_v9  ;;  %v2500_v22 = vadd.f32 %v6612_v50, %v6518_v16  ;;  %v5991_v50 = vld [vmem:[%s7349_s3] sm:$0xff]   ;;  %v5937_v8 = vld [vmem:[%s6084_s26 + $0x568] ss:$52 sps:$4 sm:$0xff]  }
 0x160   : > { %5492 = vmatprep.subr.bf16.mxu1 %v5991_v50  ;;  %v5938_v9 = vld [vmem:[%s6084_s26 + $0x230] ss:$52 sps:$4 sm:$0xff]   ;;  %v5939_v3 = vld [vmem:[%s6084_s26 + $0x5d4] ss:$52 sps:$4 sm:$0xff]  }
 0x161   : > { %v4912_v18 = vpop.f32.mrb[52].mxu1  ;;  %v4976_v26 = vpop.f32.mrb[52].mxu0  ;;  %5493 = vmatpush3.bf16.msra.mxu1 %v5991_v50  ;;  %v5945_v50 = vld [vmem:[%s6084_s26 + $0x63c] ss:$52 sps:$4 sm:$0xff]  }
 0x162   : > { %v4913_v42 = vpop.f32.mrb[53].mxu1  ;;  %v4977_v35 = vpop.f32.mrb[53].mxu0 }
 0x163   : > { %v4914_v37 = vadd.f32 %v4913_v42, %v4912_v18  ;;  %v4978_v43 = vadd.f32 %v4977_v35, %v4976_v26  ;;  %v4915_v44 = vpop.f32.mrb[54].mxu1  ;;  %v4979_v45 = vpop.f32.mrb[54].mxu0  ;;  %v5941_v18 = vld [vmem:[%s6084_s26 + $0x29c] ss:$52 sps:$4 sm:$0xff]   ;;  %v2508_v26 = vadd.f32 %v6628_v17, %v6518_v16 }
 0x164   : > { %v4916_v58 = vpop.f32.mrb[55].mxu1  ;;  %v4980_v59 = vpop.f32.mrb[55].mxu0 }
 0x165   : > { %v6674_v60 = vadd.f32 %v4914_v37, %v2497_v63  ;;  %v6677_v1 = vadd.f32 %v4978_v43, %v6546_v61  ;;  %v4917_v27 = vadd.f32 %v4916_v58, %v4915_v44  ;;  %v4981_v34 = vadd.f32 %v4980_v59, %v4979_v45 }
 0x166   : > { %3163 = vmatmul.mubr.bf16.gmra.mrb[160].mxu0 %v5931_v36  ;;  %3260 = vmatmul.mubr.bf16.gmra.mrb[160].mxu1 %v5932_v40 }
 0x167   : > { %v6679_v54 = vadd.f32 %v4917_v27, %v2500_v22  ;;  %v6682_v15 = vadd.f32 %v4981_v34, %v6550_v39  ;;  %3170 = vmatprep.mubr.bf16.mxu0 %v5933_v31  ;;  %3267 = vmatprep.mubr.bf16.mxu1 %v5935_v57  ;;  %v2505_v39 = vadd.f32 %v6620_v0, %v6518_v16  ;;  %v5943_v57 = vld [vmem:[%s6084_s26 + $0x5d0] ss:$52 sps:$4 sm:$0xff]  }
 0x168   : > { %v2513_v22 = vadd.f32 %v6636_v33, %v6518_v16 }
 0x169   : > { %v4918_v61 = vpop.f32.mrb[56].mxu1  ;;  %v4982_v2 = vpop.f32.mrb[56].mxu0 }
 0x16a   : > { %v4919_v4 = vpop.f32.mrb[57].mxu1  ;;  %v4983_v5 = vpop.f32.mrb[57].mxu0 }
 0x16b   : > { %v4920_v48 = vadd.f32 %v4919_v4, %v4918_v61  ;;  %v4984_v12 = vadd.f32 %v4983_v5, %v4982_v2  ;;  %v4921_v19 = vpop.f32.mrb[58].mxu1  ;;  %v4985_v25 = vpop.f32.mrb[58].mxu0  ;;  %v5947_v61 = vld [vmem:[%s6084_s26 + $0x304] ss:$52 sps:$4 sm:$0xff]  }
 0x16c   : > { %v4922_v42 = vpop.f32.mrb[59].mxu1  ;;  %v4986_v35 = vpop.f32.mrb[59].mxu0 }
 0x16d   : > { %v6695_v36 = vadd.f32 %v4920_v48, %v2505_v39  ;;  %v6698_v40 = vadd.f32 %v4984_v12, %v6562_v24  ;;  %v4923_v63 = vadd.f32 %v4922_v42, %v4921_v19  ;;  %v4987_v0 = vadd.f32 %v4986_v35, %v4985_v25  ;;  %v5944_v24 = vld [vmem:[%s6084_s26 + $0x298] ss:$52 sps:$4 sm:$0xff]  }
 0x16e   : > { %3171 = vmatmul.mubr.bf16.gmra.mrb[164].mxu0 %v5937_v8  ;;  %3268 = vmatmul.mubr.bf16.gmra.mrb[164].mxu1 %v5938_v9 }
 0x16f   : > { %v6700_v37 = vadd.f32 %v4923_v63, %v2508_v26  ;;  %v6703_v43 = vadd.f32 %v4987_v0, %v6566_v56  ;;  %3178 = vmatprep.mubr.bf16.mxu0 %v5939_v3  ;;  %3275 = vmatprep.mubr.bf16.mxu1 %v5941_v18  ;;  %v2516_v56 = vadd.f32 %v6644_v53, %v6518_v16  ;;  %v5949_v3 = vld [vmem:[%s6084_s26 + $0x638] ss:$52 sps:$4 sm:$0xff]  }
 0x170   : > { %v2521_v18 = vadd.f32 %v6465_v21, %v6518_v16  ;;  %v5951_v0 = vld [vmem:[%s6084_s26 + $0x36c] ss:$52 sps:$4 sm:$0xff]  }
 0x171   : > { %v4924_v17 = vpop.f32.mrb[60].mxu1  ;;  %v4988_v44 = vpop.f32.mrb[60].mxu0 }
 0x172   : > { %v4925_v45 = vpop.f32.mrb[61].mxu1  ;;  %v4989_v31 = vpop.f32.mrb[61].mxu0 }
 0x173   : > { %v4926_v58 = vadd.f32 %v4925_v45, %v4924_v17  ;;  %v4990_v59 = vadd.f32 %v4989_v31, %v4988_v44  ;;  %v4927_v27 = vpop.f32.mrb[62].mxu1  ;;  %v4991_v34 = vpop.f32.mrb[62].mxu0  ;;  %v5953_v17 = vld [vmem:[%s6084_s26 + $0x30] ss:$52 sps:$4 sm:$0xff]  }
 0x174   : > { %v4928_v2 = vpop.f32.mrb[63].mxu1  ;;  %v4992_v4 = vpop.f32.mrb[63].mxu0 }
 0x175   : > { %v6713_v5 = vadd.f32 %v4926_v58, %v2513_v22  ;;  %v6716_v8 = vadd.f32 %v4990_v59, %v6578_v51  ;;  %v4929_v9 = vadd.f32 %v4928_v2, %v4927_v27  ;;  %v4993_v33 = vadd.f32 %v4992_v4, %v4991_v34  ;;  %v5950_v51 = vld [vmem:[%s6084_s26 + $0x300] ss:$52 sps:$4 sm:$0xff]  }
 0x176   : > { %3179 = vmatmul.mubr.bf16.gmra.mrb[168].mxu0 %v5943_v57  ;;  %3276 = vmatmul.mubr.bf16.gmra.mrb[168].mxu1 %v5944_v24 }
 0x177   : > { %v6718_v39 = vadd.f32 %v4929_v9, %v2516_v56  ;;  %v6721_v48 = vadd.f32 %v4993_v33, %v6582_v7  ;;  %3186 = vmatprep.mubr.bf16.mxu0 %v5945_v50  ;;  %3283 = vmatprep.mubr.bf16.mxu1 %v5947_v61  ;;  %v2524_v7 = vadd.f32 %v6471_v30, %v6518_v16  ;;  %v5955_v50 = vld [vmem:[%s6084_s26 + $0x98] ss:$52 sps:$4 sm:$0xff]   ;;  %v5956_v33 = vld [vmem:[%s6084_s26 + $0x3d4] ss:$52 sps:$4 sm:$0xff]  }
 0x178   : > { %v2529_v61 = vadd.f32 %v6477_v38, %v6518_v16 }
 0x179   : > { %v4930_v53 = vpop.f32.mrb[64].mxu1  ;;  %v4994_v12 = vpop.f32.mrb[64].mxu0 }
 0x17a   : > { %v4931_v19 = vpop.f32.mrb[65].mxu1  ;;  %v4995_v25 = vpop.f32.mrb[65].mxu0 }
 0x17b   : > { %v4932_v26 = vadd.f32 %v4931_v19, %v4930_v53  ;;  %v4996_v42 = vadd.f32 %v4995_v25, %v4994_v12  ;;  %v4933_v35 = vpop.f32.mrb[66].mxu1  ;;  %v4997_v63 = vpop.f32.mrb[66].mxu0  ;;  %v5958_v53 = vld [vmem:[%s6084_s26 + $0x100] ss:$52 sps:$4 sm:$0xff]  }
 0x17c   : > { %v4934_v44 = vpop.f32.mrb[67].mxu1  ;;  %v4998_v45 = vpop.f32.mrb[67].mxu0 }
 0x17d   : > { %v6731_v31 = vadd.f32 %v4932_v26, %v2521_v18  ;;  %v6734_v57 = vadd.f32 %v4996_v42, %v6594_v13  ;;  %v4935_v21 = vadd.f32 %v4934_v44, %v4933_v35  ;;  %v4999_v24 = vadd.f32 %v4998_v45, %v4997_v63  ;;  %v5954_v13 = vld [vmem:[%s6084_s26 + $0x368] ss:$52 sps:$4 sm:$0xff]   ;;  %v5959_v63 = vld [vmem:[%s6084_s26 + $0x3d0] ss:$52 sps:$4 sm:$0xff]  }
 0x17e   : > { %3187 = vmatmul.mubr.bf16.gmra.mrb[172].mxu0 %v5949_v3  ;;  %3284 = vmatmul.mubr.bf16.gmra.mrb[172].mxu1 %v5950_v51 }
 0x17f   : > { %v6736_v22 = vadd.f32 %v4935_v21, %v2524_v7  ;;  %v6739_v30 = vadd.f32 %v4999_v24, %v6598_v28  ;;  %3291 = vmatprep.mubr.bf16.mxu1 %v5951_v0  ;;  %5460 = vmatprep.mubr.msk.bf16.mxu0 %vm2341_vm0, %v5953_v17  ;;  %v2532_v28 = vadd.f32 %v6486_v47, %v6518_v16  ;;  %v5960_v0 = vld [vmem:[%s6084_s26 + $0x168] ss:$52 sps:$4 sm:$0xff]  }
 0x180   : > { %v2537_v17 = vadd.f32 %v6493_v55, %v6518_v16  ;;  %v5961_v24 = vld [vmem:[%s6084_s26 + $0x43c] ss:$52 sps:$4 sm:$0xff]  }
 0x181   : > { %v4936_v58 = vpop.f32.mrb[68].mxu1  ;;  %v5000_v59 = vpop.f32.mrb[68].mxu0 }
 0x182   : > { %v4937_v27 = vpop.f32.mrb[69].mxu1  ;;  %v5001_v34 = vpop.f32.mrb[69].mxu0 }
 0x183   : > { %v4938_v56 = vadd.f32 %v4937_v27, %v4936_v58  ;;  %v5002_v2 = vadd.f32 %v5001_v34, %v5000_v59  ;;  %v4939_v4 = vpop.f32.mrb[70].mxu1  ;;  %v5003_v9 = vpop.f32.mrb[70].mxu0  ;;  %v5963_v58 = vld [vmem:[%s6084_s26 + $0x1d0] ss:$52 sps:$4 sm:$0xff]  }
 0x184   : > { %v4940_v12 = vpop.f32.mrb[71].mxu1  ;;  %v5004_v19 = vpop.f32.mrb[71].mxu0 }
 0x185   : > { %v6750_v25 = vadd.f32 %v4938_v56, %v2529_v61  ;;  %v6753_v3 = vadd.f32 %v5002_v2, %v6610_v46  ;;  %v4941_v51 = vadd.f32 %v4940_v12, %v4939_v4  ;;  %v5005_v38 = vadd.f32 %v5004_v19, %v5003_v9  ;;  %v5964_v9 = vld [vmem:[%s6084_s26 + $0x438] ss:$52 sps:$4 sm:$0xff]  }
 0x186   : > { %3292 = vmatmul.mubr.bf16.gmra.mrb[176].mxu1 %v5954_v13  ;;  %5461 = vmatmul.mubr.msk.bf16.vlgmr.msra.gmra.mrb[176].mxu0 %vm2341_vm0, %v5955_v50 }
 0x187   : > { %v6756_v18 = vadd.f32 %v4941_v51, %v2532_v28  ;;  %v6759_v47 = vadd.f32 %v5005_v38, %v6614_v52  ;;  %3299 = vmatprep.mubr.bf16.mxu1 %v5956_v33  ;;  %5464 = vmatprep.mubr.msk.bf16.mxu0 %vm2341_vm0, %v5958_v53  ;;  %v2540_v52 = vadd.f32 %v6499_v62, %v6518_v16  ;;  %v5965_v33 = vld [vmem:[%s6084_s26 + $0x238] ss:$52 sps:$4 sm:$0xff]  }
 0x188   : > { %v2545_v53 = vadd.f32 %v6505_v6, %v6518_v16  ;;  %v5966_v38 = vld [vmem:[%s6084_s26 + $0x4a4] ss:$52 sps:$4 sm:$0xff]  }
 0x189   : > { %v4942_v26 = vpop.f32.mrb[72].mxu1  ;;  %v5006_v42 = vpop.f32.mrb[72].mxu0 }
 0x18a   : > { %v4943_v35 = vpop.f32.mrb[73].mxu1  ;;  %v5007_v46 = vpop.f32.mrb[73].mxu0 }
 0x18b   : > { %v4944_v7 = vadd.f32 %v4943_v35, %v4942_v26  ;;  %v5008_v44 = vadd.f32 %v5007_v46, %v5006_v42  ;;  %v4945_v45 = vpop.f32.mrb[74].mxu1  ;;  %v5009_v21 = vpop.f32.mrb[74].mxu0  ;;  %v5968_v26 = vld [vmem:[%s6084_s26 + $0x2a0] ss:$52 sps:$4 sm:$0xff]  }
 0x18c   : > { %v4946_v59 = vpop.f32.mrb[75].mxu1  ;;  %v5010_v27 = vpop.f32.mrb[75].mxu0 }
 0x18d   : > { %v6770_v34 = vadd.f32 %v4944_v7, %v2537_v17  ;;  %v6773_v13 = vadd.f32 %v5008_v44, %v6626_v10  ;;  %v4947_v50 = vadd.f32 %v4946_v59, %v4945_v45  ;;  %v5011_v55 = vadd.f32 %v5010_v27, %v5009_v21  ;;  %v5969_v45 = vld [vmem:[%s6084_s26 + $0x4a0] ss:$52 sps:$4 sm:$0xff]   ;;  %v5970_v21 = vld [vmem:[%s6084_s26 + $0x308] ss:$52 sps:$4 sm:$0xff]  }
 0x18e   : > { %3300 = vmatmul.mubr.bf16.gmra.mrb[180].mxu1 %v5959_v63  ;;  %5465 = vmatmul.mubr.msk.bf16.gmra.mrb[180].mxu0 %vm2341_vm0, %v5960_v0  ;;  %v5971_v27 = vld [vmem:[%s6084_s26 + $0x50c] ss:$52 sps:$4 sm:$0xff]  }
 0x18f   : > { %v6776_v61 = vadd.f32 %v4947_v50, %v2540_v52  ;;  %v6779_v62 = vadd.f32 %v5011_v55, %v6630_v11  ;;  %3307 = vmatprep.mubr.bf16.mxu1 %v5961_v24  ;;  %5468 = vmatprep.mubr.msk.bf16.mxu0 %vm2341_vm0, %v5963_v58  ;;  %v2548_v11 = vadd.f32 %v6511_v14, %v6518_v16  ;;  %v5973_v50 = vld [vmem:[%s6084_s26 + $0x370] ss:$52 sps:$4 sm:$0xff]  }
 0x191   : > { %v4948_v56 = vpop.f32.mrb[76].mxu1  ;;  %v5012_v2 = vpop.f32.mrb[76].mxu0 }
 0x192   : > { %v4949_v4 = vpop.f32.mrb[77].mxu1  ;;  %v5013_v10 = vpop.f32.mrb[77].mxu0 }
 0x193   : > { %v4950_v28 = vadd.f32 %v4949_v4, %v4948_v56  ;;  %v5014_v12 = vadd.f32 %v5013_v10, %v5012_v2  ;;  %v4951_v19 = vpop.f32.mrb[78].mxu1  ;;  %v5015_v51 = vpop.f32.mrb[78].mxu0 }
 0x194   : > { %v4952_v42 = vpop.f32.mrb[79].mxu1  ;;  %v5016_v35 = vpop.f32.mrb[79].mxu0 }
 0x195   : > { %v6790_v46 = vadd.f32 %v4950_v28, %v2545_v53  ;;  %v6793_v63 = vadd.f32 %v5014_v12, %v6642_v49  ;;  %v4953_v0 = vadd.f32 %v4952_v42, %v4951_v19  ;;  %v5017_v6 = vadd.f32 %v5016_v35, %v5015_v51  ;;  %v5974_v12 = vld [vmem:[%s6084_s26 + $0x508] ss:$52 sps:$4 sm:$0xff]   ;;  %v5975_v19 = vld [vmem:[%s6084_s26 + $0x3d8] ss:$52 sps:$4 sm:$0xff]   ;;  %v5978_v35 = vld [vmem:[%s6084_s26 + $0x440] ss:$52 sps:$4 sm:$0xff]  }
 0x196   : > { %3308 = vmatmul.mubr.bf16.gmra.mrb[184].mxu1 %v5964_v9  ;;  %5469 = vmatmul.mubr.msk.bf16.gmra.mrb[184].mxu0 %vm2341_vm0, %v5965_v33  ;;  %v5976_v42 = vld [vmem:[%s6084_s26 + $0x574] ss:$52 sps:$4 sm:$0xff]  }
 0x197   : > { %v6796_v17 = vadd.f32 %v4953_v0, %v2548_v11  ;;  %v6799_v14 = vadd.f32 %v5017_v6, %v6646_v41  ;;  %3315 = vmatprep.mubr.bf16.mxu1 %v5966_v38  ;;  %5472 = vmatprep.mubr.msk.bf16.mxu0 %vm2341_vm0, %v5968_v26 }
 0x199   : > { %v5018_v16 = vpop.f32.mrb[80].mxu0  ;;  %v5082_v7 = vpop.f32.mrb[80].mxu1 }
 0x19a   : > { %v5019_v44 = vpop.f32.mrb[81].mxu0  ;;  %v5083_v49 = vpop.f32.mrb[81].mxu1 }
 0x19b   : > { %v5020_v24 = vadd.f32 %v5019_v44, %v5018_v16  ;;  %v5084_v58 = vadd.f32 %v5083_v49, %v5082_v7  ;;  %v5021_v52 = vpop.f32.mrb[82].mxu0  ;;  %v5085_v59 = vpop.f32.mrb[82].mxu1 }
 0x19c   : > { %v5022_v55 = vpop.f32.mrb[83].mxu0  ;;  %v5086_v56 = vpop.f32.mrb[83].mxu1 }
 0x19d   : > { %v6807_v41 = vadd.f32 %v5020_v24, %v6656_v20  ;;  %v6810_v2 = vadd.f32 %v5084_v58, %v6659_v23  ;;  %v5023_v4 = vadd.f32 %v5022_v55, %v5021_v52  ;;  %v5087_v10 = vadd.f32 %v5086_v56, %v5085_v59  ;;  %v5979_v58 = vld [vmem:[%s6084_s26 + $0x570] ss:$52 sps:$4 sm:$0xff]  }
 0x19e   : > { %3316 = vmatmul.mubr.bf16.gmra.mrb[188].mxu1 %v5969_v45  ;;  %5473 = vmatmul.mubr.msk.bf16.gmra.mrb[188].mxu0 %vm2341_vm0, %v5970_v21  ;;  %v5983_v55 = vld [vmem:[%s6084_s26 + $0x510] ss:$52 sps:$4 sm:$0xff]  }
 0x19f   : > { %v6814_v9 = vadd.f32 %v5023_v4, %v6661_v29  ;;  %v6817_v33 = vadd.f32 %v5087_v10, %v6664_v32  ;;  %3323 = vmatprep.mubr.bf16.mxu1 %v5971_v27  ;;  %5476 = vmatprep.mubr.msk.bf16.mxu0 %vm2341_vm0, %v5973_v50  ;;  %v5981_v50 = vld [vmem:[%s6084_s26 + $0x5dc] ss:$52 sps:$4 sm:$0xff]  }
 0x1a1   : > { %v5024_v20 = vpop.f32.mrb[84].mxu0  ;;  %v5088_v53 = vpop.f32.mrb[84].mxu1 }
 0x1a2   : > { %v5025_v23 = vpop.f32.mrb[85].mxu0  ;;  %v5089_v28 = vpop.f32.mrb[85].mxu1 }
 0x1a3   : > { %v5026_v51 = vadd.f32 %v5025_v23, %v5024_v20  ;;  %v5090_v38 = vadd.f32 %v5089_v28, %v5088_v53  ;;  %v5027_v26 = vpop.f32.mrb[86].mxu0  ;;  %v5091_v11 = vpop.f32.mrb[86].mxu1 }
 0x1a4   : > { %v5028_v29 = vpop.f32.mrb[87].mxu0  ;;  %v5092_v0 = vpop.f32.mrb[87].mxu1 }
 0x1a5   : > { %v6825_v32 = vadd.f32 %v5026_v51, %v6674_v60  ;;  %v6828_v6 = vadd.f32 %v5090_v38, %v6677_v1  ;;  %v5029_v16 = vadd.f32 %v5028_v29, %v5027_v26  ;;  %v5093_v7 = vadd.f32 %v5092_v0, %v5091_v11  ;;  %v5992_v60 = vld [vmem:[%s7349_s3 + $0x8] sm:$0xff]   ;;  %v5986_v0 = vld [vmem:[%s6084_s26 + $0x644] ss:$52 sps:$4 sm:$0xff]  }
 0x1a6   : > { %3324 = vmatmul.mubr.bf16.gmra.mrb[192].mxu1 %v5974_v12  ;;  %5477 = vmatmul.mubr.msk.bf16.gmra.mrb[192].mxu0 %vm2341_vm0, %v5975_v19  ;;  %v5984_v38 = vld [vmem:[%s6084_s26 + $0x5d8] ss:$52 sps:$4 sm:$0xff]  }
 0x1a7   : > { %v6832_v44 = vadd.f32 %v5029_v16, %v6679_v54  ;;  %v6835_v49 = vadd.f32 %v5093_v7, %v6682_v15  ;;  %3331 = vmatprep.mubr.bf16.mxu1 %v5976_v42  ;;  %5480 = vmatprep.mubr.msk.bf16.mxu0 %vm2341_vm0, %v5978_v35  ;;  %v5980_v54 = vld [vmem:[%s6084_s26 + $0x4a8] ss:$52 sps:$4 sm:$0xff]   ;;  %v5985_v26 = vld [vmem:[%s6084_s26 + $0x578] ss:$52 sps:$4 sm:$0xff]   ;;  %v5988_v16 = vld [vmem:[%s6084_s26 + $0x5e0] ss:$52 sps:$4 sm:$0xff]  }
 0x1a8   : > { %5494 = vmatprep.subr.bf16.mxu1 %v5992_v60 }
 0x1a9   : > { %v5030_v1 = vpop.f32.mrb[88].mxu0  ;;  %v5094_v45 = vpop.f32.mrb[88].mxu1  ;;  %5495 = vmatpush3.bf16.msra.mxu1 %v5992_v60 }
 0x1aa   : > { %v5031_v21 = vpop.f32.mrb[89].mxu0  ;;  %v5095_v24 = vpop.f32.mrb[89].mxu1 }
 0x1ab   : > { %v5032_v52 = vadd.f32 %v5031_v21, %v5030_v1  ;;  %v5096_v15 = vadd.f32 %v5095_v24, %v5094_v45  ;;  %v5033_v59 = vpop.f32.mrb[90].mxu0  ;;  %v5097_v27 = vpop.f32.mrb[90].mxu1 }
 0x1ac   : > { %v5034_v56 = vpop.f32.mrb[91].mxu0  ;;  %v5098_v4 = vpop.f32.mrb[91].mxu1 }
 0x1ad   : > { %v6846_v10 = vadd.f32 %v5032_v52, %v6695_v36  ;;  %v6849_v20 = vadd.f32 %v5096_v15, %v6698_v40  ;;  %v5035_v53 = vadd.f32 %v5034_v56, %v5033_v59  ;;  %v5099_v23 = vadd.f32 %v5098_v4, %v5097_v27  ;;  %v5990_v15 = vld [vmem:[%s6084_s26 + $0x648] ss:$52 sps:$4 sm:$0xff]  }
 0x1ae   : > { %3332 = vmatmul.mubr.bf16.gmra.mrb[196].mxu1 %v5979_v58  ;;  %5481 = vmatmul.mubr.msk.bf16.gmra.mrb[196].mxu0 %vm2341_vm0, %v5980_v54 }
 0x1af   : > { %v6853_v28 = vadd.f32 %v5035_v53, %v6700_v37  ;;  %v6856_v12 = vadd.f32 %v5099_v23, %v6703_v43  ;;  %3339 = vmatprep.mubr.bf16.mxu1 %v5981_v50  ;;  %5484 = vmatprep.mubr.msk.bf16.mxu0 %vm2341_vm0, %v5983_v55 }
 0x1b1   : > { %v5036_v36 = vpop.f32.mrb[92].mxu0  ;;  %v5100_v19 = vpop.f32.mrb[92].mxu1 }
 0x1b2   : > { %v5037_v40 = vpop.f32.mrb[93].mxu0  ;;  %v5101_v51 = vpop.f32.mrb[93].mxu1 }
 0x1b3   : > { %v5038_v11 = vadd.f32 %v5037_v40, %v5036_v36  ;;  %v5102_v42 = vadd.f32 %v5101_v51, %v5100_v19  ;;  %v5039_v35 = vpop.f32.mrb[94].mxu0  ;;  %v5103_v29 = vpop.f32.mrb[94].mxu1 }
 0x1b4   : > { %v5040_v37 = vpop.f32.mrb[95].mxu0  ;;  %v5104_v7 = vpop.f32.mrb[95].mxu1 }
 0x1b5   : > { %v6864_v43 = vadd.f32 %v5038_v11, %v6713_v5  ;;  %v6867_v60 = vadd.f32 %v5102_v42, %v6716_v8  ;;  %v5041_v1 = vadd.f32 %v5040_v37, %v5039_v35  ;;  %v5105_v45 = vadd.f32 %v5104_v7, %v5103_v29  ;;  %v5989_v8 = vld [vmem:[%s6084_s26 + $0x640] ss:$52 sps:$4 sm:$0xff]  }
 0x1b6   : > { %3340 = vmatmul.mubr.bf16.gmra.mrb[200].mxu1 %v5984_v38  ;;  %5485 = vmatmul.mubr.msk.bf16.gmra.mrb[200].mxu0 %vm2341_vm0, %v5985_v26 }
 0x1b7   : > { %v6871_v21 = vadd.f32 %v5041_v1, %v6718_v39  ;;  %v6874_v24 = vadd.f32 %v5105_v45, %v6721_v48  ;;  %3347 = vmatprep.mubr.bf16.mxu1 %v5986_v0  ;;  %5488 = vmatprep.mubr.msk.bf16.mxu0 %vm2341_vm0, %v5988_v16 }
 0x1b9   : > { %v5042_v58 = vpop.f32.mrb[96].mxu0  ;;  %v5106_v5 = vpop.f32.mrb[96].mxu1 }
 0x1ba   : > { %v5043_v54 = vpop.f32.mrb[97].mxu0  ;;  %v5107_v52 = vpop.f32.mrb[97].mxu1 }
 0x1bb   : > { %v5044_v59 = vadd.f32 %v5043_v54, %v5042_v58  ;;  %v5108_v27 = vadd.f32 %v5107_v52, %v5106_v5  ;;  %v5045_v50 = vpop.f32.mrb[98].mxu0  ;;  %v5109_v55 = vpop.f32.mrb[98].mxu1 }
 0x1bc   : > { %v5046_v56 = vpop.f32.mrb[99].mxu0  ;;  %v5110_v4 = vpop.f32.mrb[99].mxu1 }
 0x1bd   : > { %v6880_v39 = vadd.f32 %v5044_v59, %v6731_v31  ;;  %v6883_v48 = vadd.f32 %v5108_v27, %v6734_v57  ;;  %v5047_v53 = vadd.f32 %v5046_v56, %v5045_v50  ;;  %v5111_v23 = vadd.f32 %v5110_v4, %v5109_v55 }
 0x1be   : > { %3348 = vmatmul.mubr.bf16.gmra.mrb[204].mxu1 %v5989_v8  ;;  %5489 = vmatmul.mubr.msk.bf16.gmra.mrb[204].mxu0 %vm2341_vm0, %v5990_v15 }
 0x1bf   : > { %v6887_v36 = vadd.f32 %v5047_v53, %v6736_v22  ;;  %v6890_v19 = vadd.f32 %v5111_v23, %v6739_v30 }
 0x1c1   : > { %v5048_v40 = vpop.f32.mrb[100].mxu0  ;;  %v5112_v51 = vpop.f32.mrb[100].mxu1 }
 0x1c2   : > { %v5049_v38 = vpop.f32.mrb[101].mxu0  ;;  %v5113_v26 = vpop.f32.mrb[101].mxu1 }
 0x1c3   : > { %v5050_v31 = vadd.f32 %v5049_v38, %v5048_v40  ;;  %v5114_v11 = vadd.f32 %v5113_v26, %v5112_v51  ;;  %v5051_v42 = vpop.f32.mrb[102].mxu0  ;;  %v5115_v57 = vpop.f32.mrb[102].mxu1 }
 0x1c4   : > { %v5052_v35 = vpop.f32.mrb[103].mxu0  ;;  %v5116_v29 = vpop.f32.mrb[103].mxu1 }
 0x1c5   : > { %v6893_v0 = vadd.f32 %v5050_v31, %v6750_v25  ;;  %v6896_v16 = vadd.f32 %v5114_v11, %v6753_v3  ;;  %v5053_v22 = vadd.f32 %v5052_v35, %v5051_v42  ;;  %v5117_v37 = vadd.f32 %v5116_v29, %v5115_v57 }
 0x1c7   : > { %v6899_v30 = vadd.f32 %v5053_v22, %v6756_v18  ;;  %v6902_v7 = vadd.f32 %v5117_v37, %v6759_v47 }
 0x1c9   : > { %v5054_v1 = vpop.f32.mrb[104].mxu0  ;;  %v5118_v45 = vpop.f32.mrb[104].mxu1 }
 0x1ca   : > { %v5055_v58 = vpop.f32.mrb[105].mxu0  ;;  %v5119_v5 = vpop.f32.mrb[105].mxu1 }
 0x1cb   : > { %v5056_v54 = vadd.f32 %v5055_v58, %v5054_v1  ;;  %v5120_v52 = vadd.f32 %v5119_v5, %v5118_v45  ;;  %v5057_v8 = vpop.f32.mrb[106].mxu0  ;;  %v5121_v25 = vpop.f32.mrb[106].mxu1 }
 0x1cc   : > { %v5058_v15 = vpop.f32.mrb[107].mxu0  ;;  %v5122_v59 = vpop.f32.mrb[107].mxu1 }
 0x1cd   : > { %v6905_v3 = vadd.f32 %v5056_v54, %v6770_v34  ;;  %v6908_v27 = vadd.f32 %v5120_v52, %v6773_v13  ;;  %v5059_v18 = vadd.f32 %v5058_v15, %v5057_v8  ;;  %v5123_v50 = vadd.f32 %v5122_v59, %v5121_v25 }
 0x1cf   : > { %v6911_v47 = vadd.f32 %v5059_v18, %v6776_v61  ;;  %v6914_v55 = vadd.f32 %v5123_v50, %v6779_v62 }
 0x1d1   : > { %v5060_v56 = vpop.f32.mrb[108].mxu0  ;;  %v5124_v4 = vpop.f32.mrb[108].mxu1 }
 0x1d2   : > { %v5061_v53 = vpop.f32.mrb[109].mxu0  ;;  %v5125_v23 = vpop.f32.mrb[109].mxu1 }
 0x1d3   : > { %v5062_v40 = vadd.f32 %v5061_v53, %v5060_v56  ;;  %v5126_v51 = vadd.f32 %v5125_v23, %v5124_v4  ;;  %v5063_v38 = vpop.f32.mrb[110].mxu0  ;;  %v5127_v34 = vpop.f32.mrb[110].mxu1 }
 0x1d4   : > { %v5064_v26 = vpop.f32.mrb[111].mxu0  ;;  %v5128_v31 = vpop.f32.mrb[111].mxu1 }
 0x1d5   : > { %v6917_v13 = vadd.f32 %v5062_v40, %v6790_v46  ;;  %v6920_v11 = vadd.f32 %v5126_v51, %v6793_v63  ;;  %v5065_v61 = vadd.f32 %v5064_v26, %v5063_v38  ;;  %v5129_v42 = vadd.f32 %v5128_v31, %v5127_v34 }
 0x1d7   : > { %v6923_v62 = vadd.f32 %v5065_v61, %v6796_v17  ;;  %v6926_v57 = vadd.f32 %v5129_v42, %v6799_v14 }
 0x1d9   : > { %v5130_v35 = vpop.f32.mrb[112].mxu1  ;;  %v5194_v29 = vpop.f32.mrb[112].mxu0 }
 0x1da   : > { %v5131_v22 = vpop.f32.mrb[113].mxu1  ;;  %v5195_v37 = vpop.f32.mrb[113].mxu0 }
 0x1db   : > { %v5132_v1 = vadd.f32 %v5131_v22, %v5130_v35  ;;  %v5196_v45 = vadd.f32 %v5195_v37, %v5194_v29  ;;  %v5133_v58 = vpop.f32.mrb[114].mxu1  ;;  %v5197_v46 = vpop.f32.mrb[114].mxu0 }
 0x1dc   : > { %v5134_v5 = vpop.f32.mrb[115].mxu1  ;;  %v5198_v54 = vpop.f32.mrb[115].mxu0 }
 0x1dd   : > { %v6929_v63 = vadd.f32 %v5132_v1, %v6807_v41  ;;  %v6932_v52 = vadd.f32 %v5196_v45, %v6810_v2  ;;  %v5135_v17 = vadd.f32 %v5134_v5, %v5133_v58  ;;  %v5199_v8 = vadd.f32 %v5198_v54, %v5197_v46 }
 0x1df   : > { %v6935_v14 = vadd.f32 %v5135_v17, %v6814_v9  ;;  %v6938_v25 = vadd.f32 %v5199_v8, %v6817_v33 }
 0x1e1   : > { %v5136_v15 = vpop.f32.mrb[116].mxu1  ;;  %v5200_v59 = vpop.f32.mrb[116].mxu0 }
 0x1e2   : > { %v5137_v18 = vpop.f32.mrb[117].mxu1  ;;  %v5201_v50 = vpop.f32.mrb[117].mxu0 }
 0x1e3   : > { %v5138_v56 = vadd.f32 %v5137_v18, %v5136_v15  ;;  %v5202_v4 = vadd.f32 %v5201_v50, %v5200_v59  ;;  %v5139_v53 = vpop.f32.mrb[118].mxu1  ;;  %v5203_v41 = vpop.f32.mrb[118].mxu0 }
 0x1e4   : > { %v5140_v23 = vpop.f32.mrb[119].mxu1  ;;  %v5204_v40 = vpop.f32.mrb[119].mxu0 }
 0x1e5   : > { %v6941_v2 = vadd.f32 %v5138_v56, %v6825_v32  ;;  %v6944_v51 = vadd.f32 %v5202_v4, %v6828_v6  ;;  %v5141_v9 = vadd.f32 %v5140_v23, %v5139_v53  ;;  %v5205_v38 = vadd.f32 %v5204_v40, %v5203_v41 }
 0x1e7   : > { %v6947_v33 = vadd.f32 %v5141_v9, %v6832_v44  ;;  %v6950_v34 = vadd.f32 %v5205_v38, %v6835_v49 }
 0x1e9   : > { %v5142_v26 = vpop.f32.mrb[120].mxu1  ;;  %v5206_v31 = vpop.f32.mrb[120].mxu0 }
 0x1ea   : > { %v5143_v61 = vpop.f32.mrb[121].mxu1  ;;  %v5207_v42 = vpop.f32.mrb[121].mxu0 }
 0x1eb   : > { %v5144_v35 = vadd.f32 %v5143_v61, %v5142_v26  ;;  %v5208_v29 = vadd.f32 %v5207_v42, %v5206_v31  ;;  %v5145_v22 = vpop.f32.mrb[122].mxu1  ;;  %v5209_v32 = vpop.f32.mrb[122].mxu0 }
 0x1ec   : > { %v5146_v37 = vpop.f32.mrb[123].mxu1  ;;  %v5210_v1 = vpop.f32.mrb[123].mxu0 }
 0x1ed   : > { %v6953_v6 = vadd.f32 %v5144_v35, %v6846_v10  ;;  %v6956_v45 = vadd.f32 %v5208_v29, %v6849_v20  ;;  %v5147_v44 = vadd.f32 %v5146_v37, %v5145_v22  ;;  %v5211_v58 = vadd.f32 %v5210_v1, %v5209_v32 }
 0x1ef   : > { %v6959_v49 = vadd.f32 %v5147_v44, %v6853_v28  ;;  %v6962_v46 = vadd.f32 %v5211_v58, %v6856_v12 }
 0x1f1   : > { %v5148_v5 = vpop.f32.mrb[124].mxu1  ;;  %v5212_v54 = vpop.f32.mrb[124].mxu0 }
 0x1f2   : > { %v5149_v17 = vpop.f32.mrb[125].mxu1  ;;  %v5213_v8 = vpop.f32.mrb[125].mxu0 }
 0x1f3   : > { %v5150_v15 = vadd.f32 %v5149_v17, %v5148_v5  ;;  %v5214_v59 = vadd.f32 %v5213_v8, %v5212_v54  ;;  %v5151_v18 = vpop.f32.mrb[126].mxu1  ;;  %v5215_v10 = vpop.f32.mrb[126].mxu0 }
 0x1f4   : > { %v5152_v50 = vpop.f32.mrb[127].mxu1  ;;  %v5216_v56 = vpop.f32.mrb[127].mxu0 }
 0x1f5   : > { %v6965_v20 = vadd.f32 %v5150_v15, %v6864_v43  ;;  %v6968_v4 = vadd.f32 %v5214_v59, %v6867_v60  ;;  %v5153_v28 = vadd.f32 %v5152_v50, %v5151_v18  ;;  %v5217_v53 = vadd.f32 %v5216_v56, %v5215_v10 }
 0x1f7   : > { %v6971_v12 = vadd.f32 %v5153_v28, %v6871_v21  ;;  %v6974_v41 = vadd.f32 %v5217_v53, %v6874_v24 }
 0x1f9   : > { %v5154_v23 = vpop.f32.mrb[128].mxu1  ;;  %v5218_v40 = vpop.f32.mrb[128].mxu0 }
 0x1fa   : > { %v5155_v9 = vpop.f32.mrb[129].mxu1  ;;  %v5219_v38 = vpop.f32.mrb[129].mxu0 }
 0x1fb   : > { %v5156_v26 = vadd.f32 %v5155_v9, %v5154_v23  ;;  %v5220_v31 = vadd.f32 %v5219_v38, %v5218_v40  ;;  %v5157_v61 = vpop.f32.mrb[130].mxu1  ;;  %v5221_v43 = vpop.f32.mrb[130].mxu0 }
 0x1fc   : > { %v5158_v42 = vpop.f32.mrb[131].mxu1  ;;  %v5222_v35 = vpop.f32.mrb[131].mxu0 }
 0x1fd   : > { %v6977_v60 = vadd.f32 %v5156_v26, %v6880_v39  ;;  %v6980_v29 = vadd.f32 %v5220_v31, %v6883_v48  ;;  %v5159_v21 = vadd.f32 %v5158_v42, %v5157_v61  ;;  %v5223_v22 = vadd.f32 %v5222_v35, %v5221_v43 }
 0x1ff   : > { %v6983_v24 = vadd.f32 %v5159_v21, %v6887_v36  ;;  %v6986_v32 = vadd.f32 %v5223_v22, %v6890_v19 }
 0x201   : > { %v5160_v37 = vpop.f32.mrb[132].mxu1  ;;  %v5224_v1 = vpop.f32.mrb[132].mxu0 }
 0x202   : > { %v5161_v44 = vpop.f32.mrb[133].mxu1  ;;  %v5225_v58 = vpop.f32.mrb[133].mxu0 }
 0x203   : > { %v5162_v5 = vadd.f32 %v5161_v44, %v5160_v37  ;;  %v5226_v54 = vadd.f32 %v5225_v58, %v5224_v1  ;;  %v5163_v17 = vpop.f32.mrb[134].mxu1  ;;  %v5227_v39 = vpop.f32.mrb[134].mxu0 }
 0x204   : > { %v5164_v8 = vpop.f32.mrb[135].mxu1  ;;  %v5228_v15 = vpop.f32.mrb[135].mxu0 }
 0x205   : > { %v6989_v48 = vadd.f32 %v5162_v5, %v6893_v0  ;;  %v6992_v59 = vadd.f32 %v5226_v54, %v6896_v16  ;;  %v5165_v36 = vadd.f32 %v5164_v8, %v5163_v17  ;;  %v5229_v18 = vadd.f32 %v5228_v15, %v5227_v39 }
 0x207   : > { %v6995_v19 = vadd.f32 %v5165_v36, %v6899_v30  ;;  %v6998_v10 = vadd.f32 %v5229_v18, %v6902_v7 }
 0x209   : > { %v5166_v50 = vpop.f32.mrb[136].mxu1  ;;  %v5230_v56 = vpop.f32.mrb[136].mxu0 }
 0x20a   : > { %v5167_v28 = vpop.f32.mrb[137].mxu1  ;;  %v5231_v53 = vpop.f32.mrb[137].mxu0 }
 0x20b   : > { %v5168_v23 = vadd.f32 %v5167_v28, %v5166_v50  ;;  %v5232_v40 = vadd.f32 %v5231_v53, %v5230_v56  ;;  %v5169_v9 = vpop.f32.mrb[138].mxu1  ;;  %v5233_v0 = vpop.f32.mrb[138].mxu0 }
 0x20c   : > { %v5170_v38 = vpop.f32.mrb[139].mxu1  ;;  %v5234_v26 = vpop.f32.mrb[139].mxu0 }
 0x20d   : > { %v7001_v16 = vadd.f32 %v5168_v23, %v6905_v3  ;;  %v7004_v31 = vadd.f32 %v5232_v40, %v6908_v27  ;;  %v5171_v30 = vadd.f32 %v5170_v38, %v5169_v9  ;;  %v5235_v61 = vadd.f32 %v5234_v26, %v5233_v0  ;;  %v5993_v38 = vld [vmem:[%s7351_s5] sm:$0xff]  }
 0x20e   : > { %5528 = vmatprep.subr.bf16.mxu0 %v5993_v38 }
 0x20f   : > { %v7007_v7 = vadd.f32 %v5171_v30, %v6911_v47  ;;  %v7010_v43 = vadd.f32 %v5235_v61, %v6914_v55  ;;  %5529 = vmatpush3.bf16.msra.mxu0 %v5993_v38 }
 0x211   : > { %v5172_v42 = vpop.f32.mrb[140].mxu1  ;;  %v5236_v35 = vpop.f32.mrb[140].mxu0 }
 0x212   : > { %v5173_v21 = vpop.f32.mrb[141].mxu1  ;;  %v5237_v22 = vpop.f32.mrb[141].mxu0 }
 0x213   : > { %v5174_v37 = vadd.f32 %v5173_v21, %v5172_v42  ;;  %v5238_v1 = vadd.f32 %v5237_v22, %v5236_v35  ;;  %v5175_v44 = vpop.f32.mrb[142].mxu1  ;;  %v5239_v3 = vpop.f32.mrb[142].mxu0 }
 0x214   : > { %v5176_v58 = vpop.f32.mrb[143].mxu1  ;;  %v5240_v5 = vpop.f32.mrb[143].mxu0 }
 0x215   : > { %v7013_v27 = vadd.f32 %v5174_v37, %v6917_v13  ;;  %v7016_v54 = vadd.f32 %v5238_v1, %v6920_v11  ;;  %v5177_v47 = vadd.f32 %v5176_v58, %v5175_v44  ;;  %v5241_v17 = vadd.f32 %v5240_v5, %v5239_v3 }
 0x217   : > { %v7019_v55 = vadd.f32 %v5177_v47, %v6923_v62  ;;  %v7022_v39 = vadd.f32 %v5241_v17, %v6926_v57 }
 0x219   : > { %v5242_v8 = vpop.f32.mrb[144].mxu0  ;;  %v5306_v15 = vpop.f32.mrb[144].mxu1 }
 0x21a   : > { %v5243_v36 = vpop.f32.mrb[145].mxu0  ;;  %v5307_v18 = vpop.f32.mrb[145].mxu1 }
 0x21b   : > { %v5244_v50 = vadd.f32 %v5243_v36, %v5242_v8  ;;  %v5308_v56 = vadd.f32 %v5307_v18, %v5306_v15  ;;  %v5245_v28 = vpop.f32.mrb[146].mxu0  ;;  %v5309_v13 = vpop.f32.mrb[146].mxu1 }
 0x21c   : > { %v5246_v53 = vpop.f32.mrb[147].mxu0  ;;  %v5310_v23 = vpop.f32.mrb[147].mxu1 }
 0x21d   : > { %v7025_v11 = vadd.f32 %v5244_v50, %v6929_v63  ;;  %v5247_v40 = vadd.f32 %v5246_v53, %v5245_v28  ;;  %v5311_v9 = vadd.f32 %v5310_v23, %v5309_v13  ;;  %v7028_v62 = vadd.f32 %v5308_v56, %v6932_v52  ;;  %v5994_v63 = vld [vmem:[%s7351_s5 + $0x8] sm:$0xff]  }
 0x21e   : > { %5530 = vmatprep.subr.bf16.mxu0 %v5994_v63 }
 0x21f   : > { %v7031_v57 = vadd.f32 %v5247_v40, %v6935_v14  ;;  %v7034_v0 = vadd.f32 %v5311_v9, %v6938_v25  ;;  %5531 = vmatpush3.bf16.msra.mxu0 %v5994_v63 }
 0x221   : > { %v5248_v26 = vpop.f32.mrb[148].mxu0  ;;  %v5312_v30 = vpop.f32.mrb[148].mxu1 }
 0x222   : > { %v5249_v61 = vpop.f32.mrb[149].mxu0  ;;  %v5313_v52 = vpop.f32.mrb[149].mxu1 }
 0x223   : > { %v5250_v42 = vadd.f32 %v5249_v61, %v5248_v26  ;;  %v5314_v14 = vadd.f32 %v5313_v52, %v5312_v30  ;;  %v5251_v35 = vpop.f32.mrb[150].mxu0  ;;  %v5315_v21 = vpop.f32.mrb[150].mxu1 }
 0x224   : > { %v5252_v25 = vpop.f32.mrb[151].mxu0  ;;  %v5316_v22 = vpop.f32.mrb[151].mxu1 }
 0x225   : > { %v7043_v37 = vadd.f32 %v5250_v42, %v6941_v2  ;;  %v5253_v1 = vadd.f32 %v5252_v25, %v5251_v35  ;;  %v5317_v44 = vadd.f32 %v5316_v22, %v5315_v21  ;;  %v7046_v3 = vadd.f32 %v5314_v14, %v6944_v51 }
 0x227   : > { %v7049_v58 = vadd.f32 %v5253_v1, %v6947_v33  ;;  %v7052_v5 = vadd.f32 %v5317_v44, %v6950_v34 }
 0x229   : > { %v5254_v47 = vpop.f32.mrb[152].mxu0  ;;  %v5318_v17 = vpop.f32.mrb[152].mxu1 }
 0x22a   : > { %v5255_v8 = vpop.f32.mrb[153].mxu0  ;;  %v5319_v15 = vpop.f32.mrb[153].mxu1 }
 0x22b   : > { %v5256_v36 = vadd.f32 %v5255_v8, %v5254_v47  ;;  %v5320_v18 = vadd.f32 %v5319_v15, %v5318_v17  ;;  %v5257_v2 = vpop.f32.mrb[154].mxu0  ;;  %v5321_v50 = vpop.f32.mrb[154].mxu1 }
 0x22c   : > { %v5258_v56 = vpop.f32.mrb[155].mxu0  ;;  %v5322_v28 = vpop.f32.mrb[155].mxu1 }
 0x22d   : > { %v7055_v51 = vadd.f32 %v5256_v36, %v6953_v6  ;;  %v5259_v13 = vadd.f32 %v5258_v56, %v5257_v2  ;;  %v5323_v53 = vadd.f32 %v5322_v28, %v5321_v50  ;;  %v7058_v33 = vadd.f32 %v5320_v18, %v6956_v45 }
 0x22f   : > { %v7061_v34 = vadd.f32 %v5259_v13, %v6959_v49  ;;  %v7064_v23 = vadd.f32 %v5323_v53, %v6962_v46 }
 0x231   : > { %v5260_v40 = vpop.f32.mrb[156].mxu0  ;;  %v5324_v9 = vpop.f32.mrb[156].mxu1 }
 0x232   : > { %v5261_v38 = vpop.f32.mrb[157].mxu0  ;;  %v5325_v63 = vpop.f32.mrb[157].mxu1 }
 0x233   : > { %v5262_v26 = vadd.f32 %v5261_v38, %v5260_v40  ;;  %v5326_v30 = vadd.f32 %v5325_v63, %v5324_v9  ;;  %v5263_v61 = vpop.f32.mrb[158].mxu0  ;;  %v5327_v6 = vpop.f32.mrb[158].mxu1 }
 0x234   : > { %v5264_v52 = vpop.f32.mrb[159].mxu0  ;;  %v5328_v42 = vpop.f32.mrb[159].mxu1 }
 0x235   : > { %v7067_v14 = vadd.f32 %v5262_v26, %v6965_v20  ;;  %v5265_v45 = vadd.f32 %v5264_v52, %v5263_v61  ;;  %v5329_v35 = vadd.f32 %v5328_v42, %v5327_v6  ;;  %v7070_v49 = vadd.f32 %v5326_v30, %v6968_v4 }
 0x237   : > { %v7073_v46 = vadd.f32 %v5265_v45, %v6971_v12  ;;  %v7076_v21 = vadd.f32 %v5329_v35, %v6974_v41 }
 0x239   : > { %v5266_v25 = vpop.f32.mrb[160].mxu0  ;;  %v5330_v22 = vpop.f32.mrb[160].mxu1 }
 0x23a   : > { %v5267_v1 = vpop.f32.mrb[161].mxu0  ;;  %v5331_v44 = vpop.f32.mrb[161].mxu1 }
 0x23b   : > { %v5268_v47 = vadd.f32 %v5267_v1, %v5266_v25  ;;  %v5332_v17 = vadd.f32 %v5331_v44, %v5330_v22  ;;  %v5269_v8 = vpop.f32.mrb[162].mxu0  ;;  %v5333_v20 = vpop.f32.mrb[162].mxu1 }
 0x23c   : > { %v5270_v15 = vpop.f32.mrb[163].mxu0  ;;  %v5334_v36 = vpop.f32.mrb[163].mxu1 }
 0x23d   : > { %v7079_v18 = vadd.f32 %v5268_v47, %v6977_v60  ;;  %v5271_v4 = vadd.f32 %v5270_v15, %v5269_v8  ;;  %v5335_v2 = vadd.f32 %v5334_v36, %v5333_v20  ;;  %v7082_v12 = vadd.f32 %v5332_v17, %v6980_v29 }
 0x23f   : > { %v7085_v41 = vadd.f32 %v5271_v4, %v6983_v24  ;;  %v7088_v50 = vadd.f32 %v5335_v2, %v6986_v32 }
 0x241   : > { %v5272_v56 = vpop.f32.mrb[164].mxu0  ;;  %v5336_v28 = vpop.f32.mrb[164].mxu1 }
 0x242   : > { %v5273_v13 = vpop.f32.mrb[165].mxu0  ;;  %v5337_v53 = vpop.f32.mrb[165].mxu1 }
 0x243   : > { %v5274_v40 = vadd.f32 %v5273_v13, %v5272_v56  ;;  %v5338_v9 = vadd.f32 %v5337_v53, %v5336_v28  ;;  %v5275_v38 = vpop.f32.mrb[166].mxu0  ;;  %v5339_v60 = vpop.f32.mrb[166].mxu1 }
 0x244   : > { %v5276_v63 = vpop.f32.mrb[167].mxu0  ;;  %v5340_v26 = vpop.f32.mrb[167].mxu1 }
 0x245   : > { %v7091_v30 = vadd.f32 %v5274_v40, %v6989_v48  ;;  %v5277_v29 = vadd.f32 %v5276_v63, %v5275_v38  ;;  %v5341_v61 = vadd.f32 %v5340_v26, %v5339_v60  ;;  %v7094_v24 = vadd.f32 %v5338_v9, %v6992_v59 }
 0x247   : > { %v7097_v32 = vadd.f32 %v5277_v29, %v6995_v19  ;;  %v7100_v6 = vadd.f32 %v5341_v61, %v6998_v10 }
 0x249   : > { %v5278_v52 = vpop.f32.mrb[168].mxu0  ;;  %v5342_v42 = vpop.f32.mrb[168].mxu1 }
 0x24a   : > { %v5279_v45 = vpop.f32.mrb[169].mxu0  ;;  %v5343_v35 = vpop.f32.mrb[169].mxu1 }
 0x24b   : > { %v5280_v25 = vadd.f32 %v5279_v45, %v5278_v52  ;;  %v5344_v22 = vadd.f32 %v5343_v35, %v5342_v42  ;;  %v5281_v1 = vpop.f32.mrb[170].mxu0  ;;  %v5345_v48 = vpop.f32.mrb[170].mxu1 }
 0x24c   : > { %v5282_v44 = vpop.f32.mrb[171].mxu0  ;;  %v5346_v47 = vpop.f32.mrb[171].mxu1 }
 0x24d   : > { %v7103_v17 = vadd.f32 %v5280_v25, %v7001_v16  ;;  %v5283_v59 = vadd.f32 %v5282_v44, %v5281_v1  ;;  %v5347_v8 = vadd.f32 %v5346_v47, %v5345_v48  ;;  %v7106_v19 = vadd.f32 %v5344_v22, %v7004_v31 }
 0x24f   : > { %v7109_v10 = vadd.f32 %v5283_v59, %v7007_v7  ;;  %v7112_v20 = vadd.f32 %v5347_v8, %v7010_v43 }
 0x251   : > { %v5284_v15 = vpop.f32.mrb[172].mxu0  ;;  %v5348_v36 = vpop.f32.mrb[172].mxu1 }
 0x252   : > { %v5285_v4 = vpop.f32.mrb[173].mxu0  ;;  %v5349_v2 = vpop.f32.mrb[173].mxu1 }
 0x253   : > { %v5286_v56 = vadd.f32 %v5285_v4, %v5284_v15  ;;  %v5350_v28 = vadd.f32 %v5349_v2, %v5348_v36  ;;  %v5287_v13 = vpop.f32.mrb[174].mxu0  ;;  %v5351_v16 = vpop.f32.mrb[174].mxu1 }
 0x254   : > { %v5288_v53 = vpop.f32.mrb[175].mxu0  ;;  %v5352_v40 = vpop.f32.mrb[175].mxu1 }
 0x255   : > { %v7115_v9 = vadd.f32 %v5286_v56, %v7013_v27  ;;  %v5289_v31 = vadd.f32 %v5288_v53, %v5287_v13  ;;  %v5353_v38 = vadd.f32 %v5352_v40, %v5351_v16  ;;  %v7118_v7 = vadd.f32 %v5350_v28, %v7016_v54 }
 0x257   : > { %v7121_v43 = vadd.f32 %v5289_v31, %v7019_v55  ;;  %v7124_v60 = vadd.f32 %v5353_v38, %v7022_v39 }
 0x259   : > { %v5354_v63 = vpop.f32.mrb[176].mxu1  ;;  %v5462_v26 = vpop.f32.mrb[176].mxu0 }
 0x25a   : > { %v3399_v29 = vadd.f32 %v5462_v26, %v7046_v3  ;;  %v5355_v61 = vpop.f32.mrb[177].mxu1  ;;  %v3390_v52 = vpop.f32.mrb[177].mxu0 }
 0x25b   : > { %v5356_v42 = vadd.f32 %v5355_v61, %v5354_v63  ;;  %v3391_v27 = vadd.f32 %v3390_v52, %v7028_v62  ;;  %v5357_v45 = vpop.f32.mrb[178].mxu1  ;;  %v5463_v35 = vpop.f32.mrb[178].mxu0 }
 0x25c   : > { %v3402_v54 = vadd.f32 %v5463_v35, %v7052_v5  ;;  %v5358_v25 = vpop.f32.mrb[179].mxu1  ;;  %v3393_v22 = vpop.f32.mrb[179].mxu0  ;;  %v3519_v48 = vmax.f32 %v3399_v29, 0.0 }
 0x25d   : > { %v5359_v55 = vadd.f32 %v5358_v25, %v5357_v45  ;;  %v3394_v1 = vadd.f32 %v3393_v22, %v7034_v0  ;;  %v7131_v39 = vadd.f32 %v5356_v42, %v7025_v11  ;;  %v3517_v3 = vmax.f32 %v3391_v27, 0.0 }
 0x25e   : > { %v3520_v44 = vmax.f32 %v3402_v54, 0.0 }
 0x25f   : > { %v3518_v47 = vmax.f32 %v3394_v1, 0.0  ;;  %v7134_v59 = vadd.f32 %v5359_v55, %v7031_v57 }
 0x260   : > { %v3550_v62 = vpack.c.bf16 %v3520_v44, %v3519_v48 }
 0x261   : > { %v3549_v8 = vpack.c.bf16 %v3518_v47, %v3517_v3  ;;  %v5360_v15 = vpop.f32.mrb[180].mxu1  ;;  %v5466_v36 = vpop.f32.mrb[180].mxu0 }
 0x262   : > { %v3415_v5 = vadd.f32 %v5466_v36, %v7070_v49  ;;  %v5361_v4 = vpop.f32.mrb[181].mxu1  ;;  %v3406_v2 = vpop.f32.mrb[181].mxu0 }
 0x263   : > { %v5362_v56 = vadd.f32 %v5361_v4, %v5360_v15  ;;  %v3407_v0 = vadd.f32 %v3406_v2, %v7058_v33  ;;  %v5363_v11 = vpop.f32.mrb[182].mxu1  ;;  %v5467_v28 = vpop.f32.mrb[182].mxu0  ;;  %5496 = vmatprep.mubr.msk.bf16.mxu1 %vm2341_vm0, %v3549_v8 }
 0x264   : > { %v3418_v13 = vadd.f32 %v5467_v28, %v7076_v21  ;;  %v5364_v16 = vpop.f32.mrb[183].mxu1  ;;  %v3409_v57 = vpop.f32.mrb[183].mxu0  ;;  %5497 = vmatmul.mubr.msk.bf16.vlgmr.msra.gmra.mrb[208].mxu1 %vm2341_vm0, %v3550_v62  ;;  %v3523_v31 = vmax.f32 %v3415_v5, 0.0 }
 0x265   : > { %v5365_v53 = vadd.f32 %v5364_v16, %v5363_v11  ;;  %v3410_v40 = vadd.f32 %v3409_v57, %v7064_v23  ;;  %v3302_v49 = vadd.f32 %v5362_v56, %v7043_v37  ;;  %v3521_v63 = vmax.f32 %v3407_v0, 0.0 }
 0x266   : > { %v3524_v38 = vmax.f32 %v3418_v13, 0.0 }
 0x267   : > { %v3522_v26 = vmax.f32 %v3410_v40, 0.0  ;;  %v3305_v33 = vadd.f32 %v5365_v53, %v7049_v58 }
 0x268   : > { %v3552_v29 = vpack.c.bf16 %v3524_v38, %v3523_v31 }
 0x269   : > { %v3551_v61 = vpack.c.bf16 %v3522_v26, %v3521_v63  ;;  %v5366_v52 = vpop.f32.mrb[184].mxu1  ;;  %v5470_v42 = vpop.f32.mrb[184].mxu0 }
 0x26a   : > { %v3431_v21 = vadd.f32 %v5470_v42, %v7094_v24  ;;  %v5367_v27 = vpop.f32.mrb[185].mxu1  ;;  %v3422_v45 = vpop.f32.mrb[185].mxu0 }
 0x26b   : > { %v5368_v35 = vadd.f32 %v5367_v27, %v5366_v52  ;;  %v3423_v54 = vadd.f32 %v3422_v45, %v7082_v12  ;;  %v5369_v23 = vpop.f32.mrb[186].mxu1  ;;  %v5471_v25 = vpop.f32.mrb[186].mxu0  ;;  %5500 = vmatprep.mubr.msk.bf16.mxu1 %vm2341_vm0, %v3551_v61 }
 0x26c   : > { %v3434_v37 = vadd.f32 %v5471_v25, %v7100_v6  ;;  %v5370_v22 = vpop.f32.mrb[187].mxu1  ;;  %v3425_v55 = vpop.f32.mrb[187].mxu0  ;;  %5501 = vmatmul.mubr.msk.bf16.gmra.mrb[212].mxu1 %vm2341_vm0, %v3552_v29  ;;  %v3527_v48 = vmax.f32 %v3431_v21, 0.0 }
 0x26d   : > { %v5371_v58 = vadd.f32 %v5370_v22, %v5369_v23  ;;  %v3426_v1 = vadd.f32 %v3425_v55, %v7088_v50  ;;  %v3310_v24 = vadd.f32 %v5368_v35, %v7055_v51  ;;  %v3525_v3 = vmax.f32 %v3423_v54, 0.0 }
 0x26e   : > { %v3528_v44 = vmax.f32 %v3434_v37, 0.0 }
 0x26f   : > { %v3526_v47 = vmax.f32 %v3426_v1, 0.0  ;;  %v7152_v12 = vadd.f32 %v5371_v58, %v7061_v34 }
 0x270   : > { %v3554_v62 = vpack.c.bf16 %v3528_v44, %v3527_v48 }
 0x271   : > { %v3553_v8 = vpack.c.bf16 %v3526_v47, %v3525_v3  ;;  %v5372_v15 = vpop.f32.mrb[188].mxu1  ;;  %v5474_v6 = vpop.f32.mrb[188].mxu0 }
 0x272   : > { %v3447_v36 = vadd.f32 %v5474_v6, %v7118_v7  ;;  %v5373_v5 = vpop.f32.mrb[189].mxu1  ;;  %v3438_v4 = vpop.f32.mrb[189].mxu0 }
 0x273   : > { %v5374_v2 = vadd.f32 %v5373_v5, %v5372_v15  ;;  %v3439_v50 = vadd.f32 %v3438_v4, %v7106_v19  ;;  %v5375_v56 = vpop.f32.mrb[190].mxu1  ;;  %v5475_v51 = vpop.f32.mrb[190].mxu0  ;;  %5504 = vmatprep.mubr.msk.bf16.mxu1 %vm2341_vm0, %v3553_v8 }
 0x274   : > { %v3450_v0 = vadd.f32 %v5475_v51, %v7124_v60  ;;  %v5376_v11 = vpop.f32.mrb[191].mxu1  ;;  %v3441_v34 = vpop.f32.mrb[191].mxu0  ;;  %5505 = vmatmul.mubr.msk.bf16.gmra.mrb[216].mxu1 %vm2341_vm0, %v3554_v62  ;;  %v3531_v16 = vmax.f32 %v3447_v36, 0.0 }
 0x275   : > { %v5377_v28 = vadd.f32 %v5376_v11, %v5375_v56  ;;  %v3442_v13 = vadd.f32 %v3441_v34, %v7112_v20  ;;  %v3318_v7 = vadd.f32 %v5374_v2, %v7067_v14  ;;  %v3529_v53 = vmax.f32 %v3439_v50, 0.0 }
 0x276   : > { %v3532_v57 = vmax.f32 %v3450_v0, 0.0 }
 0x277   : > { %v3530_v40 = vmax.f32 %v3442_v13, 0.0  ;;  %v3321_v19 = vadd.f32 %v5377_v28, %v7073_v46 }
 0x278   : > { %v3556_v31 = vpack.c.bf16 %v3532_v57, %v3531_v16 }
 0x279   : > { %v3555_v38 = vpack.c.bf16 %v3530_v40, %v3529_v53  ;;  %v5378_v63 = vpop.f32.mrb[192].mxu1  ;;  %v5478_v26 = vpop.f32.mrb[192].mxu0 }
 0x27a   : > { %v3463_v60 = vadd.f32 %v5478_v26, %v3302_v49  ;;  %v5379_v29 = vpop.f32.mrb[193].mxu1  ;;  %v3454_v61 = vpop.f32.mrb[193].mxu0 }
 0x27b   : > { %v5380_v52 = vadd.f32 %v5379_v29, %v5378_v63  ;;  %v3455_v42 = vadd.f32 %v3454_v61, %v7131_v39  ;;  %v5381_v21 = vpop.f32.mrb[194].mxu1  ;;  %v5479_v20 = vpop.f32.mrb[194].mxu0  ;;  %5508 = vmatprep.mubr.msk.bf16.mxu1 %vm2341_vm0, %v3555_v38 }
 0x27c   : > { %v3466_v14 = vadd.f32 %v5479_v20, %v3305_v33  ;;  %v5382_v27 = vpop.f32.mrb[195].mxu1  ;;  %v3457_v45 = vpop.f32.mrb[195].mxu0  ;;  %5509 = vmatmul.mubr.msk.bf16.gmra.mrb[220].mxu1 %vm2341_vm0, %v3556_v31  ;;  %v3535_v49 = vmax.f32 %v3463_v60, 0.0 }
 0x27d   : > { %v5383_v46 = vadd.f32 %v5382_v27, %v5381_v21  ;;  %v3458_v35 = vadd.f32 %v3457_v45, %v7134_v59  ;;  %v3326_v54 = vadd.f32 %v5380_v52, %v7079_v18  ;;  %v3533_v25 = vmax.f32 %v3455_v42, 0.0 }
 0x27e   : > { %v3536_v23 = vmax.f32 %v3466_v14, 0.0 }
 0x27f   : > { %v3534_v37 = vmax.f32 %v3458_v35, 0.0  ;;  %v3329_v39 = vadd.f32 %v5383_v46, %v7085_v41 }
 0x280   : > { %v3558_v22 = vpack.c.bf16 %v3536_v23, %v3535_v49 }
 0x281   : > { %v3557_v55 = vpack.c.bf16 %v3534_v37, %v3533_v25  ;;  %v5384_v58 = vpop.f32.mrb[196].mxu1  ;;  %v5482_v1 = vpop.f32.mrb[196].mxu0 }
 0x282   : > { %v3479_v33 = vadd.f32 %v5482_v1, %v3318_v7  ;;  %v5385_v48 = vpop.f32.mrb[197].mxu1  ;;  %v3470_v44 = vpop.f32.mrb[197].mxu0 }
 0x283   : > { %v5386_v3 = vadd.f32 %v5385_v48, %v5384_v58  ;;  %v3471_v47 = vadd.f32 %v3470_v44, %v3310_v24  ;;  %v5387_v62 = vpop.f32.mrb[198].mxu1  ;;  %v5483_v8 = vpop.f32.mrb[198].mxu0  ;;  %5512 = vmatprep.mubr.msk.bf16.mxu1 %vm2341_vm0, %v3557_v55 }
 0x284   : > { %v3482_v18 = vadd.f32 %v5483_v8, %v3321_v19  ;;  %v5388_v59 = vpop.f32.mrb[199].mxu1  ;;  %v3473_v15 = vpop.f32.mrb[199].mxu0  ;;  %5513 = vmatmul.mubr.msk.bf16.gmra.mrb[224].mxu1 %vm2341_vm0, %v3558_v22  ;;  %v3539_v5 = vmax.f32 %v3479_v33, 0.0 }
 0x285   : > { %v5389_v6 = vadd.f32 %v5388_v59, %v5387_v62  ;;  %v3474_v41 = vadd.f32 %v3473_v15, %v7152_v12  ;;  %v3334_v36 = vadd.f32 %v5386_v3, %v7091_v30  ;;  %v3537_v2 = vmax.f32 %v3471_v47, 0.0 }
 0x286   : > { %v3540_v4 = vmax.f32 %v3482_v18, 0.0 }
 0x287   : > { %v3538_v50 = vmax.f32 %v3474_v41, 0.0  ;;  %v3337_v24 = vadd.f32 %v5389_v6, %v7097_v32 }
 0x288   : > { %v3560_v56 = vpack.c.bf16 %v3540_v4, %v3539_v5 }
 0x289   : > { %v3559_v51 = vpack.c.bf16 %v3538_v50, %v3537_v2  ;;  %v5390_v0 = vpop.f32.mrb[200].mxu1  ;;  %v5486_v11 = vpop.f32.mrb[200].mxu0 }
 0x28a   : > { %v3495_v34 = vadd.f32 %v5486_v11, %v3334_v36  ;;  %v5391_v28 = vpop.f32.mrb[201].mxu1  ;;  %v3486_v13 = vpop.f32.mrb[201].mxu0 }
 0x28b   : > { %v5392_v7 = vadd.f32 %v5391_v28, %v5390_v0  ;;  %v3487_v16 = vadd.f32 %v3486_v13, %v3326_v54  ;;  %v5393_v57 = vpop.f32.mrb[202].mxu1  ;;  %v5487_v53 = vpop.f32.mrb[202].mxu0  ;;  %5516 = vmatprep.mubr.msk.bf16.mxu1 %vm2341_vm0, %v3559_v51 }
 0x28c   : > { %v3498_v30 = vadd.f32 %v5487_v53, %v3337_v24  ;;  %v5394_v12 = vpop.f32.mrb[203].mxu1  ;;  %v3489_v40 = vpop.f32.mrb[203].mxu0  ;;  %5517 = vmatmul.mubr.msk.bf16.gmra.mrb[228].mxu1 %vm2341_vm0, %v3560_v56  ;;  %v3543_v38 = vmax.f32 %v3495_v34, 0.0 }
 0x28d   : > { %v5395_v19 = vadd.f32 %v5394_v12, %v5393_v57  ;;  %v3490_v32 = vadd.f32 %v3489_v40, %v3329_v39  ;;  %v3342_v31 = vadd.f32 %v5392_v7, %v7103_v17  ;;  %v3541_v26 = vmax.f32 %v3487_v16, 0.0 }
 0x28e   : > { %v3544_v63 = vmax.f32 %v3498_v30, 0.0 }
 0x28f   : > { %v3542_v60 = vmax.f32 %v3490_v32, 0.0  ;;  %v3345_v29 = vadd.f32 %v5395_v19, %v7109_v10 }
 0x290   : > { %v3562_v61 = vpack.c.bf16 %v3544_v63, %v3543_v38 }
 0x291   : > { %v3561_v52 = vpack.c.bf16 %v3542_v60, %v3541_v26  ;;  %v5396_v42 = vpop.f32.mrb[204].mxu1  ;;  %v5490_v21 = vpop.f32.mrb[204].mxu0 }
 0x292   : > { %v5397_v20 = vpop.f32.mrb[205].mxu1  ;;  %v3502_v14 = vpop.f32.mrb[205].mxu0 }
 0x293   : > { %v5398_v27 = vadd.f32 %v5397_v20, %v5396_v42  ;;  %v3503_v45 = vadd.f32 %v3502_v14, %v3342_v31  ;;  %v5399_v46 = vpop.f32.mrb[206].mxu1  ;;  %v5491_v35 = vpop.f32.mrb[206].mxu0  ;;  %5520 = vmatprep.mubr.msk.bf16.mxu1 %vm2341_vm0, %v3561_v52 }
 0x294   : > { %v5400_v54 = vpop.f32.mrb[207].mxu1  ;;  %v3505_v17 = vpop.f32.mrb[207].mxu0  ;;  %5521 = vmatmul.mubr.msk.bf16.gmra.mrb[232].mxu1 %vm2341_vm0, %v3562_v61 }
 0x295   : > { %v3350_v49 = vadd.f32 %v5398_v27, %v7115_v9  ;;  %v5401_v23 = vadd.f32 %v5400_v54, %v5399_v46  ;;  %v3506_v10 = vadd.f32 %v3505_v17, %v3345_v29  ;;  %v3545_v37 = vmax.f32 %v3503_v45, 0.0  ;;  %v7186_v9 = vld [vmem:[%s7350_s4] ss:$0 sm:$0xff] }
 0x297   : > { %v3511_v25 = vadd.f32 %v5490_v21, %v3350_v49  ;;  %v3353_v39 = vadd.f32 %v5401_v23, %v7121_v43  ;;  %v3546_v22 = vmax.f32 %v3506_v10, 0.0 }
 0x299   : > { %v3514_v55 = vadd.f32 %v5491_v35, %v3353_v39  ;;  %v3563_v58 = vpack.c.bf16 %v3546_v22, %v3545_v37  ;;  %v3547_v1 = vmax.f32 %v3511_v25, 0.0 }
 0x29b   : > { %v3548_v33 = vmax.f32 %v3514_v55, 0.0  ;;  %5524 = vmatprep.mubr.msk.bf16.mxu1 %vm2341_vm0, %v3563_v58 }
 0x29d   : > { %v3564_v48 = vpack.c.bf16 %v3548_v33, %v3547_v1 }
 0x29f   : > { %5525 = vmatmul.mubr.msk.bf16.gmra.mrb[236].mxu1 %vm2341_vm0, %v3564_v48 }
 0x337   : > { %v5498_v44 = vpop.f32.mrb[208].mxu1 }
 0x338   : > { %v3679_v3 = vadd.f32 %v5498_v44, %v7186_v9  ;;  %v3670_v47 = vpop.f32.mrb[209].mxu1 }
 0x339   : > { %v3671_v43 = vadd.f32 %v7186_v9, %v3670_v47  ;;  %v5499_v62 = vpop.f32.mrb[210].mxu1 }
 0x33a   : > { %v3682_v8 = vadd.f32 %v5499_v62, %v7186_v9  ;;  %v3673_v18 = vpop.f32.mrb[211].mxu1  ;;  %v3799_v15 = vmax.f32 %v3679_v3, 0.0 }
 0x33b   : > { %v3674_v59 = vadd.f32 %v7186_v9, %v3673_v18  ;;  %v3797_v41 = vmax.f32 %v3671_v43, 0.0 }
 0x33c   : > { %v3800_v6 = vmax.f32 %v3682_v8, 0.0 }
 0x33d   : > { %v3798_v36 = vmax.f32 %v3674_v59, 0.0 }
 0x33e   : > { %v3830_v5 = vpack.c.bf16 %v3800_v6, %v3799_v15 }
 0x33f   : > { %v3829_v4 = vpack.c.bf16 %v3798_v36, %v3797_v41  ;;  %v5502_v2 = vpop.f32.mrb[212].mxu1 }
 0x340   : > { %v3695_v50 = vadd.f32 %v5502_v2, %v7186_v9  ;;  %v3686_v24 = vpop.f32.mrb[213].mxu1 }
 0x341   : > { %v3687_v56 = vadd.f32 %v7186_v9, %v3686_v24  ;;  %v5503_v51 = vpop.f32.mrb[214].mxu1  ;;  %5532 = vmatprep.mubr.msk.bf16.mxu0 %vm2341_vm0, %v3829_v4 }
 0x342   : > { %v3698_v0 = vadd.f32 %v5503_v51, %v7186_v9  ;;  %v3689_v11 = vpop.f32.mrb[215].mxu1  ;;  %5533 = vmatmul.mubr.msk.bf16.vlgmr.msra.gmra.mrb[208].mxu0 %vm2341_vm0, %v3830_v5  ;;  %v3803_v28 = vmax.f32 %v3695_v50, 0.0 }
 0x343   : > { %v3690_v34 = vadd.f32 %v7186_v9, %v3689_v11  ;;  %v3801_v7 = vmax.f32 %v3687_v56, 0.0 }
 0x344   : > { %v3804_v13 = vmax.f32 %v3698_v0, 0.0 }
 0x345   : > { %v3802_v16 = vmax.f32 %v3690_v34, 0.0 }
 0x346   : > { %v3832_v57 = vpack.c.bf16 %v3804_v13, %v3803_v28 }
 0x347   : > { %v3831_v53 = vpack.c.bf16 %v3802_v16, %v3801_v7  ;;  %v5506_v30 = vpop.f32.mrb[216].mxu1 }
 0x348   : > { %v3711_v12 = vadd.f32 %v5506_v30, %v7186_v9  ;;  %v3702_v40 = vpop.f32.mrb[217].mxu1 }
 0x349   : > { %v3703_v19 = vadd.f32 %v7186_v9, %v3702_v40  ;;  %v5507_v32 = vpop.f32.mrb[218].mxu1  ;;  %5536 = vmatprep.mubr.msk.bf16.mxu0 %vm2341_vm0, %v3831_v53 }
 0x34a   : > { %v3714_v31 = vadd.f32 %v5507_v32, %v7186_v9  ;;  %v3705_v38 = vpop.f32.mrb[219].mxu1  ;;  %5537 = vmatmul.mubr.msk.bf16.gmra.mrb[212].mxu0 %vm2341_vm0, %v3832_v57  ;;  %v3807_v26 = vmax.f32 %v3711_v12, 0.0 }
 0x34b   : > { %v3706_v63 = vadd.f32 %v7186_v9, %v3705_v38  ;;  %v3805_v29 = vmax.f32 %v3703_v19, 0.0 }
 0x34c   : > { %v3808_v60 = vmax.f32 %v3714_v31, 0.0 }
 0x34d   : > { %v3806_v61 = vmax.f32 %v3706_v63, 0.0 }
 0x34e   : > { %v3834_v52 = vpack.c.bf16 %v3808_v60, %v3807_v26 }
 0x34f   : > { %v3833_v42 = vpack.c.bf16 %v3806_v61, %v3805_v29  ;;  %v5510_v21 = vpop.f32.mrb[220].mxu1 }
 0x350   : > { %v3727_v20 = vadd.f32 %v5510_v21, %v7186_v9  ;;  %v3718_v14 = vpop.f32.mrb[221].mxu1 }
 0x351   : > { %v3719_v27 = vadd.f32 %v7186_v9, %v3718_v14  ;;  %v5511_v45 = vpop.f32.mrb[222].mxu1  ;;  %5540 = vmatprep.mubr.msk.bf16.mxu0 %vm2341_vm0, %v3833_v42 }
 0x352   : > { %v3730_v46 = vadd.f32 %v5511_v45, %v7186_v9  ;;  %v3721_v35 = vpop.f32.mrb[223].mxu1  ;;  %5541 = vmatmul.mubr.msk.bf16.gmra.mrb[216].mxu0 %vm2341_vm0, %v3834_v52  ;;  %v3811_v17 = vmax.f32 %v3727_v20, 0.0 }
 0x353   : > { %v3722_v54 = vadd.f32 %v7186_v9, %v3721_v35  ;;  %v3809_v23 = vmax.f32 %v3719_v27, 0.0 }
 0x354   : > { %v3812_v49 = vmax.f32 %v3730_v46, 0.0 }
 0x355   : > { %v3810_v10 = vmax.f32 %v3722_v54, 0.0  ;;  %v7239_v54 = vld [vmem:[%s7352_s6] ss:$0 sm:$0xff] }
 0x356   : > { %v3836_v25 = vpack.c.bf16 %v3812_v49, %v3811_v17 }
 0x357   : > { %v3835_v37 = vpack.c.bf16 %v3810_v10, %v3809_v23  ;;  %v5514_v39 = vpop.f32.mrb[224].mxu1 }
 0x358   : > { %v3743_v22 = vadd.f32 %v5514_v39, %v7186_v9  ;;  %v3734_v55 = vpop.f32.mrb[225].mxu1 }
 0x359   : > { %v3735_v58 = vadd.f32 %v7186_v9, %v3734_v55  ;;  %v5515_v1 = vpop.f32.mrb[226].mxu1  ;;  %5544 = vmatprep.mubr.msk.bf16.mxu0 %vm2341_vm0, %v3835_v37 }
 0x35a   : > { %v3746_v33 = vadd.f32 %v5515_v1, %v7186_v9  ;;  %v3737_v48 = vpop.f32.mrb[227].mxu1  ;;  %5545 = vmatmul.mubr.msk.bf16.gmra.mrb[220].mxu0 %vm2341_vm0, %v3836_v25  ;;  %v3815_v3 = vmax.f32 %v3743_v22, 0.0 }
 0x35b   : > { %v3738_v44 = vadd.f32 %v7186_v9, %v3737_v48  ;;  %v3813_v43 = vmax.f32 %v3735_v58, 0.0 }
 0x35c   : > { %v3816_v47 = vmax.f32 %v3746_v33, 0.0 }
 0x35d   : > { %v3814_v62 = vmax.f32 %v3738_v44, 0.0 }
 0x35e   : > { %v3838_v8 = vpack.c.bf16 %v3816_v47, %v3815_v3 }
 0x35f   : > { %v3837_v18 = vpack.c.bf16 %v3814_v62, %v3813_v43  ;;  %v5518_v59 = vpop.f32.mrb[228].mxu1 }
 0x360   : > { %v3759_v15 = vadd.f32 %v5518_v59, %v7186_v9  ;;  %v3750_v6 = vpop.f32.mrb[229].mxu1 }
 0x361   : > { %v3751_v41 = vadd.f32 %v7186_v9, %v3750_v6  ;;  %v5519_v36 = vpop.f32.mrb[230].mxu1  ;;  %5548 = vmatprep.mubr.msk.bf16.mxu0 %vm2341_vm0, %v3837_v18 }
 0x362   : > { %v3762_v5 = vadd.f32 %v5519_v36, %v7186_v9  ;;  %v3753_v4 = vpop.f32.mrb[231].mxu1  ;;  %5549 = vmatmul.mubr.msk.bf16.gmra.mrb[224].mxu0 %vm2341_vm0, %v3838_v8  ;;  %v3819_v50 = vmax.f32 %v3759_v15, 0.0 }
 0x363   : > { %v3754_v2 = vadd.f32 %v7186_v9, %v3753_v4  ;;  %v3817_v56 = vmax.f32 %v3751_v41, 0.0 }
 0x364   : > { %v3820_v24 = vmax.f32 %v3762_v5, 0.0 }
 0x365   : > { %v3818_v51 = vmax.f32 %v3754_v2, 0.0 }
 0x366   : > { %v3840_v0 = vpack.c.bf16 %v3820_v24, %v3819_v50 }
 0x367   : > { %v3839_v11 = vpack.c.bf16 %v3818_v51, %v3817_v56  ;;  %v5522_v34 = vpop.f32.mrb[232].mxu1 }
 0x368   : > { %v3775_v28 = vadd.f32 %v5522_v34, %v7186_v9  ;;  %v3766_v13 = vpop.f32.mrb[233].mxu1 }
 0x369   : > { %v3767_v7 = vadd.f32 %v7186_v9, %v3766_v13  ;;  %v5523_v16 = vpop.f32.mrb[234].mxu1  ;;  %5552 = vmatprep.mubr.msk.bf16.mxu0 %vm2341_vm0, %v3839_v11 }
 0x36a   : > { %v3778_v57 = vadd.f32 %v5523_v16, %v7186_v9  ;;  %v3769_v53 = vpop.f32.mrb[235].mxu1  ;;  %5553 = vmatmul.mubr.msk.bf16.gmra.mrb[228].mxu0 %vm2341_vm0, %v3840_v0  ;;  %v3823_v12 = vmax.f32 %v3775_v28, 0.0 }
 0x36b   : > { %v3770_v30 = vadd.f32 %v7186_v9, %v3769_v53  ;;  %v3821_v19 = vmax.f32 %v3767_v7, 0.0 }
 0x36c   : > { %v3824_v40 = vmax.f32 %v3778_v57, 0.0 }
 0x36d   : > { %v3822_v32 = vmax.f32 %v3770_v30, 0.0 }
 0x36e   : > { %v3842_v31 = vpack.c.bf16 %v3824_v40, %v3823_v12 }
 0x36f   : > { %v3841_v38 = vpack.c.bf16 %v3822_v32, %v3821_v19 }
 0x371   : > { %5556 = vmatprep.mubr.msk.bf16.mxu0 %vm2341_vm0, %v3841_v38 }
 0x372   : > { %v5526_v63 = vpop.f32.mrb[236].mxu1  ;;  %5557 = vmatmul.mubr.msk.bf16.gmra.mrb[232].mxu0 %vm2341_vm0, %v3842_v31 }
 0x373   : > { %v3791_v26 = vadd.f32 %v5526_v63, %v7186_v9  ;;  %v3782_v60 = vpop.f32.mrb[237].mxu1 }
 0x374   : > { %v3783_v29 = vadd.f32 %v7186_v9, %v3782_v60  ;;  %v5527_v61 = vpop.f32.mrb[238].mxu1 }
 0x375   : > { %v3794_v52 = vadd.f32 %v5527_v61, %v7186_v9  ;;  %v3785_v42 = vpop.f32.mrb[239].mxu1  ;;  %v3827_v20 = vmax.f32 %v3791_v26, 0.0 }
 0x376   : > { %v3786_v21 = vadd.f32 %v7186_v9, %v3785_v42  ;;  %v3825_v27 = vmax.f32 %v3783_v29, 0.0 }
 0x377   : > { %v3828_v14 = vmax.f32 %v3794_v52, 0.0 }
 0x378   : > { %v3826_v45 = vmax.f32 %v3786_v21, 0.0 }
 0x379   : > { %v3844_v46 = vpack.c.bf16 %v3828_v14, %v3827_v20 }
 0x37a   : > { %v3843_v35 = vpack.c.bf16 %v3826_v45, %v3825_v27 }
 0x37c   : > { %5560 = vmatprep.mubr.msk.bf16.mxu0 %vm2341_vm0, %v3843_v35 }
 0x37d   : > { %5561 = vmatmul.mubr.msk.bf16.gmra.mrb[236].mxu0 %vm2341_vm0, %v3844_v46 }
 0x415   : > { %v5534_v17 = vpop.f32.mrb[208].mxu0 }
 0x416   : > { %v3959_v49 = vadd.f32 %v5534_v17, %v7239_v54  ;;  %v3950_v9 = vpop.f32.mrb[209].mxu0 }
 0x417   : > { %v3951_v23 = vadd.f32 %v7239_v54, %v3950_v9  ;;  %v5535_v10 = vpop.f32.mrb[210].mxu0 }
 0x418   : > { %v4700_v25 = vpack.c.bf16 %v3959_v49, %v3959_v49  ;;  %v3962_v37 = vadd.f32 %v5535_v10, %v7239_v54  ;;  %v3953_v39 = vpop.f32.mrb[211].mxu0 }
 0x419   : > { %v4698_v22 = vpack.c.bf16 %v3951_v23, %v3951_v23  ;;  %v3954_v55 = vadd.f32 %v7239_v54, %v3953_v39 }
 0x41a   : > { %4208 = vst.msk [vmem:[%s7246_s19 + $0x8] sm:$0xf] %vm4205_vm1, %v4700_v25  ;;  %v4701_v58 = vpack.c.bf16 %v3962_v37, %v3962_v37 }
 0x41b   : > { %4206 = vst.msk [vmem:[%s7246_s19] sm:$0xf] %vm4205_vm1, %v4698_v22  ;;  %v4699_v1 = vpack.c.bf16 %v3954_v55, %v3954_v55 }
 0x41c   : > { %4209 = vst.msk [vmem:[%s7246_s19 + $0xc] sm:$0xf] %vm4205_vm1, %v4701_v58 }
 0x41d   : > { %4207 = vst.msk [vmem:[%s7246_s19 + $0x4] sm:$0xf] %vm4205_vm1, %v4699_v1  ;;  %v5538_v33 = vpop.f32.mrb[212].mxu0 }
 0x41e   : > { %v3975_v48 = vadd.f32 %v5538_v33, %v7239_v54  ;;  %v3966_v44 = vpop.f32.mrb[213].mxu0 }
 0x41f   : > { %v3967_v3 = vadd.f32 %v7239_v54, %v3966_v44  ;;  %v5539_v47 = vpop.f32.mrb[214].mxu0 }
 0x420   : > { %v4704_v43 = vpack.c.bf16 %v3975_v48, %v3975_v48  ;;  %v3978_v62 = vadd.f32 %v5539_v47, %v7239_v54  ;;  %v3969_v8 = vpop.f32.mrb[215].mxu0 }
 0x421   : > { %v4702_v18 = vpack.c.bf16 %v3967_v3, %v3967_v3  ;;  %v3970_v59 = vadd.f32 %v7239_v54, %v3969_v8 }
 0x422   : > { %4212 = vst.msk [vmem:[%s7246_s19 + $0x18] sm:$0xf] %vm4205_vm1, %v4704_v43  ;;  %v4705_v15 = vpack.c.bf16 %v3978_v62, %v3978_v62 }
 0x423   : > { %4210 = vst.msk [vmem:[%s7246_s19 + $0x10] sm:$0xf] %vm4205_vm1, %v4702_v18  ;;  %v4703_v6 = vpack.c.bf16 %v3970_v59, %v3970_v59 }
 0x424   : > { %4213 = vst.msk [vmem:[%s7246_s19 + $0x1c] sm:$0xf] %vm4205_vm1, %v4705_v15 }
 0x425   : > { %4211 = vst.msk [vmem:[%s7246_s19 + $0x14] sm:$0xf] %vm4205_vm1, %v4703_v6  ;;  %v5542_v41 = vpop.f32.mrb[216].mxu0 }
 0x426   : > { %v3991_v36 = vadd.f32 %v5542_v41, %v7239_v54  ;;  %v3982_v5 = vpop.f32.mrb[217].mxu0 }
 0x427   : > { %v3983_v4 = vadd.f32 %v7239_v54, %v3982_v5  ;;  %v5543_v2 = vpop.f32.mrb[218].mxu0 }
 0x428   : > { %v4708_v50 = vpack.c.bf16 %v3991_v36, %v3991_v36  ;;  %v3994_v24 = vadd.f32 %v5543_v2, %v7239_v54  ;;  %v3985_v56 = vpop.f32.mrb[219].mxu0 }
 0x429   : > { %v4706_v51 = vpack.c.bf16 %v3983_v4, %v3983_v4  ;;  %v3986_v0 = vadd.f32 %v7239_v54, %v3985_v56 }
 0x42a   : > { %4216 = vst.msk [vmem:[%s7246_s19 + $0x28] sm:$0xf] %vm4205_vm1, %v4708_v50  ;;  %v4709_v11 = vpack.c.bf16 %v3994_v24, %v3994_v24 }
 0x42b   : > { %4214 = vst.msk [vmem:[%s7246_s19 + $0x20] sm:$0xf] %vm4205_vm1, %v4706_v51  ;;  %v4707_v34 = vpack.c.bf16 %v3986_v0, %v3986_v0 }
 0x42c   : > { %4217 = vst.msk [vmem:[%s7246_s19 + $0x2c] sm:$0xf] %vm4205_vm1, %v4709_v11 }
 0x42d   : > { %4215 = vst.msk [vmem:[%s7246_s19 + $0x24] sm:$0xf] %vm4205_vm1, %v4707_v34  ;;  %v5546_v28 = vpop.f32.mrb[220].mxu0 }
 0x42e   : > { %v4007_v13 = vadd.f32 %v5546_v28, %v7239_v54  ;;  %v3998_v7 = vpop.f32.mrb[221].mxu0 }
 0x42f   : > { %v3999_v16 = vadd.f32 %v7239_v54, %v3998_v7  ;;  %v5547_v57 = vpop.f32.mrb[222].mxu0 }
 0x430   : > { %v4712_v53 = vpack.c.bf16 %v4007_v13, %v4007_v13  ;;  %v4010_v30 = vadd.f32 %v5547_v57, %v7239_v54  ;;  %v4001_v12 = vpop.f32.mrb[223].mxu0 }
 0x431   : > { %v4710_v40 = vpack.c.bf16 %v3999_v16, %v3999_v16  ;;  %v4002_v19 = vadd.f32 %v7239_v54, %v4001_v12 }
 0x432   : > { %4220 = vst.msk [vmem:[%s7246_s19 + $0x38] sm:$0xf] %vm4205_vm1, %v4712_v53  ;;  %v4713_v32 = vpack.c.bf16 %v4010_v30, %v4010_v30 }
 0x433   : > { %4218 = vst.msk [vmem:[%s7246_s19 + $0x30] sm:$0xf] %vm4205_vm1, %v4710_v40  ;;  %v4711_v31 = vpack.c.bf16 %v4002_v19, %v4002_v19 }
 0x434   : > { %4221 = vst.msk [vmem:[%s7246_s19 + $0x3c] sm:$0xf] %vm4205_vm1, %v4713_v32 }
 0x435   : > { %4219 = vst.msk [vmem:[%s7246_s19 + $0x34] sm:$0xf] %vm4205_vm1, %v4711_v31  ;;  %v5550_v38 = vpop.f32.mrb[224].mxu0 }
 0x436   : > { %v4023_v63 = vadd.f32 %v5550_v38, %v7239_v54  ;;  %v4014_v26 = vpop.f32.mrb[225].mxu0 }
 0x437   : > { %v4015_v60 = vadd.f32 %v7239_v54, %v4014_v26  ;;  %v5551_v29 = vpop.f32.mrb[226].mxu0 }
 0x438   : > { %v4716_v61 = vpack.c.bf16 %v4023_v63, %v4023_v63  ;;  %v4026_v52 = vadd.f32 %v5551_v29, %v7239_v54  ;;  %v4017_v42 = vpop.f32.mrb[227].mxu0 }
 0x439   : > { %v4714_v21 = vpack.c.bf16 %v4015_v60, %v4015_v60  ;;  %v4018_v20 = vadd.f32 %v7239_v54, %v4017_v42 }
 0x43a   : > { %4224 = vst.msk [vmem:[%s7246_s19 + $0x48] sm:$0xf] %vm4205_vm1, %v4716_v61  ;;  %v4717_v14 = vpack.c.bf16 %v4026_v52, %v4026_v52 }
 0x43b   : > { %4222 = vst.msk [vmem:[%s7246_s19 + $0x40] sm:$0xf] %vm4205_vm1, %v4714_v21  ;;  %v4715_v27 = vpack.c.bf16 %v4018_v20, %v4018_v20 }
 0x43c   : > { %4225 = vst.msk [vmem:[%s7246_s19 + $0x4c] sm:$0xf] %vm4205_vm1, %v4717_v14 }
 0x43d   : > { %4223 = vst.msk [vmem:[%s7246_s19 + $0x44] sm:$0xf] %vm4205_vm1, %v4715_v27  ;;  %v5554_v45 = vpop.f32.mrb[228].mxu0 }
 0x43e   : > { %v4039_v46 = vadd.f32 %v5554_v45, %v7239_v54  ;;  %v4030_v35 = vpop.f32.mrb[229].mxu0 }
 0x43f   : > { %v4031_v17 = vadd.f32 %v7239_v54, %v4030_v35  ;;  %v5555_v49 = vpop.f32.mrb[230].mxu0 }
 0x440   : > { %v4720_v9 = vpack.c.bf16 %v4039_v46, %v4039_v46  ;;  %v4042_v23 = vadd.f32 %v5555_v49, %v7239_v54  ;;  %v4033_v10 = vpop.f32.mrb[231].mxu0 }
 0x441   : > { %v4718_v25 = vpack.c.bf16 %v4031_v17, %v4031_v17  ;;  %v4034_v37 = vadd.f32 %v7239_v54, %v4033_v10 }
 0x442   : > { %4228 = vst.msk [vmem:[%s7246_s19 + $0x58] sm:$0xf] %vm4205_vm1, %v4720_v9  ;;  %v4721_v39 = vpack.c.bf16 %v4042_v23, %v4042_v23 }
 0x443   : > { %4226 = vst.msk [vmem:[%s7246_s19 + $0x50] sm:$0xf] %vm4205_vm1, %v4718_v25  ;;  %v4719_v22 = vpack.c.bf16 %v4034_v37, %v4034_v37 }
 0x444   : > { %4229 = vst.msk [vmem:[%s7246_s19 + $0x5c] sm:$0xf] %vm4205_vm1, %v4721_v39 }
 0x445   : > { %4227 = vst.msk [vmem:[%s7246_s19 + $0x54] sm:$0xf] %vm4205_vm1, %v4719_v22  ;;  %v5558_v55 = vpop.f32.mrb[232].mxu0 }
 0x446   : > { %v4055_v58 = vadd.f32 %v5558_v55, %v7239_v54  ;;  %v4046_v1 = vpop.f32.mrb[233].mxu0 }
 0x447   : > { %v4047_v33 = vadd.f32 %v7239_v54, %v4046_v1  ;;  %v5559_v48 = vpop.f32.mrb[234].mxu0 }
 0x448   : > { %v4724_v44 = vpack.c.bf16 %v4055_v58, %v4055_v58  ;;  %v4058_v3 = vadd.f32 %v5559_v48, %v7239_v54  ;;  %v4049_v47 = vpop.f32.mrb[235].mxu0 }
 0x449   : > { %v4722_v43 = vpack.c.bf16 %v4047_v33, %v4047_v33  ;;  %v4050_v62 = vadd.f32 %v7239_v54, %v4049_v47 }
 0x44a   : > { %4232 = vst.msk [vmem:[%s7246_s19 + $0x68] sm:$0xf] %vm4205_vm1, %v4724_v44  ;;  %v4725_v8 = vpack.c.bf16 %v4058_v3, %v4058_v3 }
 0x44b   : > { %4230 = vst.msk [vmem:[%s7246_s19 + $0x60] sm:$0xf] %vm4205_vm1, %v4722_v43  ;;  %v4723_v18 = vpack.c.bf16 %v4050_v62, %v4050_v62 }
 0x44c   : > { %4233 = vst.msk [vmem:[%s7246_s19 + $0x6c] sm:$0xf] %vm4205_vm1, %v4725_v8 }
 0x44d   : > { %4231 = vst.msk [vmem:[%s7246_s19 + $0x64] sm:$0xf] %vm4205_vm1, %v4723_v18 }
 0x450   : > { %v5562_v59 = vpop.f32.mrb[236].mxu0 }
 0x451   : > { %v4071_v15 = vadd.f32 %v5562_v59, %v7239_v54  ;;  %v4062_v6 = vpop.f32.mrb[237].mxu0 }
 0x452   : > { %v4063_v41 = vadd.f32 %v7239_v54, %v4062_v6  ;;  %v5563_v36 = vpop.f32.mrb[238].mxu0 }
 0x453   : > { %v4728_v5 = vpack.c.bf16 %v4071_v15, %v4071_v15  ;;  %v4074_v4 = vadd.f32 %v5563_v36, %v7239_v54  ;;  %v4065_v2 = vpop.f32.mrb[239].mxu0 }
 0x454   : > { %v4726_v50 = vpack.c.bf16 %v4063_v41, %v4063_v41  ;;  %v4066_v24 = vadd.f32 %v7239_v54, %v4065_v2 }
 0x455   : > { %4236 = vst.msk [vmem:[%s7246_s19 + $0x78] sm:$0xf] %vm4205_vm1, %v4728_v5  ;;  %v4729_v56 = vpack.c.bf16 %v4074_v4, %v4074_v4 }
 0x456   : > { %4234 = vst.msk [vmem:[%s7246_s19 + $0x70] sm:$0xf] %vm4205_vm1, %v4726_v50  ;;  %v4727_v51 = vpack.c.bf16 %v4066_v24, %v4066_v24 }
 0x457   : > { %4237 = vst.msk [vmem:[%s7246_s19 + $0x7c] sm:$0xf] %vm4205_vm1, %v4729_v56 }
 0x458   : > { %4235 = vst.msk [vmem:[%s7246_s19 + $0x74] sm:$0xf] %vm4205_vm1, %v4727_v51 }
 0x459 PF: > { %s17_s24 = sadd.s32 1, %s6001_s24  }
 0x45a   : > { %p14_p4 = scmp.ge.s32.totalorder %s17_s24, 4  }
 0x45c   :  { %16 = sbr.rel (!%p14_p4) target bundleno = 1 (0x1), region = 78 }

</bundles_post_ra>
